<compile_context>
chip_gen: v7x
topology: tpu7x:2x2x1
jax: 0.10.0
libtpu: 0.0.40
codegen_flags: <defaults>
</compile_context>

<pallas_src>
import functools
import math

import jax
import jax.numpy as jnp
from jax.experimental import pallas as pl
from jax.experimental.pallas import tpu as pltpu


# ----------------------------------------------------------------------------
# Fused attention kernel: one (batch, query-tile) pair per grid step.
# ----------------------------------------------------------------------------
def _attention_kernel(x_ref, kv_ref, wqkv_ref, wp_ref, bp_ref, o_ref, ctx_ref,
                      *, num_heads):
    # x_ref:    (1, TQ, C)   query-tile activations for this batch element
    # kv_ref:   (1, N, C)    full key/value activations for this batch element
    # wqkv_ref: (C, 3C)      [scale*Wq | Wk | Wv] fused projection weights
    # wp_ref:   (C, C)       output projection weight
    # bp_ref:   (1, C)       output projection bias
    # o_ref:    (1, TQ, C)   output block (written exactly once)
    # ctx_ref:  (TQ, C) f32  scratch holding the concatenated per-head contexts
    C = x_ref.shape[-1]
    Dh = C // num_heads
    bf16 = jnp.bfloat16

    x = x_ref[0].astype(bf16)                      # (TQ, C)
    kvx = kv_ref[0].astype(bf16)                   # (N, C)

    # Lane-dense, K=C projections (softmax scale pre-folded into Wq).
    q = jnp.dot(x, wqkv_ref[:, :C].astype(bf16),
                preferred_element_type=jnp.float32)            # (TQ, C)
    kvp = jnp.dot(kvx, wqkv_ref[:, C:].astype(bf16),
                  preferred_element_type=jnp.float32)          # (N, 2C)
    k = kvp[:, :C]                                             # (N, C)
    v = kvp[:, C:]                                             # (N, C)

    # Per-head attention; heads are few (C / Dh), so a static unroll is fine.
    for h in range(num_heads):
        sl = slice(h * Dh, (h + 1) * Dh)
        q_h = q[:, sl].astype(bf16)                            # (TQ, Dh)
        k_h = k[:, sl].astype(bf16)                            # (N, Dh)
        v_h = v[:, sl].astype(bf16)                            # (N, Dh)

        # Scores (already scaled); softmax statistics kept in f32.
        s = jax.lax.dot_general(q_h, k_h, (((1,), (1,)), ((), ())),
                                preferred_element_type=jnp.float32)  # (TQ, N)
        m = jnp.max(s, axis=-1, keepdims=True)
        p = jnp.exp(s - m)
        l = jnp.sum(p, axis=-1, keepdims=True)

        # Unnormalized context, then normalize the small (TQ, Dh) tensor via
        # the EUP reciprocal instead of dividing the (TQ, N) probabilities.
        ctx_h = jnp.dot(p.astype(bf16), v_h,
                        preferred_element_type=jnp.float32)    # (TQ, Dh)
        ctx_ref[:, sl] = ctx_h * pl.reciprocal(l, approx=True)

    # Single lane-dense K=C output projection + bias, straight to the output.
    out = jnp.dot(ctx_ref[...].astype(bf16), wp_ref[...].astype(bf16),
                  preferred_element_type=jnp.float32) + bp_ref[...]
    o_ref[0] = out.astype(o_ref.dtype)


# ----------------------------------------------------------------------------
# Host-side wrappers.
# ----------------------------------------------------------------------------
def prepare_params(wq, wkv, wp, bp, *, num_heads):
    """One-time weight prep (hoisted out of the per-call path)."""
    C = wq.shape[0]
    Dh = C // num_heads
    scale = Dh ** (-0.5)
    wqkv = jnp.concatenate([wq * scale, wkv], axis=1)          # (C, 3C)
    return wqkv, wp, bp.reshape(1, C)


def attention_forward(x, kv, wqkv, wp, bp2, *, num_heads, q_tile=None):
    """x, kv: (B, N, C); wqkv: (C, 3C); wp: (C, C); bp2: (1, C)."""
    B, N, C = x.shape
    assert C % num_heads == 0, "dim must be divisible by num_heads"
    assert C % 128 == 0, "dim should be a multiple of 128 (lane width)"
    if q_tile is None:
        q_tile = N if N <= 256 else 256
    assert N % q_tile == 0 and q_tile % 8 == 0

    kernel = functools.partial(_attention_kernel, num_heads=num_heads)

    return pl.pallas_call(
        kernel,
        out_shape=jax.ShapeDtypeStruct((B, N, C), jnp.float32),
        grid_spec=pltpu.PrefetchScalarGridSpec(
            num_scalar_prefetch=0,
            grid=(B, N // q_tile),
            in_specs=[
                pl.BlockSpec((1, q_tile, C), lambda b, qi: (b, qi, 0)),  # x tile
                pl.BlockSpec((1, N, C), lambda b, qi: (b, 0, 0)),        # kv (full)
                pl.BlockSpec((C, 3 * C), lambda b, qi: (0, 0)),          # fused Wq|Wk|Wv
                pl.BlockSpec((C, C), lambda b, qi: (0, 0)),              # Wproj
                pl.BlockSpec((1, C), lambda b, qi: (0, 0)),              # proj bias
            ],
            out_specs=pl.BlockSpec((1, q_tile, C), lambda b, qi: (b, qi, 0)),
            scratch_shapes=[pltpu.VMEM((q_tile, C), jnp.float32)],
        ),
        compiler_params=pltpu.CompilerParams(
            dimension_semantics=("parallel", "parallel")),
    )(x, kv, wqkv, wp, bp2)


# ----------------------------------------------------------------------------
# Pure-JAX reference (mirrors the PyTorch module) for a self-check.
# ----------------------------------------------------------------------------
def attention_reference(x, kv_in, wq, wkv, wp, bp, num_heads):
    B, N, C = x.shape
    Dh = C // num_heads
    scale = Dh ** (-0.5)
    hp = jax.lax.Precision.HIGHEST
    q = jnp.einsum("bnc,cd->bnd", x, wq, precision=hp)
    kvp = jnp.einsum("bnc,cd->bnd", kv_in, wkv, precision=hp)
    k, v = kvp[..., :C], kvp[..., C:]
    q = q.reshape(B, N, num_heads, Dh).transpose(0, 2, 1, 3)
    k = k.reshape(B, N, num_heads, Dh).transpose(0, 2, 1, 3)
    v = v.reshape(B, N, num_heads, Dh).transpose(0, 2, 1, 3)
    s = jnp.einsum("bhnd,bhmd->bhnm", q, k, precision=hp) * scale
    p = jax.nn.softmax(s, axis=-1)
    o = jnp.einsum("bhnm,bhmd->bhnd", p, v, precision=hp)
    o = o.transpose(0, 2, 1, 3).reshape(B, N, C)
    return jnp.einsum("bnc,cd->bnd", o, wp, precision=hp) + bp


# ----------------------------------------------------------------------------
# Deterministic parameter init (Linear(dim, dim, bias=False),
# Linear(dim, 2*dim, bias=False), Linear(dim, dim) with bias).
# ----------------------------------------------------------------------------
def init_params(key, dim):
    k1, k2, k3, k4 = jax.random.split(key, 4)
    s = 1.0 / math.sqrt(dim)
    return {
        "wq": jax.random.uniform(k1, (dim, dim), jnp.float32, -s, s),
        "wkv": jax.random.uniform(k2, (dim, 2 * dim), jnp.float32, -s, s),
        "wp": jax.random.uniform(k3, (dim, dim), jnp.float32, -s, s),
        "bp": jax.random.uniform(k4, (dim,), jnp.float32, -s, s),
    }


if __name__ == "__main__":
    dim, num_heads = 128, 8          # head_dim = 16
    B, N = 2, 128                    # small, TPU-tile-aligned shapes

    key = jax.random.PRNGKey(0)
    pkey, xkey, kkey = jax.random.split(key, 3)
    params = init_params(pkey, dim)
    x = jax.random.normal(xkey, (B, N, dim), jnp.float32)
    kv = jax.random.normal(kkey, (B, N, dim), jnp.float32)

    # One-time weight prep (scale folding / fusion / bias reshape).
    wqkv, wp_p, bp2 = prepare_params(params["wq"], params["wkv"],
                                     params["wp"], params["bp"],
                                     num_heads=num_heads)

    fwd = jax.jit(functools.partial(attention_forward, num_heads=num_heads))
    out = fwd(x, kv, wqkv, wp_p, bp2)
    out = jax.block_until_ready(out)

    assert out.shape == (B, N, dim), out.shape
    assert bool(jnp.all(jnp.isfinite(out)))

    ref = attention_reference(x, kv, params["wq"], params["wkv"],
                              params["wp"], params["bp"], num_heads)
    assert bool(jnp.allclose(out, ref, atol=2e-2, rtol=2e-2))

    print("KERNEL_OK")
</pallas_src>

<mosaic_0001>
module attributes {stable_mosaic.version = 11 : i64} {
  func.func @_attention_kernel(%arg0: i32, %arg1: i32, %arg2: memref<1x128x128xf32, #tpu.memory_space<vmem>>, %arg3: memref<1x128x128xf32, #tpu.memory_space<vmem>>, %arg4: memref<128x384xf32, #tpu.memory_space<vmem>>, %arg5: memref<128x128xf32, #tpu.memory_space<vmem>>, %arg6: memref<1x128xf32, #tpu.memory_space<vmem>>, %arg7: memref<1x128x128xf32, #tpu.memory_space<vmem>>, %arg8: memref<128x128xf32, #tpu.memory_space<vmem>>) attributes {dimension_semantics = [#tpu.dimension_semantics<parallel>, #tpu.dimension_semantics<parallel>], iteration_bounds = array<i64: 2, 1>, scalar_prefetch = 0 : i64, scratch_operands = 1 : i64, tpu.core_type = #tpu.core_type<tc>, window_params = [{transform_indices = @transform_0, window_bounds = array<i64: 1, 128, 128>}, {transform_indices = @transform_1, window_bounds = array<i64: 1, 128, 128>}, {pipeline_mode = #tpu.pipeline_mode<synchronous>, transform_indices = @transform_2, window_bounds = array<i64: 128, 384>}, {pipeline_mode = #tpu.pipeline_mode<synchronous>, transform_indices = @transform_3, window_bounds = array<i64: 128, 128>}, {pipeline_mode = #tpu.pipeline_mode<synchronous>, transform_indices = @transform_4, window_bounds = array<i64: 1, 128>}, {transform_indices = @transform_5, window_bounds = array<i64: 1, 128, 128>}]} {
    %c0 = arith.constant 0 : index
    %c0_0 = arith.constant 0 : index
    %c0_1 = arith.constant 0 : index
    %0 = vector.load %arg2[%c0, %c0_0, %c0_1] : memref<1x128x128xf32, #tpu.memory_space<vmem>>, vector<1x128x128xf32>
    %1 = vector.shape_cast %0 : vector<1x128x128xf32> to vector<128x128xf32>
    %2 = arith.truncf %1 : vector<128x128xf32> to vector<128x128xbf16>
    %c0_2 = arith.constant 0 : index
    %c0_3 = arith.constant 0 : index
    %c0_4 = arith.constant 0 : index
    %3 = vector.load %arg3[%c0_2, %c0_3, %c0_4] : memref<1x128x128xf32, #tpu.memory_space<vmem>>, vector<1x128x128xf32>
    %4 = vector.shape_cast %3 : vector<1x128x128xf32> to vector<128x128xf32>
    %5 = arith.truncf %4 : vector<128x128xf32> to vector<128x128xbf16>
    %c0_5 = arith.constant 0 : index
    %c0_6 = arith.constant 0 : index
    %6 = vector.load %arg4[%c0_5, %c0_6] : memref<128x384xf32, #tpu.memory_space<vmem>>, vector<128x128xf32>
    %7 = arith.truncf %6 : vector<128x128xf32> to vector<128x128xbf16>
    %cst = arith.constant dense<0.000000e+00> : vector<128x128xf32>
    %8 = tpu.matmul %2, %7, %cst {dimension_numbers = #tpu.dot_dimension_numbers<[1], [0], [0], [1], [0, 0, 1, 1], [], []>} : vector<128x128xbf16>, vector<128x128xbf16>, vector<128x128xf32> -> vector<128x128xf32>
    %c0_7 = arith.constant 0 : index
    %c128 = arith.constant 128 : index
    %9 = vector.load %arg4[%c0_7, %c128] : memref<128x384xf32, #tpu.memory_space<vmem>>, vector<128x256xf32>
    %10 = arith.truncf %9 : vector<128x256xf32> to vector<128x256xbf16>
    %cst_8 = arith.constant dense<0.000000e+00> : vector<128x256xf32>
    %11 = tpu.matmul %5, %10, %cst_8 {dimension_numbers = #tpu.dot_dimension_numbers<[1], [0], [0], [1], [0, 0, 1, 1], [], []>} : vector<128x128xbf16>, vector<128x256xbf16>, vector<128x256xf32> -> vector<128x256xf32>
    %12 = vector.extract_strided_slice %11 {offsets = [0, 0], sizes = [128, 128], strides = [1, 1]} : vector<128x256xf32> to vector<128x128xf32>
    %13 = vector.extract_strided_slice %11 {offsets = [0, 128], sizes = [128, 128], strides = [1, 1]} : vector<128x256xf32> to vector<128x128xf32>
    %14 = vector.extract_strided_slice %8 {offsets = [0, 0], sizes = [128, 16], strides = [1, 1]} : vector<128x128xf32> to vector<128x16xf32>
    %15 = arith.truncf %14 : vector<128x16xf32> to vector<128x16xbf16>
    %16 = vector.extract_strided_slice %12 {offsets = [0, 0], sizes = [128, 16], strides = [1, 1]} : vector<128x128xf32> to vector<128x16xf32>
    %17 = arith.truncf %16 : vector<128x16xf32> to vector<128x16xbf16>
    %18 = vector.extract_strided_slice %13 {offsets = [0, 0], sizes = [128, 16], strides = [1, 1]} : vector<128x128xf32> to vector<128x16xf32>
    %19 = arith.truncf %18 : vector<128x16xf32> to vector<128x16xbf16>
    %cst_9 = arith.constant dense<0.000000e+00> : vector<128x128xf32>
    %20 = tpu.matmul %15, %17, %cst_9 {dimension_numbers = #tpu.dot_dimension_numbers<[1], [1], [0], [0], [0, 0, 1, 0], [], []>} : vector<128x16xbf16>, vector<128x16xbf16>, vector<128x128xf32> -> vector<128x128xf32>
    %cst_10 = arith.constant dense<0xFF800000> : vector<128xf32>
    %21 = vector.multi_reduction <maximumf>, %20, %cst_10 [1] : vector<128x128xf32> to vector<128xf32>
    %22 = vector.shape_cast %21 : vector<128xf32> to vector<128x1xf32>
    %23 = vector.broadcast %22 : vector<128x1xf32> to vector<128x128xf32>
    %24 = arith.subf %20, %23 : vector<128x128xf32>
    %25 = math.exp %24 : vector<128x128xf32>
    %cst_11 = arith.constant dense<0.000000e+00> : vector<128xf32>
    %26 = vector.multi_reduction <add>, %25, %cst_11 [1] : vector<128x128xf32> to vector<128xf32>
    %27 = vector.shape_cast %26 : vector<128xf32> to vector<128x1xf32>
    %28 = arith.truncf %25 : vector<128x128xf32> to vector<128x128xbf16>
    %cst_12 = arith.constant dense<0.000000e+00> : vector<128x16xf32>
    %29 = tpu.matmul %28, %19, %cst_12 {dimension_numbers = #tpu.dot_dimension_numbers<[1], [0], [0], [1], [0, 0, 1, 1], [], []>} : vector<128x128xbf16>, vector<128x16xbf16>, vector<128x16xf32> -> vector<128x16xf32>
    %30 = tpu.reciprocal %27 {approx = true} : vector<128x1xf32> -> vector<128x1xf32>
    %31 = vector.broadcast %30 : vector<128x1xf32> to vector<128x16xf32>
    %32 = arith.mulf %29, %31 : vector<128x16xf32>
    %c0_13 = arith.constant 0 : index
    %c0_14 = arith.constant 0 : index
    %33 = vector.load %arg8[%c0_13, %c0_14] : memref<128x128xf32, #tpu.memory_space<vmem>>, vector<128x16xf32>
    tpu.vector_store %arg8[%c0_13, %c0_14], %32 {strides = array<i32>} : memref<128x128xf32, #tpu.memory_space<vmem>>, vector<128x16xf32>,
    %34 = vector.extract_strided_slice %8 {offsets = [0, 16], sizes = [128, 16], strides = [1, 1]} : vector<128x128xf32> to vector<128x16xf32>
    %35 = arith.truncf %34 : vector<128x16xf32> to vector<128x16xbf16>
    %36 = vector.extract_strided_slice %12 {offsets = [0, 16], sizes = [128, 16], strides = [1, 1]} : vector<128x128xf32> to vector<128x16xf32>
    %37 = arith.truncf %36 : vector<128x16xf32> to vector<128x16xbf16>
    %38 = vector.extract_strided_slice %13 {offsets = [0, 16], sizes = [128, 16], strides = [1, 1]} : vector<128x128xf32> to vector<128x16xf32>
    %39 = arith.truncf %38 : vector<128x16xf32> to vector<128x16xbf16>
    %cst_15 = arith.constant dense<0.000000e+00> : vector<128x128xf32>
    %40 = tpu.matmul %35, %37, %cst_15 {dimension_numbers = #tpu.dot_dimension_numbers<[1], [1], [0], [0], [0, 0, 1, 0], [], []>} : vector<128x16xbf16>, vector<128x16xbf16>, vector<128x128xf32> -> vector<128x128xf32>
    %cst_16 = arith.constant dense<0xFF800000> : vector<128xf32>
    %41 = vector.multi_reduction <maximumf>, %40, %cst_16 [1] : vector<128x128xf32> to vector<128xf32>
    %42 = vector.shape_cast %41 : vector<128xf32> to vector<128x1xf32>
    %43 = vector.broadcast %42 : vector<128x1xf32> to vector<128x128xf32>
    %44 = arith.subf %40, %43 : vector<128x128xf32>
    %45 = math.exp %44 : vector<128x128xf32>
    %cst_17 = arith.constant dense<0.000000e+00> : vector<128xf32>
    %46 = vector.multi_reduction <add>, %45, %cst_17 [1] : vector<128x128xf32> to vector<128xf32>
    %47 = vector.shape_cast %46 : vector<128xf32> to vector<128x1xf32>
    %48 = arith.truncf %45 : vector<128x128xf32> to vector<128x128xbf16>
    %cst_18 = arith.constant dense<0.000000e+00> : vector<128x16xf32>
    %49 = tpu.matmul %48, %39, %cst_18 {dimension_numbers = #tpu.dot_dimension_numbers<[1], [0], [0], [1], [0, 0, 1, 1], [], []>} : vector<128x128xbf16>, vector<128x16xbf16>, vector<128x16xf32> -> vector<128x16xf32>
    %50 = tpu.reciprocal %47 {approx = true} : vector<128x1xf32> -> vector<128x1xf32>
    %51 = vector.broadcast %50 : vector<128x1xf32> to vector<128x16xf32>
    %52 = arith.mulf %49, %51 : vector<128x16xf32>
    %c0_19 = arith.constant 0 : index
    %c16 = arith.constant 16 : index
    %53 = vector.load %arg8[%c0_19, %c16] : memref<128x128xf32, #tpu.memory_space<vmem>>, vector<128x16xf32>
    tpu.vector_store %arg8[%c0_19, %c16], %52 {strides = array<i32>} : memref<128x128xf32, #tpu.memory_space<vmem>>, vector<128x16xf32>,
    %54 = vector.extract_strided_slice %8 {offsets = [0, 32], sizes = [128, 16], strides = [1, 1]} : vector<128x128xf32> to vector<128x16xf32>
    %55 = arith.truncf %54 : vector<128x16xf32> to vector<128x16xbf16>
    %56 = vector.extract_strided_slice %12 {offsets = [0, 32], sizes = [128, 16], strides = [1, 1]} : vector<128x128xf32> to vector<128x16xf32>
    %57 = arith.truncf %56 : vector<128x16xf32> to vector<128x16xbf16>
    %58 = vector.extract_strided_slice %13 {offsets = [0, 32], sizes = [128, 16], strides = [1, 1]} : vector<128x128xf32> to vector<128x16xf32>
    %59 = arith.truncf %58 : vector<128x16xf32> to vector<128x16xbf16>
    %cst_20 = arith.constant dense<0.000000e+00> : vector<128x128xf32>
    %60 = tpu.matmul %55, %57, %cst_20 {dimension_numbers = #tpu.dot_dimension_numbers<[1], [1], [0], [0], [0, 0, 1, 0], [], []>} : vector<128x16xbf16>, vector<128x16xbf16>, vector<128x128xf32> -> vector<128x128xf32>
    %cst_21 = arith.constant dense<0xFF800000> : vector<128xf32>
    %61 = vector.multi_reduction <maximumf>, %60, %cst_21 [1] : vector<128x128xf32> to vector<128xf32>
    %62 = vector.shape_cast %61 : vector<128xf32> to vector<128x1xf32>
    %63 = vector.broadcast %62 : vector<128x1xf32> to vector<128x128xf32>
    %64 = arith.subf %60, %63 : vector<128x128xf32>
    %65 = math.exp %64 : vector<128x128xf32>
    %cst_22 = arith.constant dense<0.000000e+00> : vector<128xf32>
    %66 = vector.multi_reduction <add>, %65, %cst_22 [1] : vector<128x128xf32> to vector<128xf32>
    %67 = vector.shape_cast %66 : vector<128xf32> to vector<128x1xf32>
    %68 = arith.truncf %65 : vector<128x128xf32> to vector<128x128xbf16>
    %cst_23 = arith.constant dense<0.000000e+00> : vector<128x16xf32>
    %69 = tpu.matmul %68, %59, %cst_23 {dimension_numbers = #tpu.dot_dimension_numbers<[1], [0], [0], [1], [0, 0, 1, 1], [], []>} : vector<128x128xbf16>, vector<128x16xbf16>, vector<128x16xf32> -> vector<128x16xf32>
    %70 = tpu.reciprocal %67 {approx = true} : vector<128x1xf32> -> vector<128x1xf32>
    %71 = vector.broadcast %70 : vector<128x1xf32> to vector<128x16xf32>
    %72 = arith.mulf %69, %71 : vector<128x16xf32>
    %c0_24 = arith.constant 0 : index
    %c32 = arith.constant 32 : index
    %73 = vector.load %arg8[%c0_24, %c32] : memref<128x128xf32, #tpu.memory_space<vmem>>, vector<128x16xf32>
    tpu.vector_store %arg8[%c0_24, %c32], %72 {strides = array<i32>} : memref<128x128xf32, #tpu.memory_space<vmem>>, vector<128x16xf32>,
    %74 = vector.extract_strided_slice %8 {offsets = [0, 48], sizes = [128, 16], strides = [1, 1]} : vector<128x128xf32> to vector<128x16xf32>
    %75 = arith.truncf %74 : vector<128x16xf32> to vector<128x16xbf16>
    %76 = vector.extract_strided_slice %12 {offsets = [0, 48], sizes = [128, 16], strides = [1, 1]} : vector<128x128xf32> to vector<128x16xf32>
    %77 = arith.truncf %76 : vector<128x16xf32> to vector<128x16xbf16>
    %78 = vector.extract_strided_slice %13 {offsets = [0, 48], sizes = [128, 16], strides = [1, 1]} : vector<128x128xf32> to vector<128x16xf32>
    %79 = arith.truncf %78 : vector<128x16xf32> to vector<128x16xbf16>
    %cst_25 = arith.constant dense<0.000000e+00> : vector<128x128xf32>
    %80 = tpu.matmul %75, %77, %cst_25 {dimension_numbers = #tpu.dot_dimension_numbers<[1], [1], [0], [0], [0, 0, 1, 0], [], []>} : vector<128x16xbf16>, vector<128x16xbf16>, vector<128x128xf32> -> vector<128x128xf32>
    %cst_26 = arith.constant dense<0xFF800000> : vector<128xf32>
    %81 = vector.multi_reduction <maximumf>, %80, %cst_26 [1] : vector<128x128xf32> to vector<128xf32>
    %82 = vector.shape_cast %81 : vector<128xf32> to vector<128x1xf32>
    %83 = vector.broadcast %82 : vector<128x1xf32> to vector<128x128xf32>
    %84 = arith.subf %80, %83 : vector<128x128xf32>
    %85 = math.exp %84 : vector<128x128xf32>
    %cst_27 = arith.constant dense<0.000000e+00> : vector<128xf32>
    %86 = vector.multi_reduction <add>, %85, %cst_27 [1] : vector<128x128xf32> to vector<128xf32>
    %87 = vector.shape_cast %86 : vector<128xf32> to vector<128x1xf32>
    %88 = arith.truncf %85 : vector<128x128xf32> to vector<128x128xbf16>
    %cst_28 = arith.constant dense<0.000000e+00> : vector<128x16xf32>
    %89 = tpu.matmul %88, %79, %cst_28 {dimension_numbers = #tpu.dot_dimension_numbers<[1], [0], [0], [1], [0, 0, 1, 1], [], []>} : vector<128x128xbf16>, vector<128x16xbf16>, vector<128x16xf32> -> vector<128x16xf32>
    %90 = tpu.reciprocal %87 {approx = true} : vector<128x1xf32> -> vector<128x1xf32>
    %91 = vector.broadcast %90 : vector<128x1xf32> to vector<128x16xf32>
    %92 = arith.mulf %89, %91 : vector<128x16xf32>
    %c0_29 = arith.constant 0 : index
    %c48 = arith.constant 48 : index
    %93 = vector.load %arg8[%c0_29, %c48] : memref<128x128xf32, #tpu.memory_space<vmem>>, vector<128x16xf32>
    tpu.vector_store %arg8[%c0_29, %c48], %92 {strides = array<i32>} : memref<128x128xf32, #tpu.memory_space<vmem>>, vector<128x16xf32>,
    %94 = vector.extract_strided_slice %8 {offsets = [0, 64], sizes = [128, 16], strides = [1, 1]} : vector<128x128xf32> to vector<128x16xf32>
    %95 = arith.truncf %94 : vector<128x16xf32> to vector<128x16xbf16>
    %96 = vector.extract_strided_slice %12 {offsets = [0, 64], sizes = [128, 16], strides = [1, 1]} : vector<128x128xf32> to vector<128x16xf32>
    %97 = arith.truncf %96 : vector<128x16xf32> to vector<128x16xbf16>
    %98 = vector.extract_strided_slice %13 {offsets = [0, 64], sizes = [128, 16], strides = [1, 1]} : vector<128x128xf32> to vector<128x16xf32>
    %99 = arith.truncf %98 : vector<128x16xf32> to vector<128x16xbf16>
    %cst_30 = arith.constant dense<0.000000e+00> : vector<128x128xf32>
    %100 = tpu.matmul %95, %97, %cst_30 {dimension_numbers = #tpu.dot_dimension_numbers<[1], [1], [0], [0], [0, 0, 1, 0], [], []>} : vector<128x16xbf16>, vector<128x16xbf16>, vector<128x128xf32> -> vector<128x128xf32>
    %cst_31 = arith.constant dense<0xFF800000> : vector<128xf32>
    %101 = vector.multi_reduction <maximumf>, %100, %cst_31 [1] : vector<128x128xf32> to vector<128xf32>
    %102 = vector.shape_cast %101 : vector<128xf32> to vector<128x1xf32>
    %103 = vector.broadcast %102 : vector<128x1xf32> to vector<128x128xf32>
    %104 = arith.subf %100, %103 : vector<128x128xf32>
    %105 = math.exp %104 : vector<128x128xf32>
    %cst_32 = arith.constant dense<0.000000e+00> : vector<128xf32>
    %106 = vector.multi_reduction <add>, %105, %cst_32 [1] : vector<128x128xf32> to vector<128xf32>
    %107 = vector.shape_cast %106 : vector<128xf32> to vector<128x1xf32>
    %108 = arith.truncf %105 : vector<128x128xf32> to vector<128x128xbf16>
    %cst_33 = arith.constant dense<0.000000e+00> : vector<128x16xf32>
    %109 = tpu.matmul %108, %99, %cst_33 {dimension_numbers = #tpu.dot_dimension_numbers<[1], [0], [0], [1], [0, 0, 1, 1], [], []>} : vector<128x128xbf16>, vector<128x16xbf16>, vector<128x16xf32> -> vector<128x16xf32>
    %110 = tpu.reciprocal %107 {approx = true} : vector<128x1xf32> -> vector<128x1xf32>
    %111 = vector.broadcast %110 : vector<128x1xf32> to vector<128x16xf32>
    %112 = arith.mulf %109, %111 : vector<128x16xf32>
    %c0_34 = arith.constant 0 : index
    %c64 = arith.constant 64 : index
    %113 = vector.load %arg8[%c0_34, %c64] : memref<128x128xf32, #tpu.memory_space<vmem>>, vector<128x16xf32>
    tpu.vector_store %arg8[%c0_34, %c64], %112 {strides = array<i32>} : memref<128x128xf32, #tpu.memory_space<vmem>>, vector<128x16xf32>,
    %114 = vector.extract_strided_slice %8 {offsets = [0, 80], sizes = [128, 16], strides = [1, 1]} : vector<128x128xf32> to vector<128x16xf32>
    %115 = arith.truncf %114 : vector<128x16xf32> to vector<128x16xbf16>
    %116 = vector.extract_strided_slice %12 {offsets = [0, 80], sizes = [128, 16], strides = [1, 1]} : vector<128x128xf32> to vector<128x16xf32>
    %117 = arith.truncf %116 : vector<128x16xf32> to vector<128x16xbf16>
    %118 = vector.extract_strided_slice %13 {offsets = [0, 80], sizes = [128, 16], strides = [1, 1]} : vector<128x128xf32> to vector<128x16xf32>
    %119 = arith.truncf %118 : vector<128x16xf32> to vector<128x16xbf16>
    %cst_35 = arith.constant dense<0.000000e+00> : vector<128x128xf32>
    %120 = tpu.matmul %115, %117, %cst_35 {dimension_numbers = #tpu.dot_dimension_numbers<[1], [1], [0], [0], [0, 0, 1, 0], [], []>} : vector<128x16xbf16>, vector<128x16xbf16>, vector<128x128xf32> -> vector<128x128xf32>
    %cst_36 = arith.constant dense<0xFF800000> : vector<128xf32>
    %121 = vector.multi_reduction <maximumf>, %120, %cst_36 [1] : vector<128x128xf32> to vector<128xf32>
    %122 = vector.shape_cast %121 : vector<128xf32> to vector<128x1xf32>
    %123 = vector.broadcast %122 : vector<128x1xf32> to vector<128x128xf32>
    %124 = arith.subf %120, %123 : vector<128x128xf32>
    %125 = math.exp %124 : vector<128x128xf32>
    %cst_37 = arith.constant dense<0.000000e+00> : vector<128xf32>
    %126 = vector.multi_reduction <add>, %125, %cst_37 [1] : vector<128x128xf32> to vector<128xf32>
    %127 = vector.shape_cast %126 : vector<128xf32> to vector<128x1xf32>
    %128 = arith.truncf %125 : vector<128x128xf32> to vector<128x128xbf16>
    %cst_38 = arith.constant dense<0.000000e+00> : vector<128x16xf32>
    %129 = tpu.matmul %128, %119, %cst_38 {dimension_numbers = #tpu.dot_dimension_numbers<[1], [0], [0], [1], [0, 0, 1, 1], [], []>} : vector<128x128xbf16>, vector<128x16xbf16>, vector<128x16xf32> -> vector<128x16xf32>
    %130 = tpu.reciprocal %127 {approx = true} : vector<128x1xf32> -> vector<128x1xf32>
    %131 = vector.broadcast %130 : vector<128x1xf32> to vector<128x16xf32>
    %132 = arith.mulf %129, %131 : vector<128x16xf32>
    %c0_39 = arith.constant 0 : index
    %c80 = arith.constant 80 : index
    %133 = vector.load %arg8[%c0_39, %c80] : memref<128x128xf32, #tpu.memory_space<vmem>>, vector<128x16xf32>
    tpu.vector_store %arg8[%c0_39, %c80], %132 {strides = array<i32>} : memref<128x128xf32, #tpu.memory_space<vmem>>, vector<128x16xf32>,
    %134 = vector.extract_strided_slice %8 {offsets = [0, 96], sizes = [128, 16], strides = [1, 1]} : vector<128x128xf32> to vector<128x16xf32>
    %135 = arith.truncf %134 : vector<128x16xf32> to vector<128x16xbf16>
    %136 = vector.extract_strided_slice %12 {offsets = [0, 96], sizes = [128, 16], strides = [1, 1]} : vector<128x128xf32> to vector<128x16xf32>
    %137 = arith.truncf %136 : vector<128x16xf32> to vector<128x16xbf16>
    %138 = vector.extract_strided_slice %13 {offsets = [0, 96], sizes = [128, 16], strides = [1, 1]} : vector<128x128xf32> to vector<128x16xf32>
    %139 = arith.truncf %138 : vector<128x16xf32> to vector<128x16xbf16>
    %cst_40 = arith.constant dense<0.000000e+00> : vector<128x128xf32>
    %140 = tpu.matmul %135, %137, %cst_40 {dimension_numbers = #tpu.dot_dimension_numbers<[1], [1], [0], [0], [0, 0, 1, 0], [], []>} : vector<128x16xbf16>, vector<128x16xbf16>, vector<128x128xf32> -> vector<128x128xf32>
    %cst_41 = arith.constant dense<0xFF800000> : vector<128xf32>
    %141 = vector.multi_reduction <maximumf>, %140, %cst_41 [1] : vector<128x128xf32> to vector<128xf32>
    %142 = vector.shape_cast %141 : vector<128xf32> to vector<128x1xf32>
    %143 = vector.broadcast %142 : vector<128x1xf32> to vector<128x128xf32>
    %144 = arith.subf %140, %143 : vector<128x128xf32>
    %145 = math.exp %144 : vector<128x128xf32>
    %cst_42 = arith.constant dense<0.000000e+00> : vector<128xf32>
    %146 = vector.multi_reduction <add>, %145, %cst_42 [1] : vector<128x128xf32> to vector<128xf32>
    %147 = vector.shape_cast %146 : vector<128xf32> to vector<128x1xf32>
    %148 = arith.truncf %145 : vector<128x128xf32> to vector<128x128xbf16>
    %cst_43 = arith.constant dense<0.000000e+00> : vector<128x16xf32>
    %149 = tpu.matmul %148, %139, %cst_43 {dimension_numbers = #tpu.dot_dimension_numbers<[1], [0], [0], [1], [0, 0, 1, 1], [], []>} : vector<128x128xbf16>, vector<128x16xbf16>, vector<128x16xf32> -> vector<128x16xf32>
    %150 = tpu.reciprocal %147 {approx = true} : vector<128x1xf32> -> vector<128x1xf32>
    %151 = vector.broadcast %150 : vector<128x1xf32> to vector<128x16xf32>
    %152 = arith.mulf %149, %151 : vector<128x16xf32>
    %c0_44 = arith.constant 0 : index
    %c96 = arith.constant 96 : index
    %153 = vector.load %arg8[%c0_44, %c96] : memref<128x128xf32, #tpu.memory_space<vmem>>, vector<128x16xf32>
    tpu.vector_store %arg8[%c0_44, %c96], %152 {strides = array<i32>} : memref<128x128xf32, #tpu.memory_space<vmem>>, vector<128x16xf32>,
    %154 = vector.extract_strided_slice %8 {offsets = [0, 112], sizes = [128, 16], strides = [1, 1]} : vector<128x128xf32> to vector<128x16xf32>
    %155 = arith.truncf %154 : vector<128x16xf32> to vector<128x16xbf16>
    %156 = vector.extract_strided_slice %12 {offsets = [0, 112], sizes = [128, 16], strides = [1, 1]} : vector<128x128xf32> to vector<128x16xf32>
    %157 = arith.truncf %156 : vector<128x16xf32> to vector<128x16xbf16>
    %158 = vector.extract_strided_slice %13 {offsets = [0, 112], sizes = [128, 16], strides = [1, 1]} : vector<128x128xf32> to vector<128x16xf32>
    %159 = arith.truncf %158 : vector<128x16xf32> to vector<128x16xbf16>
    %cst_45 = arith.constant dense<0.000000e+00> : vector<128x128xf32>
    %160 = tpu.matmul %155, %157, %cst_45 {dimension_numbers = #tpu.dot_dimension_numbers<[1], [1], [0], [0], [0, 0, 1, 0], [], []>} : vector<128x16xbf16>, vector<128x16xbf16>, vector<128x128xf32> -> vector<128x128xf32>
    %cst_46 = arith.constant dense<0xFF800000> : vector<128xf32>
    %161 = vector.multi_reduction <maximumf>, %160, %cst_46 [1] : vector<128x128xf32> to vector<128xf32>
    %162 = vector.shape_cast %161 : vector<128xf32> to vector<128x1xf32>
    %163 = vector.broadcast %162 : vector<128x1xf32> to vector<128x128xf32>
    %164 = arith.subf %160, %163 : vector<128x128xf32>
    %165 = math.exp %164 : vector<128x128xf32>
    %cst_47 = arith.constant dense<0.000000e+00> : vector<128xf32>
    %166 = vector.multi_reduction <add>, %165, %cst_47 [1] : vector<128x128xf32> to vector<128xf32>
    %167 = vector.shape_cast %166 : vector<128xf32> to vector<128x1xf32>
    %168 = arith.truncf %165 : vector<128x128xf32> to vector<128x128xbf16>
    %cst_48 = arith.constant dense<0.000000e+00> : vector<128x16xf32>
    %169 = tpu.matmul %168, %159, %cst_48 {dimension_numbers = #tpu.dot_dimension_numbers<[1], [0], [0], [1], [0, 0, 1, 1], [], []>} : vector<128x128xbf16>, vector<128x16xbf16>, vector<128x16xf32> -> vector<128x16xf32>
    %170 = tpu.reciprocal %167 {approx = true} : vector<128x1xf32> -> vector<128x1xf32>
    %171 = vector.broadcast %170 : vector<128x1xf32> to vector<128x16xf32>
    %172 = arith.mulf %169, %171 : vector<128x16xf32>
    %c0_49 = arith.constant 0 : index
    %c112 = arith.constant 112 : index
    %173 = vector.load %arg8[%c0_49, %c112] : memref<128x128xf32, #tpu.memory_space<vmem>>, vector<128x16xf32>
    tpu.vector_store %arg8[%c0_49, %c112], %172 {strides = array<i32>} : memref<128x128xf32, #tpu.memory_space<vmem>>, vector<128x16xf32>,
    %c0_50 = arith.constant 0 : index
    %c0_51 = arith.constant 0 : index
    %174 = vector.load %arg8[%c0_50, %c0_51] : memref<128x128xf32, #tpu.memory_space<vmem>>, vector<128x128xf32>
    %175 = arith.truncf %174 : vector<128x128xf32> to vector<128x128xbf16>
    %c0_52 = arith.constant 0 : index
    %c0_53 = arith.constant 0 : index
    %176 = vector.load %arg5[%c0_52, %c0_53] : memref<128x128xf32, #tpu.memory_space<vmem>>, vector<128x128xf32>
    %177 = arith.truncf %176 : vector<128x128xf32> to vector<128x128xbf16>
    %cst_54 = arith.constant dense<0.000000e+00> : vector<128x128xf32>
    %178 = tpu.matmul %175, %177, %cst_54 {dimension_numbers = #tpu.dot_dimension_numbers<[1], [0], [0], [1], [0, 0, 1, 1], [], []>} : vector<128x128xbf16>, vector<128x128xbf16>, vector<128x128xf32> -> vector<128x128xf32>
    %c0_55 = arith.constant 0 : index
    %c0_56 = arith.constant 0 : index
    %179 = vector.load %arg6[%c0_55, %c0_56] : memref<1x128xf32, #tpu.memory_space<vmem>>, vector<1x128xf32>
    %180 = vector.broadcast %179 : vector<1x128xf32> to vector<128x128xf32>
    %181 = arith.addf %178, %180 : vector<128x128xf32>
    %c0_57 = arith.constant 0 : index
    %c0_58 = arith.constant 0 : index
    %c0_59 = arith.constant 0 : index
    %182 = vector.load %arg7[%c0_57, %c0_58, %c0_59] : memref<1x128x128xf32, #tpu.memory_space<vmem>>, vector<1x128x128xf32>
    %183 = vector.shape_cast %182 : vector<1x128x128xf32> to vector<128x128xf32>
    %184 = vector.shape_cast %181 : vector<128x128xf32> to vector<1x128x128xf32>
    tpu.vector_store %arg7[%c0_57, %c0_58, %c0_59], %184 {strides = array<i32>} : memref<1x128x128xf32, #tpu.memory_space<vmem>>, vector<1x128x128xf32>,
    return
  }
  func.func @transform_0(%arg0: i32, %arg1: i32) -> (i32, i32, i32) {
    %c0_i32 = arith.constant 0 : i32
    %c0_i32_0 = arith.constant 0 : i32
    return %arg0, %arg1, %c0_i32 : i32, i32, i32
  }
  func.func @transform_1(%arg0: i32, %arg1: i32) -> (i32, i32, i32) {
    %c0_i32 = arith.constant 0 : i32
    %c0_i32_0 = arith.constant 0 : i32
    %c0_i32_1 = arith.constant 0 : i32
    return %arg0, %c0_i32, %c0_i32_0 : i32, i32, i32
  }
  func.func @transform_2(%arg0: i32, %arg1: i32) -> (i32, i32) {
    %c0_i32 = arith.constant 0 : i32
    %c0_i32_0 = arith.constant 0 : i32
    %c0_i32_1 = arith.constant 0 : i32
    return %c0_i32, %c0_i32_0 : i32, i32
  }
  func.func @transform_3(%arg0: i32, %arg1: i32) -> (i32, i32) {
    %c0_i32 = arith.constant 0 : i32
    %c0_i32_0 = arith.constant 0 : i32
    %c0_i32_1 = arith.constant 0 : i32
    return %c0_i32, %c0_i32_0 : i32, i32
  }
  func.func @transform_4(%arg0: i32, %arg1: i32) -> (i32, i32) {
    %c0_i32 = arith.constant 0 : i32
    %c0_i32_0 = arith.constant 0 : i32
    %c0_i32_1 = arith.constant 0 : i32
    return %c0_i32, %c0_i32_0 : i32, i32
  }
  func.func @transform_5(%arg0: i32, %arg1: i32) -> (i32, i32, i32) {
    %c0_i32 = arith.constant 0 : i32
    %c0_i32_0 = arith.constant 0 : i32
    return %arg0, %arg1, %c0_i32 : i32, i32, i32
  }
}

</mosaic_0001>

<bundles_post_ra>
// kernel: attention_forward.1
= control target key start
LH: loop header
LB: loop body
LE: loop exit
PB: predicated region body
PF: predicated region fallthrough
CT: control target
= control target key end

     0   :  { %s10102_s0 = inlined_call_operand.hbm [shape: f32[2,128,128], index: 0, kind: input, shape index: {}]   ;;  %s10103_s1 = inlined_call_operand.hbm [shape: f32[2,128,128], index: 1, kind: input, shape index: {}]   ;;  %s10104_s2 = inlined_call_operand.hbm [shape: f32[128,384], index: 2, kind: input, shape index: {}]   ;;  %s10105_s3 = inlined_call_operand.hbm [shape: f32[128,128], index: 3, kind: input, shape index: {}]   ;;  %s10106_s4 = inlined_call_operand.vmem [shape: f32[1,128], index: 4, kind: input, shape index: {}]   ;;  %s10107_s5 = inlined_call_operand.hbm [shape: f32[2,128,128], index: 5, kind: output, shape index: {}]  }
   0x1   :  { %10200 = sst [smem:[#allocation183_spill]] %s10102_s0 }
   0x2   :  { %10201 = sst [smem:[#allocation184_spill]] %s10104_s2 }
   0x3   :  { %10202 = sst [smem:[#allocation185_spill]] %s10105_s3 }
   0x4   :  { %10 = vsyncpa [#allocation4], 0 }
   0x5   :  { %12 = vsyncpa [#allocation4 + $0x1], 0 }
   0x6   :  { %13 = vsyncpa [#allocation7], 0 }
   0x7   :  { %15 = vsyncpa [#allocation7 + $0x1], 0 }
   0x8   :  { %16 = vsyncpa [#allocation10], 0 }
   0x9   :  { %17 = vsyncpa [#allocation5], 0 }
   0xa   :  { %19 = vsyncpa [#allocation5 + $0x1], 0  ;;  %s7046_s18 = smov 0   ;;  %s7048_s19 = smov 0  }
   0xb   :  { %s7050_s20 = smov 0   ;;  %s7052_s21 = smov 0  }
   0xc   :  { %s7054_s22 = smov 0   ;;  %s7056_s23 = smov 0  }
   0xd LB: > { %10203 = sst [smem:[#allocation17_spill]] %s6991_s22  ;;  %s7077_s24 = sadd.s32 4294967295, %s6995_s23   ;;  %s6995_s23 = sphi %s7056_s23, %s25_s23   ;;  %s6991_s22 = sphi %s7054_s22, %s10684_s22   ;;  %s6987_s21 = sphi %s7052_s21, %s10679_s21   ;;  %s6983_s20 = sphi %s7050_s20, %s10683_s20   ;;  %s6979_s19 = sphi %s7048_s19, %s10682_s19   ;;  %s6975_s18 = sphi %s7046_s18, %s10681_s18  }
   0xe   : > { %s5153_s25 = sadd.s32 4294967294, %s6995_s23   ;;  %p59_p0 = scmp.ne.s32.totalorder %s6979_s19, %s6975_s18 }
   0xf   : > { %p10108_p1 = scmp.eq.s32.totalorder %s7077_s24, 0  ;;  %p180_p3 = scmp.eq.s32.totalorder %s5153_s25, 1 }
  0x10   : > { %p5154_p5 = scmp.ge.s32.totalorder %s6995_s23, 1  ;;  %p187_p7 = scmp.lt.s32.totalorder %s6995_s23, 3 }
  0x11   : > { %p7086_p4 = por %p10108_p1, %p59_p0  ;;  %p7091_p6 = por %p180_p3, %p59_p0 }
  0x12   : > { %p7096_p8 = pnand %p5154_p5, %p187_p7  ;;  %s6997_s29 = smov [#allocation8]  }
  0x13   : > { %s10204_s26 = scalar_select %p7086_p4, 1, 0 }
  0x14   : > { %s10205_s27 = scalar_select %p7091_p6, 1, 0 }
  0x15   : > { %s199_s30 = sshll.u32 %s6997_s29, 4  ;;  %p6185_p9 = pneg %p7096_p8  ;;  %s7100_s30 = int_to_ptr.vmem [resolvable:$true] %s199_s30 }
  0x16   : > { %s6998_s7 = smov [#allocation9]   ;;  %s10208_s2 = sld [smem:[#allocation184_spill]] }
  0x17   : > { %p7107_p11 = pnand %p6185_p9, %p10108_p1  ;;  %s212_s8 = sshll.u32 %s6998_s7, 4  ;;  %s7111_s8 = int_to_ptr.vmem [resolvable:$true] %s212_s8 }
  0x19   : > { %p6787_p13 = pneg %p7107_p11 }
  0x1c   : > { %s6785_s11 = scalar_lea.hbm %s10208_s2, 6144 }
  0x1d   : > { %p6786_p12 = scmp.ne.s32.totalorder %s10208_s2, %s6785_s11  ;;  %p6792_p5 = scmp.lt.u32.totalorder %s6785_s11, %s10208_s2 }
  0x1f   : > { %p6788_p0 = pnand %p6787_p13, %p6786_p12 }
  0x21   : > { %p6789_p3 = pneg %p6788_p0 }
  0x23   : > { %p6794_p7 = pnand %p6792_p5, %p6789_p3 }
  0x25   : > { %6797 = shalt.err (!%p6794_p7)
}
  0x26   : > { %s6798_s16 = scalar_lea.vmem %s7100_s30, 6144  ;;  %p6806_p2 = scmp.lt.s32.totalorder %s7100_s30, %s7100_s30 }
  0x27   : > { %p6799_p9 = scmp.ne.s32.totalorder %s7100_s30, %s6798_s16  ;;  %p6807_p12 = scmp.lt.s32.totalorder %s6798_s16, %s6798_s16 }
  0x29   : > { %p6801_p10 = pnand %p6799_p9, %p6787_p13  ;;  %p6808_p0 = por %p6807_p12, %p6806_p2 }
  0x2b   : > { %p6802_p1 = pneg %p6801_p10 }
  0x2d   : > { %p6809_p6 = pnand %p6808_p0, %p6802_p1 }
  0x2f   : > { %6812 = shalt.err (!%p6809_p6)
}
  0x30   : > { %s6999_s17 = smov 384   ;;  %s7000_s25 = smov 24  }
  0x31   : > { %6188 = dma.hbm_to_vmem [thread:$0]  (!%p7107_p11), %s10208_s2, 6144, %s7100_s30, [#allocation7], %s6999_s17, %s6999_s17, %s7000_s25  }
  0x32   : > { %s10209_s3 = sld [smem:[#allocation185_spill]] }
  0x38   : > { %s6813_s11 = scalar_lea.hbm %s10209_s3, 2048 }
  0x39   : > { %p6814_p2 = scmp.ne.s32.totalorder %s10209_s3, %s6813_s11  ;;  %p6820_p10 = scmp.lt.u32.totalorder %s6813_s11, %s10209_s3 }
  0x3b   : > { %p6816_p1 = pnand %p6814_p2, %p6787_p13 }
  0x3d   : > { %p6817_p6 = pneg %p6816_p1 }
  0x3f   : > { %p6822_p3 = pnand %p6820_p10, %p6817_p6 }
  0x41   : > { %6825 = shalt.err (!%p6822_p3)
}
  0x42   : > { %s6826_s30 = scalar_lea.vmem %s7111_s8, 2048  ;;  %p6834_p12 = scmp.lt.s32.totalorder %s7111_s8, %s7111_s8 }
  0x43   : > { %p6827_p5 = scmp.ne.s32.totalorder %s7111_s8, %s6826_s30  ;;  %p6835_p0 = scmp.lt.s32.totalorder %s6826_s30, %s6826_s30 }
  0x45   : > { %p6829_p7 = pnand %p6827_p5, %p6787_p13  ;;  %p6836_p2 = por %p6835_p0, %p6834_p12 }
  0x47   : > { %p6830_p9 = pneg %p6829_p7 }
  0x49   : > { %p6837_p1 = pnand %p6836_p2, %p6830_p9 }
  0x4b   : > { %6840 = shalt.err (!%p6837_p1)
}
  0x4c   : > { %s10109_s16 = smov 128   ;;  %s10111_s17 = smov 8  }
  0x4d   : > { %6191 = dma.hbm_to_vmem [thread:$0]  (!%p7107_p11), %s10209_s3, 2048, %s7111_s8, [#allocation10], %s10109_s16, %s10109_s16, %s10111_s17  }
  0x4e   : > { %s37_s7 = sadd.s32 1, %s6991_s22  ;;  %s46_s9 = sadd.s32 1, %s6983_s20 }
  0x4f   : > { %p39_p13 = scmp.ge.s32.totalorder %s37_s7, 2  ;;  %p53_p6 = scmp.ne.s32.totalorder %s6983_s20, %s6979_s19 }
  0x50   : > { %p54_p10 = scmp.eq.s32.totalorder %s6995_s23, 0  ;;  %p6205_p3 = scmp.lt.s32.totalorder %s6995_s23, 2 }
  0x51   : > { %s10686_s7 = smov (%p39_p13, %s37_s7), 0  ;;  %p10211_p7 = scmp.eq.s32.totalorder %s7077_s24, 1 }
  0x52   : > { %10210 = sst [smem:[#allocation18_spill]] %s10686_s7  ;;  %p55_p5 = por %p54_p10, %p53_p6 }
  0x53   : > { %p7178_p9 = por %p10211_p7, %p53_p6  ;;  %s41_s10 = ssub.s32 %s6991_s22, %s10686_s7 }
  0x54   : > { %s229_s11 = sand.u32 1, %s6983_s20   ;;  %p44_p12 = scmp.eq.s32.totalorder %s41_s10, 0 }
  0x55   : > { %s10212_s6 = scalar_select %p7178_p9, 1, 0 }
  0x56   : > { %s7185_s8 = sshll.u32 %s229_s11, 7  ;;  %s5240_s12 = sshll.u32 %s6991_s22, 11 }
  0x57   : > { %s7189_s13 = scalar_select %p44_p12, %s6983_s20, %s46_s9  }
  0x58   : > { %s10214_s0 = sld [smem:[#allocation183_spill]]  ;;  %s233_s25 = scalar_lea.vmem [#allocation3], %s7185_s8 }
  0x59   : > { %10213 = sst [smem:[#allocation19_spill]] %s7189_s13  ;;  %s242_s29 = sshll.u32 %s233_s25, 4  ;;  %s7203_s29 = int_to_ptr.vmem [resolvable:$true] %s242_s29 }
  0x5a   : > { %p7199_p11 = pnand %p6205_p3, %p55_p5  ;;  %s7208_s14 = scalar_lea.hbm %s10103_s1, %s5240_s12 }
  0x5b   : > { %s7210_s15 = scalar_lea.sflag [#allocation4], %s229_s11 }
  0x5c   : > { %p6843_p2 = pneg %p7199_p11 }
  0x5e   : > { %s7194_s30 = scalar_lea.hbm %s10214_s0, %s5240_s12  ;;  %s6846_s3 = scalar_lea.hbm %s10214_s0, 4096 }
  0x5f   : > { %s6841_s17 = scalar_lea.hbm %s7194_s30, 2048  ;;  %p6847_p6 = scmp.lt.u32.totalorder %s7194_s30, %s10214_s0 }
  0x60   : > { %p6842_p0 = scmp.ne.s32.totalorder %s7194_s30, %s6841_s17  ;;  %p6848_p10 = scmp.lt.u32.totalorder %s6846_s3, %s6841_s17 }
  0x61   : > { %p6850_p5 = scmp.lt.u32.totalorder %s6841_s17, %s7194_s30 }
  0x62   : > { %p6844_p1 = pnand %p6843_p2, %p6842_p0  ;;  %p6849_p3 = por %p6848_p10, %p6847_p6 }
  0x64   : > { %p6845_p13 = pneg %p6844_p1  ;;  %p6851_p7 = por %p6850_p5, %p6849_p3 }
  0x66   : > { %p6852_p12 = pnand %p6851_p7, %p6845_p13 }
  0x68   : > { %6855 = shalt.err (!%p6852_p12)
}
  0x69   : > { %s6856_s16 = scalar_lea.vmem %s7203_s29, 2048  ;;  %s7003_s2 = smov [#allocation3]  }
  0x6a   : > { %p6857_p0 = scmp.ne.s32.totalorder %s7203_s29, %s6856_s16  ;;  %s6861_s11 = sshll.u32 %s7003_s2, 4  ;;  %s6862_s11 = int_to_ptr.vmem [resolvable:$false] %s6861_s11 }
  0x6b   : > { %s6863_s22 = scalar_lea.vmem %s6862_s11, 4096  ;;  %p6864_p4 = scmp.lt.s32.totalorder %s7203_s29, %s6862_s11 }
  0x6c   : > { %p6859_p1 = pnand %p6857_p0, %p6843_p2  ;;  %p6865_p6 = scmp.lt.s32.totalorder %s6863_s22, %s6856_s16 }
  0x6e   : > { %p6860_p9 = pneg %p6859_p1  ;;  %p6866_p10 = por %p6865_p6, %p6864_p4 }
  0x70   : > { %p6867_p3 = pnand %p6866_p10, %p6860_p9 }
  0x72   : > { %6870 = shalt.err (!%p6867_p3)
}
  0x73   : > { %s10216_s3 = smov 8   ;;  %s10217_s17 = smov 128  }
  0x74   : > { %6195 = dma.hbm_to_vmem [thread:$0]  (!%p7199_p11), %s7194_s30, 2048, %s7203_s29, %s7210_s15, %s10217_s17, %s10217_s17, %s10216_s3  }
  0x75   : > { %s256_s7 = scalar_lea.vmem [#allocation6], %s7185_s8  ;;  %s252_s9 = sand.u32 1, %s6995_s23  }
  0x76   : > { %s263_s12 = sshll.u32 %s256_s7, 4  ;;  %s7245_s25 = scalar_lea.sflag [#allocation7], %s252_s9  ;;  %s7243_s12 = int_to_ptr.vmem [resolvable:$true] %s263_s12 }
  0x77   : > { %s6871_s16 = scalar_lea.hbm %s7208_s14, 2048  ;;  %s6876_s22 = scalar_lea.hbm %s10103_s1, 4096 }
  0x78   : > { %p6872_p4 = scmp.ne.s32.totalorder %s7208_s14, %s6871_s16  ;;  %p6877_p5 = scmp.lt.u32.totalorder %s7208_s14, %s10103_s1 }
  0x79   : > { %p6878_p7 = scmp.lt.u32.totalorder %s6876_s22, %s6871_s16  ;;  %p6880_p0 = scmp.lt.u32.totalorder %s6871_s16, %s7208_s14 }
  0x7a   : > { %p6874_p9 = pnand %p6872_p4, %p6843_p2 }
  0x7b   : > { %p6879_p12 = por %p6878_p7, %p6877_p5 }
  0x7c   : > { %p6875_p13 = pneg %p6874_p9 }
  0x7d   : > { %p6881_p1 = por %p6880_p0, %p6879_p12 }
  0x7f   : > { %p6882_p6 = pnand %p6881_p1, %p6875_p13 }
  0x81   : > { %6885 = shalt.err (!%p6882_p6)
}
  0x82   : > { %s6886_s8 = scalar_lea.vmem %s7243_s12, 2048  ;;  %s7004_s30 = smov [#allocation6]  }
  0x83   : > { %p6887_p10 = scmp.ne.s32.totalorder %s7243_s12, %s6886_s8  ;;  %s6891_s29 = sshll.u32 %s7004_s30, 4  ;;  %s6892_s29 = int_to_ptr.vmem [resolvable:$false] %s6891_s29 }
  0x84   : > { %s6893_s0 = scalar_lea.vmem %s6892_s29, 4096  ;;  %p6894_p9 = scmp.lt.s32.totalorder %s7243_s12, %s6892_s29 }
  0x85   : > { %p6889_p3 = pnand %p6887_p10, %p6843_p2  ;;  %p6895_p5 = scmp.lt.s32.totalorder %s6893_s0, %s6886_s8 }
  0x87   : > { %p6890_p4 = pneg %p6889_p3  ;;  %p6896_p7 = por %p6895_p5, %p6894_p9 }
  0x89   : > { %p6897_p12 = pnand %p6896_p7, %p6890_p4 }
  0x8b   : > { %6900 = shalt.err (!%p6897_p12)
}
  0x8c   : > { %6198 = dma.hbm_to_vmem [thread:$0]  (!%p7199_p11), %s7208_s14, 2048, %s7243_s12, %s7245_s25, %s10217_s17, %s10217_s17, %s10216_s3  }
  0x8d   : > { %275 = sbr.rel (%p7096_p8) target bundleno = 4400 (0x1130), region = 40 }
  0x94   : > { %s7277_s13 = sand.u32 1, %s6979_s19   ;;  %p10218_p2 = scmp.ne.s32.totalorder %s10204_s26, 0 }
  0x95   : > { %s7280_s15 = sshll.u32 %s7277_s13, 7  ;;  %s278_s10 = scalar_lea.sflag [#allocation4], %s7277_s13 }
  0x96   : > { %s7284_s7 = scalar_lea.vmem [#allocation3], %s7280_s15 }
  0x97   : > { %6954 = dma.done.wait (%p10218_p2), %s278_s10, 2048  }
  0x98   : > { %6956 = vsyncadd (%p10218_p2), %s278_s10, 4294965248  ;;  %s286_s28 = sand.u32 1, %s7077_s24   ;;  %s7292_s3 = scalar_lea.vmem [#allocation6], %s7280_s15 }
  0x99   : > { %s287_s14 = scalar_lea.sflag [#allocation7], %s286_s28 }
  0x9a   : > { %6958 = dma.done.wait (%p10218_p2), %s287_s14, 2048  }
  0x9b   : > { %6960 = vsyncadd (%p10218_p2), %s287_s14, 4294965248  ;;  %p10219_p8 = scmp.eq.s32.totalorder %s7077_s24, 0 }
  0x9d   : > { %6962 = dma.done.wait (%p10219_p8), [#allocation7], 6144   ;;  %p10220_p11 = pmov %p10219_p8 }
  0x9e   : > { %p10221_p13 = pmov %p10219_p8 }
  0x9f   : > { %6964 = vsyncadd (%p10220_p11), [#allocation7], 4294961152 }
  0xa0   : > { %6966 = dma.done.wait (%p10221_p13), [#allocation10], 2048   ;;  %p10222_p0 = pmov %p10219_p8 }
  0xa1   : > { %v7005_v0 = vmov 0   ;;  %v503_v1 = vld [vmem:[#allocation8 + $0x10] sm:$0xff]  ;;  %v505_v2 = vld [vmem:[#allocation8 + $0x28] sm:$0xff]  ;;  %v504_v5 = vld [vmem:[#allocation8 + $0x20] sm:$0xff]  ;;  %vm687_vm0 = vcmask 130048   ;;  %s7006_s24 = smov 112  }
  0xa2   : > { %6968 = vsyncadd (%p10222_p0), [#allocation10], 4294965248  ;;  %582 = vmatprep.mubr.bf16.mxu1 %v7005_v0  ;;  %v502_v3 = vld [vmem:[#allocation8 + $0x8] sm:$0xff]  ;;  %v535_v4 = vpack.c.bf16 %v505_v2, %v503_v1  ;;  %v507_v6 = vld [vmem:[#allocation8 + $0x40] sm:$0xff]  ;;  %s7007_s26 = smov 96   ;;  %s7008_s17 = smov 80  }
  0xa3   : > { %v509_v7 = vld [vmem:[#allocation8 + $0x58] sm:$0xff]  ;;  %v534_v8 = vpack.c.bf16 %v504_v5, %v502_v3  ;;  %v508_v11 = vld [vmem:[#allocation8 + $0x50] sm:$0xff]  ;;  %v513_v13 = vld [vmem:[#allocation8 + $0x88] sm:$0xff]  ;;  %s7009_s12 = smov 64   ;;  %s7010_s9 = smov 48   ;;  %vm1636_vm1 = vcmask 261248  }
  0xa4   : > { %v537_v9 = vpack.c.bf16 %v509_v7, %v507_v6  ;;  %v506_v10 = vld [vmem:[#allocation8 + $0x38] sm:$0xff]  ;;  %v511_v12 = vld [vmem:[#allocation8 + $0x70] sm:$0xff]  ;;  %550 = vmatprep.subr.bf16.mxu1 %v535_v4  ;;  %v510_v16 = vld [vmem:[#allocation8 + $0x68] sm:$0xff]  ;;  %s7011_s25 = smov 32   ;;  %s7012_s16 = smov 16   ;;  %vm2167_vm2 = vcmask 392448  }
  0xa5   : > { %551 = vmatpush1.bf16.msra.mxu1 %v534_v8  ;;  %v536_v14 = vpack.c.bf16 %v508_v11, %v506_v10  ;;  %v539_v15 = vpack.c.bf16 %v513_v13, %v511_v12  ;;  %v512_v17 = vld [vmem:[#allocation8 + $0x80] sm:$0xff]  ;;  %v517_v19 = vld [vmem:[#allocation8 + $0xb8] sm:$0xff]  ;;  %v516_v23 = vld [vmem:[#allocation8 + $0xb0] sm:$0xff]  ;;  %vm2698_vm3 = vcmask 523648   ;;  %vm3229_vm4 = vcmask 654848   ;;  %s10028_s22 = scalar_lea.vmem [#allocation11], %s7280_s15 }
  0xa6   : > { %552 = vmatprep.subr.bf16.mxu1 %v537_v9  ;;  %v515_v18 = vld [vmem:[#allocation8 + $0xa0] sm:$0xff]  ;;  %v538_v20 = vpack.c.bf16 %v512_v17, %v510_v16  ;;  %v514_v22 = vld [vmem:[#allocation8 + $0x98] sm:$0xff]  ;;  %v519_v24 = vld [vmem:[#allocation8 + $0xd0] sm:$0xff]  ;;  %vm3760_vm5 = vcmask 786048   ;;  %vm4291_vm6 = vcmask 917248   ;;  %vm4822_vm7 = vcmask 1048448  }
  0xa7   : > { %v541_v21 = vpack.c.bf16 %v517_v19, %v515_v18  ;;  %v521_v25 = vld [vmem:[#allocation8 + $0xe8] sm:$0xff]  ;;  %v381_v26 = vld [vmem:[#allocation8] sm:$0xff]  ;;  %v382_v27 = vld [vmem:[#allocation8 + $0x18] sm:$0xff]  ;;  %v540_v28 = vpack.c.bf16 %v516_v23, %v514_v22  ;;  %s5242_s8 = sshll.u32 %s6987_s21, 11  ;;  %s5023_s30 = sshll.u32 %s10028_s22, 4  ;;  %s10050_s30 = int_to_ptr.vmem [resolvable:$true] %s5023_s30 }
  0xa8   : > { %v518_v29 = vld [vmem:[#allocation8 + $0xc8] sm:$0xff]  ;;  %v520_v30 = vld [vmem:[#allocation8 + $0xe0] sm:$0xff]  ;;  %v397_v31 = vpack.c.bf16 %v382_v27, %v381_v26  ;;  %v383_v32 = vld [vmem:[#allocation8 + $0x30] sm:$0xff]  ;;  %v543_v33 = vpack.c.bf16 %v521_v25, %v519_v24  ;;  %s10048_s15 = scalar_lea.hbm %s10107_s5, %s5242_s8  ;;  %s5008_s21 = scalar_lea.sflag [#allocation5], %s7277_s13 }
  0xa9   : > { %553 = vmatpush1.bf16.msra.mxu1 %v536_v14  ;;  %v384_v34 = vld [vmem:[#allocation8 + $0x48] sm:$0xff]  ;;  %v385_v35 = vld [vmem:[#allocation8 + $0x60] sm:$0xff]  ;;  %v386_v36 = vld [vmem:[#allocation8 + $0x78] sm:$0xff]  ;;  %v542_v40 = vpack.c.bf16 %v520_v30, %v518_v29  ;;  %s6901_s10 = scalar_lea.vmem %s10050_s30, 2048  ;;  %p10675_p6 = scmp.ne.s32.totalorder %s10212_s6, 0 }
  0xaa   : > { %554 = vmatprep.subr.bf16.mxu1 %v539_v15  ;;  %v523_v37 = vld [vmem:[#allocation8 + $0x100] sm:$0xff]  ;;  %v525_v38 = vld [vmem:[#allocation8 + $0x118] sm:$0xff]  ;;  %5531 = vmatprep.subr.bf16.mxu0 %v397_v31  ;;  %v398_v39 = vpack.c.bf16 %v384_v34, %v383_v32  ;;  %v399_v42 = vpack.c.bf16 %v386_v36, %v385_v35  ;;  %v524_v44 = vld [vmem:[#allocation8 + $0x110] sm:$0xff]  ;;  %p6902_p1 = scmp.ne.s32.totalorder %s10050_s30, %s6901_s10 }
  0xab   : > { %5532 = vmatpush3.bf16.msra.mxu0 %v397_v31  ;;  %v522_v41 = vld [vmem:[#allocation8 + $0xf8] sm:$0xff]  ;;  %v545_v43 = vpack.c.bf16 %v525_v38, %v523_v37  ;;  %v387_v45 = vld [vmem:[#allocation8 + $0x90] sm:$0xff]  ;;  %v388_v46 = vld [vmem:[#allocation8 + $0xa8] sm:$0xff] }
  0xac   : > { %5533 = vmatprep.subr.bf16.mxu0 %v398_v39  ;;  %v527_v47 = vld [vmem:[#allocation8 + $0x130] sm:$0xff]  ;;  %v529_v48 = vld [vmem:[#allocation8 + $0x148] sm:$0xff]  ;;  %v333_v49 = vld [vmem:[%s7284_s7] sm:$0xff]  ;;  %v544_v51 = vpack.c.bf16 %v524_v44, %v522_v41  ;;  %v400_v53 = vpack.c.bf16 %v388_v46, %v387_v45  ;;  %p6903_p10 = pnand %p6902_p1, %p10675_p6 }
  0xad   : > { %555 = vmatpush1.bf16.msra.mxu1 %v538_v20  ;;  %v334_v50 = vld [vmem:[%s7284_s7 + $0x8] sm:$0xff]  ;;  %v547_v55 = vpack.c.bf16 %v529_v48, %v527_v47  ;;  %v528_v56 = vld [vmem:[#allocation8 + $0x140] sm:$0xff]  ;;  %v390_v58 = vld [vmem:[#allocation8 + $0xd8] sm:$0xff] }
  0xae   : > { %556 = vmatprep.subr.bf16.mxu1 %v541_v21  ;;  %v526_v52 = vld [vmem:[#allocation8 + $0x128] sm:$0xff]  ;;  %v349_v54 = vpack.c.bf16 %v334_v50, %v333_v49  ;;  %v389_v57 = vld [vmem:[#allocation8 + $0xc0] sm:$0xff]  ;;  %v533_v60 = vld [vmem:[#allocation8 + $0x178] sm:$0xff]  ;;  %p6904_p3 = pneg %p6903_p10 }
  0xaf   : > { %5534 = vmatpush3.bf16.msra.mxu0 %v398_v39  ;;  %v531_v59 = vld [vmem:[#allocation8 + $0x160] sm:$0xff]  ;;  %v546_v61 = vpack.c.bf16 %v528_v56, %v526_v52  ;;  %v530_v62 = vld [vmem:[#allocation8 + $0x158] sm:$0xff]  ;;  %v401_v63 = vpack.c.bf16 %v390_v58, %v389_v57  ;;  %v532_v2 = vld [vmem:[#allocation8 + $0x170] sm:$0xff] }
  0xb0   : > { %5535 = vmatprep.subr.bf16.mxu0 %v399_v42  ;;  %5547 = vmatprep.mubr.bf16.mxu0 %v349_v54  ;;  %v549_v1 = vpack.c.bf16 %v533_v60, %v531_v59  ;;  %v391_v3 = vld [vmem:[#allocation8 + $0xf0] sm:$0xff]  ;;  %v392_v4 = vld [vmem:[#allocation8 + $0x108] sm:$0xff]  ;;  %v548_v5 = vpack.c.bf16 %v532_v2, %v530_v62  ;;  %v357_v6 = vld [vmem:[%s7292_s3] sm:$0xff] }
  0xb1   : > { %557 = vmatpush1.bf16.msra.mxu1 %v540_v28  ;;  %v358_v7 = vld [vmem:[%s7292_s3 + $0x8] sm:$0xff]  ;;  %v402_v8 = vpack.c.bf16 %v392_v4, %v391_v3  ;;  %v393_v9 = vld [vmem:[#allocation8 + $0x120] sm:$0xff]  ;;  %v394_v10 = vld [vmem:[#allocation8 + $0x138] sm:$0xff] }
  0xb2   : > { %558 = vmatprep.subr.bf16.mxu1 %v543_v33  ;;  %v373_v11 = vpack.c.bf16 %v358_v7, %v357_v6  ;;  %v403_v12 = vpack.c.bf16 %v394_v10, %v393_v9  ;;  %v395_v13 = vld [vmem:[#allocation8 + $0x150] sm:$0xff]  ;;  %v396_v14 = vld [vmem:[#allocation8 + $0x168] sm:$0xff]  ;;  %v360_v16 = vld [vmem:[%s7292_s3 + $0x18] sm:$0xff] }
  0xb3   : > { %5536 = vmatpush3.bf16.msra.mxu0 %v399_v42  ;;  %v359_v15 = vld [vmem:[%s7292_s3 + $0x10] sm:$0xff]  ;;  %v404_v17 = vpack.c.bf16 %v396_v14, %v395_v13  ;;  %v336_v20 = vld [vmem:[%s7284_s7 + $0x18] sm:$0xff]  ;;  %v337_v21 = vld [vmem:[%s7284_s7 + $0x20] sm:$0xff] }
  0xb4   : > { %5537 = vmatprep.subr.bf16.mxu0 %v400_v53  ;;  %v374_v18 = vpack.c.bf16 %v360_v16, %v359_v15  ;;  %v335_v19 = vld [vmem:[%s7284_s7 + $0x10] sm:$0xff]  ;;  %v338_v22 = vld [vmem:[%s7284_s7 + $0x28] sm:$0xff]  ;;  %v361_v25 = vld [vmem:[%s7292_s3 + $0x20] sm:$0xff] }
  0xb5   : > { %559 = vmatpush1.bf16.msra.mxu1 %v542_v40  ;;  %v350_v23 = vpack.c.bf16 %v336_v20, %v335_v19  ;;  %v351_v24 = vpack.c.bf16 %v338_v22, %v337_v21  ;;  %v362_v26 = vld [vmem:[%s7292_s3 + $0x28] sm:$0xff]  ;;  %v339_v28 = vld [vmem:[%s7284_s7 + $0x30] sm:$0xff]  ;;  %v340_v29 = vld [vmem:[%s7284_s7 + $0x38] sm:$0xff] }
  0xb6   : > { %560 = vmatprep.subr.bf16.mxu1 %v545_v43  ;;  %v375_v27 = vpack.c.bf16 %v362_v26, %v361_v25  ;;  %v341_v30 = vld [vmem:[%s7284_s7 + $0x40] sm:$0xff]  ;;  %v342_v31 = vld [vmem:[%s7284_s7 + $0x48] sm:$0xff]  ;;  %v352_v32 = vpack.c.bf16 %v340_v29, %v339_v28  ;;  %v363_v34 = vld [vmem:[%s7292_s3 + $0x30] sm:$0xff] }
  0xb7   : > { %5538 = vmatpush3.bf16.msra.mxu0 %v400_v53  ;;  %v353_v33 = vpack.c.bf16 %v342_v31, %v341_v30  ;;  %v364_v35 = vld [vmem:[%s7292_s3 + $0x38] sm:$0xff]  ;;  %v343_v37 = vld [vmem:[%s7284_s7 + $0x50] sm:$0xff]  ;;  %v345_v39 = vld [vmem:[%s7284_s7 + $0x60] sm:$0xff] }
  0xb8   : > { %5539 = vmatprep.subr.bf16.mxu0 %v401_v63  ;;  %v376_v36 = vpack.c.bf16 %v364_v35, %v363_v34  ;;  %v344_v38 = vld [vmem:[%s7284_s7 + $0x58] sm:$0xff]  ;;  %v346_v40 = vld [vmem:[%s7284_s7 + $0x68] sm:$0xff]  ;;  %v365_v43 = vld [vmem:[%s7292_s3 + $0x40] sm:$0xff] }
  0xb9   : > { %561 = vmatpush1.bf16.msra.mxu1 %v544_v51  ;;  %v354_v41 = vpack.c.bf16 %v344_v38, %v343_v37  ;;  %v355_v42 = vpack.c.bf16 %v346_v40, %v345_v39  ;;  %v366_v44 = vld [vmem:[%s7292_s3 + $0x48] sm:$0xff]  ;;  %v347_v46 = vld [vmem:[%s7284_s7 + $0x70] sm:$0xff]  ;;  %v348_v47 = vld [vmem:[%s7284_s7 + $0x78] sm:$0xff]  ;;  %s7013_s7 = smov [#allocation11]  }
  0xba   : > { %562 = vmatprep.subr.bf16.mxu1 %v547_v55  ;;  %v377_v45 = vpack.c.bf16 %v366_v44, %v365_v43  ;;  %v356_v48 = vpack.c.bf16 %v348_v47, %v347_v46  ;;  %v367_v49 = vld [vmem:[%s7292_s3 + $0x50] sm:$0xff]  ;;  %v368_v50 = vld [vmem:[%s7292_s3 + $0x58] sm:$0xff]  ;;  %v369_v52 = vld [vmem:[%s7292_s3 + $0x60] sm:$0xff]  ;;  %s6905_s28 = sshll.u32 %s7013_s7, 4  ;;  %s6906_s28 = int_to_ptr.vmem [resolvable:$false] %s6905_s28 }
  0xbb   : > { %5540 = vmatpush3.bf16.msra.mxu0 %v401_v63  ;;  %v378_v51 = vpack.c.bf16 %v368_v50, %v367_v49  ;;  %v370_v53 = vld [vmem:[%s7292_s3 + $0x68] sm:$0xff]  ;;  %v371_v55 = vld [vmem:[%s7292_s3 + $0x70] sm:$0xff]  ;;  %v372_v56 = vld [vmem:[%s7292_s3 + $0x78] sm:$0xff]  ;;  %s6907_s14 = scalar_lea.vmem %s6906_s28, 4096  ;;  %p6908_p4 = scmp.lt.s32.totalorder %s10050_s30, %s6906_s28 }
  0xbc   : > { %5541 = vmatprep.subr.bf16.mxu0 %v402_v8  ;;  %v379_v54 = vpack.c.bf16 %v370_v53, %v369_v52  ;;  %v380_v57 = vpack.c.bf16 %v372_v56, %v371_v55  ;;  %p6909_p9 = scmp.lt.s32.totalorder %s6907_s14, %s6901_s10 }
  0xbd   : > { %563 = vmatpush1.bf16.msra.mxu1 %v546_v61 }
  0xbe   : > { %564 = vmatprep.subr.bf16.mxu1 %v549_v1  ;;  %p6910_p5 = por %p6909_p9, %p6908_p4 }
  0xbf   : > { %5542 = vmatpush3.bf16.msra.mxu0 %v402_v8 }
  0xc0   : > { %5543 = vmatprep.subr.bf16.mxu0 %v403_v12  ;;  %p6911_p7 = pnand %p6910_p5, %p6904_p3 }
  0xc1   : > { %565 = vmatpush1.bf16.msra.mxu1 %v548_v5 }
  0xc3   : > { %5544 = vmatpush3.bf16.msra.mxu0 %v403_v12 }
  0xc4   : > { %583 = vmatmul.mubr.bf16.vlgmr.msra.gmra.mrb[0].mxu1 %v373_v11  ;;  %5545 = vmatprep.subr.bf16.mxu0 %v404_v17 }
  0xc5   : > { %592 = vmatprep.mubr.bf16.mxu1 %v7005_v0 }
  0xc7   : > { %5546 = vmatpush3.bf16.msra.mxu0 %v404_v17 }
  0xca   : > { %5548 = vmatmul.mubr.bf16.vlgmr.msra.gmra.mrb[0].mxu0 %v350_v23 }
  0xcb   : > { %5551 = vmatprep.mubr.bf16.mxu0 %v351_v24 }
  0xcc   : > { %593 = vmatmul.mubr.bf16.gmra.mrb[4].mxu1 %v374_v18 }
  0xcd   : > { %602 = vmatprep.mubr.bf16.mxu1 %v7005_v0 }
  0xd2   : > { %5552 = vmatmul.mubr.bf16.gmra.mrb[4].mxu0 %v352_v32 }
  0xd3   : > { %5555 = vmatprep.mubr.bf16.mxu0 %v353_v33 }
  0xd4   : > { %603 = vmatmul.mubr.bf16.gmra.mrb[8].mxu1 %v375_v27 }
  0xd5   : > { %612 = vmatprep.mubr.bf16.mxu1 %v7005_v0 }
  0xda   : > { %5556 = vmatmul.mubr.bf16.gmra.mrb[8].mxu0 %v354_v41 }
  0xdb   : > { %5559 = vmatprep.mubr.bf16.mxu0 %v355_v42 }
  0xdc   : > { %613 = vmatmul.mubr.bf16.gmra.mrb[12].mxu1 %v376_v36 }
  0xdd   : > { %622 = vmatprep.mubr.bf16.mxu1 %v7005_v0 }
  0xe2   : > { %5560 = vmatmul.mubr.bf16.gmra.mrb[12].mxu0 %v356_v48 }
  0xe4   : > { %623 = vmatmul.mubr.bf16.gmra.mrb[16].mxu1 %v377_v45 }
  0xe5   : > { %632 = vmatprep.mubr.bf16.mxu1 %v7005_v0 }
  0xec   : > { %633 = vmatmul.mubr.bf16.gmra.mrb[20].mxu1 %v378_v51 }
  0xed   : > { %642 = vmatprep.mubr.bf16.mxu1 %v7005_v0 }
  0xf4   : > { %643 = vmatmul.mubr.bf16.gmra.mrb[24].mxu1 %v379_v54 }
  0xf5   : > { %652 = vmatprep.mubr.bf16.mxu1 %v7005_v0 }
  0xfc   : > { %653 = vmatmul.mubr.bf16.gmra.mrb[28].mxu1 %v380_v57 }
 0x197   : > { %v584_v58 = vpop.f32.mrb[0].mxu1 }
 0x198   : > { %v586_v59 = vpop.f32.mrb[1].mxu1 }
 0x199   : > { %v588_v60 = vpop.f32.mrb[2].mxu1 }
 0x19a   : > { %v7346_v61 = vpack.c.bf16 %v588_v60, %v584_v58  ;;  %v590_v62 = vpop.f32.mrb[3].mxu1 }
 0x19b   : > { %v7348_v63 = vpack.c.bf16 %v590_v62, %v586_v59 }
 0x19c   : > { %1130 = vrot.lane.b32.xlu0 %v7346_v61, %s7006_s24  ;;  %6107 = vmatprep.subr.msk.bf16.mxu0 %vm687_vm0, %v7346_v61  ;;  %v713_v0 = vsel %vm687_vm0, %v7346_v61, 0 }
 0x19d   : > { %5564 = vmatpush3.bf16.xpose.msra.mxu0 %v713_v0  ;;  %5595 = vmatprep.subr.bf16.mxu1 %v7348_v63  ;;  %v5549_v6 = vpop.f32.mrb[0].mxu0 }
 0x19e   : > { %5596 = vmatpush3.bf16.msra.mxu1 %v7348_v63  ;;  %v439_v8 = vpop.f32.mrb[1].mxu0 }
 0x19f   : > { %v594_v1 = vpop.f32.mrb[4].mxu1  ;;  %v5550_v10 = vpop.f32.mrb[2].mxu0 }
 0x1a0   : > { %v596_v2 = vpop.f32.mrb[5].mxu1  ;;  %v7369_v11 = vpack.c.bf16 %v5550_v10, %v5549_v6  ;;  %v442_v12 = vpop.f32.mrb[3].mxu0 }
 0x1a1   : > { %v598_v3 = vpop.f32.mrb[6].mxu1  ;;  %v7372_v13 = vpack.c.bf16 %v442_v12, %v439_v8 }
 0x1a2   : > { %v7358_v4 = vpack.c.bf16 %v598_v3, %v594_v1  ;;  %v600_v5 = vpop.f32.mrb[7].mxu1 }
 0x1a3   : > { %v7360_v7 = vpack.c.bf16 %v600_v5, %v596_v2  ;;  %5579 = vmatprep.mubr.msk.bf16.mxu0 %vm687_vm0, %v7372_v13 }
 0x1a4   : > { %1132 = vrot.lane.b32.xlu0 %v7358_v4, %s7006_s24  ;;  %6108 = vmatprep.subr.msk.bf16.mxu0 %vm687_vm0, %v7358_v4  ;;  %v716_v9 = vsel %vm687_vm0, %v7358_v4, 0 }
 0x1a5   : > { %5566 = vmatpush3.bf16.xpose.msra.mxu0 %v716_v9  ;;  %5597 = vmatprep.subr.bf16.mxu1 %v7360_v7  ;;  %v5553_v19 = vpop.f32.mrb[4].mxu0 }
 0x1a6   : > { %5598 = vmatpush3.bf16.msra.mxu1 %v7360_v7  ;;  %v455_v21 = vpop.f32.mrb[5].mxu0 }
 0x1a7   : > { %v604_v14 = vpop.f32.mrb[8].mxu1  ;;  %v5554_v23 = vpop.f32.mrb[6].mxu0 }
 0x1a8   : > { %v606_v15 = vpop.f32.mrb[9].mxu1  ;;  %v7387_v24 = vpack.c.bf16 %v5554_v23, %v5553_v19  ;;  %v458_v25 = vpop.f32.mrb[7].mxu0 }
 0x1a9   : > { %v608_v16 = vpop.f32.mrb[10].mxu1  ;;  %v7390_v26 = vpack.c.bf16 %v458_v25, %v455_v21 }
 0x1aa   : > { %v7376_v17 = vpack.c.bf16 %v608_v16, %v604_v14  ;;  %v610_v18 = vpop.f32.mrb[11].mxu1 }
 0x1ab   : > { %v7378_v20 = vpack.c.bf16 %v610_v18, %v606_v15 }
 0x1ac   : > { %1134 = vrot.lane.b32.xlu1 %v7376_v17, %s7006_s24  ;;  %6109 = vmatprep.subr.msk.bf16.mxu0 %vm687_vm0, %v7376_v17  ;;  %v719_v22 = vsel %vm687_vm0, %v7376_v17, 0 }
 0x1ad   : > { %5568 = vmatpush3.bf16.xpose.msra.mxu0 %v719_v22  ;;  %5599 = vmatprep.subr.bf16.mxu1 %v7378_v20  ;;  %v5557_v32 = vpop.f32.mrb[8].mxu0 }
 0x1ae   : > { %5600 = vmatpush3.bf16.msra.mxu1 %v7378_v20  ;;  %v471_v34 = vpop.f32.mrb[9].mxu0 }
 0x1af   : > { %v614_v27 = vpop.f32.mrb[12].mxu1  ;;  %v5558_v36 = vpop.f32.mrb[10].mxu0 }
 0x1b0   : > { %v616_v28 = vpop.f32.mrb[13].mxu1  ;;  %v7403_v37 = vpack.c.bf16 %v5558_v36, %v5557_v32  ;;  %v474_v38 = vpop.f32.mrb[11].mxu0 }
 0x1b1   : > { %v618_v29 = vpop.f32.mrb[14].mxu1  ;;  %v7406_v39 = vpack.c.bf16 %v474_v38, %v471_v34 }
 0x1b2   : > { %v7392_v30 = vpack.c.bf16 %v618_v29, %v614_v27  ;;  %v620_v31 = vpop.f32.mrb[15].mxu1 }
 0x1b3   : > { %v7394_v33 = vpack.c.bf16 %v620_v31, %v616_v28 }
 0x1b4   : > { %10223 = vst [vmem:[#allocation20_spill] sm:$0xff] %v7392_v30  ;;  %1136 = vrot.lane.b32.xlu1 %v7392_v30, %s7006_s24  ;;  %6110 = vmatprep.subr.msk.bf16.mxu0 %vm687_vm0, %v7392_v30  ;;  %v722_v35 = vsel %vm687_vm0, %v7392_v30, 0 }
 0x1b5   : > { %5570 = vmatpush3.bf16.xpose.msra.mxu0 %v722_v35  ;;  %5601 = vmatprep.subr.bf16.mxu1 %v7394_v33  ;;  %v5561_v45 = vpop.f32.mrb[12].mxu0 }
 0x1b6   : > { %5602 = vmatpush3.bf16.msra.mxu1 %v7394_v33  ;;  %v487_v47 = vpop.f32.mrb[13].mxu0 }
 0x1b7   : > { %v624_v40 = vpop.f32.mrb[16].mxu1  ;;  %v5562_v49 = vpop.f32.mrb[14].mxu0 }
 0x1b8   : > { %v626_v41 = vpop.f32.mrb[17].mxu1  ;;  %v7419_v50 = vpack.c.bf16 %v5562_v49, %v5561_v45  ;;  %v490_v51 = vpop.f32.mrb[15].mxu0 }
 0x1b9   : > { %v628_v42 = vpop.f32.mrb[18].mxu1  ;;  %v7422_v52 = vpack.c.bf16 %v490_v51, %v487_v47 }
 0x1ba   : > { %v7408_v43 = vpack.c.bf16 %v628_v42, %v624_v40  ;;  %v630_v44 = vpop.f32.mrb[19].mxu1 }
 0x1bb   : > { %v7410_v46 = vpack.c.bf16 %v630_v44, %v626_v41 }
 0x1bc   : > { %1138 = vrot.lane.b32.xlu0 %v7408_v43, %s7006_s24  ;;  %6111 = vmatprep.subr.msk.bf16.mxu0 %vm687_vm0, %v7408_v43  ;;  %v725_v48 = vsel %vm687_vm0, %v7408_v43, 0 }
 0x1bd   : > { %5572 = vmatpush3.bf16.xpose.msra.mxu0 %v725_v48  ;;  %5603 = vmatprep.subr.bf16.mxu1 %v7410_v46 }
 0x1be   : > { %5604 = vmatpush3.bf16.msra.mxu1 %v7410_v46 }
 0x1bf   : > { %v634_v53 = vpop.f32.mrb[20].mxu1 }
 0x1c0   : > { %v636_v54 = vpop.f32.mrb[21].mxu1 }
 0x1c1   : > { %v638_v55 = vpop.f32.mrb[22].mxu1 }
 0x1c2   : > { %v7424_v56 = vpack.c.bf16 %v638_v55, %v634_v53  ;;  %v640_v57 = vpop.f32.mrb[23].mxu1 }
 0x1c3   : > { %v7426_v58 = vpack.c.bf16 %v640_v57, %v636_v54 }
 0x1c4   : > { %1140 = vrot.lane.b32.xlu1 %v7424_v56, %s7006_s24  ;;  %6112 = vmatprep.subr.msk.bf16.mxu0 %vm687_vm0, %v7424_v56  ;;  %v728_v59 = vsel %vm687_vm0, %v7424_v56, 0 }
 0x1c5   : > { %5574 = vmatpush3.bf16.xpose.msra.mxu0 %v728_v59  ;;  %5605 = vmatprep.subr.bf16.mxu1 %v7426_v58 }
 0x1c6   : > { %5606 = vmatpush3.bf16.msra.mxu1 %v7426_v58 }
 0x1c7   : > { %v644_v60 = vpop.f32.mrb[24].mxu1 }
 0x1c8   : > { %v646_v62 = vpop.f32.mrb[25].mxu1 }
 0x1c9   : > { %v648_v0 = vpop.f32.mrb[26].mxu1 }
 0x1ca   : > { %v7436_v1 = vpack.c.bf16 %v648_v0, %v644_v60  ;;  %v650_v2 = vpop.f32.mrb[27].mxu1 }
 0x1cb   : > { %v7438_v3 = vpack.c.bf16 %v650_v2, %v646_v62 }
 0x1cc   : > { %1142 = vrot.lane.b32.xlu0 %v7436_v1, %s7006_s24  ;;  %6113 = vmatprep.subr.msk.bf16.mxu0 %vm687_vm0, %v7436_v1  ;;  %v731_v5 = vsel %vm687_vm0, %v7436_v1, 0 }
 0x1cd   : > { %5576 = vmatpush3.bf16.xpose.msra.mxu0 %v731_v5  ;;  %5607 = vmatprep.subr.bf16.mxu1 %v7438_v3 }
 0x1ce   : > { %5608 = vmatpush3.bf16.msra.mxu1 %v7438_v3 }
 0x1cf   : > { %v654_v6 = vpop.f32.mrb[28].mxu1 }
 0x1d0   : > { %v656_v8 = vpop.f32.mrb[29].mxu1  ;;  %1106 = vrot.lane.b32.xlu0 %v7372_v13, %s7006_s24 }
 0x1d1   : > { %v658_v9 = vpop.f32.mrb[30].mxu1 }
 0x1d2   : > { %v7450_v10 = vpack.c.bf16 %v658_v9, %v654_v6  ;;  %v660_v12 = vpop.f32.mrb[31].mxu1 }
 0x1d3   : > { %v7452_v14 = vpack.c.bf16 %v660_v12, %v656_v8 }
 0x1d4   : > { %1144 = vrot.lane.b32.xlu1 %v7450_v10, %s7006_s24  ;;  %6114 = vmatprep.subr.msk.bf16.mxu0 %vm687_vm0, %v7450_v10  ;;  %v734_v15 = vsel %vm687_vm0, %v7450_v10, 0 }
 0x1d5   : > { %1110 = vrot.lane.b32.xlu0 %v7390_v26, %s7006_s24  ;;  %5578 = vmatpush3.bf16.xpose.msra.mxu0 %v734_v15 }
 0x1d6   : > { %5609 = vmatprep.subr.bf16.mxu1 %v7452_v14 }
 0x1d7   : > { %5610 = vmatpush3.bf16.msra.mxu1 %v7452_v14 }
 0x1d8   : > { %1108 = vrot.lane.b32.xlu1 %v7369_v11, %s7006_s24 }
 0x1d9   : > { %1114 = vrot.lane.b32.xlu0 %v7406_v39, %s7006_s24 }
 0x1dc   : > { %5580 = vmatmul.mubr.msk.bf16.vlgmr.msra.gmra.mrb[16].mxu0 %vm687_vm0, %v7369_v11  ;;  %1112 = vrot.lane.b32.xlu1 %v7387_v24, %s7006_s24 }
 0x1dd   : > { %1118 = vrot.lane.b32.xlu0 %v7422_v52, %s7006_s24  ;;  %5583 = vmatprep.mubr.msk.bf16.mxu0 %vm687_vm0, %v7390_v26 }
 0x1e0   : > { %1116 = vrot.lane.b32.xlu1 %v7403_v37, %s7006_s24 }
 0x1e1   : > { %1421 = vrot.lane.b32.xlu0 %v7360_v7, %s7006_s24 }
 0x1e4   : > { %5584 = vmatmul.mubr.msk.bf16.gmra.mrb[20].mxu0 %vm687_vm0, %v7387_v24  ;;  %1120 = vrot.lane.b32.xlu1 %v7419_v50, %s7006_s24 }
 0x1e5   : > { %1425 = vrot.lane.b32.xlu0 %v7394_v33, %s7006_s24  ;;  %5587 = vmatprep.mubr.msk.bf16.mxu0 %vm687_vm0, %v7406_v39 }
 0x1e8   : > { %1419 = vrot.lane.b32.xlu1 %v7348_v63, %s7006_s24 }
 0x1e9   : > { %1431 = vrot.lane.b32.xlu0 %v7438_v3, %s7006_s24 }
 0x1ec   : > { %5588 = vmatmul.mubr.msk.bf16.gmra.mrb[24].mxu0 %vm687_vm0, %v7403_v37  ;;  %1423 = vrot.lane.b32.xlu1 %v7378_v20, %s7006_s24 }
 0x1ed   : > { %1669 = vrot.lane.b32.xlu0 %v7346_v61, %s7007_s26  ;;  %5591 = vmatprep.mubr.msk.bf16.mxu0 %vm687_vm0, %v7422_v52 }
 0x1f0   : > { %1427 = vrot.lane.b32.xlu1 %v7410_v46, %s7006_s24 }
 0x1f1   : > { %1671 = vrot.lane.b32.xlu0 %v7358_v4, %s7007_s26 }
 0x1f4   : > { %1429 = vrot.lane.b32.xlu1 %v7426_v58, %s7006_s24  ;;  %5592 = vmatmul.mubr.msk.bf16.gmra.mrb[28].mxu0 %vm687_vm0, %v7419_v50 }
 0x1f5   : > { %1675 = vrot.lane.b32.xlu0 %v7392_v30, %s7007_s26 }
 0x1f8   : > { %1673 = vrot.lane.b32.xlu1 %v7376_v17, %s7007_s26 }
 0x1fc   : > { %1433 = vrot.lane.b32.xlu1 %v7452_v14, %s7006_s24 }
 0x20e   : > { %v1131_v16 = vpop.permute.xlu0 %1130 }
 0x20f   : > { %6115 = vmatprep.subr.msk.bf16.mxu0 %vm687_vm0, %v1131_v16  ;;  %v1171_v18 = vsel %vm687_vm0, %v1131_v16, 0 }
 0x210   : > { %5628 = vmatpush3.bf16.xpose.msra.mxu0 %v1171_v18 }
 0x216   : > { %v1133_v19 = vpop.permute.xlu0 %1132 }
 0x217   : > { %6116 = vmatprep.subr.msk.bf16.mxu0 %vm687_vm0, %v1133_v19  ;;  %v1174_v21 = vsel %vm687_vm0, %v1133_v19, 0 }
 0x218   : > { %5630 = vmatpush3.bf16.xpose.msra.mxu0 %v1174_v21 }
 0x21e   : > { %v1135_v22 = vpop.permute.xlu1 %1134 }
 0x21f   : > { %6117 = vmatprep.subr.msk.bf16.mxu0 %vm687_vm0, %v1135_v22  ;;  %v1177_v23 = vsel %vm687_vm0, %v1135_v22, 0 }
 0x220   : > { %5632 = vmatpush3.bf16.xpose.msra.mxu0 %v1177_v23 }
 0x226   : > { %v1137_v25 = vpop.permute.xlu1 %1136 }
 0x227   : > { %6118 = vmatprep.subr.msk.bf16.mxu0 %vm687_vm0, %v1137_v25  ;;  %v1180_v27 = vsel %vm687_vm0, %v1137_v25, 0 }
 0x228   : > { %5634 = vmatpush3.bf16.xpose.msra.mxu0 %v1180_v27 }
 0x22e   : > { %v1139_v28 = vpop.permute.xlu0 %1138 }
 0x22f   : > { %6119 = vmatprep.subr.msk.bf16.mxu0 %vm687_vm0, %v1139_v28  ;;  %v1183_v29 = vsel %vm687_vm0, %v1139_v28, 0 }
 0x230   : > { %5636 = vmatpush3.bf16.xpose.msra.mxu0 %v1183_v29 }
 0x236   : > { %v1141_v31 = vpop.permute.xlu1 %1140 }
 0x237   : > { %6120 = vmatprep.subr.msk.bf16.mxu0 %vm687_vm0, %v1141_v31  ;;  %v1186_v32 = vsel %vm687_vm0, %v1141_v31, 0 }
 0x238   : > { %5638 = vmatpush3.bf16.xpose.msra.mxu0 %v1186_v32 }
 0x23e   : > { %v1143_v34 = vpop.permute.xlu0 %1142 }
 0x23f   : > { %6121 = vmatprep.subr.msk.bf16.mxu0 %vm687_vm0, %v1143_v34  ;;  %v1189_v35 = vsel %vm687_vm0, %v1143_v34, 0 }
 0x240   : > { %5640 = vmatpush3.bf16.xpose.msra.mxu0 %v1189_v35 }
 0x242   : > { %v1107_v36 = vpop.permute.xlu0 %1106 }
 0x243   : > { %5643 = vmatprep.mubr.msk.bf16.mxu0 %vm687_vm0, %v1107_v36 }
 0x246   : > { %v1145_v38 = vpop.permute.xlu1 %1144 }
 0x247   : > { %6122 = vmatprep.subr.msk.bf16.mxu0 %vm687_vm0, %v1145_v38  ;;  %v1192_v40 = vsel %vm687_vm0, %v1145_v38, 0  ;;  %v1111_v44 = vpop.permute.xlu0 %1110 }
 0x248   : > { %5642 = vmatpush3.bf16.xpose.msra.mxu0 %v1192_v40 }
 0x24a   : > { %v1109_v41 = vpop.permute.xlu1 %1108 }
 0x24b   : > { %v1115_v48 = vpop.permute.xlu0 %1114 }
 0x24e   : > { %v1113_v42 = vpop.permute.xlu1 %1112 }
 0x24f   : > { %5644 = vmatmul.mubr.msk.bf16.vlgmr.msra.gmra.mrb[32].mxu0 %vm687_vm0, %v1109_v41  ;;  %v1119_v51 = vpop.permute.xlu0 %1118 }
 0x250   : > { %5647 = vmatprep.mubr.msk.bf16.mxu0 %vm687_vm0, %v1111_v44 }
 0x252   : > { %v1117_v45 = vpop.permute.xlu1 %1116 }
 0x253   : > { %v7589_v18 = vpop.permute.xlu0 %1421 }
 0x256   : > { %v1121_v47 = vpop.permute.xlu1 %1120 }
 0x257   : > { %5648 = vmatmul.mubr.msk.bf16.gmra.mrb[36].mxu0 %vm687_vm0, %v1113_v42  ;;  %v7591_v19 = vpop.permute.xlu0 %1425 }
 0x258   : > { %5651 = vmatprep.mubr.msk.bf16.mxu0 %vm687_vm0, %v1115_v48 }
 0x25a   : > { %v7535_v49 = vpop.permute.xlu1 %1419 }
 0x25b   : > { %5659 = vmatprep.subr.bf16.mxu1 %v7535_v49  ;;  %v7605_v28 = vpop.permute.xlu0 %1431 }
 0x25e   : > { %v7598_v23 = vpop.permute.xlu1 %1423 }
 0x25f   : > { %5652 = vmatmul.mubr.msk.bf16.gmra.mrb[40].mxu0 %vm687_vm0, %v1117_v45  ;;  %v7618_v35 = vpop.permute.xlu0 %1669 }
 0x260   : > { %5655 = vmatprep.mubr.msk.bf16.mxu0 %vm687_vm0, %v1119_v51 }
 0x262   : > { %v7609_v29 = vpop.permute.xlu1 %1427 }
 0x263   : > { %v7628_v41 = vpop.permute.xlu0 %1671 }
 0x264   : > { %10233 = vst [vmem:[#allocation30_spill] sm:$0xff] %v7628_v41 }
 0x266   : > { %v7624_v38 = vpop.permute.xlu1 %1429 }
 0x267   : > { %5656 = vmatmul.mubr.msk.bf16.gmra.mrb[44].mxu0 %vm687_vm0, %v1121_v47  ;;  %v7641_v48 = vpop.permute.xlu0 %1675 }
 0x268   : > { %10238 = vst [vmem:[#allocation35_spill] sm:$0xff] %v7641_v48 }
 0x26a   : > { %v7638_v47 = vpop.permute.xlu1 %1673 }
 0x26b   : > { %10237 = vst [vmem:[#allocation34_spill] sm:$0xff] %v7638_v47 }
 0x2af   : > { %v7541_v53 = vpop.f32.mrb[16].mxu0 }
 0x2b0   : > { %v7543_v54 = vpop.f32.mrb[17].mxu0  ;;  %837 = vmax.xlane.f32.xlu0 %v7541_v53 }
 0x2b1   : > { %v7546_v55 = vpop.f32.mrb[18].mxu0 }
 0x2b2   : > { %v7548_v57 = vpop.f32.mrb[19].mxu0 }
 0x2b3   : > { %835 = vmax.xlane.f32.xlu1 %v7548_v57 }
 0x2b4   : > { %833 = vmax.xlane.f32.xlu0 %v7543_v54 }
 0x2b7   : > { %v7552_v59 = vpop.f32.mrb[20].mxu0 }
 0x2b8   : > { %845 = vmax.xlane.f32.xlu1 %v7552_v59  ;;  %v7555_v60 = vpop.f32.mrb[21].mxu0  ;;  %839 = vmax.xlane.f32.xlu0 %v7546_v55 }
 0x2b9   : > { %v7558_v62 = vpop.f32.mrb[22].mxu0 }
 0x2ba   : > { %v7560_v0 = vpop.f32.mrb[23].mxu0 }
 0x2bc   : > { %841 = vmax.xlane.f32.xlu1 %v7555_v60  ;;  %847 = vmax.xlane.f32.xlu0 %v7558_v62 }
 0x2bf   : > { %v7564_v2 = vpop.f32.mrb[24].mxu0 }
 0x2c0   : > { %853 = vmax.xlane.f32.xlu1 %v7564_v2  ;;  %v7567_v5 = vpop.f32.mrb[25].mxu0  ;;  %843 = vmax.xlane.f32.xlu0 %v7560_v0 }
 0x2c1   : > { %v7570_v6 = vpop.f32.mrb[26].mxu0 }
 0x2c2   : > { %v7572_v8 = vpop.f32.mrb[27].mxu0 }
 0x2c4   : > { %849 = vmax.xlane.f32.xlu1 %v7567_v5  ;;  %855 = vmax.xlane.f32.xlu0 %v7570_v6 }
 0x2c7   : > { %v7576_v9 = vpop.f32.mrb[28].mxu0 }
 0x2c8   : > { %851 = vmax.xlane.f32.xlu0 %v7572_v8  ;;  %861 = vmax.xlane.f32.xlu1 %v7576_v9  ;;  %v7580_v12 = vpop.f32.mrb[29].mxu0 }
 0x2c9   : > { %v7582_v15 = vpop.f32.mrb[30].mxu0 }
 0x2ca   : > { %v7584_v16 = vpop.f32.mrb[31].mxu0 }
 0x2cc   : > { %857 = vmax.xlane.f32.xlu1 %v7580_v12  ;;  %863 = vmax.xlane.f32.xlu0 %v7582_v15 }
 0x2d0   : > { %859 = vmax.xlane.f32.xlu0 %v7584_v16 }
 0x322   : > { %v7593_v21 = vpop.f32.mrb[32].mxu0 }
 0x323   : > { %10224 = vst [vmem:[#allocation21_spill] sm:$0xff] %v7593_v21  ;;  %1295 = vmax.xlane.f32.xlu1 %v7593_v21  ;;  %v7596_v22 = vpop.f32.mrb[33].mxu0 }
 0x324   : > { %10225 = vst [vmem:[#allocation22_spill] sm:$0xff] %v7596_v22  ;;  %v7600_v25 = vpop.f32.mrb[34].mxu0 }
 0x325   : > { %10226 = vst [vmem:[#allocation23_spill] sm:$0xff] %v7600_v25  ;;  %1297 = vmax.xlane.f32.xlu0 %v7600_v25  ;;  %v7603_v27 = vpop.f32.mrb[35].mxu0 }
 0x326   : > { %10227 = vst [vmem:[#allocation24_spill] sm:$0xff] %v7603_v27 }
 0x327   : > { %1291 = vmax.xlane.f32.xlu1 %v7596_v22 }
 0x329   : > { %1293 = vmax.xlane.f32.xlu0 %v7603_v27 }
 0x32a   : > { %v7611_v31 = vpop.f32.mrb[36].mxu0 }
 0x32b   : > { %10228 = vst [vmem:[#allocation25_spill] sm:$0xff] %v7611_v31  ;;  %1303 = vmax.xlane.f32.xlu1 %v7611_v31  ;;  %v7614_v32 = vpop.f32.mrb[37].mxu0 }
 0x32c   : > { %10229 = vst [vmem:[#allocation26_spill] sm:$0xff] %v7614_v32  ;;  %v7616_v34 = vpop.f32.mrb[38].mxu0 }
 0x32d   : > { %10230 = vst [vmem:[#allocation27_spill] sm:$0xff] %v7616_v34  ;;  %v7620_v36 = vpop.f32.mrb[39].mxu0 }
 0x32e   : > { %10231 = vst [vmem:[#allocation28_spill] sm:$0xff] %v7620_v36  ;;  %1301 = vmax.xlane.f32.xlu0 %v7620_v36 }
 0x32f   : > { %1299 = vmax.xlane.f32.xlu1 %v7614_v32 }
 0x332   : > { %v7626_v40 = vpop.f32.mrb[40].mxu0 }
 0x333   : > { %10232 = vst [vmem:[#allocation29_spill] sm:$0xff] %v7626_v40  ;;  %1305 = vmax.xlane.f32.xlu1 %v7616_v34  ;;  %1311 = vmax.xlane.f32.xlu0 %v7626_v40  ;;  %v7632_v42 = vpop.f32.mrb[41].mxu0  ;;  %v7648_v34 = vpop.permute.xlu1 %1433 }
 0x334   : > { %10234 = vst [vmem:[#allocation31_spill] sm:$0xff] %v7632_v42  ;;  %v7634_v44 = vpop.f32.mrb[42].mxu0 }
 0x335   : > { %10235 = vst [vmem:[#allocation32_spill] sm:$0xff] %v7634_v44  ;;  %v7636_v45 = vpop.f32.mrb[43].mxu0 }
 0x336   : > { %10236 = vst [vmem:[#allocation33_spill] sm:$0xff] %v7636_v45 }
 0x337   : > { %1307 = vmax.xlane.f32.xlu1 %v7632_v42 }
 0x33a   : > { %v7643_v51 = vpop.f32.mrb[44].mxu0 }
 0x33b   : > { %1313 = vmax.xlane.f32.xlu1 %v7634_v44  ;;  %v7646_v41 = vpop.f32.mrb[45].mxu0 }
 0x33c   : > { %10239 = vst [vmem:[#allocation36_spill] sm:$0xff] %v7646_v41  ;;  %1315 = vmax.xlane.f32.xlu0 %v7646_v41  ;;  %v7651_v40 = vpop.f32.mrb[46].mxu0 }
 0x33d   : > { %v838_v32 = vpop.xlane.xlu0 %837  ;;  %v7653_v36 = vpop.f32.mrb[47].mxu0 }
 0x33e   : > { %v867_v31 = vsub.f32 %v7541_v53, %v838_v32 }
 0x33f   : > { %1309 = vmax.xlane.f32.xlu1 %v7636_v45 }
 0x340   : > { %v836_v47 = vpop.xlane.xlu1 %835  ;;  %v885_v30 = vmul.f32 1.442695, %v867_v31 }
 0x341   : > { %v866_v48 = vsub.f32 %v7548_v57, %v836_v47  ;;  %v834_v42 = vpop.xlane.xlu0 %833 }
 0x342   : > { %v865_v44 = vsub.f32 %v7543_v54, %v834_v42 }
 0x343   : > { %v883_v27 = vmul.f32 1.442695, %v866_v48  ;;  %1319 = vmax.xlane.f32.xlu1 %v7643_v51 }
 0x344   : > { %v881_v22 = vmul.f32 1.442695, %v865_v44 }
 0x345   : > { %6273 = vpow2.f32 %v883_v27  ;;  %v846_v41 = vpop.xlane.xlu1 %845  ;;  %v840_v21 = vpop.xlane.xlu0 %839 }
 0x346   : > { %6275 = vpow2.f32 %v881_v22  ;;  %v868_v25 = vsub.f32 %v7546_v55, %v840_v21  ;;  %v871_v32 = vsub.f32 %v7552_v59, %v846_v41 }
 0x347   : > { %1321 = vmax.xlane.f32.xlu1 %v7651_v40  ;;  %6277 = vpow2.f32 %v885_v30 }
 0x348   : > { %v887_v45 = vmul.f32 1.442695, %v868_v25  ;;  %v893_v48 = vmul.f32 1.442695, %v871_v32 }
 0x349   : > { %v842_v57 = vpop.xlane.xlu1 %841  ;;  %v848_v47 = vpop.xlane.xlu0 %847 }
 0x34a   : > { %v869_v53 = vsub.f32 %v7555_v60, %v842_v57  ;;  %v872_v54 = vsub.f32 %v7558_v62, %v848_v47  ;;  %6279 = vpow2.f32 %v887_v45 }
 0x34c   : > { %v889_v27 = vmul.f32 1.442695, %v869_v53  ;;  %v895_v31 = vmul.f32 1.442695, %v872_v54 }
 0x34d   : > { %v854_v42 = vpop.xlane.xlu1 %853  ;;  %v844_v44 = vpop.xlane.xlu0 %843 }
 0x34e   : > { %v870_v22 = vsub.f32 %v7560_v0, %v844_v44  ;;  %6281 = vpow2.f32 %v889_v27  ;;  %v875_v57 = vsub.f32 %v7564_v2, %v854_v42 }
 0x34f   : > { %v7666_v55 = vpop.eup %6273  ;;  %6283 = vpow2.f32 %v895_v31 }
 0x350   : > { %10240 = vst [vmem:[#allocation37_spill] sm:$0xff] %v7666_v55  ;;  %v7668_v21 = vpop.eup %6275  ;;  %v891_v25 = vmul.f32 1.442695, %v870_v22 }
 0x351   : > { %10241 = vst [vmem:[#allocation38_spill] sm:$0xff] %v7668_v21  ;;  %v850_v30 = vpop.xlane.xlu1 %849  ;;  %v856_v60 = vpop.xlane.xlu0 %855  ;;  %v945_v62 = vpack.c.bf16 %v7666_v55, %v7668_v21 }
 0x352   : > { %v873_v59 = vsub.f32 %v7567_v5, %v850_v30  ;;  %1679 = vrot.lane.b32.xlu0 %v7424_v56, %s7007_s26  ;;  %6285 = vpow2.f32 %v891_v25  ;;  %v876_v0 = vsub.f32 %v7570_v6, %v856_v60  ;;  %v7676_v41 = vpop.eup %6277  ;;  %v901_v6 = vmul.f32 1.442695, %v875_v57 }
 0x353   : > { %5611 = vmatprep.mubr.bf16.mxu1 %v945_v62  ;;  %10242 = vst [vmem:[#allocation39_spill] sm:$0xff] %v7676_v41  ;;  %6287 = vpow2.f32 %v893_v48 }
 0x354   : > { %v7678_v45 = vpop.eup %6279  ;;  %v897_v47 = vmul.f32 1.442695, %v873_v59  ;;  %v903_v27 = vmul.f32 1.442695, %v876_v0 }
 0x355   : > { %10243 = vst [vmem:[#allocation40_spill] sm:$0xff] %v7678_v45  ;;  %v852_v53 = vpop.xlane.xlu0 %851  ;;  %v862_v54 = vpop.xlane.xlu1 %861  ;;  %v946_v5 = vpack.c.bf16 %v7678_v45, %v7676_v41 }
 0x356   : > { %v874_v32 = vsub.f32 %v7572_v8, %v852_v53  ;;  %6289 = vpow2.f32 %v897_v47 }
 0x357   : > { %5612 = vmatmul.mubr.bf16.vlgmr.msra.gmra.mrb[32].mxu1 %v946_v5 }
 0x358   : > { %v899_v44 = vmul.f32 1.442695, %v874_v32  ;;  %1677 = vrot.lane.b32.xlu1 %v7408_v43, %s7007_s26  ;;  %5660 = vmatpush3.bf16.msra.mxu1 %v7535_v49  ;;  %v7689_v42 = vpop.eup %6281  ;;  %v879_v49 = vsub.f32 %v7576_v9, %v862_v54 }
 0x359   : > { %v858_v31 = vpop.xlane.xlu1 %857  ;;  %v864_v2 = vpop.xlane.xlu0 %863  ;;  %5661 = vmatprep.subr.bf16.mxu1 %v7589_v18  ;;  %10244 = vst [vmem:[#allocation41_spill] sm:$0xff] %v7689_v42 }
 0x35a   : > { %6291 = vpow2.f32 %v899_v44  ;;  %v877_v8 = vsub.f32 %v7580_v12, %v858_v31  ;;  %v880_v22 = vsub.f32 %v7582_v15, %v864_v2  ;;  %v7692_v25 = vpop.eup %6283  ;;  %v909_v9 = vmul.f32 1.442695, %v879_v49  ;;  %v10257_v31 = vld [vmem:[#allocation20_spill] sm:$0xff]  ;;  %v10258_v2 = vld [vmem:[#allocation21_spill] sm:$0xff] }
 0x35b   : > { %6293 = vpow2.f32 %v903_v27  ;;  %10245 = vst [vmem:[#allocation42_spill] sm:$0xff] %v7692_v25 }
 0x35c   : > { %1655 = vrot.lane.b32.xlu1 %v7369_v11, %s7007_s26  ;;  %v7696_v48 = vpop.eup %6285  ;;  %6295 = vpow2.f32 %v901_v6  ;;  %v905_v30 = vmul.f32 1.442695, %v877_v8  ;;  %5662 = vmatpush3.bf16.msra.mxu1 %v7589_v18  ;;  %v911_v59 = vmul.f32 1.442695, %v880_v22 }
 0x35d   : > { %10246 = vst [vmem:[#allocation43_spill] sm:$0xff] %v7696_v48  ;;  %v860_v60 = vpop.xlane.xlu0 %859  ;;  %5663 = vmatprep.subr.bf16.mxu1 %v7598_v23  ;;  %v947_v15 = vpack.c.bf16 %v7696_v48, %v7689_v42  ;;  %v7704_v62 = vpop.eup %6287 }
 0x35e   : > { %v878_v12 = vsub.f32 %v7584_v16, %v860_v60  ;;  %10247 = vst [vmem:[#allocation44_spill] sm:$0xff] %v7704_v62  ;;  %v948_v57 = vpack.c.bf16 %v7692_v25, %v7704_v62  ;;  %6297 = vpow2.f32 %v905_v30  ;;  %v10259_v30 = vld [vmem:[#allocation22_spill] sm:$0xff] }
 0x35f   : > { %5615 = vmatprep.mubr.bf16.mxu1 %v947_v15 }
 0x360   : > { %v907_v0 = vmul.f32 1.442695, %v878_v12  ;;  %1659 = vrot.lane.b32.xlu1 %v7387_v24, %s7007_s26  ;;  %5664 = vmatpush3.bf16.msra.mxu1 %v7598_v23  ;;  %v7712_v16 = vpop.eup %6289 }
 0x361   : > { %5616 = vmatmul.mubr.bf16.gmra.mrb[36].mxu1 %v948_v57  ;;  %5665 = vmatprep.subr.bf16.mxu1 %v7591_v19  ;;  %10248 = vst [vmem:[#allocation45_spill] sm:$0xff] %v7712_v16 }
 0x362   : > { %6299 = vpow2.f32 %v907_v0 }
 0x363   : > { %6301 = vpow2.f32 %v911_v59  ;;  %v10260_v59 = vld [vmem:[#allocation24_spill] sm:$0xff] }
 0x364   : > { %v7714_v18 = vpop.eup %6291  ;;  %1663 = vrot.lane.b32.xlu1 %v7403_v37, %s7007_s26  ;;  %6303 = vpow2.f32 %v909_v9  ;;  %5666 = vmatpush3.bf16.msra.mxu1 %v7591_v19 }
 0x365   : > { %10249 = vst [vmem:[#allocation46_spill] sm:$0xff] %v7714_v18  ;;  %v7718_v47 = vpop.eup %6293  ;;  %v949_v23 = vpack.c.bf16 %v7714_v18, %v7712_v16  ;;  %5667 = vmatprep.subr.bf16.mxu1 %v7609_v29 }
 0x366   : > { %10250 = vst [vmem:[#allocation47_spill] sm:$0xff] %v7718_v47  ;;  %v7724_v53 = vpop.eup %6295 }
 0x367   : > { %10251 = vst [vmem:[#allocation48_spill] sm:$0xff] %v7724_v53  ;;  %5619 = vmatprep.mubr.bf16.mxu1 %v949_v23  ;;  %v950_v54 = vpack.c.bf16 %v7718_v47, %v7724_v53  ;;  %v10282_v47 = vld [vmem:[#allocation36_spill] sm:$0xff] }
 0x368   : > { %1667 = vrot.lane.b32.xlu1 %v7419_v50, %s7007_s26  ;;  %5668 = vmatpush3.bf16.msra.mxu1 %v7609_v29  ;;  %v7732_v19 = vpop.eup %6297 }
 0x369   : > { %5620 = vmatmul.mubr.bf16.gmra.mrb[40].mxu1 %v950_v54  ;;  %5669 = vmatprep.subr.bf16.mxu1 %v7624_v38  ;;  %10252 = vst [vmem:[#allocation49_spill] sm:$0xff] %v7732_v19 }
 0x36c   : > { %v7734_v32 = vpop.eup %6299  ;;  %1952 = vrot.lane.b32.xlu1 %v7360_v7, %s7007_s26  ;;  %5670 = vmatpush3.bf16.msra.mxu1 %v7624_v38  ;;  %v10256_v38 = vld [vmem:[#allocation23_spill] sm:$0xff] }
 0x36d   : > { %10253 = vst [vmem:[#allocation50_spill] sm:$0xff] %v7734_v32  ;;  %v7738_v5 = vpop.eup %6301  ;;  %v951_v27 = vpack.c.bf16 %v7734_v32, %v7732_v19  ;;  %5671 = vmatprep.subr.bf16.mxu1 %v7605_v28 }
 0x36e   : > { %10254 = vst [vmem:[#allocation51_spill] sm:$0xff] %v7738_v5  ;;  %v7744_v29 = vpop.eup %6303 }
 0x36f   : > { %10255 = vst [vmem:[#allocation52_spill] sm:$0xff] %v7744_v29  ;;  %5623 = vmatprep.mubr.bf16.mxu1 %v951_v27  ;;  %v952_v44 = vpack.c.bf16 %v7738_v5, %v7744_v29  ;;  %v10261_v27 = vld [vmem:[#allocation25_spill] sm:$0xff] }
 0x370   : > { %1954 = vrot.lane.b32.xlu1 %v7378_v20, %s7007_s26  ;;  %5672 = vmatpush3.bf16.msra.mxu1 %v7605_v28 }
 0x371   : > { %1317 = vmax.xlane.f32.xlu0 %v7653_v36  ;;  %5624 = vmatmul.mubr.bf16.gmra.mrb[44].mxu1 %v952_v44 }
 0x372   : > { %5673 = vmatprep.subr.bf16.mxu1 %v7648_v34 }
 0x374   : > { %1958 = vrot.lane.b32.xlu1 %v7410_v46, %s7007_s26  ;;  %5674 = vmatpush3.bf16.msra.mxu1 %v7648_v34 }
 0x375   : > { %6123 = vmatprep.subr.msk.bf16.mxu1 %vm687_vm0, %v7618_v35 }
 0x378   : > { %1960 = vrot.lane.b32.xlu1 %v7426_v58, %s7007_s26 }
 0x37c   : > { %1964 = vrot.lane.b32.xlu1 %v7452_v14, %s7007_s26 }
 0x380   : > { %2204 = vrot.lane.b32.xlu1 %v7376_v17, %s7008_s17 }
 0x387   : > { %1681 = vrot.lane.b32.xlu0 %v7436_v1, %s7007_s26 }
 0x38b   : > { %1683 = vrot.lane.b32.xlu0 %v7450_v10, %s7007_s26 }
 0x38f   : > { %1653 = vrot.lane.b32.xlu0 %v7372_v13, %s7007_s26 }
 0x393   : > { %1657 = vrot.lane.b32.xlu0 %v7390_v26, %s7007_s26 }
 0x397   : > { %1661 = vrot.lane.b32.xlu0 %v7406_v39, %s7007_s26 }
 0x39b   : > { %1665 = vrot.lane.b32.xlu0 %v7422_v52, %s7007_s26 }
 0x39f   : > { %1950 = vrot.lane.b32.xlu0 %v7348_v63, %s7007_s26 }
 0x3a3   : > { %1956 = vrot.lane.b32.xlu0 %v7394_v33, %s7007_s26 }
 0x3a7   : > { %1962 = vrot.lane.b32.xlu0 %v7438_v3, %s7007_s26 }
 0x3ab   : > { %2200 = vrot.lane.b32.xlu0 %v7346_v61, %s7008_s17 }
 0x3af   : > { %2202 = vrot.lane.b32.xlu0 %v7358_v4, %s7008_s17 }
 0x3b0   : > { %v1296_v28 = vpop.xlane.xlu1 %1295 }
 0x3b1   : > { %v1325_v8 = vsub.f32 %v10258_v2, %v1296_v28 }
 0x3b2   : > { %v1298_v34 = vpop.xlane.xlu0 %1297 }
 0x3b3   : > { %v1326_v6 = vsub.f32 %v10256_v38, %v1298_v34  ;;  %2206 = vrot.lane.b32.xlu0 %v10257_v31, %s7008_s17  ;;  %v1343_v57 = vmul.f32 1.442695, %v1325_v8  ;;  %v10262_v34 = vld [vmem:[#allocation28_spill] sm:$0xff]  ;;  %v10264_v8 = vld [vmem:[#allocation27_spill] sm:$0xff] }
 0x3b4   : > { %v1292_v22 = vpop.xlane.xlu1 %1291 }
 0x3b5   : > { %v1345_v49 = vmul.f32 1.442695, %v1326_v6  ;;  %v1323_v60 = vsub.f32 %v10259_v30, %v1292_v22  ;;  %v10263_v6 = vld [vmem:[#allocation26_spill] sm:$0xff] }
 0x3b6   : > { %v1294_v12 = vpop.xlane.xlu0 %1293 }
 0x3b7   : > { %v1339_v15 = vmul.f32 1.442695, %v1323_v60  ;;  %v1324_v0 = vsub.f32 %v10260_v59, %v1294_v12  ;;  %6305 = vpow2.f32 %v1345_v49 }
 0x3b8   : > { %v1304_v9 = vpop.xlane.xlu1 %1303 }
 0x3b9   : > { %v1341_v23 = vmul.f32 1.442695, %v1324_v0  ;;  %6307 = vpow2.f32 %v1339_v15  ;;  %v1329_v44 = vsub.f32 %v10261_v27, %v1304_v9 }
 0x3bb   : > { %6309 = vpow2.f32 %v1341_v23  ;;  %v1302_v54 = vpop.xlane.xlu0 %1301  ;;  %v1351_v60 = vmul.f32 1.442695, %v1329_v44  ;;  %v10267_v44 = vld [vmem:[#allocation31_spill] sm:$0xff] }
 0x3bc   : > { %6311 = vpow2.f32 %v1343_v57  ;;  %v1328_v28 = vsub.f32 %v10262_v34, %v1302_v54  ;;  %v1300_v38 = vpop.xlane.xlu1 %1299 }
 0x3bd   : > { %v1327_v2 = vsub.f32 %v10263_v6, %v1300_v38  ;;  %v10268_v6 = vld [vmem:[#allocation32_spill] sm:$0xff] }
 0x3be   : > { %v1349_v22 = vmul.f32 1.442695, %v1328_v28 }
 0x3bf   : > { %v1347_v30 = vmul.f32 1.442695, %v1327_v2 }
 0x3c0   : > { %6313 = vpow2.f32 %v1349_v22  ;;  %v1306_v12 = vpop.xlane.xlu1 %1305  ;;  %v1312_v27 = vpop.xlane.xlu0 %1311  ;;  %v1710_v22 = vsel %vm687_vm0, %v7618_v35, 0 }
 0x3c1   : > { %6315 = vpow2.f32 %v1347_v30  ;;  %v1330_v49 = vsub.f32 %v10264_v8, %v1306_v12  ;;  %v7796_v59 = vpop.eup %6305 }
 0x3c2   : > { %10265 = vst [vmem:[#allocation23_spill] sm:$0xff] %v7796_v59  ;;  %6317 = vpow2.f32 %v1351_v60  ;;  %v10270_v60 = vld [vmem:[#allocation29_spill] sm:$0xff] }
 0x3c3   : > { %v1353_v15 = vmul.f32 1.442695, %v1330_v49  ;;  %v7798_v0 = vpop.eup %6307  ;;  %v1333_v12 = vsub.f32 %v10270_v60, %v1312_v27 }
 0x3c4   : > { %v1308_v57 = vpop.xlane.xlu1 %1307 }
 0x3c5   : > { %v7800_v9 = vpop.eup %6309  ;;  %6319 = vpow2.f32 %v1353_v15  ;;  %v1331_v34 = vsub.f32 %v10267_v44, %v1308_v57  ;;  %v10272_v15 = vld [vmem:[#allocation30_spill] sm:$0xff]  ;;  %v1359_v35 = vmul.f32 1.442695, %v1333_v12 }
 0x3c6   : > { %v7802_v23 = vpop.eup %6311  ;;  %v1403_v54 = vpack.c.bf16 %v7800_v9, %v7798_v0 }
 0x3c7   : > { %10266 = vst [vmem:[#allocation20_spill] sm:$0xff] %v7802_v23  ;;  %v1404_v28 = vpack.c.bf16 %v7796_v59, %v7802_v23  ;;  %v1355_v49 = vmul.f32 1.442695, %v1331_v34 }
 0x3c8   : > { %5675 = vmatprep.mubr.bf16.mxu1 %v1403_v54  ;;  %v1314_v38 = vpop.xlane.xlu1 %1313 }
 0x3c9   : > { %v1334_v2 = vsub.f32 %v10268_v6, %v1314_v38  ;;  %5676 = vmatmul.mubr.bf16.vlgmr.msra.gmra.mrb[48].mxu1 %v1404_v28  ;;  %v10273_v28 = vld [vmem:[#allocation33_spill] sm:$0xff]  ;;  %6321 = vpow2.f32 %v1355_v49 }
 0x3ca   : > { %v7812_v30 = vpop.eup %6313  ;;  %5692 = vmatpush3.bf16.xpose.msra.mxu1 %v1710_v22  ;;  %v10276_v22 = vld [vmem:[#allocation34_spill] sm:$0xff] }
 0x3cb   : > { %10269 = vst [vmem:[#allocation21_spill] sm:$0xff] %v7812_v30  ;;  %v7815_v8 = vpop.eup %6315  ;;  %6124 = vmatprep.subr.msk.bf16.mxu1 %vm687_vm0, %v10272_v15  ;;  %v1361_v57 = vmul.f32 1.442695, %v1334_v2  ;;  %v1713_v2 = vsel %vm687_vm0, %v10272_v15, 0  ;;  %v1716_v49 = vsel %vm687_vm0, %v10276_v22, 0 }
 0x3cc   : > { %10271 = vst [vmem:[#allocation22_spill] sm:$0xff] %v7815_v8  ;;  %v1310_v54 = vpop.xlane.xlu1 %1309  ;;  %v1405_v44 = vpack.c.bf16 %v7812_v30, %v7815_v8  ;;  %v7822_v6 = vpop.eup %6317 }
 0x3cd   : > { %v1332_v38 = vsub.f32 %v10273_v28, %v1310_v54  ;;  %10274 = vst [vmem:[#allocation24_spill] sm:$0xff] %v7822_v6  ;;  %6323 = vpow2.f32 %v1361_v57 }
 0x3ce   : > { %5679 = vmatprep.mubr.bf16.mxu1 %v1405_v44  ;;  %v10280_v44 = vld [vmem:[#allocation35_spill] sm:$0xff] }
 0x3cf   : > { %v7824_v5 = vpop.eup %6319  ;;  %v1357_v27 = vmul.f32 1.442695, %v1332_v38 }
 0x3d0   : > { %10275 = vst [vmem:[#allocation25_spill] sm:$0xff] %v7824_v5  ;;  %v1406_v34 = vpack.c.bf16 %v7824_v5, %v7822_v6  ;;  %v1320_v60 = vpop.xlane.xlu1 %1319 }
 0x3d1   : > { %6325 = vpow2.f32 %v1357_v27  ;;  %v1719_v27 = vsel %vm687_vm0, %v10280_v44, 0 }
 0x3d2   : > { %6327 = vpow2.f32 %v1359_v35  ;;  %5694 = vmatpush3.bf16.xpose.msra.mxu1 %v1713_v2  ;;  %v1316_v2 = vpop.xlane.xlu0 %1315 }
 0x3d3   : > { %5680 = vmatmul.mubr.bf16.gmra.mrb[52].mxu1 %v1406_v34  ;;  %6125 = vmatprep.subr.msk.bf16.mxu1 %vm687_vm0, %v10276_v22  ;;  %v7832_v12 = vpop.eup %6321 }
 0x3d4   : > { %10277 = vst [vmem:[#allocation28_spill] sm:$0xff] %v7832_v12  ;;  %v1322_v28 = vpop.xlane.xlu1 %1321 }
 0x3d7   : > { %v7836_v57 = vpop.eup %6323 }
 0x3d8   : > { %10278 = vst [vmem:[#allocation26_spill] sm:$0xff] %v7836_v57  ;;  %v1678_v34 = vpop.permute.xlu1 %1677 }
 0x3d9   : > { %v1722_v22 = vsel %vm687_vm0, %v1678_v34, 0 }
 0x3da   : > { %5696 = vmatpush3.bf16.xpose.msra.mxu1 %v1716_v49  ;;  %v1680_v49 = vpop.permute.xlu0 %1679 }
 0x3db   : > { %v7838_v54 = vpop.eup %6325  ;;  %6126 = vmatprep.subr.msk.bf16.mxu1 %vm687_vm0, %v10280_v44  ;;  %v1725_v32 = vsel %vm687_vm0, %v1680_v49, 0  ;;  %v1337_v44 = vsub.f32 %v7643_v51, %v1320_v60 }
 0x3dc   : > { %10279 = vst [vmem:[#allocation27_spill] sm:$0xff] %v7838_v54  ;;  %v7842_v15 = vpop.eup %6327  ;;  %v1407_v38 = vpack.c.bf16 %v7838_v54, %v7832_v12 }
 0x3dd   : > { %10281 = vst [vmem:[#allocation31_spill] sm:$0xff] %v7842_v15  ;;  %v1408_v35 = vpack.c.bf16 %v7836_v57, %v7842_v15  ;;  %v1367_v45 = vmul.f32 1.442695, %v1337_v44 }
 0x3de   : > { %5683 = vmatprep.mubr.bf16.mxu1 %v1407_v38  ;;  %v1335_v38 = vsub.f32 %v10282_v47, %v1316_v2 }
 0x3df   : > { %5684 = vmatmul.mubr.bf16.gmra.mrb[56].mxu1 %v1408_v35  ;;  %v1338_v35 = vsub.f32 %v7651_v40, %v1322_v28 }
 0x3e0   : > { %v1363_v18 = vmul.f32 1.442695, %v1335_v38 }
 0x3e2   : > { %5698 = vmatpush3.bf16.xpose.msra.mxu1 %v1719_v27  ;;  %v1369_v27 = vmul.f32 1.442695, %v1338_v35  ;;  %6329 = vpow2.f32 %v1363_v18 }
 0x3e3   : > { %6127 = vmatprep.subr.msk.bf16.mxu1 %vm687_vm0, %v1678_v34 }
 0x3e4   : > { %6331 = vpow2.f32 %v1369_v27 }
 0x3ea   : > { %5700 = vmatpush3.bf16.xpose.msra.mxu1 %v1722_v22  ;;  %v1656_v22 = vpop.permute.xlu1 %1655 }
 0x3eb   : > { %6128 = vmatprep.subr.msk.bf16.mxu1 %vm687_vm0, %v1680_v49 }
 0x3ec   : > { %v7861_v60 = vpop.eup %6329 }
 0x3ed   : > { %10283 = vst [vmem:[#allocation32_spill] sm:$0xff] %v7861_v60 }
 0x3ee   : > { %v1660_v51 = vpop.permute.xlu1 %1659 }
 0x3f2   : > { %5702 = vmatpush3.bf16.xpose.msra.mxu1 %v1725_v32  ;;  %v1664_v28 = vpop.permute.xlu1 %1663 }
 0x3f6   : > { %v1668_v38 = vpop.permute.xlu1 %1667 }
 0x3fa   : > { %v1953_v44 = vpop.permute.xlu1 %1952 }
 0x3fe   : > { %v1318_v25 = vpop.xlane.xlu0 %1317 }
 0x3ff   : > { %v1336_v48 = vsub.f32 %v7653_v36, %v1318_v25  ;;  %v7864_v25 = vpop.eup %6331 }
 0x400   : > { %10284 = vst [vmem:[#allocation29_spill] sm:$0xff] %v7864_v25 }
 0x401   : > { %v1365_v34 = vmul.f32 1.442695, %v1336_v48 }
 0x402   : > { %v1682_v55 = vpop.permute.xlu0 %1681 }
 0x403   : > { %6333 = vpow2.f32 %v1365_v34  ;;  %6129 = vmatprep.subr.msk.bf16.mxu1 %vm687_vm0, %v1682_v55  ;;  %v1728_v47 = vsel %vm687_vm0, %v1682_v55, 0  ;;  %v1955_v34 = vpop.permute.xlu1 %1954 }
 0x404   : > { %6335 = vpow2.f32 %v1367_v45  ;;  %5704 = vmatpush3.bf16.xpose.msra.mxu1 %v1728_v47 }
 0x406   : > { %v1684_v40 = vpop.permute.xlu0 %1683 }
 0x407   : > { %6130 = vmatprep.subr.msk.bf16.mxu1 %vm687_vm0, %v1684_v40  ;;  %v1731_v36 = vsel %vm687_vm0, %v1684_v40, 0  ;;  %v1959_v40 = vpop.permute.xlu1 %1958 }
 0x40a   : > { %v1654_v32 = vpop.permute.xlu0 %1653 }
 0x40c   : > { %5706 = vmatpush3.bf16.xpose.msra.mxu1 %v1731_v36 }
 0x40d   : > { %v7866_v48 = vpop.eup %6333 }
 0x40e   : > { %10285 = vst [vmem:[#allocation30_spill] sm:$0xff] %v7866_v48  ;;  %v7868_v18 = vpop.eup %6335  ;;  %v1658_v55 = vpop.permute.xlu0 %1657  ;;  %v1409_v45 = vpack.c.bf16 %v7866_v48, %v7861_v60 }
 0x40f   : > { %10286 = vst [vmem:[#allocation33_spill] sm:$0xff] %v7868_v18  ;;  %v1410_v2 = vpack.c.bf16 %v7864_v25, %v7868_v18 }
 0x410   : > { %5687 = vmatprep.mubr.bf16.mxu1 %v1409_v45 }
 0x411   : > { %5688 = vmatmul.mubr.bf16.gmra.mrb[60].mxu1 %v1410_v2 }
 0x412   : > { %5707 = vmatprep.mubr.msk.bf16.mxu1 %vm687_vm0, %v1654_v32  ;;  %v1662_v49 = vpop.permute.xlu0 %1661  ;;  %v1961_v32 = vpop.permute.xlu1 %1960 }
 0x416   : > { %v1666_v35 = vpop.permute.xlu0 %1665 }
 0x419   : > { %5708 = vmatmul.mubr.msk.bf16.vlgmr.msra.gmra.mrb[64].mxu1 %vm687_vm0, %v1656_v22 }
 0x41a   : > { %5711 = vmatprep.mubr.msk.bf16.mxu1 %vm687_vm0, %v1658_v55  ;;  %v1951_v27 = vpop.permute.xlu0 %1950 }
 0x41b   : > { %5723 = vmatprep.subr.bf16.mxu0 %v1951_v27 }
 0x41c   : > { %5724 = vmatpush3.bf16.msra.mxu0 %v1951_v27 }
 0x41d   : > { %5725 = vmatprep.subr.bf16.mxu0 %v1953_v44 }
 0x41e   : > { %v1957_v47 = vpop.permute.xlu0 %1956 }
 0x420   : > { %5726 = vmatpush3.bf16.msra.mxu0 %v1953_v44 }
 0x421   : > { %5712 = vmatmul.mubr.msk.bf16.gmra.mrb[68].mxu1 %vm687_vm0, %v1660_v51  ;;  %5727 = vmatprep.subr.bf16.mxu0 %v1955_v34 }
 0x422   : > { %5715 = vmatprep.mubr.msk.bf16.mxu1 %vm687_vm0, %v1662_v49  ;;  %v1963_v45 = vpop.permute.xlu0 %1962 }
 0x424   : > { %5728 = vmatpush3.bf16.msra.mxu0 %v1955_v34 }
 0x425   : > { %5729 = vmatprep.subr.bf16.mxu0 %v1957_v47 }
 0x426   : > { %v7896_v44 = vpop.permute.xlu0 %2200 }
 0x428   : > { %5730 = vmatpush3.bf16.msra.mxu0 %v1957_v47 }
 0x429   : > { %5716 = vmatmul.mubr.msk.bf16.gmra.mrb[72].mxu1 %vm687_vm0, %v1664_v28  ;;  %5731 = vmatprep.subr.bf16.mxu0 %v1959_v40  ;;  %v1965_v28 = vpop.permute.xlu1 %1964 }
 0x42a   : > { %5719 = vmatprep.mubr.msk.bf16.mxu1 %vm687_vm0, %v1666_v35  ;;  %v7881_v22 = vpop.f32.mrb[32].mxu1  ;;  %v8035_v29 = vpop.permute.xlu0 %2202 }
 0x42b   : > { %10287 = vst [vmem:[#allocation34_spill] sm:$0xff] %v7881_v22  ;;  %v7883_v36 = vpop.f32.mrb[33].mxu1 }
 0x42c   : > { %10288 = vst [vmem:[#allocation35_spill] sm:$0xff] %v7883_v36  ;;  %5732 = vmatpush3.bf16.msra.mxu0 %v1959_v40  ;;  %v7885_v51 = vpop.f32.mrb[34].mxu1 }
 0x42d   : > { %10289 = vst [vmem:[#allocation36_spill] sm:$0xff] %v7885_v51  ;;  %5733 = vmatprep.subr.bf16.mxu0 %v1961_v32  ;;  %v7887_v55 = vpop.f32.mrb[35].mxu1  ;;  %v8043_v19 = vpop.permute.xlu1 %2204 }
 0x42e   : > { %10290 = vst [vmem:[#allocation53_spill] sm:$0xff] %v7887_v55  ;;  %v8041_v48 = vpop.permute.xlu0 %2206 }
 0x430   : > { %5734 = vmatpush3.bf16.msra.mxu0 %v1961_v32 }
 0x431   : > { %5720 = vmatmul.mubr.msk.bf16.gmra.mrb[76].mxu1 %vm687_vm0, %v1668_v38  ;;  %5735 = vmatprep.subr.bf16.mxu0 %v1963_v45 }
 0x434   : > { %5736 = vmatpush3.bf16.msra.mxu0 %v1963_v45  ;;  %v7890_v2 = vpop.f32.mrb[36].mxu1 }
 0x435   : > { %10291 = vst [vmem:[#allocation54_spill] sm:$0xff] %v7890_v2  ;;  %5737 = vmatprep.subr.bf16.mxu0 %v1965_v28  ;;  %v7892_v49 = vpop.f32.mrb[37].mxu1 }
 0x436   : > { %10292 = vst [vmem:[#allocation55_spill] sm:$0xff] %v7892_v49  ;;  %v7894_v35 = vpop.f32.mrb[38].mxu1 }
 0x437   : > { %10293 = vst [vmem:[#allocation56_spill] sm:$0xff] %v7894_v35  ;;  %v7898_v27 = vpop.f32.mrb[39].mxu1 }
 0x438   : > { %10294 = vst [vmem:[#allocation57_spill] sm:$0xff] %v7898_v27  ;;  %5738 = vmatpush3.bf16.msra.mxu0 %v1965_v28 }
 0x439   : > { %6131 = vmatprep.subr.msk.bf16.mxu0 %vm687_vm0, %v7896_v44 }
 0x43c   : > { %v7902_v34 = vpop.f32.mrb[40].mxu1 }
 0x43d   : > { %10295 = vst [vmem:[#allocation58_spill] sm:$0xff] %v7902_v34  ;;  %v7904_v38 = vpop.f32.mrb[41].mxu1 }
 0x43e   : > { %10296 = vst [vmem:[#allocation59_spill] sm:$0xff] %v7904_v38  ;;  %v7906_v47 = vpop.f32.mrb[42].mxu1 }
 0x43f   : > { %10297 = vst [vmem:[#allocation60_spill] sm:$0xff] %v7906_v47  ;;  %v7908_v40 = vpop.f32.mrb[43].mxu1 }
 0x440   : > { %10298 = vst [vmem:[#allocation61_spill] sm:$0xff] %v7908_v40 }
 0x444   : > { %v7910_v32 = vpop.f32.mrb[44].mxu1 }
 0x445   : > { %10299 = vst [vmem:[#allocation62_spill] sm:$0xff] %v7910_v32  ;;  %v7912_v45 = vpop.f32.mrb[45].mxu1 }
 0x446   : > { %10300 = vst [vmem:[#allocation63_spill] sm:$0xff] %v7912_v45  ;;  %v7914_v35 = vpop.f32.mrb[46].mxu1 }
 0x447   : > { %10301 = vst [vmem:[#allocation64_spill] sm:$0xff] %v7914_v35  ;;  %v7916_v51 = vpop.f32.mrb[47].mxu1 }
 0x448   : > { %10302 = vst [vmem:[#allocation65_spill] sm:$0xff] %v7916_v51 }
 0x49c   : > { %v7918_v28 = vpop.f32.mrb[48].mxu1 }
 0x49d   : > { %10303 = vst [vmem:[#allocation66_spill] sm:$0xff] %v7918_v28  ;;  %v7920_v27 = vpop.f32.mrb[49].mxu1 }
 0x49e   : > { %10304 = vst [vmem:[#allocation67_spill] sm:$0xff] %v7920_v27  ;;  %v7922_v55 = vpop.f32.mrb[50].mxu1 }
 0x49f   : > { %10305 = vst [vmem:[#allocation68_spill] sm:$0xff] %v7922_v55  ;;  %v7924_v34 = vpop.f32.mrb[51].mxu1 }
 0x4a0   : > { %10306 = vst [vmem:[#allocation69_spill] sm:$0xff] %v7924_v34 }
 0x4a6   : > { %v7926_v38 = vpop.f32.mrb[52].mxu1 }
 0x4a7   : > { %10307 = vst [vmem:[#allocation70_spill] sm:$0xff] %v7926_v38  ;;  %v7928_v47 = vpop.f32.mrb[53].mxu1 }
 0x4a8   : > { %10308 = vst [vmem:[#allocation71_spill] sm:$0xff] %v7928_v47  ;;  %v7930_v40 = vpop.f32.mrb[54].mxu1 }
 0x4a9   : > { %10309 = vst [vmem:[#allocation72_spill] sm:$0xff] %v7930_v40  ;;  %v7932_v32 = vpop.f32.mrb[55].mxu1 }
 0x4aa   : > { %10310 = vst [vmem:[#allocation73_spill] sm:$0xff] %v7932_v32 }
 0x4b2   : > { %v7934_v45 = vpop.f32.mrb[56].mxu1 }
 0x4b3   : > { %10311 = vst [vmem:[#allocation74_spill] sm:$0xff] %v7934_v45  ;;  %v7936_v35 = vpop.f32.mrb[57].mxu1 }
 0x4b4   : > { %10312 = vst [vmem:[#allocation75_spill] sm:$0xff] %v7936_v35  ;;  %v7938_v51 = vpop.f32.mrb[58].mxu1 }
 0x4b5   : > { %10313 = vst [vmem:[#allocation76_spill] sm:$0xff] %v7938_v51  ;;  %v7940_v2 = vpop.f32.mrb[59].mxu1 }
 0x4b6   : > { %10314 = vst [vmem:[#allocation77_spill] sm:$0xff] %v7940_v2 }
 0x4e4   : > { %v7942_v49 = vpop.f32.mrb[60].mxu1 }
 0x4e5   : > { %10315 = vst [vmem:[#allocation78_spill] sm:$0xff] %v7942_v49  ;;  %v7944_v22 = vpop.f32.mrb[61].mxu1 }
 0x4e6   : > { %10316 = vst [vmem:[#allocation79_spill] sm:$0xff] %v7944_v22  ;;  %v7946_v36 = vpop.f32.mrb[62].mxu1 }
 0x4e7   : > { %10317 = vst [vmem:[#allocation80_spill] sm:$0xff] %v7946_v36  ;;  %v7948_v38 = vpop.f32.mrb[63].mxu1 }
 0x4e8   : > { %10318 = vst [vmem:[#allocation81_spill] sm:$0xff] %v7948_v38 }
 0x4ec   : > { %v7950_v47 = vpop.f32.mrb[64].mxu1 }
 0x4ed   : > { %1834 = vmax.xlane.f32.xlu0 %v7950_v47  ;;  %v7953_v40 = vpop.f32.mrb[65].mxu1 }
 0x4ee   : > { %v7955_v45 = vpop.f32.mrb[66].mxu1 }
 0x4ef   : > { %v1770_v35 = vpop.f32.mrb[67].mxu1 }
 0x4f0   : > { %1832 = vmax.xlane.f32.xlu1 %v1770_v35 }
 0x4f1   : > { %1830 = vmax.xlane.f32.xlu0 %v7953_v40 }
 0x4f4   : > { %v7958_v51 = vpop.f32.mrb[68].mxu1 }
 0x4f5   : > { %1836 = vmax.xlane.f32.xlu0 %v7955_v45  ;;  %1842 = vmax.xlane.f32.xlu1 %v7958_v51  ;;  %v7962_v36 = vpop.f32.mrb[69].mxu1 }
 0x4f6   : > { %v7964_v38 = vpop.f32.mrb[70].mxu1 }
 0x4f7   : > { %v7966_v49 = vpop.f32.mrb[71].mxu1 }
 0x4f9   : > { %1838 = vmax.xlane.f32.xlu1 %v7962_v36  ;;  %1840 = vmax.xlane.f32.xlu0 %v7966_v49 }
 0x4fc   : > { %v7970_v22 = vpop.f32.mrb[72].mxu1 }
 0x4fd   : > { %1844 = vmax.xlane.f32.xlu1 %v7964_v38  ;;  %1850 = vmax.xlane.f32.xlu0 %v7970_v22  ;;  %v7974_v2 = vpop.f32.mrb[73].mxu1 }
 0x4fe   : > { %v7976_v32 = vpop.f32.mrb[74].mxu1 }
 0x4ff   : > { %v7978_v55 = vpop.f32.mrb[75].mxu1 }
 0x501   : > { %1846 = vmax.xlane.f32.xlu1 %v7974_v2 }
 0x504   : > { %v7981_v28 = vpop.f32.mrb[76].mxu1 }
 0x505   : > { %1852 = vmax.xlane.f32.xlu1 %v7976_v32  ;;  %v7984_v27 = vpop.f32.mrb[77].mxu1 }
 0x506   : > { %1854 = vmax.xlane.f32.xlu0 %v7984_v27  ;;  %v7987_v34 = vpop.f32.mrb[78].mxu1 }
 0x507   : > { %v7989_v25 = vpop.f32.mrb[79].mxu1 }
 0x509   : > { %1848 = vmax.xlane.f32.xlu1 %v7978_v55 }
 0x50d   : > { %1858 = vmax.xlane.f32.xlu1 %v7981_v28 }
 0x511   : > { %1860 = vmax.xlane.f32.xlu1 %v7987_v34 }
 0x51c   : > { %2210 = vrot.lane.b32.xlu0 %v7424_v56, %s7008_s17 }
 0x522   : > { %2208 = vrot.lane.b32.xlu1 %v7408_v43, %s7008_s17 }
 0x526   : > { %2186 = vrot.lane.b32.xlu1 %v7369_v11, %s7008_s17 }
 0x52a   : > { %2190 = vrot.lane.b32.xlu1 %v7387_v24, %s7008_s17 }
 0x52e   : > { %2194 = vrot.lane.b32.xlu1 %v7403_v37, %s7008_s17 }
 0x532   : > { %2198 = vrot.lane.b32.xlu1 %v7419_v50, %s7008_s17 }
 0x536   : > { %2483 = vrot.lane.b32.xlu1 %v7360_v7, %s7008_s17 }
 0x53a   : > { %2485 = vrot.lane.b32.xlu1 %v7378_v20, %s7008_s17 }
 0x53b   : > { %1856 = vmax.xlane.f32.xlu0 %v7989_v25 }
 0x53e   : > { %2489 = vrot.lane.b32.xlu1 %v7410_v46, %s7008_s17 }
 0x542   : > { %2491 = vrot.lane.b32.xlu1 %v7426_v58, %s7008_s17 }
 0x546   : > { %2495 = vrot.lane.b32.xlu1 %v7452_v14, %s7008_s17 }
 0x54a   : > { %2735 = vrot.lane.b32.xlu1 %v7376_v17, %s7009_s12 }
 0x551   : > { %2212 = vrot.lane.b32.xlu0 %v7436_v1, %s7008_s17 }
 0x555   : > { %2214 = vrot.lane.b32.xlu0 %v7450_v10, %s7008_s17 }
 0x559   : > { %2184 = vrot.lane.b32.xlu0 %v7372_v13, %s7008_s17 }
 0x55d   : > { %2188 = vrot.lane.b32.xlu0 %v7390_v26, %s7008_s17 }
 0x561   : > { %2192 = vrot.lane.b32.xlu0 %v7406_v39, %s7008_s17 }
 0x565   : > { %2196 = vrot.lane.b32.xlu0 %v7422_v52, %s7008_s17 }
 0x569   : > { %2481 = vrot.lane.b32.xlu0 %v7348_v63, %s7008_s17 }
 0x56d   : > { %2487 = vrot.lane.b32.xlu0 %v7394_v33, %s7008_s17 }
 0x571   : > { %2493 = vrot.lane.b32.xlu0 %v7438_v3, %s7008_s17 }
 0x575   : > { %2731 = vrot.lane.b32.xlu0 %v7346_v61, %s7009_s12 }
 0x579   : > { %2733 = vrot.lane.b32.xlu0 %v7358_v4, %s7009_s12 }
 0x57a   : > { %v1835_v53 = vpop.xlane.xlu0 %1834 }
 0x57b   : > { %v1864_v41 = vsub.f32 %v7950_v47, %v1835_v53 }
 0x57d   : > { %v1833_v16 = vpop.xlane.xlu1 %1832  ;;  %2737 = vrot.lane.b32.xlu0 %v10257_v31, %s7009_s12  ;;  %v1882_v5 = vmul.f32 1.442695, %v1864_v41 }
 0x57e   : > { %v1863_v62 = vsub.f32 %v1770_v35, %v1833_v16  ;;  %v1831_v42 = vpop.xlane.xlu0 %1830 }
 0x57f   : > { %v1862_v21 = vsub.f32 %v7953_v40, %v1831_v42  ;;  %v2241_v40 = vsel %vm687_vm0, %v7896_v44, 0 }
 0x580   : > { %v1880_v57 = vmul.f32 1.442695, %v1863_v62 }
 0x581   : > { %v1878_v54 = vmul.f32 1.442695, %v1862_v21 }
 0x582   : > { %6337 = vpow2.f32 %v1880_v57  ;;  %v1843_v18 = vpop.xlane.xlu1 %1842  ;;  %v1837_v60 = vpop.xlane.xlu0 %1836 }
 0x583   : > { %6339 = vpow2.f32 %v1878_v54  ;;  %v1865_v30 = vsub.f32 %v7955_v45, %v1837_v60  ;;  %v1868_v12 = vsub.f32 %v7958_v51, %v1843_v18 }
 0x584   : > { %6341 = vpow2.f32 %v1882_v5 }
 0x585   : > { %v1884_v15 = vmul.f32 1.442695, %v1865_v30  ;;  %v1890_v62 = vmul.f32 1.442695, %v1868_v12 }
 0x586   : > { %v1839_v59 = vpop.xlane.xlu1 %1838  ;;  %v1841_v6 = vpop.xlane.xlu0 %1840 }
 0x587   : > { %v1866_v16 = vsub.f32 %v7962_v36, %v1839_v59  ;;  %v1867_v53 = vsub.f32 %v7966_v49, %v1841_v6  ;;  %6343 = vpow2.f32 %v1884_v15 }
 0x589   : > { %v1886_v42 = vmul.f32 1.442695, %v1866_v16  ;;  %v1888_v21 = vmul.f32 1.442695, %v1867_v53 }
 0x58a   : > { %v1845_v57 = vpop.xlane.xlu1 %1844  ;;  %v1851_v12 = vpop.xlane.xlu0 %1850 }
 0x58b   : > { %6345 = vpow2.f32 %v1886_v42  ;;  %v1869_v41 = vsub.f32 %v7964_v38, %v1845_v57  ;;  %v1872_v35 = vsub.f32 %v7970_v22, %v1851_v12 }
 0x58c   : > { %v8056_v54 = vpop.eup %6337  ;;  %6347 = vpow2.f32 %v1888_v21 }
 0x58d   : > { %10319 = vst [vmem:[#allocation82_spill] sm:$0xff] %v8056_v54  ;;  %v8058_v30 = vpop.eup %6339  ;;  %v1892_v60 = vmul.f32 1.442695, %v1869_v41  ;;  %6349 = vpow2.f32 %v1890_v62  ;;  %v1898_v42 = vmul.f32 1.442695, %v1872_v35 }
 0x58e   : > { %10320 = vst [vmem:[#allocation83_spill] sm:$0xff] %v8058_v30  ;;  %v1847_v5 = vpop.xlane.xlu1 %1846  ;;  %v1942_v59 = vpack.c.bf16 %v8056_v54, %v8058_v30  ;;  %v8062_v6 = vpop.eup %6341 }
 0x58f   : > { %6351 = vpow2.f32 %v1892_v60  ;;  %10321 = vst [vmem:[#allocation84_spill] sm:$0xff] %v8062_v6  ;;  %v1870_v15 = vsub.f32 %v7974_v2, %v1847_v5 }
 0x590   : > { %5739 = vmatprep.mubr.bf16.mxu0 %v1942_v59  ;;  %v2247_v59 = vsel %vm687_vm0, %v8043_v19, 0 }
 0x591   : > { %v8065_v18 = vpop.eup %6343  ;;  %v1894_v47 = vmul.f32 1.442695, %v1870_v15 }
 0x592   : > { %10322 = vst [vmem:[#allocation85_spill] sm:$0xff] %v8065_v18  ;;  %v1853_v36 = vpop.xlane.xlu1 %1852  ;;  %v1943_v49 = vpack.c.bf16 %v8065_v18, %v8062_v6 }
 0x593   : > { %v1873_v51 = vsub.f32 %v7976_v32, %v1853_v36  ;;  %6353 = vpow2.f32 %v1894_v47 }
 0x594   : > { %5740 = vmatmul.mubr.bf16.vlgmr.msra.gmra.mrb[48].mxu0 %v1943_v49 }
 0x595   : > { %v8071_v38 = vpop.eup %6345  ;;  %v1900_v2 = vmul.f32 1.442695, %v1873_v51  ;;  %5756 = vmatpush3.bf16.xpose.msra.mxu0 %v2241_v40  ;;  %v2250_v51 = vsel %vm687_vm0, %v8041_v48, 0 }
 0x596   : > { %10323 = vst [vmem:[#allocation86_spill] sm:$0xff] %v8071_v38  ;;  %v8075_v45 = vpop.eup %6347  ;;  %v1849_v16 = vpop.xlane.xlu1 %1848  ;;  %6132 = vmatprep.subr.msk.bf16.mxu0 %vm687_vm0, %v8035_v29 }
 0x597   : > { %10324 = vst [vmem:[#allocation87_spill] sm:$0xff] %v8075_v45  ;;  %v1871_v32 = vsub.f32 %v7978_v55, %v1849_v16  ;;  %v1944_v22 = vpack.c.bf16 %v8075_v45, %v8071_v38  ;;  %v8082_v53 = vpop.eup %6349  ;;  %6355 = vpow2.f32 %v1900_v2  ;;  %v2244_v55 = vsel %vm687_vm0, %v8035_v29, 0 }
 0x598   : > { %10325 = vst [vmem:[#allocation88_spill] sm:$0xff] %v8082_v53 }
 0x599   : > { %v8084_v21 = vpop.eup %6351  ;;  %v1896_v44 = vmul.f32 1.442695, %v1871_v32  ;;  %5743 = vmatprep.mubr.bf16.mxu0 %v1944_v22 }
 0x59a   : > { %10326 = vst [vmem:[#allocation89_spill] sm:$0xff] %v8084_v21  ;;  %v1945_v62 = vpack.c.bf16 %v8084_v21, %v8082_v53  ;;  %v1859_v57 = vpop.xlane.xlu1 %1858 }
 0x59b   : > { %6357 = vpow2.f32 %v1896_v44 }
 0x59c   : > { %6359 = vpow2.f32 %v1898_v42  ;;  %5744 = vmatmul.mubr.bf16.gmra.mrb[52].mxu0 %v1945_v62 }
 0x59d   : > { %5758 = vmatpush3.bf16.xpose.msra.mxu0 %v2244_v55  ;;  %v8092_v41 = vpop.eup %6353 }
 0x59e   : > { %6133 = vmatprep.subr.msk.bf16.mxu0 %vm687_vm0, %v8043_v19  ;;  %10327 = vst [vmem:[#allocation90_spill] sm:$0xff] %v8092_v41  ;;  %v1861_v36 = vpop.xlane.xlu1 %1860  ;;  %v1855_v19 = vpop.xlane.xlu0 %1854 }
 0x59f   : > { %v1874_v2 = vsub.f32 %v7984_v27, %v1855_v19  ;;  %v1877_v16 = vsub.f32 %v7987_v34, %v1861_v36 }
 0x5a1   : > { %v8094_v60 = vpop.eup %6355  ;;  %v1902_v32 = vmul.f32 1.442695, %v1874_v2  ;;  %v1908_v22 = vmul.f32 1.442695, %v1877_v16 }
 0x5a2   : > { %10328 = vst [vmem:[#allocation91_spill] sm:$0xff] %v8094_v60  ;;  %v2209_v49 = vpop.permute.xlu1 %2208  ;;  %v2211_v47 = vpop.permute.xlu0 %2210 }
 0x5a3   : > { %v2253_v35 = vsel %vm687_vm0, %v2209_v49, 0  ;;  %v2256_v40 = vsel %vm687_vm0, %v2211_v47, 0  ;;  %6361 = vpow2.f32 %v1902_v32 }
 0x5a4   : > { %6363 = vpow2.f32 %v1908_v22 }
 0x5a5   : > { %v8096_v5 = vpop.eup %6357  ;;  %5760 = vmatpush3.bf16.xpose.msra.mxu0 %v2247_v59 }
 0x5a6   : > { %10329 = vst [vmem:[#allocation92_spill] sm:$0xff] %v8096_v5  ;;  %v8100_v12 = vpop.eup %6359  ;;  %v1946_v29 = vpack.c.bf16 %v8096_v5, %v8092_v41  ;;  %6134 = vmatprep.subr.msk.bf16.mxu0 %vm687_vm0, %v8041_v48  ;;  %v1876_v48 = vsub.f32 %v7981_v28, %v1859_v57  ;;  %v2187_v59 = vpop.permute.xlu1 %2186 }
 0x5a7   : > { %10330 = vst [vmem:[#allocation93_spill] sm:$0xff] %v8100_v12  ;;  %v1947_v15 = vpack.c.bf16 %v8094_v60, %v8100_v12 }
 0x5a8   : > { %5747 = vmatprep.mubr.bf16.mxu0 %v1946_v29  ;;  %v1906_v62 = vmul.f32 1.442695, %v1876_v48 }
 0x5a9   : > { %5748 = vmatmul.mubr.bf16.gmra.mrb[56].mxu0 %v1947_v15 }
 0x5aa   : > { %v2191_v28 = vpop.permute.xlu1 %2190 }
 0x5ad   : > { %5762 = vmatpush3.bf16.xpose.msra.mxu0 %v2250_v51  ;;  %v8121_v15 = vpop.eup %6361 }
 0x5ae   : > { %6135 = vmatprep.subr.msk.bf16.mxu0 %vm687_vm0, %v2209_v49  ;;  %10331 = vst [vmem:[#allocation94_spill] sm:$0xff] %v8121_v15  ;;  %v8124_v36 = vpop.eup %6363  ;;  %v2195_v19 = vpop.permute.xlu1 %2194 }
 0x5af   : > { %10332 = vst [vmem:[#allocation95_spill] sm:$0xff] %v8124_v36 }
 0x5b2   : > { %v2199_v16 = vpop.permute.xlu1 %2198 }
 0x5b5   : > { %5764 = vmatpush3.bf16.xpose.msra.mxu0 %v2253_v35 }
 0x5b6   : > { %6136 = vmatprep.subr.msk.bf16.mxu0 %vm687_vm0, %v2211_v47  ;;  %v2484_v32 = vpop.permute.xlu1 %2483 }
 0x5bd   : > { %5766 = vmatpush3.bf16.xpose.msra.mxu0 %v2256_v40 }
 0x5c8   : > { %v1857_v42 = vpop.xlane.xlu0 %1856 }
 0x5c9   : > { %v1875_v44 = vsub.f32 %v7989_v25, %v1857_v42  ;;  %v2486_v42 = vpop.permute.xlu1 %2485 }
 0x5cb   : > { %v1904_v55 = vmul.f32 1.442695, %v1875_v44 }
 0x5cc   : > { %v2213_v29 = vpop.permute.xlu0 %2212 }
 0x5cd   : > { %6365 = vpow2.f32 %v1904_v55  ;;  %6137 = vmatprep.subr.msk.bf16.mxu0 %vm687_vm0, %v2213_v29  ;;  %v2259_v27 = vsel %vm687_vm0, %v2213_v29, 0 }
 0x5ce   : > { %6367 = vpow2.f32 %v1906_v62  ;;  %5768 = vmatpush3.bf16.xpose.msra.mxu0 %v2259_v27  ;;  %v2490_v62 = vpop.permute.xlu1 %2489 }
 0x5d0   : > { %v2215_v34 = vpop.permute.xlu0 %2214 }
 0x5d1   : > { %6138 = vmatprep.subr.msk.bf16.mxu0 %vm687_vm0, %v2215_v34  ;;  %v2262_v25 = vsel %vm687_vm0, %v2215_v34, 0 }
 0x5d2   : > { %v2492_v55 = vpop.permute.xlu1 %2491 }
 0x5d4   : > { %v2185_v57 = vpop.permute.xlu0 %2184 }
 0x5d6   : > { %5770 = vmatpush3.bf16.xpose.msra.mxu0 %v2262_v25  ;;  %v2496_v29 = vpop.permute.xlu1 %2495 }
 0x5d7   : > { %v8126_v51 = vpop.eup %6365 }
 0x5d8   : > { %10333 = vst [vmem:[#allocation96_spill] sm:$0xff] %v8126_v51  ;;  %v8128_v49 = vpop.eup %6367  ;;  %v2189_v35 = vpop.permute.xlu0 %2188  ;;  %v1948_v47 = vpack.c.bf16 %v8126_v51, %v8121_v15 }
 0x5d9   : > { %10334 = vst [vmem:[#allocation97_spill] sm:$0xff] %v8128_v49  ;;  %v1949_v40 = vpack.c.bf16 %v8124_v36, %v8128_v49 }
 0x5da   : > { %5751 = vmatprep.mubr.bf16.mxu0 %v1948_v47 }
 0x5db   : > { %5752 = vmatmul.mubr.bf16.gmra.mrb[60].mxu0 %v1949_v40 }
 0x5dc   : > { %5771 = vmatprep.mubr.msk.bf16.mxu0 %vm687_vm0, %v2185_v57  ;;  %v2193_v2 = vpop.permute.xlu0 %2192 }
 0x5e0   : > { %v2197_v48 = vpop.permute.xlu0 %2196 }
 0x5e3   : > { %5772 = vmatmul.mubr.msk.bf16.vlgmr.msra.gmra.mrb[64].mxu0 %vm687_vm0, %v2187_v59 }
 0x5e4   : > { %5775 = vmatprep.mubr.msk.bf16.mxu0 %vm687_vm0, %v2189_v35  ;;  %v2482_v22 = vpop.permute.xlu0 %2481 }
 0x5e5   : > { %5787 = vmatprep.subr.bf16.mxu1 %v2482_v22 }
 0x5e6   : > { %5788 = vmatpush3.bf16.msra.mxu1 %v2482_v22 }
 0x5e7   : > { %5789 = vmatprep.subr.bf16.mxu1 %v2484_v32 }
 0x5e8   : > { %v2488_v44 = vpop.permute.xlu0 %2487 }
 0x5ea   : > { %5790 = vmatpush3.bf16.msra.mxu1 %v2484_v32 }
 0x5eb   : > { %5776 = vmatmul.mubr.msk.bf16.gmra.mrb[68].mxu0 %vm687_vm0, %v2191_v28  ;;  %5791 = vmatprep.subr.bf16.mxu1 %v2486_v42 }
 0x5ec   : > { %5779 = vmatprep.mubr.msk.bf16.mxu0 %vm687_vm0, %v2193_v2  ;;  %v2494_v59 = vpop.permute.xlu0 %2493 }
 0x5ee   : > { %5792 = vmatpush3.bf16.msra.mxu1 %v2486_v42 }
 0x5ef   : > { %5793 = vmatprep.subr.bf16.mxu1 %v2488_v44 }
 0x5f0   : > { %v8142_v27 = vpop.permute.xlu0 %2731 }
 0x5f2   : > { %5794 = vmatpush3.bf16.msra.mxu1 %v2488_v44 }
 0x5f3   : > { %5780 = vmatmul.mubr.msk.bf16.gmra.mrb[72].mxu0 %vm687_vm0, %v2195_v19  ;;  %5795 = vmatprep.subr.bf16.mxu1 %v2490_v62 }
 0x5f4   : > { %5783 = vmatprep.mubr.msk.bf16.mxu0 %vm687_vm0, %v2197_v48 }
 0x5f6   : > { %5796 = vmatpush3.bf16.msra.mxu1 %v2490_v62 }
 0x5f7   : > { %5797 = vmatprep.subr.bf16.mxu1 %v2492_v55 }
 0x5fa   : > { %5798 = vmatpush3.bf16.msra.mxu1 %v2492_v55 }
 0x5fb   : > { %5784 = vmatmul.mubr.msk.bf16.gmra.mrb[76].mxu0 %vm687_vm0, %v2199_v16  ;;  %5799 = vmatprep.subr.bf16.mxu1 %v2494_v59 }
 0x5fe   : > { %5800 = vmatpush3.bf16.msra.mxu1 %v2494_v59 }
 0x5ff   : > { %5801 = vmatprep.subr.bf16.mxu1 %v2496_v29 }
 0x602   : > { %5802 = vmatpush3.bf16.msra.mxu1 %v2496_v29 }
 0x603   : > { %6139 = vmatprep.subr.msk.bf16.mxu1 %vm687_vm0, %v8142_v27 }
 0x667   : > { %v8146_v34 = vpop.f32.mrb[48].mxu0 }
 0x668   : > { %10335 = vst [vmem:[#allocation98_spill] sm:$0xff] %v8146_v34  ;;  %v8148_v28 = vpop.f32.mrb[49].mxu0 }
 0x669   : > { %10336 = vst [vmem:[#allocation99_spill] sm:$0xff] %v8148_v28  ;;  %v8150_v57 = vpop.f32.mrb[50].mxu0  ;;  %v8271_v28 = vpop.permute.xlu1 %2735 }
 0x66a   : > { %10337 = vst [vmem:[#allocation100_spill] sm:$0xff] %v8150_v57  ;;  %v8152_v25 = vpop.f32.mrb[51].mxu0 }
 0x66b   : > { %10338 = vst [vmem:[#allocation101_spill] sm:$0xff] %v8152_v25  ;;  %v8263_v25 = vpop.permute.xlu0 %2733 }
 0x66f   : > { %v8154_v19 = vpop.f32.mrb[52].mxu0  ;;  %v8269_v34 = vpop.permute.xlu0 %2737 }
 0x670   : > { %10339 = vst [vmem:[#allocation102_spill] sm:$0xff] %v8154_v19  ;;  %v8156_v35 = vpop.f32.mrb[53].mxu0 }
 0x671   : > { %10340 = vst [vmem:[#allocation103_spill] sm:$0xff] %v8156_v35  ;;  %v8158_v47 = vpop.f32.mrb[54].mxu0 }
 0x672   : > { %10341 = vst [vmem:[#allocation104_spill] sm:$0xff] %v8158_v47  ;;  %v8160_v40 = vpop.f32.mrb[55].mxu0 }
 0x673   : > { %10342 = vst [vmem:[#allocation105_spill] sm:$0xff] %v8160_v40 }
 0x67c   : > { %v8162_v2 = vpop.f32.mrb[56].mxu0 }
 0x67d   : > { %10343 = vst [vmem:[#allocation106_spill] sm:$0xff] %v8162_v2  ;;  %v8164_v16 = vpop.f32.mrb[57].mxu0 }
 0x67e   : > { %10344 = vst [vmem:[#allocation107_spill] sm:$0xff] %v8164_v16  ;;  %v8166_v48 = vpop.f32.mrb[58].mxu0 }
 0x67f   : > { %10345 = vst [vmem:[#allocation108_spill] sm:$0xff] %v8166_v48  ;;  %v8168_v32 = vpop.f32.mrb[59].mxu0 }
 0x680   : > { %10346 = vst [vmem:[#allocation109_spill] sm:$0xff] %v8168_v32 }
 0x6ae   : > { %v8170_v22 = vpop.f32.mrb[60].mxu0 }
 0x6af   : > { %10347 = vst [vmem:[#allocation110_spill] sm:$0xff] %v8170_v22  ;;  %v8172_v42 = vpop.f32.mrb[61].mxu0 }
 0x6b0   : > { %10348 = vst [vmem:[#allocation111_spill] sm:$0xff] %v8172_v42  ;;  %v8174_v44 = vpop.f32.mrb[62].mxu0 }
 0x6b1   : > { %10349 = vst [vmem:[#allocation112_spill] sm:$0xff] %v8174_v44  ;;  %v8176_v62 = vpop.f32.mrb[63].mxu0 }
 0x6b2   : > { %10350 = vst [vmem:[#allocation113_spill] sm:$0xff] %v8176_v62 }
 0x6b6   : > { %v8178_v55 = vpop.f32.mrb[64].mxu0 }
 0x6b7   : > { %2365 = vmax.xlane.f32.xlu0 %v8178_v55  ;;  %v8181_v59 = vpop.f32.mrb[65].mxu0 }
 0x6b8   : > { %v8183_v29 = vpop.f32.mrb[66].mxu0 }
 0x6b9   : > { %v2301_v2 = vpop.f32.mrb[67].mxu0 }
 0x6ba   : > { %2363 = vmax.xlane.f32.xlu1 %v2301_v2 }
 0x6bb   : > { %2361 = vmax.xlane.f32.xlu0 %v8181_v59 }
 0x6be   : > { %v8186_v48 = vpop.f32.mrb[68].mxu0 }
 0x6bf   : > { %2367 = vmax.xlane.f32.xlu0 %v8183_v29  ;;  %2373 = vmax.xlane.f32.xlu1 %v8186_v48  ;;  %v8190_v44 = vpop.f32.mrb[69].mxu0 }
 0x6c0   : > { %v8192_v62 = vpop.f32.mrb[70].mxu0 }
 0x6c1   : > { %v8194_v22 = vpop.f32.mrb[71].mxu0 }
 0x6c3   : > { %2369 = vmax.xlane.f32.xlu1 %v8190_v44  ;;  %2371 = vmax.xlane.f32.xlu0 %v8194_v22 }
 0x6c6   : > { %v8198_v42 = vpop.f32.mrb[72].mxu0 }
 0x6c7   : > { %2375 = vmax.xlane.f32.xlu1 %v8192_v62  ;;  %2381 = vmax.xlane.f32.xlu0 %v8198_v42  ;;  %v8202_v32 = vpop.f32.mrb[73].mxu0 }
 0x6c8   : > { %v8204_v16 = vpop.f32.mrb[74].mxu0 }
 0x6c9   : > { %v8206_v47 = vpop.f32.mrb[75].mxu0 }
 0x6cb   : > { %2377 = vmax.xlane.f32.xlu1 %v8202_v32 }
 0x6ce   : > { %v8209_v40 = vpop.f32.mrb[76].mxu0 }
 0x6cf   : > { %2383 = vmax.xlane.f32.xlu1 %v8204_v16  ;;  %v8212_v19 = vpop.f32.mrb[77].mxu0 }
 0x6d0   : > { %2385 = vmax.xlane.f32.xlu0 %v8212_v19  ;;  %v8215_v35 = vpop.f32.mrb[78].mxu0 }
 0x6d1   : > { %v8217_v57 = vpop.f32.mrb[79].mxu0 }
 0x6d3   : > { %2379 = vmax.xlane.f32.xlu1 %v8206_v47 }
 0x6d7   : > { %2389 = vmax.xlane.f32.xlu1 %v8209_v40 }
 0x6db   : > { %2391 = vmax.xlane.f32.xlu1 %v8215_v35 }
 0x6e6   : > { %2741 = vrot.lane.b32.xlu0 %v7424_v56, %s7009_s12 }
 0x6ec   : > { %2739 = vrot.lane.b32.xlu1 %v7408_v43, %s7009_s12 }
 0x6f0   : > { %2717 = vrot.lane.b32.xlu1 %v7369_v11, %s7009_s12 }
 0x6f4   : > { %2721 = vrot.lane.b32.xlu1 %v7387_v24, %s7009_s12 }
 0x6f8   : > { %2725 = vrot.lane.b32.xlu1 %v7403_v37, %s7009_s12 }
 0x6fc   : > { %2729 = vrot.lane.b32.xlu1 %v7419_v50, %s7009_s12 }
 0x700   : > { %3014 = vrot.lane.b32.xlu1 %v7360_v7, %s7009_s12 }
 0x704   : > { %3016 = vrot.lane.b32.xlu1 %v7378_v20, %s7009_s12 }
 0x705   : > { %2387 = vmax.xlane.f32.xlu0 %v8217_v57 }
 0x708   : > { %3020 = vrot.lane.b32.xlu1 %v7410_v46, %s7009_s12 }
 0x70c   : > { %3022 = vrot.lane.b32.xlu1 %v7426_v58, %s7009_s12 }
 0x710   : > { %3026 = vrot.lane.b32.xlu1 %v7452_v14, %s7009_s12 }
 0x714   : > { %3266 = vrot.lane.b32.xlu1 %v7376_v17, %s7010_s9 }
 0x71b   : > { %2743 = vrot.lane.b32.xlu0 %v7436_v1, %s7009_s12 }
 0x71f   : > { %2745 = vrot.lane.b32.xlu0 %v7450_v10, %s7009_s12 }
 0x723   : > { %2715 = vrot.lane.b32.xlu0 %v7372_v13, %s7009_s12 }
 0x727   : > { %2719 = vrot.lane.b32.xlu0 %v7390_v26, %s7009_s12 }
 0x72b   : > { %2723 = vrot.lane.b32.xlu0 %v7406_v39, %s7009_s12 }
 0x72f   : > { %2727 = vrot.lane.b32.xlu0 %v7422_v52, %s7009_s12 }
 0x733   : > { %3012 = vrot.lane.b32.xlu0 %v7348_v63, %s7009_s12 }
 0x737   : > { %3018 = vrot.lane.b32.xlu0 %v7394_v33, %s7009_s12 }
 0x73b   : > { %3024 = vrot.lane.b32.xlu0 %v7438_v3, %s7009_s12 }
 0x73f   : > { %3262 = vrot.lane.b32.xlu0 %v7346_v61, %s7010_s9 }
 0x743   : > { %3264 = vrot.lane.b32.xlu0 %v7358_v4, %s7010_s9 }
 0x744   : > { %v2366_v36 = vpop.xlane.xlu0 %2365 }
 0x745   : > { %v2395_v49 = vsub.f32 %v8178_v55, %v2366_v36 }
 0x747   : > { %v2364_v51 = vpop.xlane.xlu1 %2363  ;;  %3268 = vrot.lane.b32.xlu0 %v10257_v31, %s7010_s9  ;;  %v2413_v18 = vmul.f32 1.442695, %v2395_v49 }
 0x748   : > { %v2394_v60 = vsub.f32 %v2301_v2, %v2364_v51  ;;  %v2362_v5 = vpop.xlane.xlu0 %2361 }
 0x749   : > { %v2393_v15 = vsub.f32 %v8181_v59, %v2362_v5  ;;  %v2772_v59 = vsel %vm687_vm0, %v8142_v27, 0 }
 0x74a   : > { %v2411_v21 = vmul.f32 1.442695, %v2394_v60 }
 0x74b   : > { %v2409_v45 = vmul.f32 1.442695, %v2393_v15 }
 0x74c   : > { %6369 = vpow2.f32 %v2411_v21  ;;  %v2374_v12 = vpop.xlane.xlu1 %2373  ;;  %v2368_v41 = vpop.xlane.xlu0 %2367 }
 0x74d   : > { %6371 = vpow2.f32 %v2409_v45  ;;  %v2396_v6 = vsub.f32 %v8183_v29, %v2368_v41  ;;  %v2399_v53 = vsub.f32 %v8186_v48, %v2374_v12 }
 0x74e   : > { %6373 = vpow2.f32 %v2413_v18 }
 0x74f   : > { %v2415_v54 = vmul.f32 1.442695, %v2396_v6  ;;  %v2421_v21 = vmul.f32 1.442695, %v2399_v53 }
 0x750   : > { %v2370_v30 = vpop.xlane.xlu1 %2369  ;;  %v2372_v38 = vpop.xlane.xlu0 %2371 }
 0x751   : > { %v2397_v51 = vsub.f32 %v8190_v44, %v2370_v30  ;;  %v2398_v36 = vsub.f32 %v8194_v22, %v2372_v38  ;;  %6375 = vpow2.f32 %v2415_v54 }
 0x753   : > { %v2417_v60 = vmul.f32 1.442695, %v2397_v51  ;;  %v2419_v5 = vmul.f32 1.442695, %v2398_v36 }
 0x754   : > { %v2376_v15 = vpop.xlane.xlu1 %2375  ;;  %v2382_v38 = vpop.xlane.xlu0 %2381 }
 0x755   : > { %6377 = vpow2.f32 %v2417_v60  ;;  %v2400_v45 = vsub.f32 %v8192_v62, %v2376_v15  ;;  %v2403_v44 = vsub.f32 %v8198_v42, %v2382_v38 }
 0x756   : > { %v8284_v49 = vpop.eup %6369  ;;  %6379 = vpow2.f32 %v2419_v5 }
 0x757   : > { %10351 = vst [vmem:[#allocation114_spill] sm:$0xff] %v8284_v49  ;;  %v8286_v6 = vpop.eup %6371  ;;  %v2423_v41 = vmul.f32 1.442695, %v2400_v45  ;;  %6381 = vpow2.f32 %v2421_v21  ;;  %v2429_v60 = vmul.f32 1.442695, %v2403_v44 }
 0x758   : > { %v2378_v18 = vpop.xlane.xlu1 %2377  ;;  %v2473_v30 = vpack.c.bf16 %v8284_v49, %v8286_v6  ;;  %v8290_v54 = vpop.eup %6373 }
 0x759   : > { %6383 = vpow2.f32 %v2423_v41  ;;  %v2401_v53 = vsub.f32 %v8202_v32, %v2378_v18 }
 0x75a   : > { %5803 = vmatprep.mubr.bf16.mxu1 %v2473_v30  ;;  %v2778_v30 = vsel %vm687_vm0, %v8271_v28, 0 }
 0x75b   : > { %v8293_v12 = vpop.eup %6375  ;;  %v2425_v55 = vmul.f32 1.442695, %v2401_v53 }
 0x75c   : > { %10352 = vst [vmem:[#allocation115_spill] sm:$0xff] %v8293_v12  ;;  %v2384_v2 = vpop.xlane.xlu1 %2383  ;;  %v2474_v22 = vpack.c.bf16 %v8293_v12, %v8290_v54 }
 0x75d   : > { %v2404_v48 = vsub.f32 %v8204_v16, %v2384_v2  ;;  %6385 = vpow2.f32 %v2425_v55 }
 0x75e   : > { %5804 = vmatmul.mubr.bf16.vlgmr.msra.gmra.mrb[80].mxu1 %v2474_v22 }
 0x75f   : > { %v8299_v62 = vpop.eup %6377  ;;  %v2431_v32 = vmul.f32 1.442695, %v2404_v48  ;;  %5820 = vmatpush3.bf16.xpose.msra.mxu1 %v2772_v59  ;;  %v2781_v48 = vsel %vm687_vm0, %v8269_v34, 0 }
 0x760   : > { %10353 = vst [vmem:[#allocation116_spill] sm:$0xff] %v8299_v62  ;;  %v8303_v29 = vpop.eup %6379  ;;  %v2380_v51 = vpop.xlane.xlu1 %2379  ;;  %6140 = vmatprep.subr.msk.bf16.mxu1 %vm687_vm0, %v8263_v25 }
 0x761   : > { %10354 = vst [vmem:[#allocation117_spill] sm:$0xff] %v8303_v29  ;;  %v2402_v16 = vsub.f32 %v8206_v47, %v2380_v51  ;;  %v2475_v42 = vpack.c.bf16 %v8303_v29, %v8299_v62  ;;  %v8310_v36 = vpop.eup %6381  ;;  %6387 = vpow2.f32 %v2431_v32  ;;  %v2775_v47 = vsel %vm687_vm0, %v8263_v25, 0 }
 0x762   : > { %10355 = vst [vmem:[#allocation118_spill] sm:$0xff] %v8310_v36 }
 0x763   : > { %v8312_v5 = vpop.eup %6383  ;;  %v2427_v27 = vmul.f32 1.442695, %v2402_v16  ;;  %5807 = vmatprep.mubr.bf16.mxu1 %v2475_v42 }
 0x764   : > { %10356 = vst [vmem:[#allocation119_spill] sm:$0xff] %v8312_v5  ;;  %v2476_v21 = vpack.c.bf16 %v8312_v5, %v8310_v36  ;;  %v2390_v15 = vpop.xlane.xlu1 %2389 }
 0x765   : > { %6389 = vpow2.f32 %v2427_v27 }
 0x766   : > { %6391 = vpow2.f32 %v2429_v60  ;;  %5808 = vmatmul.mubr.bf16.gmra.mrb[84].mxu1 %v2476_v21 }
 0x767   : > { %5822 = vmatpush3.bf16.xpose.msra.mxu1 %v2775_v47  ;;  %v8320_v45 = vpop.eup %6385 }
 0x768   : > { %6141 = vmatprep.subr.msk.bf16.mxu1 %vm687_vm0, %v8271_v28  ;;  %10357 = vst [vmem:[#allocation120_spill] sm:$0xff] %v8320_v45  ;;  %v2392_v2 = vpop.xlane.xlu1 %2391  ;;  %v2386_v28 = vpop.xlane.xlu0 %2385 }
 0x769   : > { %v2405_v32 = vsub.f32 %v8212_v19, %v2386_v28  ;;  %v2408_v51 = vsub.f32 %v8215_v35, %v2392_v2 }
 0x76b   : > { %v8322_v41 = vpop.eup %6387  ;;  %v2433_v16 = vmul.f32 1.442695, %v2405_v32  ;;  %v2439_v42 = vmul.f32 1.442695, %v2408_v51 }
 0x76c   : > { %10358 = vst [vmem:[#allocation121_spill] sm:$0xff] %v8322_v41  ;;  %v2740_v22 = vpop.permute.xlu1 %2739  ;;  %v2742_v55 = vpop.permute.xlu0 %2741 }
 0x76d   : > { %v2784_v44 = vsel %vm687_vm0, %v2740_v22, 0  ;;  %v2787_v59 = vsel %vm687_vm0, %v2742_v55, 0  ;;  %6393 = vpow2.f32 %v2433_v16 }
 0x76e   : > { %6395 = vpow2.f32 %v2439_v42 }
 0x76f   : > { %v8324_v18 = vpop.eup %6389  ;;  %5824 = vmatpush3.bf16.xpose.msra.mxu1 %v2778_v30 }
 0x770   : > { %10359 = vst [vmem:[#allocation122_spill] sm:$0xff] %v8324_v18  ;;  %v8328_v38 = vpop.eup %6391  ;;  %v2477_v25 = vpack.c.bf16 %v8324_v18, %v8320_v45  ;;  %6142 = vmatprep.subr.msk.bf16.mxu1 %vm687_vm0, %v8269_v34  ;;  %v2407_v34 = vsub.f32 %v8209_v40, %v2390_v15  ;;  %v2718_v30 = vpop.permute.xlu1 %2717 }
 0x771   : > { %10360 = vst [vmem:[#allocation123_spill] sm:$0xff] %v8328_v38  ;;  %v2478_v53 = vpack.c.bf16 %v8322_v41, %v8328_v38 }
 0x772   : > { %5811 = vmatprep.mubr.bf16.mxu1 %v2477_v25  ;;  %v2437_v21 = vmul.f32 1.442695, %v2407_v34 }
 0x773   : > { %5812 = vmatmul.mubr.bf16.gmra.mrb[88].mxu1 %v2478_v53 }
 0x774   : > { %v2722_v40 = vpop.permute.xlu1 %2721 }
 0x777   : > { %5826 = vmatpush3.bf16.xpose.msra.mxu1 %v2781_v48  ;;  %v8349_v53 = vpop.eup %6393 }
 0x778   : > { %6143 = vmatprep.subr.msk.bf16.mxu1 %vm687_vm0, %v2740_v22  ;;  %10361 = vst [vmem:[#allocation124_spill] sm:$0xff] %v8349_v53  ;;  %v8352_v2 = vpop.eup %6395  ;;  %v2726_v28 = vpop.permute.xlu1 %2725 }
 0x779   : > { %10362 = vst [vmem:[#allocation125_spill] sm:$0xff] %v8352_v2 }
 0x77c   : > { %v2730_v51 = vpop.permute.xlu1 %2729 }
 0x77f   : > { %5828 = vmatpush3.bf16.xpose.msra.mxu1 %v2784_v44 }
 0x780   : > { %6144 = vmatprep.subr.msk.bf16.mxu1 %vm687_vm0, %v2742_v55  ;;  %v3015_v16 = vpop.permute.xlu1 %3014 }
 0x787   : > { %5830 = vmatpush3.bf16.xpose.msra.mxu1 %v2787_v59 }
 0x792   : > { %v2388_v60 = vpop.xlane.xlu0 %2387 }
 0x793   : > { %v2406_v27 = vsub.f32 %v8217_v57, %v2388_v60  ;;  %v3017_v60 = vpop.permute.xlu1 %3016 }
 0x795   : > { %v2435_v47 = vmul.f32 1.442695, %v2406_v27 }
 0x796   : > { %v2744_v25 = vpop.permute.xlu0 %2743 }
 0x797   : > { %6397 = vpow2.f32 %v2435_v47  ;;  %6145 = vmatprep.subr.msk.bf16.mxu1 %vm687_vm0, %v2744_v25  ;;  %v2790_v19 = vsel %vm687_vm0, %v2744_v25, 0 }
 0x798   : > { %6399 = vpow2.f32 %v2437_v21  ;;  %5832 = vmatpush3.bf16.xpose.msra.mxu1 %v2790_v19  ;;  %v3021_v21 = vpop.permute.xlu1 %3020 }
 0x79a   : > { %v2746_v35 = vpop.permute.xlu0 %2745 }
 0x79b   : > { %6146 = vmatprep.subr.msk.bf16.mxu1 %vm687_vm0, %v2746_v35  ;;  %v2793_v57 = vsel %vm687_vm0, %v2746_v35, 0 }
 0x79c   : > { %v3023_v47 = vpop.permute.xlu1 %3022 }
 0x79e   : > { %v2716_v15 = vpop.permute.xlu0 %2715 }
 0x7a0   : > { %5834 = vmatpush3.bf16.xpose.msra.mxu1 %v2793_v57  ;;  %v3027_v25 = vpop.permute.xlu1 %3026 }
 0x7a1   : > { %v8354_v48 = vpop.eup %6397 }
 0x7a2   : > { %10363 = vst [vmem:[#allocation126_spill] sm:$0xff] %v8354_v48  ;;  %v8356_v22 = vpop.eup %6399  ;;  %v2720_v44 = vpop.permute.xlu0 %2719  ;;  %v2479_v55 = vpack.c.bf16 %v8354_v48, %v8349_v53 }
 0x7a3   : > { %10364 = vst [vmem:[#allocation127_spill] sm:$0xff] %v8356_v22  ;;  %v2480_v59 = vpack.c.bf16 %v8352_v2, %v8356_v22 }
 0x7a4   : > { %5815 = vmatprep.mubr.bf16.mxu1 %v2479_v55 }
 0x7a5   : > { %5816 = vmatmul.mubr.bf16.gmra.mrb[92].mxu1 %v2480_v59 }
 0x7a6   : > { %5835 = vmatprep.mubr.msk.bf16.mxu1 %vm687_vm0, %v2716_v15  ;;  %v2724_v32 = vpop.permute.xlu0 %2723 }
 0x7aa   : > { %v2728_v34 = vpop.permute.xlu0 %2727 }
 0x7ad   : > { %5836 = vmatmul.mubr.msk.bf16.vlgmr.msra.gmra.mrb[96].mxu1 %vm687_vm0, %v2718_v30 }
 0x7ae   : > { %5839 = vmatprep.mubr.msk.bf16.mxu1 %vm687_vm0, %v2720_v44  ;;  %v3013_v42 = vpop.permute.xlu0 %3012 }
 0x7af   : > { %5851 = vmatprep.subr.bf16.mxu0 %v3013_v42 }
 0x7b0   : > { %5852 = vmatpush3.bf16.msra.mxu0 %v3013_v42 }
 0x7b1   : > { %5853 = vmatprep.subr.bf16.mxu0 %v3015_v16 }
 0x7b2   : > { %v3019_v27 = vpop.permute.xlu0 %3018 }
 0x7b4   : > { %5854 = vmatpush3.bf16.msra.mxu0 %v3015_v16 }
 0x7b5   : > { %5840 = vmatmul.mubr.msk.bf16.gmra.mrb[100].mxu1 %vm687_vm0, %v2722_v40  ;;  %5855 = vmatprep.subr.bf16.mxu0 %v3017_v60 }
 0x7b6   : > { %5843 = vmatprep.mubr.msk.bf16.mxu1 %vm687_vm0, %v2724_v32  ;;  %v3025_v30 = vpop.permute.xlu0 %3024 }
 0x7b8   : > { %5856 = vmatpush3.bf16.msra.mxu0 %v3017_v60 }
 0x7b9   : > { %5857 = vmatprep.subr.bf16.mxu0 %v3019_v27 }
 0x7ba   : > { %v8370_v19 = vpop.permute.xlu0 %3262 }
 0x7bc   : > { %5858 = vmatpush3.bf16.msra.mxu0 %v3019_v27 }
 0x7bd   : > { %5844 = vmatmul.mubr.msk.bf16.gmra.mrb[104].mxu1 %vm687_vm0, %v2726_v28  ;;  %5859 = vmatprep.subr.bf16.mxu0 %v3021_v21 }
 0x7be   : > { %5847 = vmatprep.mubr.msk.bf16.mxu1 %vm687_vm0, %v2728_v34 }
 0x7c0   : > { %5860 = vmatpush3.bf16.msra.mxu0 %v3021_v21 }
 0x7c1   : > { %5861 = vmatprep.subr.bf16.mxu0 %v3023_v47 }
 0x7c4   : > { %5862 = vmatpush3.bf16.msra.mxu0 %v3023_v47 }
 0x7c5   : > { %5848 = vmatmul.mubr.msk.bf16.gmra.mrb[108].mxu1 %vm687_vm0, %v2730_v51  ;;  %5863 = vmatprep.subr.bf16.mxu0 %v3025_v30 }
 0x7c8   : > { %5864 = vmatpush3.bf16.msra.mxu0 %v3025_v30 }
 0x7c9   : > { %5865 = vmatprep.subr.bf16.mxu0 %v3027_v25 }
 0x7cc   : > { %5866 = vmatpush3.bf16.msra.mxu0 %v3027_v25 }
 0x7cd   : > { %6147 = vmatprep.subr.msk.bf16.mxu0 %vm687_vm0, %v8370_v19 }
 0x831   : > { %v8374_v35 = vpop.f32.mrb[80].mxu1 }
 0x832   : > { %10365 = vst [vmem:[#allocation128_spill] sm:$0xff] %v8374_v35  ;;  %v8376_v40 = vpop.f32.mrb[81].mxu1  ;;  %v8491_v35 = vpop.permute.xlu0 %3264 }
 0x833   : > { %10366 = vst [vmem:[#allocation129_spill] sm:$0xff] %v8376_v40  ;;  %v8378_v15 = vpop.f32.mrb[82].mxu1 }
 0x834   : > { %10367 = vst [vmem:[#allocation130_spill] sm:$0xff] %v8378_v15  ;;  %v8380_v57 = vpop.f32.mrb[83].mxu1 }
 0x835   : > { %10368 = vst [vmem:[#allocation131_spill] sm:$0xff] %v8380_v57  ;;  %v8499_v57 = vpop.permute.xlu1 %3266 }
 0x836   : > { %v8497_v40 = vpop.permute.xlu0 %3268 }
 0x839   : > { %v8382_v28 = vpop.f32.mrb[84].mxu1 }
 0x83a   : > { %10369 = vst [vmem:[#allocation132_spill] sm:$0xff] %v8382_v28  ;;  %v8384_v44 = vpop.f32.mrb[85].mxu1 }
 0x83b   : > { %10370 = vst [vmem:[#allocation133_spill] sm:$0xff] %v8384_v44  ;;  %v8386_v55 = vpop.f32.mrb[86].mxu1 }
 0x83c   : > { %10371 = vst [vmem:[#allocation134_spill] sm:$0xff] %v8386_v55  ;;  %v8388_v59 = vpop.f32.mrb[87].mxu1 }
 0x83d   : > { %10372 = vst [vmem:[#allocation135_spill] sm:$0xff] %v8388_v59 }
 0x846   : > { %v8390_v32 = vpop.f32.mrb[88].mxu1 }
 0x847   : > { %10373 = vst [vmem:[#allocation136_spill] sm:$0xff] %v8390_v32  ;;  %v8392_v51 = vpop.f32.mrb[89].mxu1 }
 0x848   : > { %10374 = vst [vmem:[#allocation137_spill] sm:$0xff] %v8392_v51  ;;  %v8394_v34 = vpop.f32.mrb[90].mxu1 }
 0x849   : > { %10375 = vst [vmem:[#allocation138_spill] sm:$0xff] %v8394_v34  ;;  %v8396_v16 = vpop.f32.mrb[91].mxu1 }
 0x84a   : > { %10376 = vst [vmem:[#allocation139_spill] sm:$0xff] %v8396_v16 }
 0x878   : > { %v8398_v42 = vpop.f32.mrb[92].mxu1 }
 0x879   : > { %10377 = vst [vmem:[#allocation140_spill] sm:$0xff] %v8398_v42  ;;  %v8400_v60 = vpop.f32.mrb[93].mxu1 }
 0x87a   : > { %10378 = vst [vmem:[#allocation141_spill] sm:$0xff] %v8400_v60  ;;  %v8402_v27 = vpop.f32.mrb[94].mxu1 }
 0x87b   : > { %10379 = vst [vmem:[#allocation142_spill] sm:$0xff] %v8402_v27  ;;  %v8404_v21 = vpop.f32.mrb[95].mxu1 }
 0x87c   : > { %10380 = vst [vmem:[#allocation143_spill] sm:$0xff] %v8404_v21 }
 0x880   : > { %v8406_v47 = vpop.f32.mrb[96].mxu1 }
 0x881   : > { %2896 = vmax.xlane.f32.xlu0 %v8406_v47  ;;  %v8409_v30 = vpop.f32.mrb[97].mxu1 }
 0x882   : > { %v8411_v25 = vpop.f32.mrb[98].mxu1 }
 0x883   : > { %v2832_v32 = vpop.f32.mrb[99].mxu1 }
 0x884   : > { %2894 = vmax.xlane.f32.xlu1 %v2832_v32 }
 0x885   : > { %2892 = vmax.xlane.f32.xlu0 %v8409_v30 }
 0x888   : > { %v8414_v34 = vpop.f32.mrb[100].mxu1 }
 0x889   : > { %2898 = vmax.xlane.f32.xlu0 %v8411_v25  ;;  %2904 = vmax.xlane.f32.xlu1 %v8414_v34  ;;  %v8418_v27 = vpop.f32.mrb[101].mxu1 }
 0x88a   : > { %v8420_v42 = vpop.f32.mrb[102].mxu1 }
 0x88b   : > { %v8422_v21 = vpop.f32.mrb[103].mxu1 }
 0x88d   : > { %2900 = vmax.xlane.f32.xlu1 %v8418_v27  ;;  %2902 = vmax.xlane.f32.xlu0 %v8422_v21 }
 0x890   : > { %v8426_v60 = vpop.f32.mrb[104].mxu1 }
 0x891   : > { %2906 = vmax.xlane.f32.xlu1 %v8420_v42  ;;  %2912 = vmax.xlane.f32.xlu0 %v8426_v60  ;;  %v8430_v16 = vpop.f32.mrb[105].mxu1 }
 0x892   : > { %v8432_v51 = vpop.f32.mrb[106].mxu1 }
 0x893   : > { %v8434_v55 = vpop.f32.mrb[107].mxu1 }
 0x895   : > { %2908 = vmax.xlane.f32.xlu1 %v8430_v16 }
 0x898   : > { %v8437_v59 = vpop.f32.mrb[108].mxu1 }
 0x899   : > { %2914 = vmax.xlane.f32.xlu1 %v8432_v51  ;;  %v8440_v28 = vpop.f32.mrb[109].mxu1 }
 0x89a   : > { %2916 = vmax.xlane.f32.xlu0 %v8440_v28  ;;  %v8443_v44 = vpop.f32.mrb[110].mxu1 }
 0x89b   : > { %v8445_v15 = vpop.f32.mrb[111].mxu1 }
 0x89d   : > { %2910 = vmax.xlane.f32.xlu1 %v8434_v55 }
 0x8a1   : > { %2920 = vmax.xlane.f32.xlu1 %v8437_v59 }
 0x8a5   : > { %2922 = vmax.xlane.f32.xlu1 %v8443_v44 }
 0x8b0   : > { %3272 = vrot.lane.b32.xlu0 %v7424_v56, %s7010_s9 }
 0x8b6   : > { %3270 = vrot.lane.b32.xlu1 %v7408_v43, %s7010_s9 }
 0x8ba   : > { %3248 = vrot.lane.b32.xlu1 %v7369_v11, %s7010_s9 }
 0x8be   : > { %3252 = vrot.lane.b32.xlu1 %v7387_v24, %s7010_s9 }
 0x8c2   : > { %3256 = vrot.lane.b32.xlu1 %v7403_v37, %s7010_s9 }
 0x8c6   : > { %3260 = vrot.lane.b32.xlu1 %v7419_v50, %s7010_s9 }
 0x8ca   : > { %3545 = vrot.lane.b32.xlu1 %v7360_v7, %s7010_s9 }
 0x8ce   : > { %3547 = vrot.lane.b32.xlu1 %v7378_v20, %s7010_s9 }
 0x8cf   : > { %2918 = vmax.xlane.f32.xlu0 %v8445_v15 }
 0x8d2   : > { %3551 = vrot.lane.b32.xlu1 %v7410_v46, %s7010_s9 }
 0x8d6   : > { %3553 = vrot.lane.b32.xlu1 %v7426_v58, %s7010_s9 }
 0x8da   : > { %3557 = vrot.lane.b32.xlu1 %v7452_v14, %s7010_s9 }
 0x8de   : > { %3797 = vrot.lane.b32.xlu1 %v7376_v17, %s7011_s25 }
 0x8e5   : > { %3274 = vrot.lane.b32.xlu0 %v7436_v1, %s7010_s9 }
 0x8e9   : > { %3276 = vrot.lane.b32.xlu0 %v7450_v10, %s7010_s9 }
 0x8ed   : > { %3246 = vrot.lane.b32.xlu0 %v7372_v13, %s7010_s9 }
 0x8f1   : > { %3250 = vrot.lane.b32.xlu0 %v7390_v26, %s7010_s9 }
 0x8f5   : > { %3254 = vrot.lane.b32.xlu0 %v7406_v39, %s7010_s9 }
 0x8f9   : > { %3258 = vrot.lane.b32.xlu0 %v7422_v52, %s7010_s9 }
 0x8fd   : > { %3543 = vrot.lane.b32.xlu0 %v7348_v63, %s7010_s9 }
 0x901   : > { %3549 = vrot.lane.b32.xlu0 %v7394_v33, %s7010_s9 }
 0x905   : > { %3555 = vrot.lane.b32.xlu0 %v7438_v3, %s7010_s9 }
 0x909   : > { %3793 = vrot.lane.b32.xlu0 %v7346_v61, %s7011_s25 }
 0x90d   : > { %3795 = vrot.lane.b32.xlu0 %v7358_v4, %s7011_s25 }
 0x90e   : > { %v2897_v2 = vpop.xlane.xlu0 %2896 }
 0x90f   : > { %v2926_v22 = vsub.f32 %v8406_v47, %v2897_v2 }
 0x911   : > { %v2895_v48 = vpop.xlane.xlu1 %2894  ;;  %3799 = vrot.lane.b32.xlu0 %v10257_v31, %s7011_s25  ;;  %v2944_v12 = vmul.f32 1.442695, %v2926_v22 }
 0x912   : > { %v2925_v41 = vsub.f32 %v2832_v32, %v2895_v48  ;;  %v2893_v18 = vpop.xlane.xlu0 %2892 }
 0x913   : > { %v2924_v53 = vsub.f32 %v8409_v30, %v2893_v18  ;;  %v3303_v30 = vsel %vm687_vm0, %v8370_v19, 0 }
 0x914   : > { %v2942_v5 = vmul.f32 1.442695, %v2925_v41 }
 0x915   : > { %v2940_v29 = vmul.f32 1.442695, %v2924_v53 }
 0x916   : > { %6401 = vpow2.f32 %v2942_v5  ;;  %v2905_v38 = vpop.xlane.xlu1 %2904  ;;  %v2899_v45 = vpop.xlane.xlu0 %2898 }
 0x917   : > { %6403 = vpow2.f32 %v2940_v29  ;;  %v2927_v49 = vsub.f32 %v8411_v25, %v2899_v45  ;;  %v2930_v62 = vsub.f32 %v8414_v34, %v2905_v38 }
 0x918   : > { %6405 = vpow2.f32 %v2944_v12 }
 0x919   : > { %v2946_v36 = vmul.f32 1.442695, %v2927_v49  ;;  %v2952_v5 = vmul.f32 1.442695, %v2930_v62 }
 0x91a   : > { %v2901_v23 = vpop.xlane.xlu1 %2900  ;;  %v2903_v8 = vpop.xlane.xlu0 %2902 }
 0x91b   : > { %v2928_v48 = vsub.f32 %v8418_v27, %v2901_v23  ;;  %v2929_v2 = vsub.f32 %v8422_v21, %v2903_v8  ;;  %6407 = vpow2.f32 %v2946_v36 }
 0x91d   : > { %v2948_v41 = vmul.f32 1.442695, %v2928_v48  ;;  %v2950_v18 = vmul.f32 1.442695, %v2929_v2 }
 0x91e   : > { %v2907_v53 = vpop.xlane.xlu1 %2906  ;;  %v2913_v62 = vpop.xlane.xlu0 %2912 }
 0x91f   : > { %6409 = vpow2.f32 %v2948_v41  ;;  %v2931_v29 = vsub.f32 %v8420_v42, %v2907_v53  ;;  %v2934_v27 = vsub.f32 %v8426_v60, %v2913_v62 }
 0x920   : > { %v8512_v22 = vpop.eup %6401  ;;  %6411 = vpow2.f32 %v2950_v18 }
 0x921   : > { %v8514_v49 = vpop.eup %6403  ;;  %v2954_v45 = vmul.f32 1.442695, %v2931_v29  ;;  %6413 = vpow2.f32 %v2952_v5  ;;  %v2960_v41 = vmul.f32 1.442695, %v2934_v27 }
 0x922   : > { %v2909_v12 = vpop.xlane.xlu1 %2908  ;;  %v3004_v23 = vpack.c.bf16 %v8512_v22, %v8514_v49  ;;  %v8518_v8 = vpop.eup %6405 }
 0x923   : > { %6415 = vpow2.f32 %v2954_v45  ;;  %v2932_v36 = vsub.f32 %v8430_v16, %v2909_v12 }
 0x924   : > { %5867 = vmatprep.mubr.bf16.mxu0 %v3004_v23  ;;  %v3309_v23 = vsel %vm687_vm0, %v8499_v57, 0 }
 0x925   : > { %v8521_v38 = vpop.eup %6407  ;;  %v2956_v47 = vmul.f32 1.442695, %v2932_v36 }
 0x926   : > { %v2915_v32 = vpop.xlane.xlu1 %2914  ;;  %v3005_v42 = vpack.c.bf16 %v8521_v38, %v8518_v8 }
 0x927   : > { %v2935_v34 = vsub.f32 %v8432_v51, %v2915_v32  ;;  %6417 = vpow2.f32 %v2956_v47 }
 0x928   : > { %5868 = vmatmul.mubr.bf16.vlgmr.msra.gmra.mrb[80].mxu0 %v3005_v42 }
 0x929   : > { %v8527_v21 = vpop.eup %6409  ;;  %v2962_v16 = vmul.f32 1.442695, %v2935_v34  ;;  %5884 = vmatpush3.bf16.xpose.msra.mxu0 %v3303_v30  ;;  %v3312_v34 = vsel %vm687_vm0, %v8497_v40, 0 }
 0x92a   : > { %v8531_v25 = vpop.eup %6411  ;;  %v2911_v48 = vpop.xlane.xlu1 %2910  ;;  %6148 = vmatprep.subr.msk.bf16.mxu0 %vm687_vm0, %v8491_v35 }
 0x92b   : > { %v2933_v51 = vsub.f32 %v8434_v55, %v2911_v48  ;;  %v3006_v60 = vpack.c.bf16 %v8531_v25, %v8527_v21  ;;  %v8538_v2 = vpop.eup %6413  ;;  %6419 = vpow2.f32 %v2962_v16  ;;  %v3306_v55 = vsel %vm687_vm0, %v8491_v35, 0 }
 0x92d   : > { %v8540_v18 = vpop.eup %6415  ;;  %v2958_v19 = vmul.f32 1.442695, %v2933_v51  ;;  %5871 = vmatprep.mubr.bf16.mxu0 %v3006_v60 }
 0x92e   : > { %v3007_v5 = vpack.c.bf16 %v8540_v18, %v8538_v2  ;;  %v2921_v53 = vpop.xlane.xlu1 %2920 }
 0x92f   : > { %6421 = vpow2.f32 %v2958_v19 }
 0x930   : > { %6423 = vpow2.f32 %v2960_v41  ;;  %5872 = vmatmul.mubr.bf16.gmra.mrb[84].mxu0 %v3007_v5 }
 0x931   : > { %5886 = vmatpush3.bf16.xpose.msra.mxu0 %v3306_v55  ;;  %v8548_v29 = vpop.eup %6417 }
 0x932   : > { %6149 = vmatprep.subr.msk.bf16.mxu0 %vm687_vm0, %v8499_v57  ;;  %v2923_v32 = vpop.xlane.xlu1 %2922  ;;  %v2917_v57 = vpop.xlane.xlu0 %2916 }
 0x933   : > { %v2936_v16 = vsub.f32 %v8440_v28, %v2917_v57  ;;  %v2939_v48 = vsub.f32 %v8443_v44, %v2923_v32 }
 0x935   : > { %v8550_v45 = vpop.eup %6419  ;;  %v2964_v51 = vmul.f32 1.442695, %v2936_v16  ;;  %v2970_v60 = vmul.f32 1.442695, %v2939_v48 }
 0x936   : > { %v3271_v42 = vpop.permute.xlu1 %3270  ;;  %v3273_v47 = vpop.permute.xlu0 %3272 }
 0x937   : > { %v3315_v27 = vsel %vm687_vm0, %v3271_v42, 0  ;;  %v3318_v30 = vsel %vm687_vm0, %v3273_v47, 0  ;;  %6425 = vpow2.f32 %v2964_v51 }
 0x938   : > { %6427 = vpow2.f32 %v2970_v60 }
 0x939   : > { %v8552_v12 = vpop.eup %6421  ;;  %5888 = vmatpush3.bf16.xpose.msra.mxu0 %v3309_v23 }
 0x93a   : > { %v8556_v62 = vpop.eup %6423  ;;  %v3008_v35 = vpack.c.bf16 %v8552_v12, %v8548_v29  ;;  %6150 = vmatprep.subr.msk.bf16.mxu0 %vm687_vm0, %v8497_v40  ;;  %v2938_v40 = vsub.f32 %v8437_v59, %v2921_v53  ;;  %v3249_v23 = vpop.permute.xlu1 %3248 }
 0x93b   : > { %v3009_v36 = vpack.c.bf16 %v8550_v45, %v8556_v62 }
 0x93c   : > { %5875 = vmatprep.mubr.bf16.mxu0 %v3008_v35  ;;  %v2968_v5 = vmul.f32 1.442695, %v2938_v40 }
 0x93d   : > { %5876 = vmatmul.mubr.bf16.gmra.mrb[88].mxu0 %v3009_v36 }
 0x93e   : > { %v3253_v59 = vpop.permute.xlu1 %3252 }
 0x941   : > { %5890 = vmatpush3.bf16.xpose.msra.mxu0 %v3312_v34  ;;  %v8577_v36 = vpop.eup %6425 }
 0x942   : > { %6151 = vmatprep.subr.msk.bf16.mxu0 %vm687_vm0, %v3271_v42  ;;  %v8580_v32 = vpop.eup %6427  ;;  %v3257_v57 = vpop.permute.xlu1 %3256 }
 0x946   : > { %v3261_v48 = vpop.permute.xlu1 %3260 }
 0x949   : > { %5892 = vmatpush3.bf16.xpose.msra.mxu0 %v3315_v27 }
 0x94a   : > { %6152 = vmatprep.subr.msk.bf16.mxu0 %vm687_vm0, %v3273_v47  ;;  %v3546_v51 = vpop.permute.xlu1 %3545 }
 0x951   : > { %5894 = vmatpush3.bf16.xpose.msra.mxu0 %v3318_v30 }
 0x95c   : > { %v2919_v41 = vpop.xlane.xlu0 %2918 }
 0x95d   : > { %v2937_v19 = vsub.f32 %v8445_v15, %v2919_v41  ;;  %v3548_v41 = vpop.permute.xlu1 %3547 }
 0x95f   : > { %v2966_v55 = vmul.f32 1.442695, %v2937_v19 }
 0x960   : > { %v3275_v35 = vpop.permute.xlu0 %3274 }
 0x961   : > { %6429 = vpow2.f32 %v2966_v55  ;;  %6153 = vmatprep.subr.msk.bf16.mxu0 %vm687_vm0, %v3275_v35  ;;  %v3321_v28 = vsel %vm687_vm0, %v3275_v35, 0 }
 0x962   : > { %6431 = vpow2.f32 %v2968_v5  ;;  %5896 = vmatpush3.bf16.xpose.msra.mxu0 %v3321_v28  ;;  %v3552_v5 = vpop.permute.xlu1 %3551 }
 0x964   : > { %v3277_v44 = vpop.permute.xlu0 %3276 }
 0x965   : > { %6154 = vmatprep.subr.msk.bf16.mxu0 %vm687_vm0, %v3277_v44  ;;  %v3324_v15 = vsel %vm687_vm0, %v3277_v44, 0 }
 0x966   : > { %v3554_v55 = vpop.permute.xlu1 %3553 }
 0x968   : > { %v3247_v53 = vpop.permute.xlu0 %3246 }
 0x96a   : > { %5898 = vmatpush3.bf16.xpose.msra.mxu0 %v3324_v15  ;;  %v3558_v35 = vpop.permute.xlu1 %3557 }
 0x96b   : > { %v8582_v34 = vpop.eup %6429 }
 0x96c   : > { %v8584_v42 = vpop.eup %6431  ;;  %v3251_v27 = vpop.permute.xlu0 %3250  ;;  %v3010_v47 = vpack.c.bf16 %v8582_v34, %v8577_v36 }
 0x96d   : > { %v3011_v30 = vpack.c.bf16 %v8580_v32, %v8584_v42 }
 0x96e   : > { %5879 = vmatprep.mubr.bf16.mxu0 %v3010_v47 }
 0x96f   : > { %5880 = vmatmul.mubr.bf16.gmra.mrb[92].mxu0 %v3011_v30 }
 0x970   : > { %5899 = vmatprep.mubr.msk.bf16.mxu0 %vm687_vm0, %v3247_v53  ;;  %v3255_v16 = vpop.permute.xlu0 %3254 }
 0x974   : > { %v3259_v40 = vpop.permute.xlu0 %3258 }
 0x977   : > { %5900 = vmatmul.mubr.msk.bf16.vlgmr.msra.gmra.mrb[96].mxu0 %vm687_vm0, %v3249_v23 }
 0x978   : > { %5903 = vmatprep.mubr.msk.bf16.mxu0 %vm687_vm0, %v3251_v27  ;;  %v3544_v60 = vpop.permute.xlu0 %3543 }
 0x979   : > { %5915 = vmatprep.subr.bf16.mxu1 %v3544_v60 }
 0x97a   : > { %5916 = vmatpush3.bf16.msra.mxu1 %v3544_v60 }
 0x97b   : > { %5917 = vmatprep.subr.bf16.mxu1 %v3546_v51 }
 0x97c   : > { %v3550_v19 = vpop.permute.xlu0 %3549 }
 0x97e   : > { %5918 = vmatpush3.bf16.msra.mxu1 %v3546_v51 }
 0x97f   : > { %5904 = vmatmul.mubr.msk.bf16.gmra.mrb[100].mxu0 %vm687_vm0, %v3253_v59  ;;  %5919 = vmatprep.subr.bf16.mxu1 %v3548_v41 }
 0x980   : > { %5907 = vmatprep.mubr.msk.bf16.mxu0 %vm687_vm0, %v3255_v16  ;;  %v3556_v23 = vpop.permute.xlu0 %3555 }
 0x982   : > { %5920 = vmatpush3.bf16.msra.mxu1 %v3548_v41 }
 0x983   : > { %5921 = vmatprep.subr.bf16.mxu1 %v3550_v19 }
 0x984   : > { %v8598_v28 = vpop.permute.xlu0 %3793 }
 0x986   : > { %5922 = vmatpush3.bf16.msra.mxu1 %v3550_v19 }
 0x987   : > { %5908 = vmatmul.mubr.msk.bf16.gmra.mrb[104].mxu0 %vm687_vm0, %v3257_v57  ;;  %5923 = vmatprep.subr.bf16.mxu1 %v3552_v5 }
 0x988   : > { %5911 = vmatprep.mubr.msk.bf16.mxu0 %vm687_vm0, %v3259_v40 }
 0x98a   : > { %5924 = vmatpush3.bf16.msra.mxu1 %v3552_v5 }
 0x98b   : > { %5925 = vmatprep.subr.bf16.mxu1 %v3554_v55 }
 0x98e   : > { %5926 = vmatpush3.bf16.msra.mxu1 %v3554_v55 }
 0x98f   : > { %5912 = vmatmul.mubr.msk.bf16.gmra.mrb[108].mxu0 %vm687_vm0, %v3261_v48  ;;  %5927 = vmatprep.subr.bf16.mxu1 %v3556_v23 }
 0x992   : > { %5928 = vmatpush3.bf16.msra.mxu1 %v3556_v23 }
 0x993   : > { %5929 = vmatprep.subr.bf16.mxu1 %v3558_v35 }
 0x996   : > { %5930 = vmatpush3.bf16.msra.mxu1 %v3558_v35 }
 0x997   : > { %6155 = vmatprep.subr.msk.bf16.mxu1 %vm687_vm0, %v8598_v28 }
 0x9fb   : > { %v8602_v44 = vpop.f32.mrb[80].mxu0 }
 0x9fc   : > { %10381 = vst [vmem:[#allocation144_spill] sm:$0xff] %v8602_v44  ;;  %v8604_v59 = vpop.f32.mrb[81].mxu0 }
 0x9fd   : > { %10382 = vst [vmem:[#allocation145_spill] sm:$0xff] %v8604_v59  ;;  %v8606_v53 = vpop.f32.mrb[82].mxu0 }
 0x9fe   : > { %10383 = vst [vmem:[#allocation146_spill] sm:$0xff] %v8606_v53  ;;  %v8608_v15 = vpop.f32.mrb[83].mxu0 }
 0x9ff   : > { %10384 = vst [vmem:[#allocation147_spill] sm:$0xff] %v8608_v15 }
 0xa03   : > { %v8610_v57 = vpop.f32.mrb[84].mxu0 }
 0xa04   : > { %10385 = vst [vmem:[#allocation148_spill] sm:$0xff] %v8610_v57  ;;  %v8612_v27 = vpop.f32.mrb[85].mxu0 }
 0xa05   : > { %10386 = vst [vmem:[#allocation149_spill] sm:$0xff] %v8612_v27  ;;  %v8614_v47 = vpop.f32.mrb[86].mxu0 }
 0xa06   : > { %10387 = vst [vmem:[#allocation150_spill] sm:$0xff] %v8614_v47  ;;  %v8616_v30 = vpop.f32.mrb[87].mxu0 }
 0xa07   : > { %10388 = vst [vmem:[#allocation151_spill] sm:$0xff] %v8616_v30 }
 0xa10   : > { %v8618_v16 = vpop.f32.mrb[88].mxu0 }
 0xa11   : > { %10389 = vst [vmem:[#allocation152_spill] sm:$0xff] %v8618_v16  ;;  %v8620_v48 = vpop.f32.mrb[89].mxu0 }
 0xa12   : > { %10390 = vst [vmem:[#allocation153_spill] sm:$0xff] %v8620_v48  ;;  %v8622_v40 = vpop.f32.mrb[90].mxu0 }
 0xa13   : > { %10391 = vst [vmem:[#allocation154_spill] sm:$0xff] %v8622_v40  ;;  %v8624_v51 = vpop.f32.mrb[91].mxu0 }
 0xa14   : > { %10392 = vst [vmem:[#allocation155_spill] sm:$0xff] %v8624_v51 }
 0xa42   : > { %v8626_v60 = vpop.f32.mrb[92].mxu0 }
 0xa43   : > { %10393 = vst [vmem:[#allocation156_spill] sm:$0xff] %v8626_v60  ;;  %v8628_v41 = vpop.f32.mrb[93].mxu0 }
 0xa44   : > { %10394 = vst [vmem:[#allocation157_spill] sm:$0xff] %v8628_v41  ;;  %v8630_v19 = vpop.f32.mrb[94].mxu0 }
 0xa45   : > { %10395 = vst [vmem:[#allocation158_spill] sm:$0xff] %v8630_v19  ;;  %v8632_v5 = vpop.f32.mrb[95].mxu0 }
 0xa46   : > { %10396 = vst [vmem:[#allocation159_spill] sm:$0xff] %v8632_v5 }
 0xa4a   : > { %v8634_v55 = vpop.f32.mrb[96].mxu0 }
 0xa4b   : > { %3427 = vmax.xlane.f32.xlu0 %v8634_v55  ;;  %v8637_v23 = vpop.f32.mrb[97].mxu0 }
 0xa4c   : > { %v8639_v35 = vpop.f32.mrb[98].mxu0 }
 0xa4d   : > { %v8641_v16 = vpop.f32.mrb[99].mxu0 }
 0xa4e   : > { %3425 = vmax.xlane.f32.xlu1 %v8641_v16 }
 0xa4f   : > { %3423 = vmax.xlane.f32.xlu0 %v8637_v23 }
 0xa52   : > { %v8645_v60 = vpop.f32.mrb[100].mxu0 }
 0xa53   : > { %3429 = vmax.xlane.f32.xlu0 %v8639_v35  ;;  %3435 = vmax.xlane.f32.xlu1 %v8645_v60  ;;  %v8649_v19 = vpop.f32.mrb[101].mxu0 }
 0xa54   : > { %v8651_v5 = vpop.f32.mrb[102].mxu0 }
 0xa55   : > { %v8653_v41 = vpop.f32.mrb[103].mxu0 }
 0xa57   : > { %3431 = vmax.xlane.f32.xlu1 %v8649_v19  ;;  %3433 = vmax.xlane.f32.xlu0 %v8653_v41 }
 0xa5a   : > { %v8657_v40 = vpop.f32.mrb[104].mxu0 }
 0xa5b   : > { %3437 = vmax.xlane.f32.xlu1 %v8651_v5  ;;  %3443 = vmax.xlane.f32.xlu0 %v8657_v40  ;;  %v8661_v51 = vpop.f32.mrb[105].mxu0 }
 0xa5c   : > { %v8663_v48 = vpop.f32.mrb[106].mxu0 }
 0xa5d   : > { %v8665_v47 = vpop.f32.mrb[107].mxu0 }
 0xa5f   : > { %3439 = vmax.xlane.f32.xlu1 %v8661_v51 }
 0xa62   : > { %v8668_v30 = vpop.f32.mrb[108].mxu0 }
 0xa63   : > { %3445 = vmax.xlane.f32.xlu1 %v8663_v48  ;;  %v8671_v57 = vpop.f32.mrb[109].mxu0 }
 0xa64   : > { %3447 = vmax.xlane.f32.xlu0 %v8671_v57  ;;  %v8674_v27 = vpop.f32.mrb[110].mxu0 }
 0xa65   : > { %v8676_v53 = vpop.f32.mrb[111].mxu0 }
 0xa67   : > { %3441 = vmax.xlane.f32.xlu1 %v8665_v47 }
 0xa6b   : > { %3451 = vmax.xlane.f32.xlu1 %v8668_v30 }
 0xa6f   : > { %3453 = vmax.xlane.f32.xlu1 %v8674_v27 }
 0xa7a   : > { %3803 = vrot.lane.b32.xlu0 %v7424_v56, %s7011_s25 }
 0xa80   : > { %3801 = vrot.lane.b32.xlu1 %v7408_v43, %s7011_s25 }
 0xa84   : > { %3779 = vrot.lane.b32.xlu1 %v7369_v11, %s7011_s25 }
 0xa88   : > { %3783 = vrot.lane.b32.xlu1 %v7387_v24, %s7011_s25 }
 0xa8c   : > { %3787 = vrot.lane.b32.xlu1 %v7403_v37, %s7011_s25 }
 0xa90   : > { %3791 = vrot.lane.b32.xlu1 %v7419_v50, %s7011_s25 }
 0xa94   : > { %4076 = vrot.lane.b32.xlu1 %v7360_v7, %s7011_s25 }
 0xa98   : > { %4078 = vrot.lane.b32.xlu1 %v7378_v20, %s7011_s25 }
 0xa99   : > { %3449 = vmax.xlane.f32.xlu0 %v8676_v53 }
 0xa9c   : > { %4082 = vrot.lane.b32.xlu1 %v7410_v46, %s7011_s25 }
 0xaa0   : > { %4084 = vrot.lane.b32.xlu1 %v7426_v58, %s7011_s25 }
 0xaa4   : > { %4088 = vrot.lane.b32.xlu1 %v7452_v14, %s7011_s25 }
 0xaa8   : > { %4328 = vrot.lane.b32.xlu1 %v7376_v17, %s7012_s16  ;;  %v8748_v17 = vpop.permute.xlu1 %3797 }
 0xaac   : > { %4332 = vrot.lane.b32.xlu1 %v7408_v43, %s7012_s16 }
 0xaaf   : > { %3805 = vrot.lane.b32.xlu0 %v7436_v1, %s7011_s25 }
 0xab0   : > { %4310 = vrot.lane.b32.xlu1 %v7369_v11, %s7012_s16  ;;  %v8740_v11 = vpop.permute.xlu0 %3795 }
 0xab3   : > { %3807 = vrot.lane.b32.xlu0 %v7450_v10, %s7011_s25 }
 0xab4   : > { %4314 = vrot.lane.b32.xlu1 %v7387_v24, %s7012_s16 }
 0xab7   : > { %3777 = vrot.lane.b32.xlu0 %v7372_v13, %s7011_s25 }
 0xab8   : > { %4318 = vrot.lane.b32.xlu1 %v7403_v37, %s7012_s16 }
 0xabb   : > { %3781 = vrot.lane.b32.xlu0 %v7390_v26, %s7011_s25 }
 0xabc   : > { %4322 = vrot.lane.b32.xlu1 %v7419_v50, %s7012_s16 }
 0xabf   : > { %3785 = vrot.lane.b32.xlu0 %v7406_v39, %s7011_s25 }
 0xac0   : > { %4607 = vrot.lane.b32.xlu1 %v7360_v7, %s7012_s16  ;;  %v8746_v7 = vpop.permute.xlu0 %3799 }
 0xac3   : > { %3789 = vrot.lane.b32.xlu0 %v7422_v52, %s7011_s25 }
 0xac4   : > { %4611 = vrot.lane.b32.xlu1 %v7394_v33, %s7012_s16 }
 0xac7   : > { %4074 = vrot.lane.b32.xlu0 %v7348_v63, %s7011_s25 }
 0xac8   : > { %4615 = vrot.lane.b32.xlu1 %v7426_v58, %s7012_s16 }
 0xacb   : > { %4080 = vrot.lane.b32.xlu0 %v7394_v33, %s7011_s25 }
 0xacc   : > { %4619 = vrot.lane.b32.xlu1 %v7452_v14, %s7012_s16 }
 0xacf   : > { %4086 = vrot.lane.b32.xlu0 %v7438_v3, %s7011_s25 }
 0xad3   : > { %4324 = vrot.lane.b32.xlu0 %v7346_v61, %s7012_s16 }
 0xad7   : > { %4326 = vrot.lane.b32.xlu0 %v7358_v4, %s7012_s16 }
 0xad8   : > { %v3428_v24 = vpop.xlane.xlu0 %3427 }
 0xad9   : > { %v3457_v50 = vsub.f32 %v8634_v55, %v3428_v24 }
 0xadb   : > { %v3426_v33 = vpop.xlane.xlu1 %3425  ;;  %4330 = vrot.lane.b32.xlu0 %v10257_v31, %s7012_s16  ;;  %v3475_v44 = vmul.f32 1.442695, %v3457_v50 }
 0xadc   : > { %v3456_v37 = vsub.f32 %v8641_v16, %v3426_v33  ;;  %v3424_v43 = vpop.xlane.xlu0 %3423 }
 0xadd   : > { %v3455_v58 = vsub.f32 %v8637_v23, %v3424_v43 }
 0xade   : > { %v3473_v61 = vmul.f32 1.442695, %v3456_v37 }
 0xadf   : > { %v3471_v14 = vmul.f32 1.442695, %v3455_v58  ;;  %4334 = vrot.lane.b32.xlu0 %v7424_v56, %s7012_s16 }
 0xae0   : > { %6433 = vpow2.f32 %v3473_v61  ;;  %v3436_v15 = vpop.xlane.xlu1 %3435  ;;  %v3430_v4 = vpop.xlane.xlu0 %3429 }
 0xae1   : > { %6435 = vpow2.f32 %v3471_v14  ;;  %v3458_v59 = vsub.f32 %v8639_v35, %v3430_v4  ;;  %v3461_v16 = vsub.f32 %v8645_v60, %v3436_v15 }
 0xae2   : > { %6437 = vpow2.f32 %v3475_v44 }
 0xae3   : > { %v3477_v31 = vmul.f32 1.442695, %v3458_v59  ;;  %4336 = vrot.lane.b32.xlu0 %v7436_v1, %s7012_s16  ;;  %v3483_v35 = vmul.f32 1.442695, %v3461_v16 }
 0xae4   : > { %v3432_v55 = vpop.xlane.xlu1 %3431  ;;  %v3434_v23 = vpop.xlane.xlu0 %3433 }
 0xae5   : > { %v3459_v24 = vsub.f32 %v8649_v19, %v3432_v55  ;;  %v3460_v56 = vsub.f32 %v8653_v41, %v3434_v23  ;;  %6439 = vpow2.f32 %v3477_v31 }
 0xae7   : > { %v3479_v33 = vmul.f32 1.442695, %v3459_v24  ;;  %v3481_v37 = vmul.f32 1.442695, %v3460_v56  ;;  %4338 = vrot.lane.b32.xlu0 %v7450_v10, %s7012_s16 }
 0xae8   : > { %v3438_v59 = vpop.xlane.xlu1 %3437  ;;  %v3444_v19 = vpop.xlane.xlu0 %3443 }
 0xae9   : > { %6441 = vpow2.f32 %v3479_v33  ;;  %v3462_v1 = vsub.f32 %v8651_v5, %v3438_v59  ;;  %v3465_v14 = vsub.f32 %v8657_v40, %v3444_v19 }
 0xaea   : > { %v8768_v43 = vpop.eup %6433  ;;  %6443 = vpow2.f32 %v3481_v37 }
 0xaeb   : > { %v8770_v15 = vpop.eup %6435  ;;  %v3485_v44 = vmul.f32 1.442695, %v3462_v1  ;;  %4308 = vrot.lane.b32.xlu0 %v7372_v13, %s7012_s16  ;;  %6445 = vpow2.f32 %v3483_v35  ;;  %v3491_v23 = vmul.f32 1.442695, %v3465_v14 }
 0xaec   : > { %v3440_v60 = vpop.xlane.xlu1 %3439  ;;  %v3535_v41 = vpack.c.bf16 %v8768_v43, %v8770_v15  ;;  %v8776_v10 = vpop.eup %6437 }
 0xaed   : > { %6447 = vpow2.f32 %v3485_v44  ;;  %v3463_v5 = vsub.f32 %v8661_v51, %v3440_v60  ;;  %v3834_v51 = vsel %vm687_vm0, %v8598_v28, 0 }
 0xaee   : > { %5931 = vmatprep.mubr.bf16.mxu1 %v3535_v41 }
 0xaef   : > { %4312 = vrot.lane.b32.xlu0 %v7390_v26, %s7012_s16  ;;  %v8781_v50 = vpop.eup %6439  ;;  %v3487_v31 = vmul.f32 1.442695, %v3463_v5 }
 0xaf0   : > { %v3446_v58 = vpop.xlane.xlu1 %3445  ;;  %1371 = vadd.xlane.f32.xlu1 %v7798_v0  ;;  %v3536_v61 = vpack.c.bf16 %v8781_v50, %v8776_v10 }
 0xaf1   : > { %v3466_v13 = vsub.f32 %v8663_v48, %v3446_v58  ;;  %6449 = vpow2.f32 %v3487_v31 }
 0xaf2   : > { %5932 = vmatmul.mubr.bf16.vlgmr.msra.gmra.mrb[112].mxu1 %v3536_v61 }
 0xaf3   : > { %v8788_v4 = vpop.eup %6441  ;;  %4316 = vrot.lane.b32.xlu0 %v7406_v39, %s7012_s16  ;;  %v3493_v0 = vmul.f32 1.442695, %v3466_v13  ;;  %5948 = vmatpush3.bf16.xpose.msra.mxu1 %v3834_v51 }
 0xaf4   : > { %v8794_v26 = vpop.eup %6443  ;;  %v3442_v48 = vpop.xlane.xlu1 %3441  ;;  %6156 = vmatprep.subr.msk.bf16.mxu1 %vm687_vm0, %v8740_v11 }
 0xaf5   : > { %v3464_v40 = vsub.f32 %v8665_v47, %v3442_v48  ;;  %v3537_v16 = vpack.c.bf16 %v8794_v26, %v8788_v4  ;;  %v8801_v55 = vpop.eup %6445  ;;  %6451 = vpow2.f32 %v3493_v0  ;;  %v3837_v47 = vsel %vm687_vm0, %v8740_v11, 0 }
 0xaf6   : > { %v3840_v11 = vsel %vm687_vm0, %v8748_v17, 0 }
 0xaf7   : > { %v8803_v28 = vpop.eup %6447  ;;  %v3489_v39 = vmul.f32 1.442695, %v3464_v40  ;;  %5935 = vmatprep.mubr.bf16.mxu1 %v3537_v16  ;;  %4320 = vrot.lane.b32.xlu0 %v7422_v52, %s7012_s16 }
 0xaf8   : > { %v3538_v24 = vpack.c.bf16 %v8803_v28, %v8801_v55  ;;  %v3452_v52 = vpop.xlane.xlu1 %3451 }
 0xaf9   : > { %6453 = vpow2.f32 %v3489_v39 }
 0xafa   : > { %6455 = vpow2.f32 %v3491_v23  ;;  %5936 = vmatmul.mubr.bf16.gmra.mrb[116].mxu1 %v3538_v24 }
 0xafb   : > { %4605 = vrot.lane.b32.xlu0 %v7348_v63, %s7012_s16  ;;  %5950 = vmatpush3.bf16.xpose.msra.mxu1 %v3837_v47  ;;  %v8817_v56 = vpop.eup %6449 }
 0xafc   : > { %6157 = vmatprep.subr.msk.bf16.mxu1 %vm687_vm0, %v8748_v17  ;;  %v3454_v59 = vpop.xlane.xlu1 %3453  ;;  %v3843_v17 = vsel %vm687_vm0, %v8746_v7, 0 }
 0xafd   : > { %v3470_v58 = vsub.f32 %v8674_v27, %v3454_v59 }
 0xaff   : > { %4609 = vrot.lane.b32.xlu0 %v7378_v20, %s7012_s16  ;;  %v8819_v33 = vpop.eup %6451  ;;  %v3501_v14 = vmul.f32 1.442695, %v3470_v58 }
 0xb00   : > { %v3802_v1 = vpop.permute.xlu1 %3801 }
 0xb01   : > { %v3846_v44 = vsel %vm687_vm0, %v3802_v1, 0 }
 0xb03   : > { %v8821_v37 = vpop.eup %6453  ;;  %4613 = vrot.lane.b32.xlu0 %v7410_v46, %s7012_s16  ;;  %5952 = vmatpush3.bf16.xpose.msra.mxu1 %v3840_v11  ;;  %v3448_v46 = vpop.xlane.xlu0 %3447 }
 0xb04   : > { %v8827_v63 = vpop.eup %6455  ;;  %v3539_v35 = vpack.c.bf16 %v8821_v37, %v8817_v56  ;;  %6158 = vmatprep.subr.msk.bf16.mxu1 %vm687_vm0, %v8746_v7  ;;  %v3780_v19 = vpop.permute.xlu1 %3779  ;;  %v3467_v5 = vsub.f32 %v8671_v57, %v3448_v46  ;;  %v3469_v7 = vsub.f32 %v8668_v30, %v3452_v52 }
 0xb05   : > { %v3540_v20 = vpack.c.bf16 %v8819_v33, %v8827_v63 }
 0xb06   : > { %5939 = vmatprep.mubr.bf16.mxu1 %v3539_v35  ;;  %v3495_v61 = vmul.f32 1.442695, %v3467_v5  ;;  %v3499_v0 = vmul.f32 1.442695, %v3469_v7 }
 0xb07   : > { %5940 = vmatmul.mubr.bf16.gmra.mrb[120].mxu1 %v3540_v20  ;;  %v3804_v60 = vpop.permute.xlu0 %3803 }
 0xb08   : > { %v3849_v41 = vsel %vm687_vm0, %v3804_v60, 0  ;;  %v3784_v13 = vpop.permute.xlu1 %3783  ;;  %6457 = vpow2.f32 %v3495_v61 }
 0xb09   : > { %6459 = vpow2.f32 %v3501_v14 }
 0xb0b   : > { %5954 = vmatpush3.bf16.xpose.msra.mxu1 %v3843_v17 }
 0xb0c   : > { %6159 = vmatprep.subr.msk.bf16.mxu1 %vm687_vm0, %v3802_v1  ;;  %v3788_v40 = vpop.permute.xlu1 %3787 }
 0xb10   : > { %v3792_v30 = vpop.permute.xlu1 %3791 }
 0xb12   : > { %v8848_v39 = vpop.eup %6457 }
 0xb13   : > { %5956 = vmatpush3.bf16.xpose.msra.mxu1 %v3846_v44  ;;  %v8851_v24 = vpop.eup %6459 }
 0xb14   : > { %6160 = vmatprep.subr.msk.bf16.mxu1 %vm687_vm0, %v3804_v60  ;;  %v4077_v11 = vpop.permute.xlu1 %4076 }
 0xb18   : > { %v4079_v1 = vpop.permute.xlu1 %4078 }
 0xb1b   : > { %5958 = vmatpush3.bf16.xpose.msra.mxu1 %v3849_v41 }
 0xb1c   : > { %v4083_v44 = vpop.permute.xlu1 %4082 }
 0xb20   : > { %v4085_v5 = vpop.permute.xlu1 %4084 }
 0xb24   : > { %v4089_v7 = vpop.permute.xlu1 %4088 }
 0xb26   : > { %v3450_v31 = vpop.xlane.xlu0 %3449 }
 0xb27   : > { %v3468_v51 = vsub.f32 %v8676_v53, %v3450_v31 }
 0xb28   : > { %v8872_v14 = vpop.permute.xlu1 %4328 }
 0xb29   : > { %v3497_v48 = vmul.f32 1.442695, %v3468_v51 }
 0xb2a   : > { %v3806_v16 = vpop.permute.xlu0 %3805 }
 0xb2b   : > { %6461 = vpow2.f32 %v3497_v48  ;;  %6161 = vmatprep.subr.msk.bf16.mxu1 %vm687_vm0, %v3806_v16  ;;  %v3852_v57 = vsel %vm687_vm0, %v3806_v16, 0 }
 0xb2c   : > { %6463 = vpow2.f32 %v3499_v0  ;;  %5960 = vmatpush3.bf16.xpose.msra.mxu1 %v3852_v57  ;;  %v8877_v31 = vpop.permute.xlu1 %4332 }
 0xb2e   : > { %v3808_v27 = vpop.permute.xlu0 %3807 }
 0xb2f   : > { %6162 = vmatprep.subr.msk.bf16.mxu1 %vm687_vm0, %v3808_v27  ;;  %v3855_v53 = vsel %vm687_vm0, %v3808_v27, 0 }
 0xb30   : > { %v8883_v48 = vpop.permute.xlu1 %4310 }
 0xb31   : > { %10397 = vst [vmem:[#allocation160_spill] sm:$0xff] %v8883_v48  ;;  %v10424_v48 = vld [vmem:[#allocation86_spill] sm:$0xff] }
 0xb32   : > { %v3778_v23 = vpop.permute.xlu0 %3777 }
 0xb34   : > { %5962 = vmatpush3.bf16.xpose.msra.mxu1 %v3855_v53  ;;  %v8889_v16 = vpop.permute.xlu1 %4314 }
 0xb35   : > { %v8853_v47 = vpop.eup %6461  ;;  %10398 = vst [vmem:[#allocation161_spill] sm:$0xff] %v8889_v16  ;;  %v10422_v16 = vld [vmem:[#allocation24_spill] sm:$0xff] }
 0xb36   : > { %v8855_v52 = vpop.eup %6463  ;;  %v3782_v35 = vpop.permute.xlu0 %3781  ;;  %v3541_v20 = vpack.c.bf16 %v8853_v47, %v8848_v39 }
 0xb37   : > { %v3542_v59 = vpack.c.bf16 %v8851_v24, %v8855_v52 }
 0xb38   : > { %5943 = vmatprep.mubr.bf16.mxu1 %v3541_v20 }
 0xb39   : > { %5944 = vmatmul.mubr.bf16.gmra.mrb[124].mxu1 %v3542_v59 }
 0xb3a   : > { %5963 = vmatprep.mubr.msk.bf16.mxu1 %vm687_vm0, %v3778_v23  ;;  %v3786_v17 = vpop.permute.xlu0 %3785 }
 0xb3e   : > { %v3790_v46 = vpop.permute.xlu0 %3789 }
 0xb41   : > { %5964 = vmatmul.mubr.msk.bf16.vlgmr.msra.gmra.mrb[128].mxu1 %vm687_vm0, %v3780_v19 }
 0xb42   : > { %5967 = vmatprep.mubr.msk.bf16.mxu1 %vm687_vm0, %v3782_v35  ;;  %v4075_v60 = vpop.permute.xlu0 %4074 }
 0xb43   : > { %5979 = vmatprep.subr.bf16.mxu0 %v4075_v60 }
 0xb44   : > { %5980 = vmatpush3.bf16.msra.mxu0 %v4075_v60 }
 0xb45   : > { %5981 = vmatprep.subr.bf16.mxu0 %v4077_v11 }
 0xb46   : > { %v4081_v41 = vpop.permute.xlu0 %4080 }
 0xb48   : > { %5982 = vmatpush3.bf16.msra.mxu0 %v4077_v11 }
 0xb49   : > { %5968 = vmatmul.mubr.msk.bf16.gmra.mrb[132].mxu1 %vm687_vm0, %v3784_v13  ;;  %5983 = vmatprep.subr.bf16.mxu0 %v4079_v1 }
 0xb4a   : > { %5971 = vmatprep.mubr.msk.bf16.mxu1 %vm687_vm0, %v3786_v17  ;;  %v4087_v58 = vpop.permute.xlu0 %4086 }
 0xb4c   : > { %5984 = vmatpush3.bf16.msra.mxu0 %v4079_v1 }
 0xb4d   : > { %5985 = vmatprep.subr.bf16.mxu0 %v4081_v41 }
 0xb4e   : > { %v8866_v19 = vpop.permute.xlu0 %4324 }
 0xb50   : > { %5986 = vmatpush3.bf16.msra.mxu0 %v4081_v41 }
 0xb51   : > { %5972 = vmatmul.mubr.msk.bf16.gmra.mrb[136].mxu1 %vm687_vm0, %v3788_v40  ;;  %5987 = vmatprep.subr.bf16.mxu0 %v4083_v44 }
 0xb52   : > { %5975 = vmatprep.mubr.msk.bf16.mxu1 %vm687_vm0, %v3790_v46  ;;  %v8870_v61 = vpop.permute.xlu0 %4326 }
 0xb54   : > { %5988 = vmatpush3.bf16.msra.mxu0 %v4083_v44 }
 0xb55   : > { %5989 = vmatprep.subr.bf16.mxu0 %v4085_v5 }
 0xb56   : > { %v8874_v13 = vpop.permute.xlu0 %4330 }
 0xb58   : > { %5990 = vmatpush3.bf16.msra.mxu0 %v4085_v5 }
 0xb59   : > { %5976 = vmatmul.mubr.msk.bf16.gmra.mrb[140].mxu1 %vm687_vm0, %v3792_v30  ;;  %5991 = vmatprep.subr.bf16.mxu0 %v4087_v58  ;;  %v8895_v30 = vpop.permute.xlu1 %4318 }
 0xb5a   : > { %v8879_v51 = vpop.permute.xlu0 %4334  ;;  %10400 = vst [vmem:[#allocation163_spill] sm:$0xff] %v8895_v30 }
 0xb5c   : > { %5992 = vmatpush3.bf16.msra.mxu0 %v4087_v58 }
 0xb5d   : > { %5993 = vmatprep.subr.bf16.mxu0 %v4089_v7  ;;  %v8899_v53 = vpop.permute.xlu1 %4322 }
 0xb5e   : > { %v8881_v0 = vpop.permute.xlu0 %4336  ;;  %10402 = vst [vmem:[#allocation165_spill] sm:$0xff] %v8899_v53 }
 0xb60   : > { %5994 = vmatpush3.bf16.msra.mxu0 %v4089_v7 }
 0xb61   : > { %6163 = vmatprep.subr.msk.bf16.mxu0 %vm687_vm0, %v8866_v19  ;;  %v4608_v20 = vpop.permute.xlu1 %4607 }
 0xb62   : > { %v8887_v40 = vpop.permute.xlu0 %4338 }
 0xb65   : > { %v4612_v17 = vpop.permute.xlu1 %4611 }
 0xb66   : > { %v8891_v57 = vpop.permute.xlu0 %4308 }
 0xb69   : > { %v4616_v46 = vpop.permute.xlu1 %4615 }
 0xb6a   : > { %v8893_v27 = vpop.permute.xlu0 %4312 }
 0xb6b   : > { %10399 = vst [vmem:[#allocation162_spill] sm:$0xff] %v8893_v27  ;;  %v10423_v27 = vld [vmem:[#allocation23_spill] sm:$0xff] }
 0xb6e   : > { %v8897_v23 = vpop.permute.xlu0 %4316 }
 0xb6f   : > { %10401 = vst [vmem:[#allocation164_spill] sm:$0xff] %v8897_v23 }
 0xb72   : > { %v8901_v11 = vpop.permute.xlu0 %4320 }
 0xb73   : > { %10403 = vst [vmem:[#allocation166_spill] sm:$0xff] %v8901_v11 }
 0xb76   : > { %v4606_v35 = vpop.permute.xlu0 %4605 }
 0xb77   : > { %6043 = vmatprep.subr.bf16.mxu1 %v4606_v35 }
 0xb78   : > { %6044 = vmatpush3.bf16.msra.mxu1 %v4606_v35 }
 0xb79   : > { %6045 = vmatprep.subr.bf16.mxu1 %v4608_v20 }
 0xb7a   : > { %v4610_v59 = vpop.permute.xlu0 %4609 }
 0xb7c   : > { %6046 = vmatpush3.bf16.msra.mxu1 %v4608_v20 }
 0xb7d   : > { %6047 = vmatprep.subr.bf16.mxu1 %v4610_v59 }
 0xb7e   : > { %v4614_v1 = vpop.permute.xlu0 %4613 }
 0xb80   : > { %6048 = vmatpush3.bf16.msra.mxu1 %v4610_v59 }
 0xb81   : > { %6049 = vmatprep.subr.bf16.mxu1 %v4612_v17 }
 0xb84   : > { %6050 = vmatpush3.bf16.msra.mxu1 %v4612_v17 }
 0xb85   : > { %6051 = vmatprep.subr.bf16.mxu1 %v4614_v1 }
 0xb88   : > { %6052 = vmatpush3.bf16.msra.mxu1 %v4614_v1 }
 0xb89   : > { %6053 = vmatprep.subr.bf16.mxu1 %v4616_v46 }
 0xb8c   : > { %6054 = vmatpush3.bf16.msra.mxu1 %v4616_v46 }
 0xbc5   : > { %v8903_v44 = vpop.f32.mrb[112].mxu1 }
 0xbc6   : > { %10404 = vst [vmem:[#allocation167_spill] sm:$0xff] %v8903_v44  ;;  %v8905_v60 = vpop.f32.mrb[113].mxu1 }
 0xbc7   : > { %10405 = vst [vmem:[#allocation168_spill] sm:$0xff] %v8905_v60  ;;  %v8907_v41 = vpop.f32.mrb[114].mxu1 }
 0xbc8   : > { %10406 = vst [vmem:[#allocation169_spill] sm:$0xff] %v8907_v41  ;;  %v8909_v5 = vpop.f32.mrb[115].mxu1 }
 0xbc9   : > { %10407 = vst [vmem:[#allocation170_spill] sm:$0xff] %v8909_v5 }
 0xbcd   : > { %v8911_v58 = vpop.f32.mrb[116].mxu1 }
 0xbce   : > { %10408 = vst [vmem:[#allocation171_spill] sm:$0xff] %v8911_v58  ;;  %v8913_v7 = vpop.f32.mrb[117].mxu1 }
 0xbcf   : > { %10409 = vst [vmem:[#allocation172_spill] sm:$0xff] %v8913_v7  ;;  %v8915_v35 = vpop.f32.mrb[118].mxu1 }
 0xbd0   : > { %10410 = vst [vmem:[#allocation173_spill] sm:$0xff] %v8915_v35  ;;  %v8917_v20 = vpop.f32.mrb[119].mxu1 }
 0xbd1   : > { %10411 = vst [vmem:[#allocation174_spill] sm:$0xff] %v8917_v20 }
 0xbda   : > { %v8919_v59 = vpop.f32.mrb[120].mxu1 }
 0xbdb   : > { %10412 = vst [vmem:[#allocation175_spill] sm:$0xff] %v8919_v59  ;;  %v8921_v17 = vpop.f32.mrb[121].mxu1 }
 0xbdc   : > { %10413 = vst [vmem:[#allocation176_spill] sm:$0xff] %v8921_v17  ;;  %v8923_v1 = vpop.f32.mrb[122].mxu1 }
 0xbdd   : > { %10414 = vst [vmem:[#allocation177_spill] sm:$0xff] %v8923_v1  ;;  %v8925_v46 = vpop.f32.mrb[123].mxu1 }
 0xbde   : > { %10415 = vst [vmem:[#allocation178_spill] sm:$0xff] %v8925_v46 }
 0xc0c   : > { %v8927_v44 = vpop.f32.mrb[124].mxu1 }
 0xc0d   : > { %10416 = vst [vmem:[#allocation179_spill] sm:$0xff] %v8927_v44  ;;  %v8929_v41 = vpop.f32.mrb[125].mxu1 }
 0xc0e   : > { %10417 = vst [vmem:[#allocation180_spill] sm:$0xff] %v8929_v41  ;;  %v8931_v5 = vpop.f32.mrb[126].mxu1 }
 0xc0f   : > { %10418 = vst [vmem:[#allocation181_spill] sm:$0xff] %v8931_v5  ;;  %v8933_v58 = vpop.f32.mrb[127].mxu1 }
 0xc10   : > { %10419 = vst [vmem:[#allocation182_spill] sm:$0xff] %v8933_v58 }
 0xc14   : > { %v8935_v7 = vpop.f32.mrb[128].mxu1 }
 0xc15   : > { %3958 = vmax.xlane.f32.xlu0 %v8935_v7  ;;  %v8938_v35 = vpop.f32.mrb[129].mxu1 }
 0xc16   : > { %v8940_v59 = vpop.f32.mrb[130].mxu1 }
 0xc17   : > { %v8942_v17 = vpop.f32.mrb[131].mxu1 }
 0xc18   : > { %3956 = vmax.xlane.f32.xlu1 %v8942_v17 }
 0xc19   : > { %3954 = vmax.xlane.f32.xlu0 %v8938_v35 }
 0xc1c   : > { %v8946_v44 = vpop.f32.mrb[132].mxu1 }
 0xc1d   : > { %3960 = vmax.xlane.f32.xlu0 %v8940_v59  ;;  %3966 = vmax.xlane.f32.xlu1 %v8946_v44  ;;  %v8950_v5 = vpop.f32.mrb[133].mxu1 }
 0xc1e   : > { %v8952_v58 = vpop.f32.mrb[134].mxu1 }
 0xc1f   : > { %v8954_v41 = vpop.f32.mrb[135].mxu1 }
 0xc21   : > { %3962 = vmax.xlane.f32.xlu1 %v8950_v5 }
 0xc24   : > { %v8957_v1 = vpop.f32.mrb[136].mxu1 }
 0xc25   : > { %3968 = vmax.xlane.f32.xlu1 %v8952_v58  ;;  %v8960_v46 = vpop.f32.mrb[137].mxu1 }
 0xc26   : > { %v8962_v20 = vpop.f32.mrb[138].mxu1 }
 0xc27   : > { %v8964_v60 = vpop.f32.mrb[139].mxu1 }
 0xc29   : > { %2441 = vadd.xlane.f32.xlu1 %v8286_v6  ;;  %v10420_v6 = vld [vmem:[#allocation22_spill] sm:$0xff] }
 0xc2c   : > { %v8967_v53 = vpop.f32.mrb[140].mxu1 }
 0xc2d   : > { %3970 = vmax.xlane.f32.xlu1 %v8960_v46  ;;  %v8970_v11 = vpop.f32.mrb[141].mxu1 }
 0xc2e   : > { %v8972_v30 = vpop.f32.mrb[142].mxu1 }
 0xc2f   : > { %v8974_v23 = vpop.f32.mrb[143].mxu1 }
 0xc31   : > { %3976 = vmax.xlane.f32.xlu1 %v8962_v20 }
 0xc33   : > { %4617 = vrot.lane.b32.xlu0 %v7438_v3, %s7012_s16  ;;  %v10421_v3 = vld [vmem:[#allocation20_spill] sm:$0xff] }
 0xc35   : > { %3972 = vmax.xlane.f32.xlu1 %v8964_v60 }
 0xc39   : > { %3982 = vmax.xlane.f32.xlu1 %v8967_v53 }
 0xc3d   : > { %3984 = vmax.xlane.f32.xlu1 %v8972_v30 }
 0xc41   : > { %2445 = vadd.xlane.f32.xlu1 %v8290_v54  ;;  %v10425_v54 = vld [vmem:[#allocation83_spill] sm:$0xff] }
 0xc45   : > { %2972 = vadd.xlane.f32.xlu1 %v8514_v49  ;;  %v10426_v49 = vld [vmem:[#allocation88_spill] sm:$0xff] }
 0xc49   : > { %2976 = vadd.xlane.f32.xlu1 %v8518_v8  ;;  %v10427_v8 = vld [vmem:[#allocation82_spill] sm:$0xff] }
 0xc4d   : > { %3503 = vadd.xlane.f32.xlu1 %v8770_v15  ;;  %v10428_v15 = vld [vmem:[#allocation116_spill] sm:$0xff] }
 0xc51   : > { %3507 = vadd.xlane.f32.xlu1 %v8776_v10  ;;  %v10429_v10 = vld [vmem:[#allocation84_spill] sm:$0xff] }
 0xc52   : > { %1373 = vadd.xlane.f32.xlu0 %v7800_v9  ;;  %v10430_v9 = vld [vmem:[#allocation118_spill] sm:$0xff] }
 0xc55   : > { %1379 = vadd.xlane.f32.xlu1 %v10420_v6  ;;  %v10434_v6 = vld [vmem:[#allocation31_spill] sm:$0xff] }
 0xc56   : > { %1375 = vadd.xlane.f32.xlu0 %v10421_v3  ;;  %v10436_v3 = vld [vmem:[#allocation90_spill] sm:$0xff] }
 0xc59   : > { %1383 = vadd.xlane.f32.xlu1 %v10422_v16  ;;  %v10431_v16 = vld [vmem:[#allocation85_spill] sm:$0xff] }
 0xc5a   : > { %1377 = vadd.xlane.f32.xlu0 %v10423_v27  ;;  %v10433_v27 = vld [vmem:[#allocation114_spill] sm:$0xff] }
 0xc5d   : > { %1918 = vadd.xlane.f32.xlu1 %v10424_v48  ;;  %v10432_v48 = vld [vmem:[#allocation28_spill] sm:$0xff] }
 0xc5e   : > { %1910 = vadd.xlane.f32.xlu0 %v10425_v54  ;;  %v10440_v54 = vld [vmem:[#allocation21_spill] sm:$0xff] }
 0xc61   : > { %1922 = vadd.xlane.f32.xlu1 %v10426_v49  ;;  %v10441_v49 = vld [vmem:[#allocation25_spill] sm:$0xff] }
 0xc62   : > { %1912 = vadd.xlane.f32.xlu0 %v10427_v8 }
 0xc65   : > { %2449 = vadd.xlane.f32.xlu1 %v10428_v15 }
 0xc66   : > { %1914 = vadd.xlane.f32.xlu0 %v10429_v10 }
 0xc69   : > { %2453 = vadd.xlane.f32.xlu1 %v10430_v9 }
 0xc6a   : > { %3964 = vmax.xlane.f32.xlu0 %v8954_v41 }
 0xc6d   : > { %2980 = vadd.xlane.f32.xlu1 %v8527_v21  ;;  %v10435_v21 = vld [vmem:[#allocation115_spill] sm:$0xff] }
 0xc6e   : > { %1916 = vadd.xlane.f32.xlu0 %v10431_v16 }
 0xc71   : > { %2984 = vadd.xlane.f32.xlu1 %v8538_v2  ;;  %v10437_v2 = vld [vmem:[#allocation93_spill] sm:$0xff] }
 0xc72   : > { %3974 = vmax.xlane.f32.xlu0 %v8957_v1 }
 0xc75   : > { %3511 = vadd.xlane.f32.xlu1 %v8788_v4  ;;  %v10438_v4 = vld [vmem:[#allocation120_spill] sm:$0xff] }
 0xc76   : > { %3978 = vmax.xlane.f32.xlu0 %v8970_v11 }
 0xc79   : > { %3515 = vadd.xlane.f32.xlu1 %v8801_v55  ;;  %v10439_v55 = vld [vmem:[#allocation123_spill] sm:$0xff] }
 0xc7a   : > { %3980 = vmax.xlane.f32.xlu0 %v8974_v23 }
 0xc7d   : > { %1387 = vadd.xlane.f32.xlu1 %v10432_v48 }
 0xc7e   : > { %2443 = vadd.xlane.f32.xlu0 %v10433_v27 }
 0xc81   : > { %1391 = vadd.xlane.f32.xlu1 %v10434_v6  ;;  %v10446_v6 = vld [vmem:[#allocation33_spill] sm:$0xff] }
 0xc82   : > { %2447 = vadd.xlane.f32.xlu0 %v10435_v21  ;;  %v10447_v21 = vld [vmem:[#allocation119_spill] sm:$0xff] }
 0xc85   : > { %1926 = vadd.xlane.f32.xlu1 %v10436_v3 }
 0xc86   : > { %2974 = vadd.xlane.f32.xlu0 %v8512_v22  ;;  %v4620_v22 = vpop.permute.xlu1 %4619 }
 0xc89   : > { %1930 = vadd.xlane.f32.xlu1 %v10437_v2 }
 0xc8a   : > { %2978 = vadd.xlane.f32.xlu0 %v8521_v38  ;;  %v10442_v38 = vld [vmem:[#allocation87_spill] sm:$0xff]  ;;  %v9026_v8 = vpop.xlane.xlu1 %1371 }
 0xc8d   : > { %2457 = vadd.xlane.f32.xlu1 %v10438_v4 }
 0xc8e   : > { %3505 = vadd.xlane.f32.xlu0 %v8768_v43  ;;  %v10443_v43 = vld [vmem:[#allocation89_spill] sm:$0xff] }
 0xc91   : > { %2461 = vadd.xlane.f32.xlu1 %v10439_v55  ;;  %v10448_v55 = vld [vmem:[#allocation94_spill] sm:$0xff] }
 0xc92   : > { %3509 = vadd.xlane.f32.xlu0 %v8781_v50 }
 0xc95   : > { %2988 = vadd.xlane.f32.xlu1 %v8548_v29  ;;  %v10444_v29 = vld [vmem:[#allocation32_spill] sm:$0xff] }
 0xc96   : > { %1381 = vadd.xlane.f32.xlu0 %v10440_v54 }
 0xc99   : > { %2992 = vadd.xlane.f32.xlu1 %v8556_v62  ;;  %v10445_v62 = vld [vmem:[#allocation117_spill] sm:$0xff] }
 0xc9a   : > { %1385 = vadd.xlane.f32.xlu0 %v10441_v49 }
 0xc9d   : > { %3519 = vadd.xlane.f32.xlu1 %v8817_v56 }
 0xc9e   : > { %1920 = vadd.xlane.f32.xlu0 %v10442_v38  ;;  %v10449_v38 = vld [vmem:[#allocation97_spill] sm:$0xff] }
 0xca1   : > { %3523 = vadd.xlane.f32.xlu1 %v8827_v63 }
 0xca2   : > { %1924 = vadd.xlane.f32.xlu0 %v10443_v43  ;;  %v3959_v50 = vpop.xlane.xlu0 %3958 }
 0xca3   : > { %v3988_v16 = vsub.f32 %v8935_v7, %v3959_v50 }
 0xca5   : > { %v3957_v15 = vpop.xlane.xlu1 %3956  ;;  %1395 = vadd.xlane.f32.xlu1 %v10444_v29  ;;  %v4006_v2 = vmul.f32 1.442695, %v3988_v16 }
 0xca6   : > { %v3987_v10 = vsub.f32 %v8942_v17, %v3957_v15  ;;  %2451 = vadd.xlane.f32.xlu0 %v10445_v62  ;;  %v3955_v9 = vpop.xlane.xlu0 %3954  ;;  %v10450_v15 = vld [vmem:[#allocation124_spill] sm:$0xff] }
 0xca7   : > { %v3986_v56 = vsub.f32 %v8938_v35, %v3955_v9 }
 0xca8   : > { %v4004_v48 = vmul.f32 1.442695, %v3987_v10 }
 0xca9   : > { %v4002_v27 = vmul.f32 1.442695, %v3986_v56  ;;  %1399 = vadd.xlane.f32.xlu1 %v10446_v6  ;;  %v10453_v6 = vld [vmem:[#allocation26_spill] sm:$0xff] }
 0xcaa   : > { %6465 = vpow2.f32 %v4004_v48  ;;  %v9036_v63 = vpop.xlane.xlu1 %3966  ;;  %2455 = vadd.xlane.f32.xlu0 %v10447_v21  ;;  %v3961_v3 = vpop.xlane.xlu0 %3960  ;;  %v10452_v48 = vld [vmem:[#allocation27_spill] sm:$0xff]  ;;  %v10454_v21 = vld [vmem:[#allocation92_spill] sm:$0xff] }
 0xcab   : > { %6467 = vpow2.f32 %v4002_v27  ;;  %v3992_v17 = vsub.f32 %v8946_v44, %v9036_v63  ;;  %v3989_v4 = vsub.f32 %v8940_v59, %v3961_v3  ;;  %v10455_v3 = vld [vmem:[#allocation91_spill] sm:$0xff]  ;;  %v10471_v63 = vld [vmem:[#allocation126_spill] sm:$0xff] }
 0xcac   : > { %6469 = vpow2.f32 %v4006_v2  ;;  %v4371_v2 = vsel %vm687_vm0, %v8872_v14, 0 }
 0xcad   : > { %v4008_v7 = vmul.f32 1.442695, %v3989_v4  ;;  %1934 = vadd.xlane.f32.xlu1 %v10448_v55  ;;  %v10457_v4 = vld [vmem:[#allocation122_spill] sm:$0xff]  ;;  %v10459_v55 = vld [vmem:[#allocation121_spill] sm:$0xff] }
 0xcae   : > { %v9043_v35 = vpop.xlane.xlu1 %3962  ;;  %2982 = vadd.xlane.f32.xlu0 %v8531_v25  ;;  %v4618_v54 = vpop.permute.xlu0 %4617 }
 0xcaf   : > { %v3990_v49 = vsub.f32 %v8950_v5, %v9043_v35  ;;  %6055 = vmatprep.subr.bf16.mxu1 %v4618_v54  ;;  %6471 = vpow2.f32 %v4008_v7  ;;  %v10458_v7 = vld [vmem:[#allocation39_spill] sm:$0xff] }
 0xcb0   : > { %6056 = vmatpush3.bf16.msra.mxu1 %v4618_v54  ;;  %v4374_v54 = vsel %vm687_vm0, %v8874_v13, 0  ;;  %v10472_v35 = vld [vmem:[#allocation99_spill] sm:$0xff] }
 0xcb1   : > { %1938 = vadd.xlane.f32.xlu1 %v10449_v38  ;;  %6057 = vmatprep.subr.bf16.mxu1 %v4620_v22 }
 0xcb2   : > { %v9049_v43 = vpop.xlane.xlu1 %3968  ;;  %2986 = vadd.xlane.f32.xlu0 %v8540_v18  ;;  %v10451_v18 = vld [vmem:[#allocation127_spill] sm:$0xff] }
 0xcb3   : > { %v3993_v59 = vsub.f32 %v8952_v58, %v9049_v43 }
 0xcb4   : > { %v9054_v50 = vpop.eup %6465  ;;  %6058 = vmatpush3.bf16.msra.mxu1 %v4620_v22 }
 0xcb5   : > { %v9056_v25 = vpop.eup %6467  ;;  %2465 = vadd.xlane.f32.xlu1 %v10450_v15  ;;  %v10461_v15 = vld [vmem:[#allocation44_spill] sm:$0xff] }
 0xcb6   : > { %v9059_v29 = vpop.xlane.xlu1 %2441  ;;  %3513 = vadd.xlane.f32.xlu0 %v8794_v26  ;;  %v4066_v10 = vpack.c.bf16 %v9054_v50, %v9056_v25  ;;  %v9064_v62 = vpop.eup %6469  ;;  %v4365_v26 = vsel %vm687_vm0, %v8866_v19, 0 }
 0xcb8   : > { %5995 = vmatprep.mubr.bf16.mxu0 %v4066_v10 }
 0xcb9   : > { %2469 = vadd.xlane.f32.xlu1 %v10451_v18  ;;  %v9067_v9 = vpop.eup %6471  ;;  %v4377_v18 = vsel %vm687_vm0, %v8877_v31, 0 }
 0xcba   : > { %v9069_v16 = vpop.xlane.xlu1 %3970  ;;  %3517 = vadd.xlane.f32.xlu0 %v8803_v28  ;;  %v4067_v22 = vpack.c.bf16 %v9067_v9, %v9064_v62 }
 0xcbc   : > { %5996 = vmatmul.mubr.bf16.vlgmr.msra.gmra.mrb[112].mxu0 %v4067_v22 }
 0xcbd   : > { %2996 = vadd.xlane.f32.xlu1 %v8577_v36  ;;  %6012 = vmatpush3.bf16.xpose.msra.mxu0 %v4365_v26  ;;  %v4368_v36 = vsel %vm687_vm0, %v8870_v61, 0  ;;  %v10463_v26 = vld [vmem:[#allocation48_spill] sm:$0xff] }
 0xcbe   : > { %v9077_v56 = vpop.xlane.xlu1 %3976  ;;  %1389 = vadd.xlane.f32.xlu0 %v10452_v48  ;;  %6164 = vmatprep.subr.msk.bf16.mxu0 %vm687_vm0, %v8870_v61  ;;  %v10456_v61 = vld [vmem:[#allocation38_spill] sm:$0xff] }
 0xcbf   : > { %v3997_v28 = vsub.f32 %v8962_v20, %v9077_v56 }
 0xcc1   : > { %3000 = vadd.xlane.f32.xlu1 %v8584_v42 }
 0xcc2   : > { %v9085_v27 = vpop.xlane.xlu1 %3972  ;;  %1393 = vadd.xlane.f32.xlu0 %v10453_v6  ;;  %v10464_v6 = vld [vmem:[#allocation49_spill] sm:$0xff] }
 0xcc5   : > { %3527 = vadd.xlane.f32.xlu1 %v8848_v39  ;;  %6014 = vmatpush3.bf16.xpose.msra.mxu0 %v4368_v36 }
 0xcc6   : > { %v9091_v19 = vpop.xlane.xlu1 %3982  ;;  %1928 = vadd.xlane.f32.xlu0 %v10454_v21  ;;  %6165 = vmatprep.subr.msk.bf16.mxu0 %vm687_vm0, %v8872_v14  ;;  %v10460_v14 = vld [vmem:[#allocation41_spill] sm:$0xff] }
 0xcc9   : > { %3531 = vadd.xlane.f32.xlu1 %v8855_v52 }
 0xcca   : > { %v9097_v42 = vpop.xlane.xlu1 %3984  ;;  %1932 = vadd.xlane.f32.xlu0 %v10455_v3  ;;  %v10466_v3 = vld [vmem:[#allocation52_spill] sm:$0xff] }
 0xccd   : > { %913 = vadd.xlane.f32.xlu1 %v10456_v61  ;;  %6016 = vmatpush3.bf16.xpose.msra.mxu0 %v4371_v2 }
 0xcce   : > { %v9103_v39 = vpop.xlane.xlu1 %2445  ;;  %2459 = vadd.xlane.f32.xlu0 %v10457_v4  ;;  %6166 = vmatprep.subr.msk.bf16.mxu0 %vm687_vm0, %v8874_v13  ;;  %v10462_v13 = vld [vmem:[#allocation45_spill] sm:$0xff] }
 0xccf   : > { %v10468_v4 = vld [vmem:[#allocation69_spill] sm:$0xff] }
 0xcd1   : > { %917 = vadd.xlane.f32.xlu1 %v10458_v7 }
 0xcd2   : > { %v9109_v52 = vpop.xlane.xlu1 %2972  ;;  %2463 = vadd.xlane.f32.xlu0 %v10459_v55  ;;  %v4383_v55 = vsel %vm687_vm0, %v8881_v0, 0 }
 0xcd5   : > { %921 = vadd.xlane.f32.xlu1 %v10460_v14  ;;  %6018 = vmatpush3.bf16.xpose.msra.mxu0 %v4374_v54  ;;  %v10469_v14 = vld [vmem:[#allocation96_spill] sm:$0xff] }
 0xcd6   : > { %v9115_v38 = vpop.xlane.xlu1 %2976  ;;  %2990 = vadd.xlane.f32.xlu0 %v8552_v12  ;;  %6167 = vmatprep.subr.msk.bf16.mxu0 %vm687_vm0, %v8877_v31  ;;  %v4380_v31 = vsel %vm687_vm0, %v8879_v51, 0 }
 0xcd9   : > { %925 = vadd.xlane.f32.xlu1 %v10461_v15 }
 0xcda   : > { %v9121_v10 = vpop.xlane.xlu1 %3503  ;;  %2994 = vadd.xlane.f32.xlu0 %v8550_v45 }
 0xcdd   : > { %929 = vadd.xlane.f32.xlu1 %v10462_v13  ;;  %6020 = vmatpush3.bf16.xpose.msra.mxu0 %v4377_v18  ;;  %v3995_v13 = vsub.f32 %v8964_v60, %v9085_v27  ;;  %v4016_v60 = vmul.f32 1.442695, %v3993_v59  ;;  %v3994_v27 = vsub.f32 %v8960_v46, %v9069_v16 }
 0xcde   : > { %v9127_v22 = vpop.xlane.xlu1 %3507  ;;  %3521 = vadd.xlane.f32.xlu0 %v8821_v37  ;;  %6168 = vmatprep.subr.msk.bf16.mxu0 %vm687_vm0, %v8879_v51  ;;  %v10465_v37 = vld [vmem:[#allocation30_spill] sm:$0xff] }
 0xcdf   : > { %v1374_v12 = vpop.xlane.xlu0 %1373  ;;  %v4018_v46 = vmul.f32 1.442695, %v3994_v27 }
 0xce0   : > { %6473 = vrcp.f32 %v1374_v12 }
 0xce1   : > { %933 = vadd.xlane.f32.xlu1 %v10463_v26  ;;  %6475 = vrcp.f32 %v9026_v8  ;;  %v10470_v8 = vld [vmem:[#allocation95_spill] sm:$0xff] }
 0xce2   : > { %v9133_v48 = vpop.xlane.xlu1 %1379  ;;  %3525 = vadd.xlane.f32.xlu0 %v8819_v33  ;;  %v10467_v33 = vld [vmem:[#allocation29_spill] sm:$0xff] }
 0xce3   : > { %v1376_v45 = vpop.xlane.xlu0 %1375 }
 0xce5   : > { %937 = vadd.xlane.f32.xlu1 %v10464_v6  ;;  %6022 = vmatpush3.bf16.xpose.msra.mxu0 %v4380_v31  ;;  %v4386_v31 = vsel %vm687_vm0, %v8887_v40, 0 }
 0xce6   : > { %v9139_v36 = vpop.xlane.xlu1 %1383  ;;  %1397 = vadd.xlane.f32.xlu0 %v10465_v37  ;;  %6169 = vmatprep.subr.msk.bf16.mxu0 %vm687_vm0, %v8881_v0  ;;  %v4014_v0 = vmul.f32 1.442695, %v3992_v17  ;;  %v4020_v17 = vmul.f32 1.442695, %v3995_v13  ;;  %v10473_v37 = vld [vmem:[#allocation67_spill] sm:$0xff] }
 0xce7   : > { %v1378_v21 = vpop.xlane.xlu0 %1377 }
 0xce9   : > { %941 = vadd.xlane.f32.xlu1 %v10466_v3 }
 0xcea   : > { %v6474_v2 = vpop.eup %6473  ;;  %v9145_v61 = vpop.xlane.xlu1 %1918  ;;  %1401 = vadd.xlane.f32.xlu0 %v10467_v33 }
 0xceb   : > { %v1911_v51 = vpop.xlane.xlu0 %1910  ;;  %v9150_v7 = vmul.f32 %v6474_v2, %v10468_v4  ;;  %v6476_v26 = vpop.eup %6475  ;;  %v10475_v2 = vld [vmem:[#allocation66_spill] sm:$0xff] }
 0xcec   : > { %6477 = vrcp.f32 %v1911_v51  ;;  %v1556_v58 = vmul.f32 %v6476_v26, %v10473_v37 }
 0xced   : > { %6024 = vmatpush3.bf16.xpose.msra.mxu0 %v4383_v55  ;;  %6479 = vrcp.f32 %v1376_v45  ;;  %v4010_v45 = vmul.f32 1.442695, %v3990_v49  ;;  %v4024_v55 = vmul.f32 1.442695, %v3997_v28 }
 0xcee   : > { %v9154_v54 = vpop.xlane.xlu1 %1922  ;;  %1936 = vadd.xlane.f32.xlu0 %v10469_v14  ;;  %6170 = vmatprep.subr.msk.bf16.mxu0 %vm687_vm0, %v8887_v40  ;;  %6481 = vrcp.f32 %v1378_v21  ;;  %v10474_v21 = vld [vmem:[#allocation125_spill] sm:$0xff] }
 0xcef   : > { %v1913_v15 = vpop.xlane.xlu0 %1912 }
 0xcf2   : > { %v9159_v18 = vpop.xlane.xlu1 %2449  ;;  %1940 = vadd.xlane.f32.xlu0 %v10470_v8 }
 0xcf3   : > { %v1915_v12 = vpop.xlane.xlu0 %1914 }
 0xcf4   : > { %6483 = vrcp.f32 %v1915_v12  ;;  %v10477_v12 = vld [vmem:[#allocation68_spill] sm:$0xff] }
 0xcf5   : > { %6026 = vmatpush3.bf16.xpose.msra.mxu0 %v4386_v31  ;;  %6485 = vrcp.f32 %v1913_v15  ;;  %v10476_v15 = vld [vmem:[#allocation98_spill] sm:$0xff] }
 0xcf6   : > { %v6478_v6 = vpop.eup %6477  ;;  %v9177_v44 = vpop.xlane.xlu1 %2453  ;;  %2467 = vadd.xlane.f32.xlu0 %v10471_v63  ;;  %6487 = vpow2.f32 %v4014_v0 }
 0xcf7   : > { %v3965_v5 = vpop.xlane.xlu0 %3964  ;;  %v9181_v49 = vmul.f32 %v6478_v6, %v10472_v35  ;;  %v6480_v43 = vpop.eup %6479  ;;  %6489 = vpow2.f32 %v4010_v45 }
 0xcf8   : > { %v3991_v40 = vsub.f32 %v8954_v41, %v3965_v5  ;;  %6491 = vpow2.f32 %v4016_v60  ;;  %v1558_v33 = vmul.f32 %v6480_v43, %v10475_v2  ;;  %v6482_v51 = vpop.eup %6481  ;;  %v10478_v60 = vld [vmem:[#allocation101_spill] sm:$0xff] }
 0xcf9   : > { %6493 = vpow2.f32 %v4020_v17  ;;  %v1559_v0 = vmul.f32 %v6482_v51, %v10477_v12  ;;  %v10480_v51 = vld [vmem:[#allocation37_spill] sm:$0xff] }
 0xcfa   : > { %v4012_v59 = vmul.f32 1.442695, %v3991_v40  ;;  %1588 = vrot.lane.b32.xlu1 %v1556_v58, %s7012_s16  ;;  %v9186_v16 = vpop.xlane.xlu1 %2980  ;;  %2471 = vadd.xlane.f32.xlu0 %v10474_v21 }
 0xcfb   : > { %v1917_v3 = vpop.xlane.xlu0 %1916 }
 0xcfc   : > { %6495 = vpow2.f32 %v4012_v59 }
 0xcfd   : > { %6497 = vrcp.f32 %v1917_v3 }
 0xcfe   : > { %v6484_v41 = vpop.eup %6483  ;;  %6499 = vpow2.f32 %v4018_v46  ;;  %v9190_v4 = vpop.xlane.xlu1 %2984  ;;  %2998 = vadd.xlane.f32.xlu0 %v8582_v34  ;;  %1592 = vrot.lane.b32.xlu1 %v1558_v33, %s7012_s16  ;;  %v4001_v34 = vsub.f32 %v8972_v30, %v9097_v42  ;;  %v4000_v30 = vsub.f32 %v8967_v53, %v9091_v19  ;;  %v10479_v19 = vld [vmem:[#allocation100_spill] sm:$0xff] }
 0xcff   : > { %v3975_v14 = vpop.xlane.xlu0 %3974  ;;  %v9198_v8 = vmul.f32 %v6484_v41, %v10476_v15  ;;  %v6486_v26 = vpop.eup %6485  ;;  %6501 = vpow2.f32 %v4024_v55 }
 0xd00   : > { %v3996_v13 = vsub.f32 %v8957_v1, %v3975_v14  ;;  %v9202_v45 = vpop.eup %6487  ;;  %v2088_v27 = vmul.f32 %v6486_v26, %v10478_v60  ;;  %v4030_v46 = vmul.f32 1.442695, %v4000_v30  ;;  %v10481_v14 = vld [vmem:[#allocation40_spill] sm:$0xff]  ;;  %v10483_v30 = vld [vmem:[#allocation42_spill] sm:$0xff] }
 0xd01   : > { %v9210_v20 = vpop.eup %6489 }
 0xd02   : > { %v4022_v31 = vmul.f32 1.442695, %v3996_v13  ;;  %v9206_v6 = vpop.xlane.xlu1 %3511  ;;  %3002 = vadd.xlane.f32.xlu0 %v8580_v32  ;;  %1594 = vrot.lane.b32.xlu1 %v1559_v0, %s7012_s16  ;;  %v9212_v1 = vpop.eup %6491  ;;  %v4032_v32 = vmul.f32 1.442695, %v4001_v34  ;;  %v10482_v34 = vld [vmem:[#allocation43_spill] sm:$0xff] }
 0xd03   : > { %v3979_v56 = vpop.xlane.xlu0 %3978  ;;  %v9216_v63 = vpop.eup %6493  ;;  %v4069_v53 = vpack.c.bf16 %v9212_v1, %v9202_v45 }
 0xd04   : > { %6503 = vpow2.f32 %v4022_v31  ;;  %v3998_v28 = vsub.f32 %v8970_v11, %v3979_v56 }
 0xd05   : > { %6505 = vpow2.f32 %v4032_v32 }
 0xd06   : > { %v9220_v42 = vpop.eup %6495  ;;  %v9222_v17 = vpop.xlane.xlu1 %3515  ;;  %3529 = vadd.xlane.f32.xlu0 %v8853_v47  ;;  %2121 = vrot.lane.b32.xlu1 %v2088_v27, %s7011_s25  ;;  %v4026_v35 = vmul.f32 1.442695, %v3998_v28 }
 0xd07   : > { %v6498_v5 = vpop.eup %6497  ;;  %v3981_v40 = vpop.xlane.xlu0 %3980  ;;  %v4068_v11 = vpack.c.bf16 %v9220_v42, %v9210_v20 }
 0xd08   : > { %v9228_v37 = vpop.eup %6499  ;;  %v3999_v58 = vsub.f32 %v8974_v23, %v3981_v40  ;;  %v2090_v43 = vmul.f32 %v6498_v5, %v10479_v19  ;;  %6507 = vpow2.f32 %v4026_v35  ;;  %v10485_v35 = vld [vmem:[#allocation46_spill] sm:$0xff] }
 0xd09   : > { %5999 = vmatprep.mubr.bf16.mxu0 %v4068_v11  ;;  %v4070_v47 = vpack.c.bf16 %v9216_v63, %v9228_v37  ;;  %v9242_v3 = vpop.eup %6501  ;;  %v10489_v19 = vld [vmem:[#allocation162_spill] sm:$0xff] }
 0xd0a   : > { %v4028_v59 = vmul.f32 1.442695, %v3999_v58  ;;  %v9236_v21 = vpop.xlane.xlu1 %1387  ;;  %3533 = vadd.xlane.f32.xlu0 %v8851_v24  ;;  %6000 = vmatmul.mubr.bf16.gmra.mrb[116].mxu0 %v4069_v53  ;;  %v10487_v58 = vld [vmem:[#allocation47_spill] sm:$0xff]  ;;  %v10488_v53 = vld [vmem:[#allocation160_spill] sm:$0xff] }
 0xd0b   : > { %2125 = vrot.lane.b32.xlu1 %v2090_v43, %s7011_s25  ;;  %6003 = vmatprep.mubr.bf16.mxu0 %v4070_v47  ;;  %v9240_v23 = vpop.xlane.xlu0 %2443 }
 0xd0c   : > { %6509 = vpow2.f32 %v4028_v59 }
 0xd0d   : > { %6511 = vpow2.f32 %v4030_v46  ;;  %v10491_v46 = vld [vmem:[#allocation50_spill] sm:$0xff] }
 0xd0e   : > { %v6504_v2 = vpop.eup %6503  ;;  %v9244_v33 = vpop.xlane.xlu1 %1391  ;;  %915 = vadd.xlane.f32.xlu0 %v10480_v51  ;;  %v10493_v51 = vld [vmem:[#allocation51_spill] sm:$0xff] }
 0xd0f   : > { %v9247_v41 = vpop.xlane.xlu0 %2447  ;;  %v4071_v24 = vpack.c.bf16 %v9242_v3, %v6504_v2  ;;  %v9255_v13 = vpop.eup %6505 }
 0xd12   : > { %v9250_v55 = vpop.xlane.xlu1 %1926  ;;  %919 = vadd.xlane.f32.xlu0 %v10481_v14  ;;  %6004 = vmatmul.mubr.bf16.gmra.mrb[120].mxu0 %v4071_v24  ;;  %v6508_v12 = vpop.eup %6507  ;;  %v10494_v24 = vld [vmem:[#allocation161_spill] sm:$0xff]  ;;  %v10495_v14 = vld [vmem:[#allocation164_spill] sm:$0xff] }
 0xd13   : > { %v9253_v15 = vpop.xlane.xlu0 %2974 }
 0xd16   : > { %v9257_v0 = vpop.eup %6509  ;;  %v9259_v26 = vpop.xlane.xlu1 %1930  ;;  %923 = vadd.xlane.f32.xlu0 %v10482_v34 }
 0xd17   : > { %v6512_v31 = vpop.eup %6511  ;;  %v9262_v56 = vpop.xlane.xlu0 %2978  ;;  %v4072_v28 = vpack.c.bf16 %v9257_v0, %v6508_v12 }
 0xd18   : > { %v4073_v60 = vpack.c.bf16 %v9255_v13, %v6512_v31 }
 0xd19   : > { %6007 = vmatprep.mubr.bf16.mxu0 %v4072_v28 }
 0xd1a   : > { %v9266_v27 = vpop.xlane.xlu1 %2457  ;;  %927 = vadd.xlane.f32.xlu0 %v10483_v30  ;;  %6008 = vmatmul.mubr.bf16.gmra.mrb[124].mxu0 %v4073_v60 }
 0xd1b   : > { %6027 = vmatprep.mubr.msk.bf16.mxu0 %vm687_vm0, %v8891_v57  ;;  %v9271_v32 = vpop.xlane.xlu0 %3505 }
 0xd1e   : > { %v9273_v5 = vpop.xlane.xlu1 %2461  ;;  %931 = vadd.xlane.f32.xlu0 %v10485_v35  ;;  %v10498_v35 = vld [vmem:[#allocation163_spill] sm:$0xff] }
 0xd1f   : > { %10484 = vst [vmem:[#allocation22_spill] sm:$0xff] %v9273_v5  ;;  %v9276_v40 = vpop.xlane.xlu0 %3509 }
 0xd22   : > { %v9278_v11 = vpop.xlane.xlu1 %2988  ;;  %935 = vadd.xlane.f32.xlu0 %v10487_v58  ;;  %6028 = vmatmul.mubr.msk.bf16.vlgmr.msra.gmra.mrb[128].mxu0 %vm687_vm0, %v10488_v53  ;;  %v10499_v58 = vld [vmem:[#allocation166_spill] sm:$0xff] }
 0xd23   : > { %10486 = vst [vmem:[#allocation20_spill] sm:$0xff] %v9278_v11  ;;  %6031 = vmatprep.mubr.msk.bf16.mxu0 %vm687_vm0, %v10489_v19  ;;  %v9285_v43 = vpop.xlane.xlu0 %1381 }
 0xd26   : > { %v9287_v57 = vpop.xlane.xlu1 %2992  ;;  %939 = vadd.xlane.f32.xlu0 %v10491_v46 }
 0xd27   : > { %10490 = vst [vmem:[#allocation24_spill] sm:$0xff] %v9287_v57  ;;  %v9290_v47 = vpop.xlane.xlu0 %1385 }
 0xd2a   : > { %v9292_v59 = vpop.xlane.xlu1 %3519  ;;  %943 = vadd.xlane.f32.xlu0 %v10493_v51  ;;  %6032 = vmatmul.mubr.msk.bf16.gmra.mrb[132].mxu0 %vm687_vm0, %v10494_v24  ;;  %v10502_v51 = vld [vmem:[#allocation165_spill] sm:$0xff] }
 0xd2b   : > { %10492 = vst [vmem:[#allocation23_spill] sm:$0xff] %v9292_v59  ;;  %6035 = vmatprep.mubr.msk.bf16.mxu0 %vm687_vm0, %v10495_v14  ;;  %v9299_v34 = vpop.xlane.xlu0 %1920 }
 0xd2e   : > { %v9301_v28 = vpop.xlane.xlu1 %3523 }
 0xd2f   : > { %10496 = vst [vmem:[#allocation86_spill] sm:$0xff] %v9301_v28  ;;  %4038 = vadd.xlane.f32.xlu1 %v9064_v62  ;;  %v9304_v60 = vpop.xlane.xlu0 %1924 }
 0xd32   : > { %v9306_v30 = vpop.xlane.xlu1 %1395  ;;  %6036 = vmatmul.mubr.msk.bf16.gmra.mrb[136].mxu0 %vm687_vm0, %v10498_v35 }
 0xd33   : > { %10497 = vst [vmem:[#allocation83_spill] sm:$0xff] %v9306_v30  ;;  %4034 = vadd.xlane.f32.xlu1 %v9056_v25  ;;  %6039 = vmatprep.mubr.msk.bf16.mxu0 %vm687_vm0, %v10499_v58  ;;  %v9313_v53 = vpop.xlane.xlu0 %2451  ;;  %v10514_v30 = vld [vmem:[#allocation35_spill] sm:$0xff] }
 0xd36   : > { %v9315_v19 = vpop.xlane.xlu1 %1399 }
 0xd37   : > { %10500 = vst [vmem:[#allocation88_spill] sm:$0xff] %v9315_v19  ;;  %4046 = vadd.xlane.f32.xlu1 %v9202_v45  ;;  %v9318_v46 = vpop.xlane.xlu0 %2455 }
 0xd3a   : > { %v9320_v62 = vpop.xlane.xlu1 %1934  ;;  %6040 = vmatmul.mubr.msk.bf16.gmra.mrb[140].mxu0 %vm687_vm0, %v10502_v51 }
 0xd3b   : > { %10501 = vst [vmem:[#allocation82_spill] sm:$0xff] %v9320_v62  ;;  %4042 = vadd.xlane.f32.xlu1 %v9210_v20  ;;  %v9325_v24 = vpop.xlane.xlu0 %2982 }
 0xd3e   : > { %v9327_v25 = vpop.xlane.xlu1 %1938 }
 0xd3f   : > { %10503 = vst [vmem:[#allocation116_spill] sm:$0xff] %v9327_v25  ;;  %4054 = vadd.xlane.f32.xlu1 %v6504_v2  ;;  %v9329_v14 = vpop.xlane.xlu0 %2986 }
 0xd40   : > { %1590 = vrot.lane.b32.xlu0 %v9150_v7, %s7012_s16 }
 0xd42   : > { %v9333_v45 = vpop.xlane.xlu1 %2465 }
 0xd43   : > { %10504 = vst [vmem:[#allocation84_spill] sm:$0xff] %v9333_v45  ;;  %4050 = vadd.xlane.f32.xlu1 %v9228_v37  ;;  %v9336_v35 = vpop.xlane.xlu0 %3513 }
 0xd44   : > { %2119 = vrot.lane.b32.xlu0 %v9181_v49, %s7011_s25 }
 0xd46   : > { %v9340_v20 = vpop.xlane.xlu1 %2469 }
 0xd47   : > { %10505 = vst [vmem:[#allocation118_spill] sm:$0xff] %v9340_v20  ;;  %4062 = vadd.xlane.f32.xlu1 %v6512_v31  ;;  %v9342_v58 = vpop.xlane.xlu0 %3517 }
 0xd48   : > { %2123 = vrot.lane.b32.xlu0 %v9198_v8, %s7011_s25 }
 0xd4a   : > { %v9346_v2 = vpop.xlane.xlu1 %2996 }
 0xd4b   : > { %10506 = vst [vmem:[#allocation85_spill] sm:$0xff] %v9346_v2  ;;  %4058 = vadd.xlane.f32.xlu1 %v6508_v12  ;;  %v9348_v7 = vpop.xlane.xlu0 %1389 }
 0xd4e   : > { %v9350_v51 = vpop.xlane.xlu1 %3000 }
 0xd4f   : > { %10507 = vst [vmem:[#allocation28_spill] sm:$0xff] %v9350_v51  ;;  %v9352_v37 = vpop.xlane.xlu0 %1393 }
 0xd52   : > { %v9354_v45 = vpop.xlane.xlu1 %3527 }
 0xd53   : > { %10508 = vst [vmem:[#allocation114_spill] sm:$0xff] %v9354_v45  ;;  %v9356_v49 = vpop.xlane.xlu0 %1928 }
 0xd56   : > { %v9358_v20 = vpop.xlane.xlu1 %3531 }
 0xd57   : > { %10509 = vst [vmem:[#allocation31_spill] sm:$0xff] %v9358_v20  ;;  %v9360_v31 = vpop.xlane.xlu0 %1932 }
 0xd58   : > { %10510 = vst [vmem:[#allocation115_spill] sm:$0xff] %v9360_v31 }
 0xd5a   : > { %v914_v25 = vpop.xlane.xlu1 %913 }
 0xd5b   : > { %6513 = vrcp.f32 %v914_v25  ;;  %v9362_v8 = vpop.xlane.xlu0 %2459 }
 0xd5c   : > { %10511 = vst [vmem:[#allocation90_spill] sm:$0xff] %v9362_v8 }
 0xd5e   : > { %v918_v2 = vpop.xlane.xlu1 %917 }
 0xd5f   : > { %6515 = vrcp.f32 %v918_v2  ;;  %v9364_v12 = vpop.xlane.xlu0 %2463  ;;  %v10516_v2 = vld [vmem:[#allocation34_spill] sm:$0xff] }
 0xd60   : > { %10512 = vst [vmem:[#allocation93_spill] sm:$0xff] %v9364_v12 }
 0xd62   : > { %v922_v62 = vpop.xlane.xlu1 %921 }
 0xd63   : > { %6517 = vrcp.f32 %v922_v62  ;;  %v9366_v51 = vpop.xlane.xlu0 %2990 }
 0xd64   : > { %10513 = vst [vmem:[#allocation120_spill] sm:$0xff] %v9366_v51 }
 0xd65   : > { %v6514_v19 = vpop.eup %6513 }
 0xd66   : > { %v926_v45 = vpop.xlane.xlu1 %925  ;;  %v1066_v28 = vmul.f32 %v6514_v19, %v10514_v30  ;;  %v10518_v19 = vld [vmem:[#allocation55_spill] sm:$0xff] }
 0xd67   : > { %6519 = vrcp.f32 %v926_v45  ;;  %4040 = vadd.xlane.f32.xlu0 %v9067_v9  ;;  %v9370_v20 = vpop.xlane.xlu0 %2994 }
 0xd68   : > { %10515 = vst [vmem:[#allocation123_spill] sm:$0xff] %v9370_v20  ;;  %1082 = vst.msk [vmem:[#allocation2] sm:$0xff] %vm687_vm0, %v1066_v28 }
 0xd69   : > { %v6516_v25 = vpop.eup %6515 }
 0xd6a   : > { %v930_v59 = vpop.xlane.xlu1 %929  ;;  %v1068_v57 = vmul.f32 %v6516_v25, %v10516_v2 }
 0xd6b   : > { %6521 = vrcp.f32 %v930_v59  ;;  %4036 = vadd.xlane.f32.xlu0 %v9054_v50  ;;  %v9375_v62 = vpop.xlane.xlu0 %3521  ;;  %v10520_v59 = vld [vmem:[#allocation54_spill] sm:$0xff] }
 0xd6c   : > { %10517 = vst [vmem:[#allocation21_spill] sm:$0xff] %v9375_v62  ;;  %1084 = vst.msk [vmem:[#allocation2 + $0x10] sm:$0xff] %vm687_vm0, %v1068_v57 }
 0xd6d   : > { %v6518_v51 = vpop.eup %6517 }
 0xd6e   : > { %v934_v30 = vpop.xlane.xlu1 %933  ;;  %v1070_v45 = vmul.f32 %v6518_v51, %v10518_v19 }
 0xd6f   : > { %6523 = vrcp.f32 %v934_v30  ;;  %4048 = vadd.xlane.f32.xlu0 %v9212_v1  ;;  %v9380_v9 = vpop.xlane.xlu0 %3525  ;;  %v10522_v30 = vld [vmem:[#allocation59_spill] sm:$0xff] }
 0xd70   : > { %10519 = vst [vmem:[#allocation25_spill] sm:$0xff] %v9380_v9  ;;  %1086 = vst.msk [vmem:[#allocation2 + $0x20] sm:$0xff] %vm687_vm0, %v1070_v45  ;;  %v10536_v9 = vld [vmem:[#allocation36_spill] sm:$0xff] }
 0xd71   : > { %v6520_v28 = vpop.eup %6519 }
 0xd72   : > { %v938_v25 = vpop.xlane.xlu1 %937  ;;  %v1072_v2 = vmul.f32 %v6520_v28, %v10520_v59 }
 0xd73   : > { %6525 = vrcp.f32 %v938_v25  ;;  %4044 = vadd.xlane.f32.xlu0 %v9220_v42  ;;  %v9385_v50 = vpop.xlane.xlu0 %1397  ;;  %v10524_v25 = vld [vmem:[#allocation58_spill] sm:$0xff] }
 0xd74   : > { %10521 = vst [vmem:[#allocation87_spill] sm:$0xff] %v9385_v50  ;;  %1088 = vst.msk [vmem:[#allocation2 + $0x30] sm:$0xff] %vm687_vm0, %v1072_v2 }
 0xd75   : > { %v6522_v57 = vpop.eup %6521 }
 0xd76   : > { %v942_v51 = vpop.xlane.xlu1 %941  ;;  %v1074_v19 = vmul.f32 %v6522_v57, %v10522_v30 }
 0xd77   : > { %6527 = vrcp.f32 %v942_v51  ;;  %4056 = vadd.xlane.f32.xlu0 %v9242_v3  ;;  %v9390_v1 = vpop.xlane.xlu0 %1401  ;;  %v10526_v3 = vld [vmem:[#allocation63_spill] sm:$0xff] }
 0xd78   : > { %10523 = vst [vmem:[#allocation89_spill] sm:$0xff] %v9390_v1  ;;  %1090 = vst.msk [vmem:[#allocation2 + $0x40] sm:$0xff] %vm687_vm0, %v1074_v19 }
 0xd79   : > { %v6524_v45 = vpop.eup %6523 }
 0xd7a   : > { %v1589_v28 = vpop.permute.xlu1 %1588  ;;  %v1076_v42 = vmul.f32 %v6524_v45, %v10524_v25  ;;  %v10528_v45 = vld [vmem:[#allocation62_spill] sm:$0xff] }
 0xd7b   : > { %1637 = vst.msk [vmem:[#allocation2] sm:$0xff] %vm1636_vm1, %v1589_v28  ;;  %4052 = vadd.xlane.f32.xlu0 %v9216_v63  ;;  %v9396_v59 = vpop.xlane.xlu0 %1936 }
 0xd7c   : > { %10525 = vst [vmem:[#allocation32_spill] sm:$0xff] %v9396_v59  ;;  %1092 = vst.msk [vmem:[#allocation2 + $0x50] sm:$0xff] %vm687_vm0, %v1076_v42 }
 0xd7d   : > { %v6526_v2 = vpop.eup %6525 }
 0xd7e   : > { %v1593_v57 = vpop.permute.xlu1 %1592  ;;  %v1078_v51 = vmul.f32 %v6526_v2, %v10526_v3 }
 0xd7f   : > { %1639 = vst.msk [vmem:[#allocation2 + $0x10] sm:$0xff] %vm1636_vm1, %v1593_v57  ;;  %4064 = vadd.xlane.f32.xlu0 %v9255_v13  ;;  %v9402_v30 = vpop.xlane.xlu0 %1940 }
 0xd80   : > { %10527 = vst [vmem:[#allocation117_spill] sm:$0xff] %v9402_v30  ;;  %1094 = vst.msk [vmem:[#allocation2 + $0x60] sm:$0xff] %vm687_vm0, %v1078_v51  ;;  %v10535_v30 = vld [vmem:[#allocation53_spill] sm:$0xff] }
 0xd81   : > { %v6528_v19 = vpop.eup %6527 }
 0xd82   : > { %v1080_v28 = vmul.f32 %v6528_v19, %v10528_v45 }
 0xd83   : > { %4060 = vadd.xlane.f32.xlu0 %v9257_v0  ;;  %v9407_v63 = vpop.xlane.xlu0 %2467 }
 0xd84   : > { %10529 = vst [vmem:[#allocation33_spill] sm:$0xff] %v9407_v63  ;;  %1096 = vst.msk [vmem:[#allocation2 + $0x70] sm:$0xff] %vm687_vm0, %v1080_v28 }
 0xd87   : > { %v9410_v25 = vpop.xlane.xlu0 %2471 }
 0xd88   : > { %10530 = vst [vmem:[#allocation119_spill] sm:$0xff] %v9410_v25  ;;  %v1595_v25 = vpop.permute.xlu1 %1594 }
 0xd8b   : > { %v9412_v42 = vpop.xlane.xlu0 %2998 }
 0xd8c   : > { %10531 = vst [vmem:[#allocation94_spill] sm:$0xff] %v9412_v42  ;;  %v2122_v1 = vpop.permute.xlu1 %2121 }
 0xd8f   : > { %v9414_v2 = vpop.xlane.xlu0 %3002  ;;  %v9416_v13 = vpop.f32.mrb[112].mxu0 }
 0xd90   : > { %10532 = vst [vmem:[#allocation97_spill] sm:$0xff] %v9414_v2  ;;  %v9418_v57 = vpop.f32.mrb[113].mxu0 }
 0xd91   : > { %v9420_v3 = vpop.f32.mrb[114].mxu0 }
 0xd92   : > { %v9422_v51 = vpop.f32.mrb[115].mxu0 }
 0xd93   : > { %v9424_v19 = vpop.xlane.xlu0 %3529 }
 0xd94   : > { %10533 = vst [vmem:[#allocation124_spill] sm:$0xff] %v9424_v19 }
 0xd97   : > { %v9426_v0 = vpop.xlane.xlu0 %3533 }
 0xd98   : > { %10534 = vst [vmem:[#allocation127_spill] sm:$0xff] %v9426_v0  ;;  %v10539_v0 = vld [vmem:[#allocation61_spill] sm:$0xff] }
 0xd9b   : > { %v916_v45 = vpop.xlane.xlu0 %915 }
 0xd9c   : > { %6529 = vrcp.f32 %v916_v45 }
 0xd9f   : > { %v920_v28 = vpop.xlane.xlu0 %919 }
 0xda0   : > { %6531 = vrcp.f32 %v920_v28  ;;  %v2126_v28 = vpop.permute.xlu1 %2125 }
 0xda3   : > { %v924_v42 = vpop.xlane.xlu0 %923 }
 0xda4   : > { %6533 = vrcp.f32 %v924_v42 }
 0xda6   : > { %v6530_v2 = vpop.eup %6529 }
 0xda7   : > { %v928_v63 = vpop.xlane.xlu0 %927  ;;  %v1067_v59 = vmul.f32 %v6530_v2, %v10535_v30  ;;  %v10537_v30 = vld [vmem:[#allocation57_spill] sm:$0xff] }
 0xda8   : > { %6535 = vrcp.f32 %v928_v63 }
 0xda9   : > { %1083 = vst.msk [vmem:[#allocation2 + $0x8] sm:$0xff] %vm687_vm0, %v1067_v59 }
 0xdaa   : > { %v6532_v50 = vpop.eup %6531 }
 0xdab   : > { %v1069_v19 = vmul.f32 %v6532_v50, %v10536_v9  ;;  %v932_v62 = vpop.xlane.xlu0 %931  ;;  %v10538_v9 = vld [vmem:[#allocation56_spill] sm:$0xff] }
 0xdac   : > { %6537 = vrcp.f32 %v932_v62 }
 0xdad   : > { %1085 = vst.msk [vmem:[#allocation2 + $0x18] sm:$0xff] %vm687_vm0, %v1069_v19 }
 0xdae   : > { %v6534_v45 = vpop.eup %6533  ;;  %1640 = vst.msk [vmem:[#allocation2 + $0x18] sm:$0xff] %vm1636_vm1, %v1595_v25 }
 0xdaf   : > { %v936_v42 = vpop.xlane.xlu0 %935  ;;  %2171 = vst.msk [vmem:[#allocation2 + $0x18] sm:$0xff] %vm2167_vm2, %v2126_v28  ;;  %v1071_v2 = vmul.f32 %v6534_v45, %v10537_v30  ;;  %v10540_v45 = vld [vmem:[#allocation60_spill] sm:$0xff] }
 0xdb0   : > { %6539 = vrcp.f32 %v936_v42 }
 0xdb1   : > { %1087 = vst.msk [vmem:[#allocation2 + $0x28] sm:$0xff] %vm687_vm0, %v1071_v2 }
 0xdb2   : > { %v6536_v59 = vpop.eup %6535 }
 0xdb3   : > { %v940_v63 = vpop.xlane.xlu0 %939  ;;  %v1073_v50 = vmul.f32 %v6536_v59, %v10538_v9  ;;  %v10541_v59 = vld [vmem:[#allocation65_spill] sm:$0xff]  ;;  %v10542_v9 = vld [vmem:[#allocation64_spill] sm:$0xff] }
 0xdb4   : > { %6541 = vrcp.f32 %v940_v63 }
 0xdb5   : > { %1089 = vst.msk [vmem:[#allocation2 + $0x38] sm:$0xff] %vm687_vm0, %v1073_v50 }
 0xdb6   : > { %v6538_v62 = vpop.eup %6537 }
 0xdb7   : > { %v944_v19 = vpop.xlane.xlu0 %943  ;;  %v1075_v20 = vmul.f32 %v6538_v62, %v10539_v0 }
 0xdb8   : > { %6543 = vrcp.f32 %v944_v19 }
 0xdb9   : > { %1091 = vst.msk [vmem:[#allocation2 + $0x48] sm:$0xff] %vm687_vm0, %v1075_v20  ;;  %6545 = vrcp.f32 %v9240_v23 }
 0xdba   : > { %v6540_v25 = vpop.eup %6539  ;;  %6547 = vrcp.f32 %v9059_v29  ;;  %v10555_v29 = vld [vmem:[#allocation129_spill] sm:$0xff] }
 0xdbb   : > { %v1591_v28 = vpop.permute.xlu0 %1590  ;;  %v1077_v42 = vmul.f32 %v6540_v25, %v10540_v45  ;;  %6549 = vrcp.f32 %v9103_v39 }
 0xdbc   : > { %1638 = vst.msk [vmem:[#allocation2 + $0x8] sm:$0xff] %vm1636_vm1, %v1591_v28  ;;  %6551 = vrcp.f32 %v9109_v52  ;;  %v10560_v52 = vld [vmem:[#allocation145_spill] sm:$0xff] }
 0xdbd   : > { %2169 = vst.msk [vmem:[#allocation2 + $0x8] sm:$0xff] %vm2167_vm2, %v2122_v1  ;;  %6553 = vrcp.f32 %v9115_v38 }
 0xdbe   : > { %1093 = vst.msk [vmem:[#allocation2 + $0x58] sm:$0xff] %vm687_vm0, %v1077_v42  ;;  %v6542_v30 = vpop.eup %6541  ;;  %6555 = vrcp.f32 %v9247_v41 }
 0xdbf   : > { %v2120_v2 = vpop.permute.xlu0 %2119  ;;  %v1079_v63 = vmul.f32 %v6542_v30, %v10541_v59  ;;  %6557 = vrcp.f32 %v9121_v10  ;;  %v10561_v10 = vld [vmem:[#allocation144_spill] sm:$0xff] }
 0xdc0   : > { %2168 = vst.msk [vmem:[#allocation2] sm:$0xff] %vm2167_vm2, %v2120_v2  ;;  %6559 = vrcp.f32 %v9253_v15  ;;  %v10562_v15 = vld [vmem:[#allocation130_spill] sm:$0xff] }
 0xdc1   : > { %1095 = vst.msk [vmem:[#allocation2 + $0x68] sm:$0xff] %vm687_vm0, %v1079_v63  ;;  %6561 = vrcp.f32 %v9127_v22 }
 0xdc2   : > { %v6544_v0 = vpop.eup %6543  ;;  %6563 = vrcp.f32 %v9262_v56  ;;  %v10563_v56 = vld [vmem:[#allocation168_spill] sm:$0xff] }
 0xdc3   : > { %v2124_v20 = vpop.permute.xlu0 %2123  ;;  %v1081_v50 = vmul.f32 %v6544_v0, %v10542_v9 }
 0xdc4   : > { %2170 = vst.msk [vmem:[#allocation2 + $0x10] sm:$0xff] %vm2167_vm2, %v2124_v20 }
 0xdc5   : > { %1097 = vst.msk [vmem:[#allocation2 + $0x78] sm:$0xff] %vm687_vm0, %v1081_v50 }
 0xddd   : > { %v9450_v62 = vpop.f32.mrb[116].mxu0 }
 0xdde   : > { %v9452_v1 = vpop.f32.mrb[117].mxu0 }
 0xddf   : > { %v9454_v19 = vpop.f32.mrb[118].mxu0 }
 0xde0   : > { %10543 = vst [vmem:[#allocation27_spill] sm:$0xff] %v9454_v19  ;;  %v9456_v25 = vpop.f32.mrb[119].mxu0 }
 0xde5   : > { %v9458_v28 = vpop.f32.mrb[120].mxu0 }
 0xde6   : > { %10544 = vst [vmem:[#allocation26_spill] sm:$0xff] %v9458_v28  ;;  %v9460_v45 = vpop.f32.mrb[121].mxu0 }
 0xde7   : > { %10545 = vst [vmem:[#allocation92_spill] sm:$0xff] %v9460_v45  ;;  %v9462_v42 = vpop.f32.mrb[122].mxu0  ;;  %v10554_v45 = vld [vmem:[#allocation131_spill] sm:$0xff] }
 0xde8   : > { %10546 = vst [vmem:[#allocation91_spill] sm:$0xff] %v9462_v42  ;;  %v9464_v30 = vpop.f32.mrb[123].mxu0 }
 0xde9   : > { %10547 = vst [vmem:[#allocation38_spill] sm:$0xff] %v9464_v30  ;;  %v6546_v30 = vpop.eup %6545 }
 0xdea   : > { %v6548_v12 = vpop.eup %6547 }
 0xdeb   : > { %v2618_v11 = vmul.f32 %v6548_v12, %v10555_v29  ;;  %v4039_v12 = vpop.xlane.xlu1 %4038 }
 0xded   : > { %v9466_v2 = vpop.f32.mrb[124].mxu0 }
 0xdee   : > { %10548 = vst [vmem:[#allocation122_spill] sm:$0xff] %v9466_v2  ;;  %v9468_v59 = vpop.f32.mrb[125].mxu0 }
 0xdef   : > { %10549 = vst [vmem:[#allocation39_spill] sm:$0xff] %v9468_v59  ;;  %v9470_v63 = vpop.f32.mrb[126].mxu0  ;;  %v4035_v39 = vpop.xlane.xlu1 %4034 }
 0xdf0   : > { %10550 = vst [vmem:[#allocation121_spill] sm:$0xff] %v9470_v63  ;;  %v9472_v0 = vpop.f32.mrb[127].mxu0  ;;  %6565 = vrcp.f32 %v4035_v39 }
 0xdf1   : > { %10551 = vst [vmem:[#allocation41_spill] sm:$0xff] %v9472_v0  ;;  %6567 = vrcp.f32 %v9271_v32  ;;  %v10565_v32 = vld [vmem:[#allocation167_spill] sm:$0xff] }
 0xdf2   : > { %6569 = vrcp.f32 %v4039_v12 }
 0xdf3   : > { %6571 = vrcp.f32 %v9276_v40  ;;  %v10566_v40 = vld [vmem:[#allocation146_spill] sm:$0xff] }
 0xdf4   : > { %6573 = vrcp.f32 %v9133_v48 }
 0xdf5   : > { %v9474_v20 = vpop.f32.mrb[128].mxu0 }
 0xdf6   : > { %10552 = vst [vmem:[#allocation44_spill] sm:$0xff] %v9474_v20  ;;  %4489 = vmax.xlane.f32.xlu1 %v9474_v20  ;;  %v9477_v9 = vpop.f32.mrb[129].mxu0  ;;  %v2619_v20 = vmul.f32 %v6546_v30, %v10554_v45  ;;  %v10559_v30 = vld [vmem:[#allocation128_spill] sm:$0xff] }
 0xdf7   : > { %10553 = vst [vmem:[#allocation45_spill] sm:$0xff] %v9477_v9  ;;  %v9479_v50 = vpop.f32.mrb[130].mxu0  ;;  %4485 = vmax.xlane.f32.xlu0 %v9477_v9 }
 0xdf8   : > { %v9483_v42 = vpop.f32.mrb[131].mxu0 }
 0xdfd   : > { %v9485_v2 = vpop.f32.mrb[132].mxu0 }
 0xdfe   : > { %v9488_v63 = vpop.f32.mrb[133].mxu0 }
 0xdff   : > { %v9490_v0 = vpop.f32.mrb[134].mxu0 }
 0xe00   : > { %v9492_v59 = vpop.f32.mrb[135].mxu0 }
 0xe05   : > { %v9494_v28 = vpop.f32.mrb[136].mxu0 }
 0xe06   : > { %v9497_v9 = vpop.f32.mrb[137].mxu0 }
 0xe07   : > { %v9499_v23 = vpop.f32.mrb[138].mxu0  ;;  %2652 = vrot.lane.b32.xlu1 %v2619_v20, %s7010_s9 }
 0xe08   : > { %v9502_v8 = vpop.f32.mrb[139].mxu0 }
 0xe0d   : > { %v9505_v31 = vpop.f32.mrb[140].mxu0  ;;  %2650 = vrot.lane.b32.xlu0 %v2618_v11, %s7010_s9  ;;  %v6550_v11 = vpop.eup %6549 }
 0xe0e   : > { %10556 = vst [vmem:[#allocation48_spill] sm:$0xff] %v9505_v31  ;;  %v9508_v5 = vpop.f32.mrb[141].mxu0  ;;  %v2620_v20 = vmul.f32 %v6550_v11, %v10559_v30  ;;  %v6552_v29 = vpop.eup %6551 }
 0xe0f   : > { %10557 = vst [vmem:[#allocation49_spill] sm:$0xff] %v9508_v5  ;;  %v9510_v19 = vpop.f32.mrb[142].mxu0  ;;  %v3149_v38 = vmul.f32 %v6552_v29, %v10560_v52 }
 0xe10   : > { %v9512_v45 = vpop.f32.mrb[143].mxu0 }
 0xe11   : > { %10558 = vst [vmem:[#allocation30_spill] sm:$0xff] %v9512_v45 }
 0xe2b   : > { %4491 = vmax.xlane.f32.xlu1 %v9479_v50 }
 0xe2c   : > { %4493 = vmax.xlane.f32.xlu0 %v9488_v63 }
 0xe2f   : > { %4487 = vmax.xlane.f32.xlu1 %v9483_v42 }
 0xe30   : > { %4501 = vmax.xlane.f32.xlu0 %v9497_v9 }
 0xe33   : > { %4497 = vmax.xlane.f32.xlu1 %v9485_v2 }
 0xe34   : > { %4507 = vmax.xlane.f32.xlu0 %v9499_v23 }
 0xe37   : > { %4499 = vmax.xlane.f32.xlu1 %v9490_v0 }
 0xe38   : > { %4515 = vmax.xlane.f32.xlu0 %v9510_v19 }
 0xe3b   : > { %4495 = vmax.xlane.f32.xlu1 %v9492_v59 }
 0xe3c   : > { %4511 = vmax.xlane.f32.xlu0 %v9512_v45 }
 0xe3f   : > { %4505 = vmax.xlane.f32.xlu1 %v9494_v28 }
 0xe43   : > { %4503 = vmax.xlane.f32.xlu1 %v9502_v8 }
 0xe47   : > { %4513 = vmax.xlane.f32.xlu1 %v9505_v31  ;;  %v6554_v31 = vpop.eup %6553 }
 0xe48   : > { %v6556_v41 = vpop.eup %6555  ;;  %v3151_v11 = vmul.f32 %v6554_v31, %v10561_v10  ;;  %v10564_v31 = vld [vmem:[#allocation147_spill] sm:$0xff]  ;;  %v9552_v10 = vpop.xlane.xlu1 %4046 }
 0xe49   : > { %v6558_v30 = vpop.eup %6557  ;;  %v2621_v22 = vmul.f32 %v6556_v41, %v10562_v15 }
 0xe4a   : > { %v3680_v52 = vmul.f32 %v6558_v30, %v10563_v56 }
 0xe4b   : > { %4509 = vmax.xlane.f32.xlu1 %v9508_v5  ;;  %v4041_v5 = vpop.xlane.xlu0 %4040 }
 0xe4c   : > { %v9564_v56 = vpop.xlane.xlu1 %4042 }
 0xe4f   : > { %v4037_v29 = vpop.xlane.xlu0 %4036 }
 0xe50   : > { %6575 = vrcp.f32 %v4037_v29 }
 0xe51   : > { %6577 = vrcp.f32 %v9139_v36 }
 0xe52   : > { %2654 = vrot.lane.b32.xlu0 %v2620_v20, %s7010_s9  ;;  %v6560_v20 = vpop.eup %6559  ;;  %6579 = vrcp.f32 %v4041_v5  ;;  %v10568_v5 = vld [vmem:[#allocation169_spill] sm:$0xff] }
 0xe53   : > { %v6562_v45 = vpop.eup %6561  ;;  %v3150_v39 = vmul.f32 %v6560_v20, %v10564_v31  ;;  %6581 = vrcp.f32 %v9145_v61  ;;  %v10569_v61 = vld [vmem:[#allocation71_spill] sm:$0xff] }
 0xe54   : > { %v3682_v41 = vmul.f32 %v6562_v45, %v10565_v32  ;;  %v10567_v45 = vld [vmem:[#allocation170_spill] sm:$0xff]  ;;  %6583 = vrcp.f32 %v9285_v43 }
 0xe55   : > { %6585 = vrcp.f32 %v9154_v54  ;;  %v10570_v54 = vld [vmem:[#allocation70_spill] sm:$0xff] }
 0xe56   : > { %3181 = vrot.lane.b32.xlu0 %v3149_v38, %s7009_s12  ;;  %v6564_v38 = vpop.eup %6563  ;;  %6587 = vrcp.f32 %v9290_v47 }
 0xe57   : > { %v6566_v12 = vpop.eup %6565  ;;  %v3152_v30 = vmul.f32 %v6564_v38, %v10566_v40  ;;  %6589 = vrcp.f32 %v9159_v18  ;;  %v10571_v18 = vld [vmem:[#allocation103_spill] sm:$0xff] }
 0xe58   : > { %v6568_v15 = vpop.eup %6567  ;;  %v4211_v48 = vmul.f32 %v6566_v12, %v9418_v57  ;;  %6591 = vrcp.f32 %v9299_v34  ;;  %v10572_v34 = vld [vmem:[#allocation73_spill] sm:$0xff] }
 0xe59   : > { %v3681_v20 = vmul.f32 %v6568_v15, %v10567_v45  ;;  %6593 = vrcp.f32 %v9177_v44  ;;  %v10573_v44 = vld [vmem:[#allocation102_spill] sm:$0xff] }
 0xe5a   : > { %3185 = vrot.lane.b32.xlu0 %v3151_v11, %s7009_s12  ;;  %v9554_v11 = vpop.xlane.xlu0 %4048  ;;  %6595 = vrcp.f32 %v9304_v60  ;;  %v10574_v60 = vld [vmem:[#allocation72_spill] sm:$0xff] }
 0xe5b   : > { %6597 = vrcp.f32 %v9186_v16  ;;  %v10575_v16 = vld [vmem:[#allocation133_spill] sm:$0xff] }
 0xe5c   : > { %2656 = vrot.lane.b32.xlu1 %v2621_v22, %s7010_s9  ;;  %v6570_v22 = vpop.eup %6569  ;;  %6599 = vrcp.f32 %v9313_v53  ;;  %v10576_v53 = vld [vmem:[#allocation105_spill] sm:$0xff] }
 0xe5d   : > { %v6572_v29 = vpop.eup %6571  ;;  %v4213_v36 = vmul.f32 %v6570_v22, %v9416_v13  ;;  %6601 = vrcp.f32 %v9190_v4  ;;  %v10577_v4 = vld [vmem:[#allocation132_spill] sm:$0xff] }
 0xe5e   : > { %3712 = vrot.lane.b32.xlu0 %v3680_v52, %s7008_s17  ;;  %v9566_v52 = vpop.xlane.xlu0 %4044  ;;  %v6574_v31 = vpop.eup %6573  ;;  %v3683_v57 = vmul.f32 %v6572_v29, %v10568_v5  ;;  %6603 = vrcp.f32 %v9318_v46  ;;  %v10578_v46 = vld [vmem:[#allocation104_spill] sm:$0xff] }
 0xe5f   : > { %v1560_v38 = vmul.f32 %v6574_v31, %v10569_v61  ;;  %6605 = vrcp.f32 %v9206_v6 }
 0xe60   : > { %3183 = vrot.lane.b32.xlu1 %v3150_v39, %s7009_s12  ;;  %v6576_v39 = vpop.eup %6575  ;;  %6607 = vrcp.f32 %v9325_v24  ;;  %v10580_v24 = vld [vmem:[#allocation135_spill] sm:$0xff] }
 0xe61   : > { %v6578_v32 = vpop.eup %6577  ;;  %v4212_v43 = vmul.f32 %v6576_v39, %v9422_v51  ;;  %6609 = vrcp.f32 %v9222_v17 }
 0xe62   : > { %3716 = vrot.lane.b32.xlu0 %v3682_v41, %s7008_s17  ;;  %v9577_v41 = vpop.xlane.xlu1 %4054  ;;  %v9579_v13 = vpop.xlane.xlu0 %4056  ;;  %v1562_v40 = vmul.f32 %v6578_v32, %v10570_v54 }
 0xe63   : > { %v6580_v12 = vpop.eup %6579  ;;  %6611 = vrcp.f32 %v9329_v14  ;;  %v10582_v14 = vld [vmem:[#allocation134_spill] sm:$0xff] }
 0xe64   : > { %3187 = vrot.lane.b32.xlu1 %v3152_v30, %s7009_s12  ;;  %v6582_v30 = vpop.eup %6581  ;;  %v4214_v47 = vmul.f32 %v6580_v12, %v9420_v3  ;;  %6613 = vrcp.f32 %v9336_v35  ;;  %v10583_v35 = vld [vmem:[#allocation172_spill] sm:$0xff] }
 0xe65   : > { %v6584_v15 = vpop.eup %6583  ;;  %v2091_v22 = vmul.f32 %v6582_v30, %v10571_v18  ;;  %6615 = vrcp.f32 %v9564_v56 }
 0xe66   : > { %4243 = vrot.lane.b32.xlu0 %v4211_v48, %s7007_s26  ;;  %v9590_v48 = vpop.xlane.xlu1 %4050  ;;  %v9592_v51 = vpop.xlane.xlu0 %4052 }
 0xe67   : > { %v6586_v45 = vpop.eup %6585  ;;  %6617 = vrcp.f32 %v9342_v58 }
 0xe68   : > { %3714 = vrot.lane.b32.xlu1 %v3681_v20, %s7008_s17  ;;  %v1561_v20 = vmul.f32 %v6584_v15, %v10572_v34  ;;  %v6588_v29 = vpop.eup %6587  ;;  %v2093_v3 = vmul.f32 %v6586_v45, %v10573_v44  ;;  %6619 = vrcp.f32 %v9552_v10 }
 0xe6a   : > { %4247 = vrot.lane.b32.xlu0 %v4213_v36, %s7007_s26  ;;  %v6590_v36 = vpop.eup %6589  ;;  %v9603_v31 = vpop.xlane.xlu1 %4062  ;;  %6621 = vrcp.f32 %v9236_v21 }
 0xe6b   : > { %v9605_v5 = vpop.xlane.xlu0 %4064  ;;  %v6592_v39 = vpop.eup %6591  ;;  %v2622_v61 = vmul.f32 %v6590_v36, %v10575_v16  ;;  %6623 = vrcp.f32 %v9566_v52 }
 0xe6c   : > { %3718 = vrot.lane.b32.xlu1 %v3683_v57, %s7008_s17  ;;  %v1563_v57 = vmul.f32 %v6588_v29, %v10574_v60  ;;  %v2092_v32 = vmul.f32 %v6592_v39, %v10576_v53 }
 0xe6e   : > { %1596 = vrot.lane.b32.xlu0 %v1560_v38, %s7012_s16  ;;  %v6594_v38 = vpop.eup %6593  ;;  %v9616_v12 = vpop.xlane.xlu1 %4058  ;;  %6625 = vrcp.f32 %v9244_v33  ;;  %v10588_v33 = vld [vmem:[#allocation173_spill] sm:$0xff] }
 0xe6f   : > { %v9618_v54 = vpop.xlane.xlu0 %4060 }
 0xe70   : > { %4245 = vrot.lane.b32.xlu1 %v4212_v43, %s7007_s26  ;;  %v6596_v43 = vpop.eup %6595  ;;  %6627 = vrcp.f32 %v9554_v11 }
 0xe71   : > { %v6598_v30 = vpop.eup %6597  ;;  %6629 = vrcp.f32 %v9250_v55 }
 0xe72   : > { %1600 = vrot.lane.b32.xlu0 %v1562_v40, %s7012_s16  ;;  %v2624_v40 = vmul.f32 %v6594_v38, %v10577_v4  ;;  %v6600_v15 = vpop.eup %6599  ;;  %v10584_v38 = vld [vmem:[#allocation151_spill] sm:$0xff]  ;;  %v10586_v4 = vld [vmem:[#allocation150_spill] sm:$0xff]  ;;  %6631 = vrcp.f32 %v9348_v7 }
 0xe73   : > { %v6602_v34 = vpop.eup %6601  ;;  %6633 = vrcp.f32 %v9259_v26  ;;  %v10590_v7 = vld [vmem:[#allocation74_spill] sm:$0xff]  ;;  %v10591_v26 = vld [vmem:[#allocation27_spill] sm:$0xff] }
 0xe74   : > { %4249 = vrot.lane.b32.xlu1 %v4214_v47, %s7007_s26  ;;  %v2094_v47 = vmul.f32 %v6596_v43, %v10578_v46  ;;  %v6604_v29 = vpop.eup %6603  ;;  %v10587_v46 = vld [vmem:[#allocation174_spill] sm:$0xff]  ;;  %6635 = vrcp.f32 %v9352_v37 }
 0xe75   : > { %v6606_v60 = vpop.eup %6605  ;;  %6637 = vrcp.f32 %v9266_v27  ;;  %v10592_v37 = vld [vmem:[#allocation22_spill] sm:$0xff]  ;;  %v10594_v27 = vld [vmem:[#allocation115_spill] sm:$0xff] }
 0xe76   : > { %2127 = vrot.lane.b32.xlu0 %v2091_v22, %s7011_s25  ;;  %v10579_v22 = vld [vmem:[#allocation149_spill] sm:$0xff]  ;;  %v6608_v39 = vpop.eup %6607  ;;  %v3684_v16 = vmul.f32 %v6606_v60, %v10583_v35  ;;  %6639 = vrcp.f32 %v9356_v49  ;;  %v10596_v49 = vld [vmem:[#allocation20_spill] sm:$0xff] }
 0xe77   : > { %v3153_v45 = vmul.f32 %v6598_v30, %v10579_v22  ;;  %v3154_v56 = vmul.f32 %v6608_v39, %v10584_v38  ;;  %v10595_v60 = vld [vmem:[#allocation77_spill] sm:$0xff]  ;;  %v10597_v39 = vld [vmem:[#allocation106_spill] sm:$0xff]  ;;  %v10599_v38 = vld [vmem:[#allocation76_spill] sm:$0xff] }
 0xe78   : > { %1598 = vrot.lane.b32.xlu1 %v1561_v20, %s7012_s16  ;;  %v2623_v20 = vmul.f32 %v6600_v15, %v10580_v24 }
 0xe7a   : > { %2131 = vrot.lane.b32.xlu0 %v2093_v3, %s7011_s25  ;;  %v10581_v3 = vld [vmem:[#allocation148_spill] sm:$0xff] }
 0xe7b   : > { %v3155_v36 = vmul.f32 %v6602_v34, %v10581_v3 }
 0xe7c   : > { %1602 = vrot.lane.b32.xlu1 %v1563_v57, %s7012_s16  ;;  %v2625_v57 = vmul.f32 %v6604_v29, %v10582_v14 }
 0xe7e   : > { %2658 = vrot.lane.b32.xlu0 %v2622_v61, %s7010_s9  ;;  %v6610_v61 = vpop.eup %6609  ;;  %6641 = vrcp.f32 %v10592_v37 }
 0xe7f   : > { %v6612_v53 = vpop.eup %6611  ;;  %6643 = vrcp.f32 %v10594_v27 }
 0xe80   : > { %2129 = vrot.lane.b32.xlu1 %v2092_v32, %s7011_s25  ;;  %v10585_v32 = vld [vmem:[#allocation171_spill] sm:$0xff]  ;;  %v6614_v58 = vpop.eup %6613  ;;  %6645 = vrcp.f32 %v10596_v49  ;;  %v10616_v49 = vld [vmem:[#allocation25_spill] sm:$0xff] }
 0xe81   : > { %v3686_v43 = vmul.f32 %v6610_v61, %v10585_v32  ;;  %v6616_v30 = vpop.eup %6615  ;;  %v10598_v61 = vld [vmem:[#allocation90_spill] sm:$0xff]  ;;  %v10600_v32 = vld [vmem:[#allocation24_spill] sm:$0xff] }
 0xe82   : > { %2662 = vrot.lane.b32.xlu0 %v2624_v40, %s7010_s9  ;;  %v3156_v40 = vmul.f32 %v6612_v53, %v10586_v4  ;;  %v4215_v10 = vmul.f32 %v6616_v30, %v9452_v1  ;;  %v6618_v21 = vpop.eup %6617  ;;  %6647 = vrcp.f32 %v10598_v61  ;;  %v10603_v30 = vld [vmem:[#allocation109_spill] sm:$0xff] }
 0xe83   : > { %v9626_v18 = vpop.xlane.xlu1 %4489  ;;  %v6620_v52 = vpop.eup %6619  ;;  %v3687_v1 = vmul.f32 %v6618_v21, %v10588_v33  ;;  %6649 = vrcp.f32 %v10600_v32  ;;  %v10607_v33 = vld [vmem:[#allocation108_spill] sm:$0xff] }
 0xe84   : > { %2133 = vrot.lane.b32.xlu1 %v2094_v47, %s7011_s25  ;;  %v9629_v6 = vpop.xlane.xlu0 %4485  ;;  %v3685_v47 = vmul.f32 %v6614_v58, %v10587_v46  ;;  %v4217_v15 = vmul.f32 %v6620_v52, %v9450_v62  ;;  %v6622_v22 = vpop.eup %6621  ;;  %v10604_v46 = vld [vmem:[#allocation23_spill] sm:$0xff] }
 0xe85   : > { %v6624_v11 = vpop.eup %6623 }
 0xe86   : > { %3189 = vrot.lane.b32.xlu0 %v3153_v45, %s7009_s12  ;;  %v10589_v45 = vld [vmem:[#allocation75_spill] sm:$0xff]  ;;  %v6626_v24 = vpop.eup %6625  ;;  %v4216_v55 = vmul.f32 %v6624_v11, %v9456_v25 }
 0xe87   : > { %v2653_v44 = vpop.permute.xlu1 %2652  ;;  %v1564_v34 = vmul.f32 %v6622_v22, %v10589_v45  ;;  %v6628_v62 = vpop.eup %6627  ;;  %v10593_v25 = vld [vmem:[#allocation107_spill] sm:$0xff]  ;;  %v10606_v22 = vld [vmem:[#allocation120_spill] sm:$0xff]  ;;  %v10608_v45 = vld [vmem:[#allocation86_spill] sm:$0xff] }
 0xe88   : > { %2700 = vst.msk [vmem:[#allocation2 + $0x8] sm:$0xff] %vm2698_vm3, %v2653_v44  ;;  %2660 = vrot.lane.b32.xlu1 %v2623_v20, %s7010_s9  ;;  %v2651_v17 = vpop.permute.xlu0 %2650  ;;  %v1566_v20 = vmul.f32 %v6626_v24, %v10590_v7  ;;  %v6630_v29 = vpop.eup %6629  ;;  %v4218_v44 = vmul.f32 %v6628_v62, %v10591_v26 }
 0xe89   : > { %2699 = vst.msk [vmem:[#allocation2] sm:$0xff] %vm2698_vm3, %v2651_v17  ;;  %v6632_v17 = vpop.eup %6631  ;;  %v2095_v3 = vmul.f32 %v6630_v29, %v10593_v25  ;;  %v10612_v29 = vld [vmem:[#allocation139_spill] sm:$0xff]  ;;  %v10614_v25 = vld [vmem:[#allocation45_spill] sm:$0xff] }
 0xe8a   : > { %3193 = vrot.lane.b32.xlu0 %v3155_v36, %s7009_s12  ;;  %v6634_v36 = vpop.eup %6633  ;;  %v1565_v14 = vmul.f32 %v6632_v17, %v10595_v60  ;;  %v10613_v17 = vld [vmem:[#allocation21_spill] sm:$0xff] }
 0xe8b   : > { %v2097_v35 = vmul.f32 %v6634_v36, %v10597_v39  ;;  %v10617_v39 = vld [vmem:[#allocation138_spill] sm:$0xff] }
 0xe8c   : > { %2664 = vrot.lane.b32.xlu1 %v2625_v57, %s7010_s9  ;;  %v6636_v57 = vpop.eup %6635 }
 0xe8e   : > { %3720 = vrot.lane.b32.xlu0 %v3684_v16, %s7008_s17  ;;  %v6638_v16 = vpop.eup %6637 }
 0xe8f   : > { %v6640_v53 = vpop.eup %6639 }
 0xe90   : > { %3191 = vrot.lane.b32.xlu1 %v3154_v56, %s7009_s12  ;;  %v1567_v56 = vmul.f32 %v6636_v57, %v10599_v38  ;;  %v6642_v4 = vpop.eup %6641 }
 0xe91   : > { %v6644_v21 = vpop.eup %6643 }
 0xe92   : > { %3724 = vrot.lane.b32.xlu0 %v3686_v43, %s7008_s17  ;;  %v10601_v43 = vld [vmem:[#allocation137_spill] sm:$0xff] }
 0xe93   : > { %v2626_v58 = vmul.f32 %v6638_v16, %v10601_v43  ;;  %v10619_v43 = vld [vmem:[#allocation83_spill] sm:$0xff] }
 0xe94   : > { %3195 = vrot.lane.b32.xlu1 %v3156_v40, %s7009_s12  ;;  %v10602_v40 = vld [vmem:[#allocation93_spill] sm:$0xff] }
 0xe95   : > { %6651 = vrcp.f32 %v10602_v40 }
 0xe96   : > { %4251 = vrot.lane.b32.xlu0 %v4215_v10, %s7007_s26  ;;  %v2096_v10 = vmul.f32 %v6640_v53, %v10603_v30  ;;  %6653 = vrcp.f32 %v10604_v46 }
 0xe97   : > { %6655 = vrcp.f32 %v10606_v22 }
 0xe98   : > { %3722 = vrot.lane.b32.xlu1 %v3685_v47, %s7008_s17  ;;  %v10605_v47 = vld [vmem:[#allocation136_spill] sm:$0xff]  ;;  %6657 = vrcp.f32 %v10608_v45 }
 0xe99   : > { %v2628_v52 = vmul.f32 %v6642_v4, %v10605_v47 }
 0xe9a   : > { %4255 = vrot.lane.b32.xlu0 %v4217_v15, %s7007_s26  ;;  %v6646_v15 = vpop.eup %6645 }
 0xe9b   : > { %v6648_v11 = vpop.eup %6647 }
 0xe9c   : > { %3726 = vrot.lane.b32.xlu1 %v3687_v1, %s7008_s17  ;;  %v2098_v1 = vmul.f32 %v6644_v21, %v10607_v33  ;;  %v6650_v7 = vpop.eup %6649  ;;  %v2627_v26 = vmul.f32 %v6648_v11, %v10612_v29  ;;  %v10623_v33 = vld [vmem:[#allocation88_spill] sm:$0xff]  ;;  %v10626_v29 = vld [vmem:[#allocation178_spill] sm:$0xff] }
 0xe9e   : > { %1604 = vrot.lane.b32.xlu0 %v1564_v34, %s7012_s16  ;;  %v10609_v34 = vld [vmem:[#allocation44_spill] sm:$0xff] }
 0xe9f   : > { %v4519_v24 = vsub.f32 %v10609_v34, %v9626_v18  ;;  %v10615_v18 = vld [vmem:[#allocation152_spill] sm:$0xff] }
 0xea0   : > { %4253 = vrot.lane.b32.xlu1 %v4216_v55, %s7007_s26  ;;  %v10610_v55 = vld [vmem:[#allocation153_spill] sm:$0xff]  ;;  %v3159_v27 = vmul.f32 %v6650_v7, %v10615_v18 }
 0xea1   : > { %v3157_v62 = vmul.f32 %v6646_v15, %v10610_v55  ;;  %v4537_v37 = vmul.f32 1.442695, %v4519_v24 }
 0xea2   : > { %1608 = vrot.lane.b32.xlu0 %v1566_v20, %s7012_s16  ;;  %v10611_v20 = vld [vmem:[#allocation123_spill] sm:$0xff] }
 0xea3   : > { %6659 = vrcp.f32 %v10611_v20  ;;  %v10625_v20 = vld [vmem:[#allocation82_spill] sm:$0xff] }
 0xea4   : > { %4257 = vrot.lane.b32.xlu1 %v4218_v44, %s7007_s26  ;;  %v6652_v44 = vpop.eup %6651  ;;  %6661 = vrcp.f32 %v10613_v17  ;;  %v10628_v17 = vld [vmem:[#allocation26_spill] sm:$0xff] }
 0xea5   : > { %v6654_v60 = vpop.eup %6653  ;;  %6663 = vrcp.f32 %v9590_v48 }
 0xea6   : > { %2135 = vrot.lane.b32.xlu0 %v2095_v3, %s7011_s25  ;;  %v4517_v3 = vsub.f32 %v10614_v25, %v9629_v6  ;;  %6665 = vrcp.f32 %v10616_v49  ;;  %v6656_v16 = vpop.eup %6655  ;;  %v10629_v49 = vld [vmem:[#allocation116_spill] sm:$0xff] }
 0xea7   : > { %6667 = vrcp.f32 %v9577_v41  ;;  %v6658_v53 = vpop.eup %6657 }
 0xea8   : > { %1606 = vrot.lane.b32.xlu1 %v1565_v14, %s7012_s16  ;;  %6669 = vpow2.f32 %v4537_v37  ;;  %v4533_v61 = vmul.f32 1.442695, %v4517_v3 }
 0xeaa   : > { %2139 = vrot.lane.b32.xlu0 %v2097_v35, %s7011_s25  ;;  %v2629_v35 = vmul.f32 %v6652_v44, %v10617_v39  ;;  %v10627_v44 = vld [vmem:[#allocation87_spill] sm:$0xff]  ;;  %v10630_v39 = vld [vmem:[#allocation177_spill] sm:$0xff] }
 0xeac   : > { %1610 = vrot.lane.b32.xlu1 %v1567_v56, %s7012_s16  ;;  %v10618_v56 = vld [vmem:[#allocation176_spill] sm:$0xff] }
 0xead   : > { %v3688_v48 = vmul.f32 %v6654_v60, %v10618_v56  ;;  %v6660_v4 = vpop.eup %6659 }
 0xeae   : > { %2666 = vrot.lane.b32.xlu0 %v2626_v58, %s7010_s9  ;;  %v10620_v58 = vld [vmem:[#allocation155_spill] sm:$0xff]  ;;  %v6662_v47 = vpop.eup %6661 }
 0xeaf   : > { %v3158_v41 = vmul.f32 %v6656_v16, %v10620_v58  ;;  %v6664_v22 = vpop.eup %6663  ;;  %v10631_v16 = vld [vmem:[#allocation89_spill] sm:$0xff] }
 0xeb0   : > { %2137 = vrot.lane.b32.xlu1 %v2096_v10, %s7011_s25  ;;  %v10621_v10 = vld [vmem:[#allocation175_spill] sm:$0xff] }
 0xeb1   : > { %v3690_v21 = vmul.f32 %v6658_v53, %v10621_v10 }
 0xeb2   : > { %2670 = vrot.lane.b32.xlu0 %v2628_v52, %s7010_s9  ;;  %v10622_v52 = vld [vmem:[#allocation154_spill] sm:$0xff] }
 0xeb3   : > { %v3160_v15 = vmul.f32 %v6660_v4, %v10622_v52 }
 0xeb4   : > { %2141 = vrot.lane.b32.xlu1 %v2098_v1, %s7011_s25  ;;  %v10624_v1 = vld [vmem:[#allocation92_spill] sm:$0xff] }
 0xeb5   : > { %v4219_v11 = vmul.f32 %v6664_v22, %v10624_v1 }
 0xeb6   : > { %3197 = vrot.lane.b32.xlu0 %v3157_v62, %s7009_s12 }
 0xeb8   : > { %v4492_v36 = vpop.xlane.xlu1 %4491  ;;  %2668 = vrot.lane.b32.xlu1 %v2627_v26, %s7010_s9  ;;  %v3689_v26 = vmul.f32 %v6662_v47, %v10626_v29 }
 0xeb9   : > { %v4520_v14 = vsub.f32 %v9479_v50, %v4492_v36  ;;  %v4494_v57 = vpop.xlane.xlu0 %4493 }
 0xeba   : > { %3201 = vrot.lane.b32.xlu0 %v3159_v27, %s7009_s12  ;;  %v4521_v45 = vsub.f32 %v9488_v63, %v4494_v57 }
 0xebb   : > { %v4539_v6 = vmul.f32 1.442695, %v4520_v14 }
 0xebc   : > { %v4488_v38 = vpop.xlane.xlu1 %4487  ;;  %2672 = vrot.lane.b32.xlu1 %v2629_v35, %s7010_s9  ;;  %v4541_v3 = vmul.f32 1.442695, %v4521_v45 }
 0xebd   : > { %6671 = vpow2.f32 %v4539_v6  ;;  %v4518_v50 = vsub.f32 %v9483_v42, %v4488_v38  ;;  %v9725_v32 = vpop.xlane.xlu0 %4501 }
 0xebe   : > { %6673 = vrcp.f32 %v10619_v43  ;;  %3728 = vrot.lane.b32.xlu0 %v3688_v48, %s7008_s17 }
 0xebf   : > { %6675 = vrcp.f32 %v9592_v51  ;;  %v4535_v40 = vmul.f32 1.442695, %v4518_v50  ;;  %v6666_v51 = vpop.eup %6665 }
 0xec0   : > { %6677 = vpow2.f32 %v4533_v61  ;;  %v4498_v30 = vpop.xlane.xlu1 %4497  ;;  %3199 = vrot.lane.b32.xlu1 %v3158_v41, %s7009_s12  ;;  %v6668_v55 = vpop.eup %6667  ;;  %v10632_v61 = vld [vmem:[#allocation79_spill] sm:$0xff]  ;;  %v10633_v41 = vld [vmem:[#allocation84_spill] sm:$0xff] }
 0xec1   : > { %6679 = vpow2.f32 %v4535_v40  ;;  %v4523_v42 = vsub.f32 %v9485_v2, %v4498_v30  ;;  %v4508_v46 = vpop.xlane.xlu0 %4507  ;;  %v9744_v7 = vpop.eup %6669  ;;  %v4221_v37 = vmul.f32 %v6668_v55, %v10628_v17  ;;  %v10635_v40 = vld [vmem:[#allocation32_spill] sm:$0xff] }
 0xec2   : > { %3732 = vrot.lane.b32.xlu0 %v3690_v21, %s7008_s17  ;;  %6681 = vrcp.f32 %v10623_v33 }
 0xec3   : > { %v4545_v34 = vmul.f32 1.442695, %v4523_v42  ;;  %6683 = vrcp.f32 %v9579_v13 }
 0xec4   : > { %v4500_v24 = vpop.xlane.xlu1 %4499  ;;  %3203 = vrot.lane.b32.xlu1 %v3160_v15, %s7009_s12  ;;  %6685 = vrcp.f32 %v10625_v20 }
 0xec5   : > { %v4524_v2 = vsub.f32 %v9490_v0, %v4500_v24  ;;  %v9742_v62 = vpop.xlane.xlu0 %4515  ;;  %6687 = vrcp.f32 %v10627_v44  ;;  %v4528_v0 = vsub.f32 %v9499_v23, %v4508_v46  ;;  %v3691_v23 = vmul.f32 %v6666_v51, %v10630_v39  ;;  %v10636_v46 = vld [vmem:[#allocation78_spill] sm:$0xff]  ;;  %v10637_v51 = vld [vmem:[#allocation91_spill] sm:$0xff]  ;;  %v10641_v44 = vld [vmem:[#allocation48_spill] sm:$0xff] }
 0xec6   : > { %4259 = vrot.lane.b32.xlu0 %v4219_v11, %s7007_s26  ;;  %6689 = vpow2.f32 %v4545_v34  ;;  %v10639_v34 = vld [vmem:[#allocation111_spill] sm:$0xff] }
 0xec7   : > { %v9749_v63 = vpop.eup %6671  ;;  %v4547_v25 = vmul.f32 1.442695, %v4524_v2  ;;  %v4555_v56 = vmul.f32 1.442695, %v4528_v0 }
 0xec8   : > { %v6674_v13 = vpop.eup %6673  ;;  %v4496_v36 = vpop.xlane.xlu1 %4495  ;;  %3730 = vrot.lane.b32.xlu1 %v3689_v26, %s7008_s17  ;;  %v4598_v18 = vpack.c.bf16 %v9749_v63, %v9744_v7 }
 0xec9   : > { %v6676_v27 = vpop.eup %6675  ;;  %6691 = vpow2.f32 %v4547_v25  ;;  %v4522_v60 = vsub.f32 %v9492_v59, %v4496_v36  ;;  %v9758_v14 = vpop.xlane.xlu0 %4511  ;;  %v1568_v38 = vmul.f32 %v6674_v13, %v10632_v61  ;;  %v4525_v59 = vsub.f32 %v9497_v9, %v9725_v32  ;;  %v10634_v9 = vld [vmem:[#allocation38_spill] sm:$0xff]  ;;  %v10642_v13 = vld [vmem:[#allocation81_spill] sm:$0xff] }
 0xeca   : > { %v9760_v57 = vpop.eup %6677  ;;  %6693 = vrcp.f32 %v10629_v49  ;;  %4263 = vrot.lane.b32.xlu0 %v4221_v37, %s7007_s26  ;;  %v4220_v32 = vmul.f32 %v6676_v27, %v10634_v9  ;;  %v10643_v36 = vld [vmem:[#allocation33_spill] sm:$0xff]  ;;  %v10644_v49 = vld [vmem:[#allocation110_spill] sm:$0xff] }
 0xecb   : > { %v9765_v35 = vpop.eup %6679  ;;  %6695 = vrcp.f32 %v10631_v16  ;;  %v4543_v6 = vmul.f32 1.442695, %v4522_v60  ;;  %v4549_v21 = vmul.f32 1.442695, %v4525_v59 }
 0xecc   : > { %6697 = vpow2.f32 %v4541_v3  ;;  %v4506_v48 = vpop.xlane.xlu1 %4505  ;;  %3734 = vrot.lane.b32.xlu1 %v3691_v23, %s7008_s17  ;;  %v4597_v53 = vpack.c.bf16 %v9765_v35, %v9760_v57  ;;  %v6682_v50 = vpop.eup %6681 }
 0xecd   : > { %6699 = vpow2.f32 %v4543_v6  ;;  %v4527_v43 = vsub.f32 %v9494_v28, %v4506_v48  ;;  %v2655_v58 = vpop.permute.xlu0 %2654  ;;  %v6684_v4 = vpop.eup %6683  ;;  %v4532_v28 = vsub.f32 %v9510_v19, %v9742_v62  ;;  %v1570_v47 = vmul.f32 %v6682_v50, %v10636_v46  ;;  %v10638_v19 = vld [vmem:[#allocation117_spill] sm:$0xff] }
 0xece   : > { %6701 = vrcp.f32 %v10633_v41  ;;  %2701 = vst.msk [vmem:[#allocation2 + $0x10] sm:$0xff] %vm2698_vm3, %v2655_v58  ;;  %1612 = vrot.lane.b32.xlu0 %v1568_v38, %s7012_s16  ;;  %6059 = vmatprep.mubr.bf16.mxu1 %v4597_v53  ;;  %v6686_v10 = vpop.eup %6685  ;;  %v4222_v1 = vmul.f32 %v6684_v4, %v10637_v51  ;;  %v10645_v6 = vld [vmem:[#allocation49_spill] sm:$0xff] }
 0xecf   : > { %6703 = vrcp.f32 %v10635_v40  ;;  %v4553_v30 = vmul.f32 1.442695, %v4527_v43  ;;  %6060 = vmatmul.mubr.bf16.vlgmr.msra.gmra.mrb[144].mxu1 %v4598_v18  ;;  %v6688_v52 = vpop.eup %6687  ;;  %v2099_v24 = vmul.f32 %v6686_v10, %v10639_v34  ;;  %v4563_v2 = vmul.f32 1.442695, %v4532_v28  ;;  %v10647_v58 = vld [vmem:[#allocation141_spill] sm:$0xff] }
 0xed0   : > { %6705 = vpow2.f32 %v4555_v56  ;;  %v4504_v42 = vpop.xlane.xlu1 %4503  ;;  %4261 = vrot.lane.b32.xlu1 %v4220_v32, %s7007_s26  ;;  %v9785_v33 = vpop.eup %6689  ;;  %v1569_v3 = vmul.f32 %v6688_v52, %v10642_v13  ;;  %v10646_v56 = vld [vmem:[#allocation80_spill] sm:$0xff] }
 0xed1   : > { %6707 = vpow2.f32 %v4553_v30  ;;  %v4526_v15 = vsub.f32 %v9502_v8, %v4504_v42  ;;  %v3182_v22 = vpop.permute.xlu0 %3181  ;;  %v10640_v8 = vld [vmem:[#allocation30_spill] sm:$0xff]  ;;  %v10648_v30 = vld [vmem:[#allocation113_spill] sm:$0xff] }
 0xed2   : > { %3230 = vst.msk [vmem:[#allocation2] sm:$0xff] %vm3229_vm4, %v3182_v22  ;;  %1616 = vrot.lane.b32.xlu0 %v1570_v47, %s7012_s16  ;;  %6709 = vrcp.f32 %v10638_v19  ;;  %v4530_v62 = vsub.f32 %v10640_v8, %v9758_v14 }
 0xed3   : > { %v9790_v11 = vpop.eup %6691  ;;  %v4551_v45 = vmul.f32 1.442695, %v4526_v15  ;;  %6711 = vpow2.f32 %v4549_v21  ;;  %v10649_v15 = vld [vmem:[#allocation112_spill] sm:$0xff] }
 0xed4   : > { %v6694_v55 = vpop.eup %6693  ;;  %v4514_v20 = vpop.xlane.xlu1 %4513  ;;  %4265 = vrot.lane.b32.xlu1 %v4222_v1, %s7007_s26  ;;  %v4600_v29 = vpack.c.bf16 %v9790_v11, %v9785_v33  ;;  %v4559_v60 = vmul.f32 1.442695, %v4530_v62 }
 0xed5   : > { %v6696_v26 = vpop.eup %6695  ;;  %6713 = vpow2.f32 %v4551_v45  ;;  %v4531_v17 = vsub.f32 %v10641_v44, %v4514_v20  ;;  %v3186_v37 = vpop.permute.xlu0 %3185  ;;  %v2101_v39 = vmul.f32 %v6694_v55, %v10644_v49 }
 0xed6   : > { %v9800_v25 = vpop.eup %6697  ;;  %3232 = vst.msk [vmem:[#allocation2 + $0x10] sm:$0xff] %vm3229_vm4, %v3186_v37  ;;  %2143 = vrot.lane.b32.xlu0 %v2099_v24, %s7011_s25  ;;  %6715 = vrcp.f32 %v10643_v36  ;;  %v1571_v48 = vmul.f32 %v6696_v26, %v10646_v56  ;;  %v10650_v24 = vld [vmem:[#allocation143_spill] sm:$0xff] }
 0xed7   : > { %v9805_v0 = vpop.eup %6699  ;;  %v4561_v18 = vmul.f32 1.442695, %v4531_v17  ;;  %6717 = vpow2.f32 %v4563_v2 }
 0xed8   : > { %v6702_v27 = vpop.eup %6701  ;;  %v4510_v14 = vpop.xlane.xlu1 %4509  ;;  %1614 = vrot.lane.b32.xlu1 %v1569_v3, %s7012_s16  ;;  %v4599_v23 = vpack.c.bf16 %v9805_v0, %v9800_v25 }
 0xed9   : > { %v6704_v16 = vpop.eup %6703  ;;  %6719 = vpow2.f32 %v4561_v18  ;;  %v4529_v61 = vsub.f32 %v10645_v6, %v4510_v14  ;;  %v3713_v38 = vpop.permute.xlu0 %3712  ;;  %v2630_v41 = vmul.f32 %v6702_v27, %v10647_v58 }
 0xeda   : > { %v9813_v59 = vpop.eup %6705  ;;  %3761 = vst.msk [vmem:[#allocation2] sm:$0xff] %vm3760_vm5, %v3713_v38  ;;  %2147 = vrot.lane.b32.xlu0 %v2101_v39, %s7011_s25  ;;  %6063 = vmatprep.mubr.bf16.mxu1 %v4599_v23  ;;  %6721 = vpow2.f32 %v4559_v60  ;;  %v2100_v10 = vmul.f32 %v6704_v16, %v10648_v30 }
 0xedb   : > { %v9818_v53 = vpop.eup %6707  ;;  %v4557_v50 = vmul.f32 1.442695, %v4529_v61  ;;  %6064 = vmatmul.mubr.bf16.gmra.mrb[148].mxu1 %v4600_v29 }
 0xedc   : > { %v2657_v43 = vpop.permute.xlu1 %2656  ;;  %1618 = vrot.lane.b32.xlu1 %v1571_v48, %s7012_s16  ;;  %v4602_v9 = vpack.c.bf16 %v9813_v59, %v9818_v53  ;;  %v6710_v32 = vpop.eup %6709  ;;  %v10652_v48 = vld [vmem:[#allocation85_spill] sm:$0xff] }
 0xedd   : > { %6723 = vpow2.f32 %v4557_v50  ;;  %2702 = vst.msk [vmem:[#allocation2 + $0x18] sm:$0xff] %vm2698_vm3, %v2657_v43  ;;  %v3717_v4 = vpop.permute.xlu0 %3716  ;;  %v9825_v40 = vpop.eup %6711  ;;  %v2102_v22 = vmul.f32 %v6710_v32, %v10649_v15  ;;  %v10653_v43 = vld [vmem:[#allocation28_spill] sm:$0xff]  ;;  %v10654_v32 = vld [vmem:[#allocation119_spill] sm:$0xff]  ;;  %v10659_v15 = vld [vmem:[#allocation157_spill] sm:$0xff] }
 0xede   : > { %3763 = vst.msk [vmem:[#allocation2 + $0x10] sm:$0xff] %vm3760_vm5, %v3717_v4  ;;  %2674 = vrot.lane.b32.xlu0 %v2630_v41, %s7010_s9  ;;  %v10655_v4 = vld [vmem:[#allocation114_spill] sm:$0xff] }
 0xedf   : > { %v9830_v21 = vpop.eup %6713 }
 0xee0   : > { %v3184_v28 = vpop.permute.xlu1 %3183  ;;  %2145 = vrot.lane.b32.xlu1 %v2100_v10, %s7011_s25  ;;  %v4601_v42 = vpack.c.bf16 %v9830_v21, %v9825_v40  ;;  %v6716_v46 = vpop.eup %6715  ;;  %v10656_v10 = vld [vmem:[#allocation140_spill] sm:$0xff] }
 0xee1   : > { %3231 = vst.msk [vmem:[#allocation2 + $0x8] sm:$0xff] %vm3229_vm4, %v3184_v28  ;;  %v4244_v47 = vpop.permute.xlu0 %4243  ;;  %v9836_v52 = vpop.eup %6717  ;;  %v2631_v55 = vmul.f32 %v6716_v46, %v10650_v24  ;;  %v10658_v46 = vld [vmem:[#allocation31_spill] sm:$0xff] }
 0xee2   : > { %4292 = vst.msk [vmem:[#allocation2] sm:$0xff] %vm4291_vm6, %v4244_v47  ;;  %6067 = vmatprep.mubr.bf16.mxu1 %v4601_v42  ;;  %v10657_v42 = vld [vmem:[#allocation94_spill] sm:$0xff] }
 0xee3   : > { %v9840_v51 = vpop.eup %6719  ;;  %6068 = vmatmul.mubr.bf16.gmra.mrb[152].mxu1 %v4602_v9 }
 0xee4   : > { %v3188_v1 = vpop.permute.xlu1 %3187  ;;  %2149 = vrot.lane.b32.xlu1 %v2102_v22, %s7011_s25  ;;  %v4604_v19 = vpack.c.bf16 %v9836_v52, %v9840_v51  ;;  %v9846_v34 = vpop.eup %6721 }
 0xee5   : > { %3233 = vst.msk [vmem:[#allocation2 + $0x18] sm:$0xff] %vm3229_vm4, %v3188_v1  ;;  %v4248_v45 = vpop.permute.xlu0 %4247  ;;  %v10660_v1 = vld [vmem:[#allocation97_spill] sm:$0xff] }
 0xee6   : > { %4294 = vst.msk [vmem:[#allocation2 + $0x10] sm:$0xff] %vm4291_vm6, %v4248_v45 }
 0xee7   : > { %v9850_v2 = vpop.eup %6723 }
 0xee8   : > { %v3715_v8 = vpop.permute.xlu1 %3714  ;;  %2676 = vrot.lane.b32.xlu1 %v2631_v55, %s7010_s9  ;;  %v4603_v62 = vpack.c.bf16 %v9846_v34, %v9850_v2  ;;  %v10662_v55 = vld [vmem:[#allocation156_spill] sm:$0xff] }
 0xee9   : > { %3762 = vst.msk [vmem:[#allocation2 + $0x8] sm:$0xff] %vm3760_vm5, %v3715_v8  ;;  %v1597_v20 = vpop.permute.xlu0 %1596 }
 0xeea   : > { %1641 = vst.msk [vmem:[#allocation2 + $0x20] sm:$0xff] %vm1636_vm1, %v1597_v20  ;;  %6071 = vmatprep.mubr.bf16.mxu1 %v4603_v62  ;;  %v10663_v62 = vld [vmem:[#allocation142_spill] sm:$0xff] }
 0xeeb   : > { %6072 = vmatmul.mubr.bf16.gmra.mrb[156].mxu1 %v4604_v19 }
 0xeec   : > { %v3719_v29 = vpop.permute.xlu1 %3718 }
 0xeed   : > { %3764 = vst.msk [vmem:[#allocation2 + $0x18] sm:$0xff] %vm3760_vm5, %v3719_v29  ;;  %v1601_v26 = vpop.permute.xlu0 %1600 }
 0xeee   : > { %1643 = vst.msk [vmem:[#allocation2 + $0x30] sm:$0xff] %vm1636_vm1, %v1601_v26 }
 0xef0   : > { %v4246_v44 = vpop.permute.xlu1 %4245 }
 0xef1   : > { %4293 = vst.msk [vmem:[#allocation2 + $0x8] sm:$0xff] %vm4291_vm6, %v4246_v44  ;;  %v2128_v17 = vpop.permute.xlu0 %2127 }
 0xef2   : > { %2172 = vst.msk [vmem:[#allocation2 + $0x20] sm:$0xff] %vm2167_vm2, %v2128_v17  ;;  %v10664_v17 = vld [vmem:[#allocation180_spill] sm:$0xff] }
 0xef4   : > { %v4250_v37 = vpop.permute.xlu1 %4249 }
 0xef5   : > { %4295 = vst.msk [vmem:[#allocation2 + $0x18] sm:$0xff] %vm4291_vm6, %v4250_v37  ;;  %v2132_v13 = vpop.permute.xlu0 %2131 }
 0xef6   : > { %2174 = vst.msk [vmem:[#allocation2 + $0x30] sm:$0xff] %vm2167_vm2, %v2132_v13 }
 0xef8   : > { %v1599_v3 = vpop.permute.xlu1 %1598 }
 0xef9   : > { %1642 = vst.msk [vmem:[#allocation2 + $0x28] sm:$0xff] %vm1636_vm1, %v1599_v3  ;;  %v2659_v36 = vpop.permute.xlu0 %2658  ;;  %v10665_v3 = vld [vmem:[#allocation127_spill] sm:$0xff] }
 0xefa   : > { %2703 = vst.msk [vmem:[#allocation2 + $0x20] sm:$0xff] %vm2698_vm3, %v2659_v36 }
 0xefc   : > { %v1603_v18 = vpop.permute.xlu1 %1602 }
 0xefd   : > { %1644 = vst.msk [vmem:[#allocation2 + $0x38] sm:$0xff] %vm1636_vm1, %v1603_v18  ;;  %4571 = vadd.xlane.f32.xlu0 %v9749_v63  ;;  %v2663_v27 = vpop.permute.xlu0 %2662 }
 0xefe   : > { %2705 = vst.msk [vmem:[#allocation2 + $0x30] sm:$0xff] %vm2698_vm3, %v2663_v27 }
 0xf00   : > { %v2130_v60 = vpop.permute.xlu1 %2129 }
 0xf01   : > { %2173 = vst.msk [vmem:[#allocation2 + $0x28] sm:$0xff] %vm2167_vm2, %v2130_v60  ;;  %4567 = vadd.xlane.f32.xlu0 %v9765_v35  ;;  %v3190_v14 = vpop.permute.xlu0 %3189 }
 0xf02   : > { %3234 = vst.msk [vmem:[#allocation2 + $0x20] sm:$0xff] %vm3229_vm4, %v3190_v14  ;;  %v10667_v14 = vld [vmem:[#allocation179_spill] sm:$0xff] }
 0xf04   : > { %v2134_v49 = vpop.permute.xlu1 %2133 }
 0xf05   : > { %2175 = vst.msk [vmem:[#allocation2 + $0x38] sm:$0xff] %vm2167_vm2, %v2134_v49  ;;  %4579 = vadd.xlane.f32.xlu0 %v9790_v11  ;;  %v3194_v39 = vpop.permute.xlu0 %3193 }
 0xf06   : > { %3236 = vst.msk [vmem:[#allocation2 + $0x30] sm:$0xff] %vm3229_vm4, %v3194_v39 }
 0xf08   : > { %v2661_v63 = vpop.permute.xlu1 %2660 }
 0xf09   : > { %2704 = vst.msk [vmem:[#allocation2 + $0x28] sm:$0xff] %vm2698_vm3, %v2661_v63  ;;  %4575 = vadd.xlane.f32.xlu0 %v9805_v0  ;;  %v3721_v23 = vpop.permute.xlu0 %3720  ;;  %v10668_v63 = vld [vmem:[#allocation158_spill] sm:$0xff] }
 0xf0a   : > { %3765 = vst.msk [vmem:[#allocation2 + $0x20] sm:$0xff] %vm3760_vm5, %v3721_v23 }
 0xf0c   : > { %v2665_v35 = vpop.permute.xlu1 %2664  ;;  %4569 = vadd.xlane.f32.xlu1 %v9744_v7 }
 0xf0d   : > { %2706 = vst.msk [vmem:[#allocation2 + $0x38] sm:$0xff] %vm2698_vm3, %v2665_v35  ;;  %4587 = vadd.xlane.f32.xlu0 %v9813_v59  ;;  %v3725_v16 = vpop.permute.xlu0 %3724  ;;  %v10651_v59 = vld [vmem:[#allocation118_spill] sm:$0xff] }
 0xf0e   : > { %3767 = vst.msk [vmem:[#allocation2 + $0x30] sm:$0xff] %vm3760_vm5, %v3725_v16  ;;  %6725 = vrcp.f32 %v10651_v59 }
 0xf0f   : > { %6727 = vrcp.f32 %v10652_v48 }
 0xf10   : > { %v3192_v11 = vpop.permute.xlu1 %3191  ;;  %4565 = vadd.xlane.f32.xlu1 %v9760_v57  ;;  %6729 = vrcp.f32 %v10653_v43 }
 0xf11   : > { %3235 = vst.msk [vmem:[#allocation2 + $0x28] sm:$0xff] %vm3229_vm4, %v3192_v11  ;;  %4583 = vadd.xlane.f32.xlu0 %v9830_v21  ;;  %v4252_v0 = vpop.permute.xlu0 %4251  ;;  %6731 = vrcp.f32 %v10654_v32  ;;  %v10669_v11 = vld [vmem:[#allocation39_spill] sm:$0xff]  ;;  %v4865_v32 = vld [vmem:[#allocation9 + $0x10] sm:$0xff] }
 0xf12   : > { %4296 = vst.msk [vmem:[#allocation2 + $0x20] sm:$0xff] %vm4291_vm6, %v4252_v0  ;;  %6733 = vrcp.f32 %v10655_v4 }
 0xf13   : > { %6735 = vrcp.f32 %v10657_v42 }
 0xf14   : > { %v3196_v6 = vpop.permute.xlu1 %3195  ;;  %4577 = vadd.xlane.f32.xlu1 %v9785_v33  ;;  %6737 = vrcp.f32 %v10658_v46 }
 0xf15   : > { %3237 = vst.msk [vmem:[#allocation2 + $0x38] sm:$0xff] %vm3229_vm4, %v3196_v6  ;;  %4595 = vadd.xlane.f32.xlu0 %v9836_v52  ;;  %v4256_v7 = vpop.permute.xlu0 %4255  ;;  %6739 = vrcp.f32 %v10660_v1 }
 0xf16   : > { %4298 = vst.msk [vmem:[#allocation2 + $0x30] sm:$0xff] %vm4291_vm6, %v4256_v7 }
 0xf18   : > { %v3723_v61 = vpop.permute.xlu1 %3722  ;;  %4573 = vadd.xlane.f32.xlu1 %v9800_v25  ;;  %v6726_v9 = vpop.eup %6725 }
 0xf19   : > { %3766 = vst.msk [vmem:[#allocation2 + $0x28] sm:$0xff] %vm3760_vm5, %v3723_v61  ;;  %4591 = vadd.xlane.f32.xlu0 %v9846_v34  ;;  %v1605_v57 = vpop.permute.xlu0 %1604  ;;  %v2632_v21 = vmul.f32 %v6726_v9, %v10656_v10  ;;  %v6728_v28 = vpop.eup %6727  ;;  %v10661_v34 = vld [vmem:[#allocation124_spill] sm:$0xff]  ;;  %v4864_v9 = vld [vmem:[#allocation9 + $0x8] sm:$0xff] }
 0xf1a   : > { %1645 = vst.msk [vmem:[#allocation2 + $0x40] sm:$0xff] %vm1636_vm1, %v1605_v57  ;;  %v3161_v22 = vmul.f32 %v6728_v28, %v10659_v15  ;;  %6741 = vrcp.f32 %v10661_v34  ;;  %v4868_v28 = vld [vmem:[#allocation9 + $0x28] sm:$0xff]  ;;  %v4870_v15 = vld [vmem:[#allocation9 + $0x38] sm:$0xff] }
 0xf1b   : > { %6743 = vrcp.f32 %v9616_v12  ;;  %v10666_v12 = vld [vmem:[#allocation159_spill] sm:$0xff] }
 0xf1c   : > { %v3727_v38 = vpop.permute.xlu1 %3726  ;;  %4585 = vadd.xlane.f32.xlu1 %v9818_v53  ;;  %6745 = vrcp.f32 %v10665_v3  ;;  %v4874_v3 = vld [vmem:[#allocation9 + $0x58] sm:$0xff] }
 0xf1d   : > { %3768 = vst.msk [vmem:[#allocation2 + $0x38] sm:$0xff] %vm3760_vm5, %v3727_v38  ;;  %v1609_v33 = vpop.permute.xlu0 %1608  ;;  %6747 = vrcp.f32 %v9618_v54  ;;  %v10670_v54 = vld [vmem:[#allocation182_spill] sm:$0xff] }
 0xf1e   : > { %1647 = vst.msk [vmem:[#allocation2 + $0x50] sm:$0xff] %vm1636_vm1, %v1609_v33  ;;  %v10671_v33 = vld [vmem:[#allocation181_spill] sm:$0xff] }
 0xf20   : > { %v4254_v56 = vpop.permute.xlu1 %4253  ;;  %4581 = vadd.xlane.f32.xlu1 %v9825_v40 }
 0xf21   : > { %4297 = vst.msk [vmem:[#allocation2 + $0x28] sm:$0xff] %vm4291_vm6, %v4254_v56  ;;  %v2136_v25 = vpop.permute.xlu0 %2135 }
 0xf22   : > { %2176 = vst.msk [vmem:[#allocation2 + $0x40] sm:$0xff] %vm2167_vm2, %v2136_v25 }
 0xf24   : > { %v4258_v50 = vpop.permute.xlu1 %4257  ;;  %4593 = vadd.xlane.f32.xlu1 %v9840_v51  ;;  %v6730_v51 = vpop.eup %6729 }
 0xf25   : > { %4299 = vst.msk [vmem:[#allocation2 + $0x38] sm:$0xff] %vm4291_vm6, %v4258_v50  ;;  %v2140_v53 = vpop.permute.xlu0 %2139  ;;  %v6732_v19 = vpop.eup %6731  ;;  %v10672_v50 = vld [vmem:[#allocation41_spill] sm:$0xff] }
 0xf26   : > { %2178 = vst.msk [vmem:[#allocation2 + $0x50] sm:$0xff] %vm2167_vm2, %v2140_v53  ;;  %v6734_v8 = vpop.eup %6733  ;;  %v2633_v20 = vmul.f32 %v6732_v19, %v10663_v62  ;;  %v4871_v19 = vld [vmem:[#allocation9 + $0x40] sm:$0xff] }
 0xf27   : > { %v6736_v29 = vpop.eup %6735  ;;  %v3692_v37 = vmul.f32 %v6734_v8, %v10664_v17 }
 0xf28   : > { %v1607_v58 = vpop.permute.xlu1 %1606  ;;  %4589 = vadd.xlane.f32.xlu1 %v9850_v2  ;;  %v3163_v2 = vmul.f32 %v6730_v51, %v10662_v55  ;;  %v6738_v13 = vpop.eup %6737  ;;  %v3162_v36 = vmul.f32 %v6736_v29, %v10666_v12 }
 0xf29   : > { %1646 = vst.msk [vmem:[#allocation2 + $0x48] sm:$0xff] %vm1636_vm1, %v1607_v58  ;;  %v2667_v41 = vpop.permute.xlu0 %2666  ;;  %v6740_v18 = vpop.eup %6739  ;;  %v3694_v49 = vmul.f32 %v6738_v13, %v10667_v14  ;;  %v4873_v13 = vld [vmem:[#allocation9 + $0x50] sm:$0xff] }
 0xf2a   : > { %2707 = vst.msk [vmem:[#allocation2 + $0x40] sm:$0xff] %vm2698_vm3, %v2667_v41  ;;  %v6742_v39 = vpop.eup %6741  ;;  %v3164_v23 = vmul.f32 %v6740_v18, %v10668_v63  ;;  %v4863_v41 = vld [vmem:[#allocation9] sm:$0xff]  ;;  %v4884_v12 = vpack.c.bf16 %v4874_v3, %v4873_v13 }
 0xf2b   : > { %v6744_v35 = vpop.eup %6743  ;;  %v3693_v7 = vmul.f32 %v6742_v39, %v10670_v54  ;;  %v4879_v4 = vpack.c.bf16 %v4864_v9, %v4863_v41 }
 0xf2c   : > { %v1611_v40 = vpop.permute.xlu1 %1610  ;;  %v4223_v0 = vmul.f32 %v6744_v35, %v10669_v11  ;;  %v6746_v61 = vpop.eup %6745 }
 0xf2d   : > { %1648 = vst.msk [vmem:[#allocation2 + $0x58] sm:$0xff] %vm1636_vm1, %v1611_v40  ;;  %v2671_v30 = vpop.permute.xlu0 %2670  ;;  %v3695_v59 = vmul.f32 %v6746_v61, %v10671_v33  ;;  %v6748_v56 = vpop.eup %6747  ;;  %v4866_v40 = vld [vmem:[#allocation9 + $0x18] sm:$0xff]  ;;  %6075 = vmatprep.subr.bf16.mxu1 %v4879_v4 }
 0xf2e   : > { %2709 = vst.msk [vmem:[#allocation2 + $0x50] sm:$0xff] %vm2698_vm3, %v2671_v30  ;;  %v4224_v53 = vmul.f32 %v6748_v56, %v10672_v50  ;;  %v4880_v10 = vpack.c.bf16 %v4866_v40, %v4865_v32  ;;  %6076 = vmatpush3.bf16.msra.mxu1 %v4879_v4 }
 0xf2f   : > { %2678 = vrot.lane.b32.xlu0 %v2632_v21, %s7010_s9  ;;  %v4867_v21 = vld [vmem:[#allocation9 + $0x20] sm:$0xff] }
 0xf30   : > { %v2138_v47 = vpop.permute.xlu1 %2137  ;;  %6077 = vmatprep.subr.bf16.mxu1 %v4880_v10  ;;  %v4881_v46 = vpack.c.bf16 %v4868_v28, %v4867_v21 }
 0xf31   : > { %2177 = vst.msk [vmem:[#allocation2 + $0x48] sm:$0xff] %vm2167_vm2, %v2138_v47  ;;  %v3198_v52 = vpop.permute.xlu0 %3197 }
 0xf32   : > { %3238 = vst.msk [vmem:[#allocation2 + $0x40] sm:$0xff] %vm3229_vm4, %v3198_v52  ;;  %v4869_v52 = vld [vmem:[#allocation9 + $0x30] sm:$0xff]  ;;  %6078 = vmatpush3.bf16.msra.mxu1 %v4880_v10 }
 0xf33   : > { %3205 = vrot.lane.b32.xlu0 %v3161_v22, %s7009_s12  ;;  %6079 = vmatprep.subr.bf16.mxu1 %v4881_v46  ;;  %v4882_v51 = vpack.c.bf16 %v4870_v15, %v4869_v52 }
 0xf34   : > { %v2142_v45 = vpop.permute.xlu1 %2141 }
 0xf35   : > { %2179 = vst.msk [vmem:[#allocation2 + $0x58] sm:$0xff] %vm2167_vm2, %v2142_v45  ;;  %v3202_v24 = vpop.permute.xlu0 %3201  ;;  %v4872_v45 = vld [vmem:[#allocation9 + $0x48] sm:$0xff] }
 0xf36   : > { %3240 = vst.msk [vmem:[#allocation2 + $0x50] sm:$0xff] %vm3229_vm4, %v3202_v24  ;;  %6080 = vmatpush3.bf16.msra.mxu1 %v4881_v46  ;;  %v4883_v24 = vpack.c.bf16 %v4872_v45, %v4871_v19 }
 0xf37   : > { %3209 = vrot.lane.b32.xlu0 %v3163_v2, %s7009_s12  ;;  %6081 = vmatprep.subr.bf16.mxu1 %v4882_v51 }
 0xf38   : > { %v2669_v26 = vpop.permute.xlu1 %2668 }
 0xf39   : > { %2708 = vst.msk [vmem:[#allocation2 + $0x48] sm:$0xff] %vm2698_vm3, %v2669_v26  ;;  %2680 = vrot.lane.b32.xlu1 %v2633_v20, %s7010_s9  ;;  %v3729_v44 = vpop.permute.xlu0 %3728 }
 0xf3a   : > { %3769 = vst.msk [vmem:[#allocation2 + $0x40] sm:$0xff] %vm3760_vm5, %v3729_v44  ;;  %6082 = vmatpush3.bf16.msra.mxu1 %v4882_v51 }
 0xf3b   : > { %3736 = vrot.lane.b32.xlu0 %v3692_v37, %s7008_s17  ;;  %6083 = vmatprep.subr.bf16.mxu1 %v4883_v24 }
 0xf3c   : > { %v2673_v27 = vpop.permute.xlu1 %2672 }
 0xf3d   : > { %2710 = vst.msk [vmem:[#allocation2 + $0x58] sm:$0xff] %vm2698_vm3, %v2673_v27  ;;  %3207 = vrot.lane.b32.xlu1 %v3162_v36, %s7009_s12  ;;  %v3733_v60 = vpop.permute.xlu0 %3732  ;;  %v4875_v27 = vld [vmem:[#allocation9 + $0x60] sm:$0xff] }
 0xf3e   : > { %3771 = vst.msk [vmem:[#allocation2 + $0x50] sm:$0xff] %vm3760_vm5, %v3733_v60  ;;  %6084 = vmatpush3.bf16.msra.mxu1 %v4883_v24  ;;  %v4876_v60 = vld [vmem:[#allocation9 + $0x68] sm:$0xff] }
 0xf3f   : > { %3740 = vrot.lane.b32.xlu0 %v3694_v49, %s7008_s17  ;;  %6085 = vmatprep.subr.bf16.mxu1 %v4884_v12  ;;  %v4885_v14 = vpack.c.bf16 %v4876_v60, %v4875_v27 }
 0xf40   : > { %v3200_v16 = vpop.permute.xlu1 %3199 }
 0xf41   : > { %3239 = vst.msk [vmem:[#allocation2 + $0x48] sm:$0xff] %vm3229_vm4, %v3200_v16  ;;  %3211 = vrot.lane.b32.xlu1 %v3164_v23, %s7009_s12  ;;  %v4260_v6 = vpop.permute.xlu0 %4259 }
 0xf42   : > { %4300 = vst.msk [vmem:[#allocation2 + $0x40] sm:$0xff] %vm4291_vm6, %v4260_v6  ;;  %6086 = vmatpush3.bf16.msra.mxu1 %v4884_v12  ;;  %v4878_v6 = vld [vmem:[#allocation9 + $0x78] sm:$0xff]  ;;  %v10673_v12 = vld [vmem:[#allocation122_spill] sm:$0xff] }
 0xf43   : > { %4267 = vrot.lane.b32.xlu0 %v4223_v0, %s7007_s26  ;;  %6087 = vmatprep.subr.bf16.mxu1 %v4885_v14  ;;  %v4877_v0 = vld [vmem:[#allocation9 + $0x70] sm:$0xff] }
 0xf44   : > { %v3204_v57 = vpop.permute.xlu1 %3203 }
 0xf45   : > { %3241 = vst.msk [vmem:[#allocation2 + $0x58] sm:$0xff] %vm3229_vm4, %v3204_v57  ;;  %3738 = vrot.lane.b32.xlu1 %v3693_v7, %s7008_s17  ;;  %v4264_v38 = vpop.permute.xlu0 %4263 }
 0xf46   : > { %4302 = vst.msk [vmem:[#allocation2 + $0x50] sm:$0xff] %vm4291_vm6, %v4264_v38  ;;  %6088 = vmatpush3.bf16.msra.mxu1 %v4885_v14  ;;  %v4886_v38 = vpack.c.bf16 %v4878_v6, %v4877_v0 }
 0xf48   : > { %v3731_v25 = vpop.permute.xlu1 %3730  ;;  %6089 = vmatprep.subr.bf16.mxu1 %v4886_v38 }
 0xf49   : > { %3770 = vst.msk [vmem:[#allocation2 + $0x48] sm:$0xff] %vm3760_vm5, %v3731_v25  ;;  %3742 = vrot.lane.b32.xlu1 %v3695_v59, %s7008_s17  ;;  %v1613_v48 = vpop.permute.xlu0 %1612 }
 0xf4a   : > { %1649 = vst.msk [vmem:[#allocation2 + $0x60] sm:$0xff] %vm1636_vm1, %v1613_v48  ;;  %6090 = vmatpush3.bf16.msra.mxu1 %v4886_v38 }
 0xf4c   : > { %v3735_v43 = vpop.permute.xlu1 %3734 }
 0xf4d   : > { %3772 = vst.msk [vmem:[#allocation2 + $0x58] sm:$0xff] %vm3760_vm5, %v3735_v43  ;;  %4269 = vrot.lane.b32.xlu1 %v4224_v53, %s7007_s26  ;;  %v1617_v58 = vpop.permute.xlu0 %1616 }
 0xf4e   : > { %1651 = vst.msk [vmem:[#allocation2 + $0x70] sm:$0xff] %vm1636_vm1, %v1617_v58 }
 0xf50   : > { %v4262_v30 = vpop.permute.xlu1 %4261 }
 0xf51   : > { %4301 = vst.msk [vmem:[#allocation2 + $0x48] sm:$0xff] %vm4291_vm6, %v4262_v30  ;;  %v2144_v42 = vpop.permute.xlu0 %2143 }
 0xf52   : > { %2180 = vst.msk [vmem:[#allocation2 + $0x60] sm:$0xff] %vm2167_vm2, %v2144_v42 }
 0xf54   : > { %v4266_v47 = vpop.permute.xlu1 %4265 }
 0xf55   : > { %4303 = vst.msk [vmem:[#allocation2 + $0x58] sm:$0xff] %vm4291_vm6, %v4266_v47  ;;  %v2148_v22 = vpop.permute.xlu0 %2147 }
 0xf56   : > { %2182 = vst.msk [vmem:[#allocation2 + $0x70] sm:$0xff] %vm2167_vm2, %v2148_v22 }
 0xf58   : > { %v1615_v1 = vpop.permute.xlu1 %1614 }
 0xf59   : > { %1650 = vst.msk [vmem:[#allocation2 + $0x68] sm:$0xff] %vm1636_vm1, %v1615_v1  ;;  %v2675_v34 = vpop.permute.xlu0 %2674 }
 0xf5a   : > { %2711 = vst.msk [vmem:[#allocation2 + $0x60] sm:$0xff] %vm2698_vm3, %v2675_v34 }
 0xf5c   : > { %v1619_v55 = vpop.permute.xlu1 %1618 }
 0xf5d   : > { %1652 = vst.msk [vmem:[#allocation2 + $0x78] sm:$0xff] %vm1636_vm1, %v1619_v55 }
 0xf60   : > { %v2146_v2 = vpop.permute.xlu1 %2145 }
 0xf61   : > { %2181 = vst.msk [vmem:[#allocation2 + $0x68] sm:$0xff] %vm2167_vm2, %v2146_v2 }
 0xf64   : > { %v2150_v8 = vpop.permute.xlu1 %2149 }
 0xf65   : > { %2183 = vst.msk [vmem:[#allocation2 + $0x78] sm:$0xff] %vm2167_vm2, %v2150_v8 }
 0xf68   : > { %v2677_v62 = vpop.permute.xlu1 %2676 }
 0xf69   : > { %2712 = vst.msk [vmem:[#allocation2 + $0x68] sm:$0xff] %vm2698_vm3, %v2677_v62 }
 0xf8a   : > { %v4572_v20 = vpop.xlane.xlu0 %4571 }
 0xf8b   : > { %6749 = vrcp.f32 %v4572_v20 }
 0xf8e   : > { %v4568_v29 = vpop.xlane.xlu0 %4567 }
 0xf92   : > { %v4580_v26 = vpop.xlane.xlu0 %4579 }
 0xf95   : > { %v6750_v23 = vpop.eup %6749 }
 0xf96   : > { %v4576_v44 = vpop.xlane.xlu0 %4575 }
 0xf99   : > { %v4570_v17 = vpop.xlane.xlu1 %4569 }
 0xf9a   : > { %6751 = vrcp.f32 %v4570_v17  ;;  %v4588_v37 = vpop.xlane.xlu0 %4587 }
 0xf9b   : > { %6753 = vrcp.f32 %v4568_v29 }
 0xf9d   : > { %v4566_v36 = vpop.xlane.xlu1 %4565 }
 0xf9e   : > { %6755 = vrcp.f32 %v4566_v36  ;;  %v4584_v18 = vpop.xlane.xlu0 %4583 }
 0xfa1   : > { %v4578_v49 = vpop.xlane.xlu1 %4577 }
 0xfa2   : > { %v6061_v39 = vpop.f32.mrb[144].mxu1  ;;  %v9969_v63 = vpop.xlane.xlu0 %4595  ;;  %6757 = vrcp.f32 %v4578_v49 }
 0xfa3   : > { %v4663_v35 = vpop.f32.mrb[145].mxu1  ;;  %6759 = vrcp.f32 %v4580_v26 }
 0xfa4   : > { %v6752_v16 = vpop.eup %6751  ;;  %v6062_v11 = vpop.f32.mrb[146].mxu1 }
 0xfa5   : > { %v4744_v54 = vmul.f32 %v6752_v16, %v6061_v39  ;;  %v4745_v7 = vmul.f32 %v6750_v23, %v6062_v11  ;;  %v4666_v61 = vpop.f32.mrb[147].mxu1  ;;  %v4574_v57 = vpop.xlane.xlu1 %4573  ;;  %v10674_v39 = vld [vmem:[#allocation121_spill] sm:$0xff] }
 0xfa6   : > { %6761 = vrcp.f32 %v4574_v57  ;;  %v4592_v33 = vpop.xlane.xlu0 %4591  ;;  %v6754_v59 = vpop.eup %6753 }
 0xfa7   : > { %4778 = vrot.lane.b32.xlu0 %v4744_v54, %s7006_s24  ;;  %4780 = vrot.lane.b32.xlu1 %v4745_v7, %s7006_s24  ;;  %v4743_v48 = vmul.f32 %v6754_v59, %v4666_v61  ;;  %6763 = vrcp.f32 %v4576_v44 }
 0xfa8   : > { %v6756_v56 = vpop.eup %6755 }
 0xfa9   : > { %v4742_v25 = vmul.f32 %v6756_v56, %v4663_v35  ;;  %v4586_v50 = vpop.xlane.xlu1 %4585 }
 0xfaa   : > { %v2679_v53 = vpop.permute.xlu0 %2678  ;;  %6765 = vrcp.f32 %v4586_v50 }
 0xfab   : > { %2713 = vst.msk [vmem:[#allocation2 + $0x70] sm:$0xff] %vm2698_vm3, %v2679_v53  ;;  %4774 = vrot.lane.b32.xlu0 %v4742_v25, %s7006_s24  ;;  %4776 = vrot.lane.b32.xlu1 %v4743_v48, %s7006_s24  ;;  %6767 = vrcp.f32 %v4588_v37 }
 0xfac   : > { %v6758_v58 = vpop.eup %6757 }
 0xfad   : > { %v4582_v43 = vpop.xlane.xlu1 %4581  ;;  %v6760_v32 = vpop.eup %6759 }
 0xfae   : > { %6769 = vrcp.f32 %v4582_v43  ;;  %v6065_v41 = vpop.f32.mrb[148].mxu1  ;;  %v3206_v9 = vpop.permute.xlu0 %3205 }
 0xfaf   : > { %v4748_v4 = vmul.f32 %v6758_v58, %v6065_v41  ;;  %3242 = vst.msk [vmem:[#allocation2 + $0x60] sm:$0xff] %vm3229_vm4, %v3206_v9  ;;  %v4679_v40 = vpop.f32.mrb[149].mxu1  ;;  %6771 = vrcp.f32 %v4584_v18 }
 0xfb0   : > { %v6762_v30 = vpop.eup %6761  ;;  %v6066_v10 = vpop.f32.mrb[150].mxu1  ;;  %6773 = vrcp.f32 %v9603_v31 }
 0xfb1   : > { %v4749_v21 = vmul.f32 %v6760_v32, %v6066_v10  ;;  %v4682_v28 = vpop.f32.mrb[151].mxu1  ;;  %v4594_v42 = vpop.xlane.xlu1 %4593  ;;  %4786 = vrot.lane.b32.xlu0 %v4748_v4, %s7006_s24  ;;  %v4746_v47 = vmul.f32 %v6762_v30, %v4679_v40  ;;  %6775 = vrcp.f32 %v9605_v5 }
 0xfb2   : > { %v3210_v46 = vpop.permute.xlu0 %3209  ;;  %v6764_v52 = vpop.eup %6763 }
 0xfb3   : > { %3244 = vst.msk [vmem:[#allocation2 + $0x70] sm:$0xff] %vm3229_vm4, %v3210_v46  ;;  %4788 = vrot.lane.b32.xlu1 %v4749_v21, %s7006_s24  ;;  %v4747_v15 = vmul.f32 %v6764_v52, %v4682_v28 }
 0xfb4   : > { %v6766_v51 = vpop.eup %6765 }
 0xfb5   : > { %v4590_v22 = vpop.xlane.xlu1 %4589  ;;  %4782 = vrot.lane.b32.xlu0 %v4746_v47, %s7006_s24  ;;  %v6768_v45 = vpop.eup %6767 }
 0xfb6   : > { %6777 = vrcp.f32 %v4590_v22  ;;  %v6069_v1 = vpop.f32.mrb[152].mxu1  ;;  %v3737_v19 = vpop.permute.xlu0 %3736 }
 0xfb7   : > { %v4752_v34 = vmul.f32 %v6766_v51, %v6069_v1  ;;  %3773 = vst.msk [vmem:[#allocation2 + $0x60] sm:$0xff] %vm3760_vm5, %v3737_v19  ;;  %v4695_v31 = vpop.f32.mrb[153].mxu1  ;;  %4784 = vrot.lane.b32.xlu1 %v4747_v15, %s7006_s24  ;;  %6779 = vrcp.f32 %v4592_v33 }
 0xfb8   : > { %v6770_v24 = vpop.eup %6769  ;;  %v6070_v55 = vpop.f32.mrb[154].mxu1  ;;  %6781 = vrcp.f32 %v4594_v42 }
 0xfb9   : > { %v4753_v2 = vmul.f32 %v6768_v45, %v6070_v55  ;;  %v2681_v8 = vpop.permute.xlu1 %2680  ;;  %v4698_v5 = vpop.f32.mrb[155].mxu1  ;;  %4794 = vrot.lane.b32.xlu0 %v4752_v34, %s7006_s24  ;;  %v4750_v20 = vmul.f32 %v6770_v24, %v4695_v31  ;;  %6783 = vrcp.f32 %v9969_v63 }
 0xfba   : > { %2714 = vst.msk [vmem:[#allocation2 + $0x78] sm:$0xff] %vm2698_vm3, %v2681_v8  ;;  %v3741_v62 = vpop.permute.xlu0 %3740  ;;  %v6772_v29 = vpop.eup %6771 }
 0xfbb   : > { %3775 = vst.msk [vmem:[#allocation2 + $0x70] sm:$0xff] %vm3760_vm5, %v3741_v62  ;;  %4796 = vrot.lane.b32.xlu1 %v4753_v2, %s7006_s24  ;;  %v6774_v26 = vpop.eup %6773  ;;  %v4751_v44 = vmul.f32 %v6772_v29, %v4698_v5 }
 0xfbc   : > { %v6776_v37 = vpop.eup %6775  ;;  %v4225_v36 = vmul.f32 %v6774_v26, %v10673_v12 }
 0xfbd   : > { %v3208_v17 = vpop.permute.xlu1 %3207  ;;  %4790 = vrot.lane.b32.xlu0 %v4750_v20, %s7006_s24  ;;  %v4226_v23 = vmul.f32 %v6776_v37, %v10674_v39  ;;  %v5234_v37 = vld [vmem:[%s10106_s4] ss:$0 sm:$0xff] }
 0xfbe   : > { %3243 = vst.msk [vmem:[#allocation2 + $0x68] sm:$0xff] %vm3229_vm4, %v3208_v17  ;;  %v6073_v13 = vpop.f32.mrb[156].mxu1  ;;  %v4268_v3 = vpop.permute.xlu0 %4267 }
 0xfbf   : > { %4304 = vst.msk [vmem:[#allocation2 + $0x60] sm:$0xff] %vm4291_vm6, %v4268_v3  ;;  %v4711_v18 = vpop.f32.mrb[157].mxu1  ;;  %4792 = vrot.lane.b32.xlu1 %v4751_v44, %s7006_s24 }
 0xfc0   : > { %v6778_v27 = vpop.eup %6777  ;;  %v6074_v60 = vpop.f32.mrb[158].mxu1 }
 0xfc1   : > { %v3212_v14 = vpop.permute.xlu1 %3211  ;;  %v4714_v49 = vpop.f32.mrb[159].mxu1  ;;  %4271 = vrot.lane.b32.xlu0 %v4225_v36, %s7007_s26  ;;  %v4754_v63 = vmul.f32 %v6778_v27, %v4711_v18 }
 0xfc2   : > { %3245 = vst.msk [vmem:[#allocation2 + $0x78] sm:$0xff] %vm3229_vm4, %v3212_v14  ;;  %v6780_v35 = vpop.eup %6779 }
 0xfc3   : > { %4273 = vrot.lane.b32.xlu1 %v4226_v23, %s7007_s26  ;;  %v4755_v16 = vmul.f32 %v6780_v35, %v4714_v49  ;;  %v6782_v0 = vpop.eup %6781 }
 0xfc4   : > { %v4756_v6 = vmul.f32 %v6782_v0, %v6073_v13  ;;  %v6784_v54 = vpop.eup %6783 }
 0xfc5   : > { %v3739_v11 = vpop.permute.xlu1 %3738  ;;  %4798 = vrot.lane.b32.xlu0 %v4754_v63, %s7006_s24  ;;  %v4757_v7 = vmul.f32 %v6784_v54, %v6074_v60 }
 0xfc6   : > { %3774 = vst.msk [vmem:[#allocation2 + $0x68] sm:$0xff] %vm3760_vm5, %v3739_v11 }
 0xfc7   : > { %4800 = vrot.lane.b32.xlu1 %v4755_v16, %s7006_s24 }
 0xfc9   : > { %v3743_v61 = vpop.permute.xlu1 %3742  ;;  %4802 = vrot.lane.b32.xlu0 %v4756_v6, %s7006_s24 }
 0xfca   : > { %3776 = vst.msk [vmem:[#allocation2 + $0x78] sm:$0xff] %vm3760_vm5, %v3743_v61 }
 0xfcb   : > { %4804 = vrot.lane.b32.xlu1 %v4757_v7, %s7006_s24 }
 0xfcd   : > { %v4270_v57 = vpop.permute.xlu1 %4269 }
 0xfce   : > { %4305 = vst.msk [vmem:[#allocation2 + $0x68] sm:$0xff] %vm4291_vm6, %v4270_v57 }
0x1019   : > { %v4781_v38 = vpop.permute.xlu1 %4780  ;;  %v4779_v33 = vpop.permute.xlu0 %4778 }
0x101a   : > { %4826 = vst.msk [vmem:[#allocation2 + $0x18] sm:$0xff] %vm4822_vm7, %v4781_v38  ;;  %4825 = vst.msk [vmem:[#allocation2 + $0x10] sm:$0xff] %vm4822_vm7, %v4779_v33 }
0x101d   : > { %v4777_v59 = vpop.permute.xlu1 %4776  ;;  %v4775_v56 = vpop.permute.xlu0 %4774 }
0x101e   : > { %4824 = vst.msk [vmem:[#allocation2 + $0x8] sm:$0xff] %vm4822_vm7, %v4777_v59  ;;  %4823 = vst.msk [vmem:[#allocation2] sm:$0xff] %vm4822_vm7, %v4775_v56 }
0x1021   : > { %v4841_v48 = vld [vmem:[#allocation2 + $0x10] sm:$0xff]  ;;  %v4842_v50 = vld [vmem:[#allocation2 + $0x18] sm:$0xff] }
0x1022   : > { %v4856_v32 = vpack.c.bf16 %v4842_v50, %v4841_v48 }
0x1023   : > { %v4787_v25 = vpop.permute.xlu0 %4786 }
0x1024   : > { %4829 = vst.msk [vmem:[#allocation2 + $0x30] sm:$0xff] %vm4822_vm7, %v4787_v25 }
0x1025   : > { %v4789_v53 = vpop.permute.xlu1 %4788  ;;  %v4839_v43 = vld [vmem:[#allocation2] sm:$0xff]  ;;  %v4840_v58 = vld [vmem:[#allocation2 + $0x8] sm:$0xff] }
0x1026   : > { %4830 = vst.msk [vmem:[#allocation2 + $0x38] sm:$0xff] %vm4822_vm7, %v4789_v53  ;;  %v4855_v41 = vpack.c.bf16 %v4840_v58, %v4839_v43 }
0x1027   : > { %v4783_v9 = vpop.permute.xlu0 %4782 }
0x1028   : > { %4827 = vst.msk [vmem:[#allocation2 + $0x20] sm:$0xff] %vm4822_vm7, %v4783_v9  ;;  %6091 = vmatprep.mubr.bf16.mxu1 %v4855_v41 }
0x1029   : > { %v4785_v4 = vpop.permute.xlu1 %4784  ;;  %6092 = vmatmul.mubr.bf16.vlgmr.msra.gmra.mrb[160].mxu1 %v4856_v32 }
0x102a   : > { %4828 = vst.msk [vmem:[#allocation2 + $0x28] sm:$0xff] %vm4822_vm7, %v4785_v4 }
0x102b   : > { %v4795_v40 = vpop.permute.xlu0 %4794  ;;  %v4845_v52 = vld [vmem:[#allocation2 + $0x30] sm:$0xff] }
0x102c   : > { %4833 = vst.msk [vmem:[#allocation2 + $0x50] sm:$0xff] %vm4822_vm7, %v4795_v40 }
0x102d   : > { %v4797_v30 = vpop.permute.xlu1 %4796  ;;  %v4846_v21 = vld [vmem:[#allocation2 + $0x38] sm:$0xff] }
0x102e   : > { %4834 = vst.msk [vmem:[#allocation2 + $0x58] sm:$0xff] %vm4822_vm7, %v4797_v30  ;;  %v4858_v22 = vpack.c.bf16 %v4846_v21, %v4845_v52 }
0x102f   : > { %v4791_v10 = vpop.permute.xlu0 %4790  ;;  %v4843_v42 = vld [vmem:[#allocation2 + $0x20] sm:$0xff] }
0x1030   : > { %4831 = vst.msk [vmem:[#allocation2 + $0x40] sm:$0xff] %vm4822_vm7, %v4791_v10 }
0x1031   : > { %v4793_v28 = vpop.permute.xlu1 %4792  ;;  %v4844_v46 = vld [vmem:[#allocation2 + $0x28] sm:$0xff] }
0x1032   : > { %4832 = vst.msk [vmem:[#allocation2 + $0x48] sm:$0xff] %vm4822_vm7, %v4793_v28  ;;  %v4857_v47 = vpack.c.bf16 %v4844_v46, %v4843_v42 }
0x1033   : > { %v4272_v15 = vpop.permute.xlu0 %4271  ;;  %v4849_v55 = vld [vmem:[#allocation2 + $0x50] sm:$0xff] }
0x1034   : > { %4306 = vst.msk [vmem:[#allocation2 + $0x70] sm:$0xff] %vm4291_vm6, %v4272_v15  ;;  %6095 = vmatprep.mubr.bf16.mxu1 %v4857_v47 }
0x1035   : > { %v4274_v51 = vpop.permute.xlu1 %4273  ;;  %6096 = vmatmul.mubr.bf16.gmra.mrb[164].mxu1 %v4858_v22  ;;  %v4850_v19 = vld [vmem:[#allocation2 + $0x58] sm:$0xff] }
0x1036   : > { %4307 = vst.msk [vmem:[#allocation2 + $0x78] sm:$0xff] %vm4291_vm6, %v4274_v51  ;;  %v4860_v8 = vpack.c.bf16 %v4850_v19, %v4849_v55 }
0x1037   : > { %v4799_v1 = vpop.permute.xlu0 %4798  ;;  %v4847_v34 = vld [vmem:[#allocation2 + $0x40] sm:$0xff] }
0x1038   : > { %4835 = vst.msk [vmem:[#allocation2 + $0x60] sm:$0xff] %vm4822_vm7, %v4799_v1 }
0x1039   : > { %v4801_v45 = vpop.permute.xlu1 %4800  ;;  %v4848_v31 = vld [vmem:[#allocation2 + $0x48] sm:$0xff] }
0x103a   : > { %4836 = vst.msk [vmem:[#allocation2 + $0x68] sm:$0xff] %vm4822_vm7, %v4801_v45  ;;  %v4859_v24 = vpack.c.bf16 %v4848_v31, %v4847_v34 }
0x103b   : > { %v4803_v2 = vpop.permute.xlu0 %4802 }
0x103c   : > { %4837 = vst.msk [vmem:[#allocation2 + $0x70] sm:$0xff] %vm4822_vm7, %v4803_v2  ;;  %6099 = vmatprep.mubr.bf16.mxu1 %v4859_v24 }
0x103d   : > { %v4805_v5 = vpop.permute.xlu1 %4804  ;;  %6100 = vmatmul.mubr.bf16.gmra.mrb[168].mxu1 %v4860_v8 }
0x103e   : > { %4838 = vst.msk [vmem:[#allocation2 + $0x78] sm:$0xff] %vm4822_vm7, %v4805_v5 }
0x103f   : > { %v4851_v62 = vld [vmem:[#allocation2 + $0x60] sm:$0xff] }
0x1041   : > { %v4852_v20 = vld [vmem:[#allocation2 + $0x68] sm:$0xff] }
0x1042   : > { %v4861_v29 = vpack.c.bf16 %v4852_v20, %v4851_v62 }
0x1043   : > { %v4853_v26 = vld [vmem:[#allocation2 + $0x70] sm:$0xff] }
0x1044   : > { %6103 = vmatprep.mubr.bf16.mxu1 %v4861_v29 }
0x1045   : > { %v4854_v44 = vld [vmem:[#allocation2 + $0x78] sm:$0xff] }
0x1046   : > { %v4862_v17 = vpack.c.bf16 %v4854_v44, %v4853_v26 }
0x1048   : > { %6104 = vmatmul.mubr.bf16.gmra.mrb[172].mxu1 %v4862_v17 }
0x10fc   : > { %v6093_v13 = vpop.f32.mrb[160].mxu1 }
0x10fd   : > { %v4937_v3 = vadd.f32 %v6093_v13, %v5234_v37  ;;  %v4928_v12 = vpop.f32.mrb[161].mxu1 }
0x10fe   : > { %v4929_v36 = vadd.f32 %v5234_v37, %v4928_v12  ;;  %v6094_v18 = vpop.f32.mrb[162].mxu1 }
0x10ff   : > { %4993 = vst [vmem:[%s10028_s22 + $0x10] sm:$0xff] %v4937_v3  ;;  %v4940_v27 = vadd.f32 %v6094_v18, %v5234_v37  ;;  %v4931_v60 = vpop.f32.mrb[163].mxu1 }
0x1100   : > { %4991 = vst [vmem:[%s10028_s22] sm:$0xff] %v4929_v36  ;;  %v4932_v14 = vadd.f32 %v5234_v37, %v4931_v60 }
0x1101   : > { %4994 = vst [vmem:[%s10028_s22 + $0x18] sm:$0xff] %v4940_v27 }
0x1102   : > { %4992 = vst [vmem:[%s10028_s22 + $0x8] sm:$0xff] %v4932_v14 }
0x1108   : > { %v6097_v49 = vpop.f32.mrb[164].mxu1 }
0x1109   : > { %v4953_v39 = vadd.f32 %v6097_v49, %v5234_v37  ;;  %v4944_v23 = vpop.f32.mrb[165].mxu1 }
0x110a   : > { %v4945_v63 = vadd.f32 %v5234_v37, %v4944_v23  ;;  %v6098_v35 = vpop.f32.mrb[166].mxu1 }
0x110b   : > { %4997 = vst [vmem:[%s10028_s22 + $0x30] sm:$0xff] %v4953_v39  ;;  %v4956_v16 = vadd.f32 %v6098_v35, %v5234_v37  ;;  %v4947_v11 = vpop.f32.mrb[167].mxu1 }
0x110c   : > { %4995 = vst [vmem:[%s10028_s22 + $0x20] sm:$0xff] %v4945_v63  ;;  %v4948_v0 = vadd.f32 %v5234_v37, %v4947_v11 }
0x110d   : > { %4998 = vst [vmem:[%s10028_s22 + $0x38] sm:$0xff] %v4956_v16 }
0x110e   : > { %4996 = vst [vmem:[%s10028_s22 + $0x28] sm:$0xff] %v4948_v0 }
0x1110   : > { %v6101_v6 = vpop.f32.mrb[168].mxu1 }
0x1111   : > { %v4969_v54 = vadd.f32 %v6101_v6, %v5234_v37  ;;  %v4960_v7 = vpop.f32.mrb[169].mxu1 }
0x1112   : > { %v4961_v61 = vadd.f32 %v5234_v37, %v4960_v7  ;;  %v6102_v57 = vpop.f32.mrb[170].mxu1 }
0x1113   : > { %5001 = vst [vmem:[%s10028_s22 + $0x50] sm:$0xff] %v4969_v54  ;;  %v4972_v38 = vadd.f32 %v6102_v57, %v5234_v37  ;;  %v4963_v33 = vpop.f32.mrb[171].mxu1 }
0x1114   : > { %4999 = vst [vmem:[%s10028_s22 + $0x40] sm:$0xff] %v4961_v61  ;;  %v4964_v59 = vadd.f32 %v5234_v37, %v4963_v33 }
0x1115   : > { %5002 = vst [vmem:[%s10028_s22 + $0x58] sm:$0xff] %v4972_v38 }
0x1116   : > { %5000 = vst [vmem:[%s10028_s22 + $0x48] sm:$0xff] %v4964_v59 }
0x111b   : > { %v6105_v56 = vpop.f32.mrb[172].mxu1 }
0x111c   : > { %v4985_v25 = vadd.f32 %v6105_v56, %v5234_v37  ;;  %v4976_v48 = vpop.f32.mrb[173].mxu1 }
0x111d   : > { %v4977_v50 = vadd.f32 %v5234_v37, %v4976_v48  ;;  %v6106_v53 = vpop.f32.mrb[174].mxu1 }
0x111e   : > { %5005 = vst [vmem:[%s10028_s22 + $0x70] sm:$0xff] %v4985_v25  ;;  %v4988_v43 = vadd.f32 %v6106_v53, %v5234_v37  ;;  %v4979_v58 = vpop.f32.mrb[175].mxu1 }
0x111f   : > { %5003 = vst [vmem:[%s10028_s22 + $0x60] sm:$0xff] %v4977_v50  ;;  %v4980_v41 = vadd.f32 %v5234_v37, %v4979_v58 }
0x1120   : > { %5006 = vst [vmem:[%s10028_s22 + $0x78] sm:$0xff] %v4988_v43 }
0x1121   : > { %5004 = vst [vmem:[%s10028_s22 + $0x68] sm:$0xff] %v4980_v41 }
0x1122   : > { %6914 = shalt.err (!%p6911_p7)
}
0x1123   : > { %s6915_s3 = scalar_lea.hbm %s10048_s15, 2048  ;;  %s6919_s17 = scalar_lea.hbm %s10107_s5, 4096 }
0x1124   : > { %p6916_p12 = scmp.ne.s32.totalorder %s10048_s15, %s6915_s3  ;;  %p6920_p11 = scmp.lt.u32.totalorder %s10048_s15, %s10107_s5 }
0x1125   : > { %p6921_p13 = scmp.lt.u32.totalorder %s6919_s17, %s6915_s3  ;;  %p6923_p1 = scmp.lt.u32.totalorder %s6915_s3, %s10048_s15 }
0x1126   : > { %p6917_p2 = pnand %p6916_p12, %p10675_p6 }
0x1127   : > { %p6922_p0 = por %p6921_p13, %p6920_p11 }
0x1128   : > { %p6918_p8 = pneg %p6917_p2 }
0x1129   : > { %p6924_p10 = por %p6923_p1, %p6922_p0 }
0x112b   : > { %p6925_p3 = pnand %p6924_p10, %p6918_p8 }
0x112d   : > { %6928 = shalt.err (!%p6925_p3)
}
0x112e   : > { %s7014_s25 = smov 128   ;;  %s7015_s16 = smov 8  }
0x112f   : > { %6183 = dma.vmem_to_hbm [thread:$0]  (%p10675_p6), %s10050_s30, 2048, %s10048_s15, %s5008_s21, %s7014_s25, %s7014_s25, %s7015_s16  }
0x1130 PF: > { %s5038_s2 = sand.u32 1, %s6975_s18   ;;  %p10676_p4 = scmp.ne.s32.totalorder %s10205_s27, 0 }
0x1131   : > { %p10677_p9 = scmp.ge.s32.totalorder %s6995_s23, 2  ;;  %s5039_s11 = scalar_lea.sflag [#allocation5], %s5038_s2 }
0x1133   : > { %p6200_p5 = pnand %p10677_p9, %p10676_p4 }
0x1135   : > { %6970 = dma.done.wait (!%p6200_p5), %s5039_s11, 2048  }
0x1136   : > { %6972 = vsyncadd (!%p6200_p5), %s5039_s11, 4294965248  ;;  %s25_s23 = sadd.s32 1, %s6995_s23   ;;  %s10678_s22 = sld [smem:[#allocation19_spill]] }
0x1137   : > { %p22_p7 = scmp.ge.s32.totalorder %s25_s23, 4   ;;  %s10679_s21 = sld [smem:[#allocation17_spill]] }
0x1138   : > { %s10680_s6 = sld [smem:[#allocation18_spill]]  ;;  %s10681_s18 = smov %s6979_s19 }
0x1139   : > { %s10682_s19 = smov %s6983_s20  ;;  %24 = sbr.rel (!%p22_p7) target bundleno = 13 (0xd), region = 106 }
0x113c   : > { %s10683_s20 = smov %s10678_s22 }
0x113e   : > { %s10684_s22 = smov %s10680_s6 }
0x1140   :  { %5044 = vsyncpa [#allocation4], 1 }
0x1141   :  { %5046 = vsyncpa [#allocation4 + $0x1], 1 }
0x1142   :  { %5047 = vsyncpa [#allocation7], 1 }
0x1143   :  { %5049 = vsyncpa [#allocation7 + $0x1], 1 }
0x1144   :  { %5050 = vsyncpa [#allocation10], 1 }
0x1145   :  { %5051 = vsyncpa [#allocation5], 1 }
0x1146   :  { %5053 = vsyncpa [#allocation5 + $0x1], 1 }

</bundles_post_ra>
